<compile_context>
chip_gen: v5e
topology: v5e:2x2
jax: 0.10.0
libtpu: 0.0.40
codegen_flags: <defaults>
</compile_context>

<pallas_src>
import math
import numpy as np
import jax
import jax.numpy as jnp
from jax.experimental import pallas as pl
from jax.experimental.pallas import tpu as pltpu

# ----------------------------- configuration (small, module-consistent) -----
INPUT_SIZE   = 16    # features of `cond`
NUM_LAYERS   = 2     # RNN layers (GRU)
NUM_CELLS    = 32    # RNN hidden size == conditioning_length
COND_LENGTH  = 32
TARGET_DIM   = 45    # matches ActNorm2d(45) in the reference module
DIFF_STEPS   = 100
BETA_END     = 0.1
RES_LAYERS   = 3
RES_CHANNELS = 4
DIL_CYCLE    = 2
TIME_EMB_DIM = 16    # EpsilonTheta default
RES_HIDDEN   = 64    # EpsilonTheta default residual_hidden
B, T = 2, 8
N  = B * T           # samples processed in one shot (grid-free kernel)
CT = RES_CHANNELS * N

# roll-based conv shifts rely on the wrapped lanes landing inside the masked edge
assert max(2 ** (l % DIL_CYCLE) for l in range(RES_LAYERS)) < TARGET_DIM

# ----------------------------- packed-slab layout constants ------------------
H   = NUM_CELLS
D   = TARGET_DIM
RH  = RES_HIDDEN
RC  = RES_CHANNELS
L   = RES_LAYERS
D2  = TARGET_DIM // 2

# bf16 weight slab (all MXU operands, biases folded where free)
R_WCAT  = 0                       # (H, 6H)         [whh0 | whh1]
R_WIH1  = 32                      # (H, 3H)
R_WP1   = 64                      # (2E+1, RH+1)    emb MLP stage 1 (+bias row, ones col)
R_WP2   = 104                     # (RH+1, RH+1)    emb MLP stage 2 (+bias row, ones col)
R_WDP   = 176                     # (RH+1, L*RC)    all diffusion projections (+bias row)
R_WC1   = 248                     # (COND_LENGTH, D2)
R_WC2   = 280                     # (D2, D)
R_MDIL  = 304                     # L x (2CT, 3CT+N+1)   kron dilated conv + cond (+bias col)
R_MOUT  = R_MDIL + L * 2 * CT     # L x (2CT, CT+1)      kron output projection (+bias col)
R_MSKIP = R_MOUT + L * 2 * CT     # (CT, 3CT+1)          kron skip projection   (+bias col)
R_MO    = R_MSKIP + CT            # (N, 3CT+1)           kron final projection  (+bias col)
WSLAB_ROWS = R_MO + N             # 1152
WSLAB_COLS = 256

# f32 vector slab (remaining bias rows / per-channel scalars)
V_BIH1 = 0                        # (1, 3H)  bih1 + [bhh1_r, bhh1_z, 0]
V_BHN0 = 1                        # (1, H)   bhh0_n
V_BHN1 = 2                        # (1, H)   bhh1_n
V_BC1  = 3                        # (1, D2)
V_BC2  = 4                        # (1, D)
V_WIN  = 8                        # (CT, 2)  col0 = input-proj weight, col1 = bias (channel-major)
VSLAB_ROWS = V_WIN + CT
VSLAB_COLS = 128

# per-sample packed input slab (128-lane aligned fields)
X_XN, X_NOISE, X_EMB = 0, 128, 256
XSLAB_COLS = 384

BF16, F32 = jnp.bfloat16, jnp.float32


def _leaky(v):
    return jnp.where(v > 0, v, 0.4 * v)


def _silu(v):
    return v * jax.nn.sigmoid(v)


# ----------------------------- the fused forward kernel ----------------------
def _fused_kernel(gi0_ref, xslab_ref, wslab_ref, vslab_ref, out_ref):
    def wsl(r0, nr, nc):                       # bf16 weight-slab slice
        return wslab_ref[r0:r0 + nr, 0:nc]

    # ======================= stacked GRU over the conditioning sequence ======
    wcat = wsl(R_WCAT, H, 6 * H)               # [whh0 | whh1]
    wih1 = wsl(R_WIH1, H, 3 * H)
    bih1_aug = vslab_ref[V_BIH1:V_BIH1 + 1, 0:3 * H]
    bhh0_n = vslab_ref[V_BHN0:V_BHN0 + 1, 0:H]
    bhh1_n = vslab_ref[V_BHN1:V_BHN1 + 1, 0:H]

    def cell(gi, gh, bhn, h_prev):
        r = jax.nn.sigmoid(gi[:, :H] + gh[:, :H])
        z = jax.nn.sigmoid(gi[:, H:2 * H] + gh[:, H:2 * H])
        n = jnp.tanh(gi[:, 2 * H:] + r * (gh[:, 2 * H:] + bhn))
        return (1.0 - z) * n + z * h_prev

    h_all = jnp.zeros((2 * B, H), F32)         # rows 0:B layer-0 state, B:2B layer-1 state
    cond_rows = []
    for t in range(T):                         # static unroll, T is small
        # both hidden-state matmuls in one MXU push
        gh_all = jnp.dot(h_all.astype(BF16), wcat, preferred_element_type=F32)  # (2B, 6H)
        h0 = cell(gi0_ref[t], gh_all[0:B, 0:3 * H], bhh0_n, h_all[0:B])
        gi1 = jnp.dot(h0.astype(BF16), wih1, preferred_element_type=F32) + bih1_aug
        h1 = cell(gi1, gh_all[B:2 * B, 3 * H:6 * H], bhh1_n, h_all[B:2 * B])
        h_all = jnp.concatenate([h0, h1], axis=0)
        cond_rows.append(h1)
    cond_all = jnp.concatenate(cond_rows, axis=0)            # (N, H), row = t*B + b
    # TODO(synk): inter-layer dropout (training mode) omitted; LSTM branch not implemented.

    # ======================= per-sample fields from the packed slab ==========
    xn = xslab_ref[:, X_XN:X_XN + D]                          # ActNorm'd + q_sample'd input
    noise = xslab_ref[:, X_NOISE:X_NOISE + D]
    emb1 = xslab_ref[:, X_EMB:X_EMB + 2 * TIME_EMB_DIM + 1]   # [sin|cos emb | 1]

    # ======================= DiffusionEmbedding MLP (biases folded) ==========
    lane_rh = jax.lax.broadcasted_iota(jnp.int32, (1, RH + 1), 1)
    e1 = jnp.dot(emb1.astype(BF16), wsl(R_WP1, 2 * TIME_EMB_DIM + 1, RH + 1),
                 preferred_element_type=F32)
    e1 = jnp.where(lane_rh < RH, _silu(e1), e1)               # keep the ones lane intact
    e2 = jnp.dot(e1.astype(BF16), wsl(R_WP2, RH + 1, RH + 1),
                 preferred_element_type=F32)
    e2 = jnp.where(lane_rh < RH, _silu(e2), e2)               # (N, RH+1), last lane == 1

    # all residual-layer diffusion projections with ONE matmul, one channel-major re-layout
    dstep_all = jnp.dot(e2.astype(BF16), wsl(R_WDP, RH + 1, L * RC),
                        preferred_element_type=F32)           # (N, L*RC)
    dcm = jnp.concatenate([dstep_all[:, j:j + 1] for j in range(L * RC)],
                          axis=0)                             # (L*CT, 1), rows (l, c, n)

    # ======================= CondUpsampler ===================================
    c1 = _leaky(jnp.dot(cond_all.astype(BF16), wsl(R_WC1, COND_LENGTH, D2),
                        preferred_element_type=F32) + vslab_ref[V_BC1:V_BC1 + 1, 0:D2])
    cond_up = _leaky(jnp.dot(c1.astype(BF16), wsl(R_WC2, D2, D),
                             preferred_element_type=F32) + vslab_ref[V_BC2:V_BC2 + 1, 0:D])

    # ======================= EpsilonTheta residual stack =====================
    lane_d = jax.lax.broadcasted_iota(jnp.int32, (1, D), 1)

    def shiftd(v, off):
        # y[:, d] = v[:, d + off], zero outside [0, D) (Conv1d zero padding)
        if off == 0:
            return v
        rolled = pltpu.roll(v, (-off) % D, axis=1)            # XLU lane rotation
        m = (lane_d < D - off) if off > 0 else (lane_d >= -off)
        return jnp.where(m, rolled, 0.0)

    ones_row = jnp.ones((1, D), F32)

    # input_projection Conv1d(1, RC, 1) + leaky, channel-major (RC*N, D)
    x_rep = jnp.concatenate([xn] * RC, axis=0)                # (CT, D)
    h = _leaky(vslab_ref[V_WIN:V_WIN + CT, 0:1] * x_rep
               + vslab_ref[V_WIN:V_WIN + CT, 1:2])
    skip = jnp.zeros((CT, D), F32)

    inv_s2 = 1.0 / math.sqrt(2.0)
    for l in range(L):
        dil = 2 ** (l % DIL_CYCLE)
        y = h + dcm[l * CT:(l + 1) * CT]
        # dilated_conv + conditioner_projection + their biases: one MXU matmul
        sh = jnp.concatenate([shiftd(y, -dil), y, shiftd(y, dil), cond_up, ones_row],
                             axis=0).astype(BF16)             # (3CT+N+1, D)
        z = jnp.dot(wsl(R_MDIL + l * 2 * CT, 2 * CT, 3 * CT + N + 1), sh,
                    preferred_element_type=F32)               # (2CT, D)
        g = jax.nn.sigmoid(z[:CT]) * jnp.tanh(z[CT:])
        # output_projection Conv1d(RC -> 2RC, 1) + leaky, bias folded
        sh2 = jnp.concatenate([g, ones_row], axis=0).astype(BF16)
        y2 = _leaky(jnp.dot(wsl(R_MOUT + l * 2 * CT, 2 * CT, CT + 1), sh2,
                            preferred_element_type=F32))      # (2CT, D)
        h = (h + y2[:CT]) * inv_s2
        skip = skip + y2[CT:]

    x2 = skip * (1.0 / math.sqrt(L))
    # skip_projection Conv1d(RC, RC, 3, padding=1) + leaky
    sh3 = jnp.concatenate([shiftd(x2, -1), x2, shiftd(x2, 1), ones_row],
                          axis=0).astype(BF16)
    xs = _leaky(jnp.dot(wsl(R_MSKIP, CT, 3 * CT + 1), sh3,
                        preferred_element_type=F32))          # (CT, D)
    # output_projection Conv1d(RC, 1, 3, padding=1)
    sh4 = jnp.concatenate([shiftd(xs, -1), xs, shiftd(xs, 1), ones_row],
                          axis=0).astype(BF16)
    eps = jnp.dot(wsl(R_MO, N, 3 * CT + 1), sh4,
                  preferred_element_type=F32)                 # (N, D)

    err = eps - noise
    out_ref[...] = err * err                                  # reduce over D in XLA


# ----------------------------- parameter construction ------------------------
def build_params():
    rng = np.random.default_rng(42)

    def rnd(shape, scale):
        return (rng.standard_normal(shape) * scale).astype(np.float32)

    p = {}

    # --- GRU raw weights (pre-transposed, gate order r|z|n like PyTorch) -----
    wih0 = rnd((INPUT_SIZE, 3 * H), 1.0 / math.sqrt(INPUT_SIZE))
    whh0 = rnd((H, 3 * H), 1.0 / math.sqrt(H))
    bih0 = rnd((3 * H,), 0.05)
    bhh0 = rnd((3 * H,), 0.05)
    wih1 = rnd((H, 3 * H), 1.0 / math.sqrt(H))
    whh1 = rnd((H, 3 * H), 1.0 / math.sqrt(H))
    bih1 = rnd((3 * H,), 0.05)
    bhh1 = rnd((3 * H,), 0.05)

    bih0_aug = bih0.copy()
    bih0_aug[:2 * H] += bhh0[:2 * H]          # fold r/z part of b_hh into the precomputed gates
    bih1_aug = bih1.copy()
    bih1_aug[:2 * H] += bhh1[:2 * H]

    p['wih0'] = jnp.asarray(wih0)
    p['bih0_aug'] = jnp.asarray(bih0_aug[None, :])

    # --- ActNorm (deterministic init; data-dependent init omitted) -----------
    p['an_bias'] = jnp.asarray(rnd((1, D), 0.1))
    p['an_logs'] = jnp.asarray(rnd((1, D), 0.05))

    # --- EpsilonTheta raw weights --------------------------------------------
    wp1 = rnd((2 * TIME_EMB_DIM, RH), 1.0 / math.sqrt(2 * TIME_EMB_DIM))
    bp1 = rnd((RH,), 0.05)
    wp2 = rnd((RH, RH), 1.0 / math.sqrt(RH))
    bp2 = rnd((RH,), 0.05)
    wdp = rnd((L, RH, RC), 1.0 / math.sqrt(RH))
    bdp = rnd((L, RC), 0.05)
    wc1 = rnd((COND_LENGTH, D2), 1.0 / math.sqrt(COND_LENGTH))
    bc1 = rnd((D2,), 0.05)
    wc2 = rnd((D2, D), 1.0 / math.sqrt(D2))
    bc2 = rnd((D,), 0.05)
    w_in = rnd((RC,), 0.5)
    b_in = rnd((RC,), 0.05)
    wdil = rnd((L, 2 * RC, RC, 3), 1.0 / math.sqrt(3 * RC))
    bdil = rnd((L, 2 * RC), 0.05)
    wcond = rnd((L, 2 * RC), 0.3)
    bcond = rnd((L, 2 * RC), 0.05)
    wout = rnd((L, 2 * RC, RC), 1.0 / math.sqrt(RC))
    bout = rnd((L, 2 * RC), 0.05)
    wskip = rnd((RC, RC, 3), 1.0 / math.sqrt(3 * RC))
    bskip = rnd((RC,), 0.05)
    wo = rnd((RC, 3), 1.0 / math.sqrt(3 * RC))
    bo = rnd((1,), 0.05)

    # --- bf16 weight slab (every MXU operand, biases folded) -----------------
    eye = np.eye(N, dtype=np.float32)
    ws = np.zeros((WSLAB_ROWS, WSLAB_COLS), np.float32)

    ws[R_WCAT:R_WCAT + H, 0:6 * H] = np.concatenate([whh0, whh1], axis=1)
    ws[R_WIH1:R_WIH1 + H, 0:3 * H] = wih1

    ws[R_WP1:R_WP1 + 2 * TIME_EMB_DIM, 0:RH] = wp1
    ws[R_WP1 + 2 * TIME_EMB_DIM, 0:RH] = bp1
    ws[R_WP1 + 2 * TIME_EMB_DIM, RH] = 1.0          # carry the ones lane forward
    ws[R_WP2:R_WP2 + RH, 0:RH] = wp2
    ws[R_WP2 + RH, 0:RH] = bp2
    ws[R_WP2 + RH, RH] = 1.0
    ws[R_WDP:R_WDP + RH, 0:L * RC] = wdp.transpose(1, 0, 2).reshape(RH, L * RC)
    ws[R_WDP + RH, 0:L * RC] = bdp.reshape(L * RC)

    ws[R_WC1:R_WC1 + COND_LENGTH, 0:D2] = wc1
    ws[R_WC2:R_WC2 + D2, 0:D] = wc2

    for l in range(L):
        r0 = R_MDIL + l * 2 * CT
        ws[r0:r0 + 2 * CT, 0:3 * CT] = np.kron(
            wdil[l].transpose(0, 2, 1).reshape(2 * RC, 3 * RC), eye)
        ws[r0:r0 + 2 * CT, 3 * CT:3 * CT + N] = np.kron(wcond[l][:, None], eye)
        ws[r0:r0 + 2 * CT, 3 * CT + N] = np.repeat(bdil[l] + bcond[l], N)
        r1 = R_MOUT + l * 2 * CT
        ws[r1:r1 + 2 * CT, 0:CT] = np.kron(wout[l], eye)
        ws[r1:r1 + 2 * CT, CT] = np.repeat(bout[l], N)
    ws[R_MSKIP:R_MSKIP + CT, 0:3 * CT] = np.kron(
        wskip.transpose(0, 2, 1).reshape(RC, 3 * RC), eye)
    ws[R_MSKIP:R_MSKIP + CT, 3 * CT] = np.repeat(bskip, N)
    ws[R_MO:R_MO + N, 0:3 * CT] = np.kron(wo.transpose(1, 0).reshape(1, 3 * RC), eye)
    ws[R_MO:R_MO + N, 3 * CT] = bo[0]
    p['wslab'] = jnp.asarray(ws, BF16)

    # --- f32 vector slab ------------------------------------------------------
    vs = np.zeros((VSLAB_ROWS, VSLAB_COLS), np.float32)
    vs[V_BIH1, 0:3 * H] = bih1_aug
    vs[V_BHN0, 0:H] = bhh0[2 * H:]
    vs[V_BHN1, 0:H] = bhh1[2 * H:]
    vs[V_BC1, 0:D2] = bc1
    vs[V_BC2, 0:D] = bc2
    vs[V_WIN:V_WIN + CT, 0] = np.repeat(w_in, N)
    vs[V_WIN:V_WIN + CT, 1] = np.repeat(b_in, N)
    p['vslab'] = jnp.asarray(vs)

    # --- GaussianDiffusion linear beta schedule -------------------------------
    betas = np.linspace(1e-4, BETA_END, DIFF_STEPS, dtype=np.float64)
    acp = np.cumprod(1.0 - betas)
    p['sqrt_acp'] = jnp.asarray(np.sqrt(acp), jnp.float32)
    p['sqrt_1macp'] = jnp.asarray(np.sqrt(1.0 - acp), jnp.float32)

    # --- DiffusionEmbedding sin/cos table -------------------------------------
    steps = np.arange(DIFF_STEPS, dtype=np.float64)[:, None]
    dims = np.arange(TIME_EMB_DIM, dtype=np.float64)[None, :]
    tbl = steps * 10.0 ** (dims * 4.0 / (TIME_EMB_DIM - 1))
    p['emb_table'] = jnp.asarray(
        np.concatenate([np.sin(tbl), np.cos(tbl)], axis=1), jnp.float32)
    return p


# ----------------------------- full forward (jitted) -------------------------
@jax.jit
def time_grad_forward(params, x_input, cond, key):
    Bn, Tn, Dn = x_input.shape
    Nn = Bn * Tn

    # layer-0 GRU input gates for all timesteps in one XLA matmul (time-major layout)
    gi0 = jnp.einsum('bti,ig->tbg', cond.astype(jnp.float32),
                     params['wih0']) + params['bih0_aug']          # (T, B, 3H)

    # GaussianDiffusion.log_prob glue: per-sample diffusion step / noise,
    # ActNorm forward + q_sample done elementwise in XLA (row n = t*B + b).
    kt, kn = jax.random.split(key)
    tstep = jax.random.randint(kt, (Nn,), 0, DIFF_STEPS)
    noise = jax.random.normal(kn, (Nn, Dn), jnp.float32)
    x_tm = jnp.transpose(x_input, (1, 0, 2)).reshape(Nn, Dn).astype(jnp.float32)
    xa = (x_tm + params['an_bias']) * jnp.exp(params['an_logs'])
    xn = (params['sqrt_acp'][tstep][:, None] * xa
          + params['sqrt_1macp'][tstep][:, None] * noise)

    # single packed per-sample input slab (128-lane aligned fields)
    xslab = jnp.zeros((Nn, XSLAB_COLS), jnp.float32)
    xslab = xslab.at[:, X_XN:X_XN + Dn].set(xn)
    xslab = xslab.at[:, X_NOISE:X_NOISE + Dn].set(noise)
    xslab = xslab.at[:, X_EMB:X_EMB + 2 * TIME_EMB_DIM].set(params['emb_table'][tstep])
    xslab = xslab.at[:, X_EMB + 2 * TIME_EMB_DIM].set(1.0)

    # one grid-free fused Pallas kernel for GRU + EpsilonTheta + squared error
    err2 = pl.pallas_call(
        _fused_kernel,
        out_shape=jax.ShapeDtypeStruct((Nn, Dn), jnp.float32),
    )(gi0, xslab, params['wslab'], params['vslab'])

    per_sample = jnp.mean(err2, axis=-1).reshape(Tn, Bn)           # rows are (t, b)
    likelihoods = jnp.transpose(per_sample, (1, 0))[:, :, None]    # (B, T, 1)
    return likelihoods, jnp.mean(likelihoods)


if __name__ == "__main__":
    params = build_params()
    key = jax.random.PRNGKey(0)
    kx, kc, kd = jax.random.split(key, 3)
    x_input = jax.random.normal(kx, (B, T, TARGET_DIM), jnp.float32)
    cond = jax.random.normal(kc, (B, T, INPUT_SIZE), jnp.float32)

    likelihoods, mean_lik = time_grad_forward(params, x_input, cond, kd)
    jax.block_until_ready((likelihoods, mean_lik))
    assert likelihoods.shape == (B, T, 1)
    assert bool(jnp.isfinite(likelihoods).all()) and bool(jnp.isfinite(mean_lik))
    print("KERNEL_OK")
</pallas_src>

<mosaic_0001>
module attributes {stable_mosaic.version = 11 : i64} {
  func.func @_fused_kernel(%arg0: memref<8x2x96xf32, #tpu.memory_space<vmem>>, %arg1: memref<16x384xf32, #tpu.memory_space<vmem>>, %arg2: memref<1152x256xbf16, #tpu.memory_space<vmem>>, %arg3: memref<72x128xf32, #tpu.memory_space<vmem>>, %arg4: memref<16x45xf32, #tpu.memory_space<vmem>>) attributes {dimension_semantics = [], scalar_prefetch = 0 : i64, scratch_operands = 0 : i64, tpu.core_type = #tpu.core_type<tc>} {
    %c0 = arith.constant 0 : index
    %c0_0 = arith.constant 0 : index
    %0 = vector.load %arg2[%c0, %c0_0] : memref<1152x256xbf16, #tpu.memory_space<vmem>>, vector<32x192xbf16>
    %c32 = arith.constant 32 : index
    %c0_1 = arith.constant 0 : index
    %1 = vector.load %arg2[%c32, %c0_1] : memref<1152x256xbf16, #tpu.memory_space<vmem>>, vector<32x96xbf16>
    %c0_2 = arith.constant 0 : index
    %c0_3 = arith.constant 0 : index
    %2 = vector.load %arg3[%c0_2, %c0_3] : memref<72x128xf32, #tpu.memory_space<vmem>>, vector<1x96xf32>
    %c1 = arith.constant 1 : index
    %c0_4 = arith.constant 0 : index
    %3 = vector.load %arg3[%c1, %c0_4] : memref<72x128xf32, #tpu.memory_space<vmem>>, vector<1x32xf32>
    %c2 = arith.constant 2 : index
    %c0_5 = arith.constant 0 : index
    %4 = vector.load %arg3[%c2, %c0_5] : memref<72x128xf32, #tpu.memory_space<vmem>>, vector<1x32xf32>
    %cst = arith.constant 0.000000e+00 : f32
    %5 = vector.broadcast %cst : f32 to vector<4x32xf32>
    %6 = arith.truncf %5 : vector<4x32xf32> to vector<4x32xbf16>
    %cst_6 = arith.constant dense<0.000000e+00> : vector<4x192xf32>
    %7 = tpu.matmul %6, %0, %cst_6 {dimension_numbers = #tpu.dot_dimension_numbers<[1], [0], [0], [1], [0, 0, 1, 1], [], []>} : vector<4x32xbf16>, vector<32x192xbf16>, vector<4x192xf32> -> vector<4x192xf32>
    %c0_7 = arith.constant 0 : index
    %c0_8 = arith.constant 0 : index
    %c0_9 = arith.constant 0 : index
    %8 = vector.load %arg0[%c0_7, %c0_8, %c0_9] : memref<8x2x96xf32, #tpu.memory_space<vmem>>, vector<1x2x96xf32>
    %9 = vector.shape_cast %8 : vector<1x2x96xf32> to vector<2x96xf32>
    %10 = vector.extract_strided_slice %7 {offsets = [0, 0], sizes = [2, 96], strides = [1, 1]} : vector<4x192xf32> to vector<2x96xf32>
    %11 = vector.extract_strided_slice %5 {offsets = [0, 0], sizes = [2, 32], strides = [1, 1]} : vector<4x32xf32> to vector<2x32xf32>
    %12 = vector.extract_strided_slice %9 {offsets = [0, 0], sizes = [2, 32], strides = [1, 1]} : vector<2x96xf32> to vector<2x32xf32>
    %13 = vector.extract_strided_slice %10 {offsets = [0, 0], sizes = [2, 32], strides = [1, 1]} : vector<2x96xf32> to vector<2x32xf32>
    %14 = arith.addf %12, %13 : vector<2x32xf32>
    %15 = arith.negf %14 : vector<2x32xf32>
    %16 = math.exp %15 : vector<2x32xf32>
    %cst_10 = arith.constant 1.000000e+00 : f32
    %17 = vector.broadcast %cst_10 : f32 to vector<2x32xf32>
    %18 = arith.addf %17, %16 : vector<2x32xf32>
    %19 = arith.divf %17, %18 : vector<2x32xf32>
    %20 = vector.extract_strided_slice %9 {offsets = [0, 32], sizes = [2, 32], strides = [1, 1]} : vector<2x96xf32> to vector<2x32xf32>
    %21 = vector.extract_strided_slice %10 {offsets = [0, 32], sizes = [2, 32], strides = [1, 1]} : vector<2x96xf32> to vector<2x32xf32>
    %22 = arith.addf %20, %21 : vector<2x32xf32>
    %23 = arith.negf %22 : vector<2x32xf32>
    %24 = math.exp %23 : vector<2x32xf32>
    %cst_11 = arith.constant 1.000000e+00 : f32
    %25 = vector.broadcast %cst_11 : f32 to vector<2x32xf32>
    %26 = arith.addf %25, %24 : vector<2x32xf32>
    %27 = arith.divf %25, %26 : vector<2x32xf32>
    %28 = vector.extract_strided_slice %9 {offsets = [0, 64], sizes = [2, 32], strides = [1, 1]} : vector<2x96xf32> to vector<2x32xf32>
    %29 = vector.extract_strided_slice %10 {offsets = [0, 64], sizes = [2, 32], strides = [1, 1]} : vector<2x96xf32> to vector<2x32xf32>
    %30 = vector.broadcast %3 : vector<1x32xf32> to vector<2x32xf32>
    %31 = arith.addf %29, %30 : vector<2x32xf32>
    %32 = arith.mulf %19, %31 : vector<2x32xf32>
    %33 = arith.addf %28, %32 : vector<2x32xf32>
    %34 = math.tanh %33 : vector<2x32xf32>
    %cst_12 = arith.constant 1.000000e+00 : f32
    %35 = vector.broadcast %cst_12 : f32 to vector<2x32xf32>
    %36 = arith.subf %35, %27 : vector<2x32xf32>
    %37 = arith.mulf %36, %34 : vector<2x32xf32>
    %38 = arith.mulf %27, %11 : vector<2x32xf32>
    %39 = arith.addf %37, %38 : vector<2x32xf32>
    %40 = arith.truncf %39 : vector<2x32xf32> to vector<2x32xbf16>
    %cst_13 = arith.constant dense<0.000000e+00> : vector<2x96xf32>
    %41 = tpu.matmul %40, %1, %cst_13 {dimension_numbers = #tpu.dot_dimension_numbers<[1], [0], [0], [1], [0, 0, 1, 1], [], []>} : vector<2x32xbf16>, vector<32x96xbf16>, vector<2x96xf32> -> vector<2x96xf32>
    %42 = vector.broadcast %2 : vector<1x96xf32> to vector<2x96xf32>
    %43 = arith.addf %41, %42 : vector<2x96xf32>
    %44 = vector.extract_strided_slice %7 {offsets = [2, 96], sizes = [2, 96], strides = [1, 1]} : vector<4x192xf32> to vector<2x96xf32>
    %45 = vector.extract_strided_slice %5 {offsets = [2, 0], sizes = [2, 32], strides = [1, 1]} : vector<4x32xf32> to vector<2x32xf32>
    %46 = vector.extract_strided_slice %43 {offsets = [0, 0], sizes = [2, 32], strides = [1, 1]} : vector<2x96xf32> to vector<2x32xf32>
    %47 = vector.extract_strided_slice %44 {offsets = [0, 0], sizes = [2, 32], strides = [1, 1]} : vector<2x96xf32> to vector<2x32xf32>
    %48 = arith.addf %46, %47 : vector<2x32xf32>
    %49 = arith.negf %48 : vector<2x32xf32>
    %50 = math.exp %49 : vector<2x32xf32>
    %cst_14 = arith.constant 1.000000e+00 : f32
    %51 = vector.broadcast %cst_14 : f32 to vector<2x32xf32>
    %52 = arith.addf %51, %50 : vector<2x32xf32>
    %53 = arith.divf %51, %52 : vector<2x32xf32>
    %54 = vector.extract_strided_slice %43 {offsets = [0, 32], sizes = [2, 32], strides = [1, 1]} : vector<2x96xf32> to vector<2x32xf32>
    %55 = vector.extract_strided_slice %44 {offsets = [0, 32], sizes = [2, 32], strides = [1, 1]} : vector<2x96xf32> to vector<2x32xf32>
    %56 = arith.addf %54, %55 : vector<2x32xf32>
    %57 = arith.negf %56 : vector<2x32xf32>
    %58 = math.exp %57 : vector<2x32xf32>
    %cst_15 = arith.constant 1.000000e+00 : f32
    %59 = vector.broadcast %cst_15 : f32 to vector<2x32xf32>
    %60 = arith.addf %59, %58 : vector<2x32xf32>
    %61 = arith.divf %59, %60 : vector<2x32xf32>
    %62 = vector.extract_strided_slice %43 {offsets = [0, 64], sizes = [2, 32], strides = [1, 1]} : vector<2x96xf32> to vector<2x32xf32>
    %63 = vector.extract_strided_slice %44 {offsets = [0, 64], sizes = [2, 32], strides = [1, 1]} : vector<2x96xf32> to vector<2x32xf32>
    %64 = vector.broadcast %4 : vector<1x32xf32> to vector<2x32xf32>
    %65 = arith.addf %63, %64 : vector<2x32xf32>
    %66 = arith.mulf %53, %65 : vector<2x32xf32>
    %67 = arith.addf %62, %66 : vector<2x32xf32>
    %68 = math.tanh %67 : vector<2x32xf32>
    %cst_16 = arith.constant 1.000000e+00 : f32
    %69 = vector.broadcast %cst_16 : f32 to vector<2x32xf32>
    %70 = arith.subf %69, %61 : vector<2x32xf32>
    %71 = arith.mulf %70, %68 : vector<2x32xf32>
    %72 = arith.mulf %61, %45 : vector<2x32xf32>
    %73 = arith.addf %71, %72 : vector<2x32xf32>
    %74 = tpu.concatenate %39, %73 in 0 : vector<2x32xf32>, vector<2x32xf32> -> vector<4x32xf32>
    %75 = arith.truncf %74 : vector<4x32xf32> to vector<4x32xbf16>
    %cst_17 = arith.constant dense<0.000000e+00> : vector<4x192xf32>
    %76 = tpu.matmul %75, %0, %cst_17 {dimension_numbers = #tpu.dot_dimension_numbers<[1], [0], [0], [1], [0, 0, 1, 1], [], []>} : vector<4x32xbf16>, vector<32x192xbf16>, vector<4x192xf32> -> vector<4x192xf32>
    %c1_18 = arith.constant 1 : index
    %c0_19 = arith.constant 0 : index
    %c0_20 = arith.constant 0 : index
    %77 = vector.load %arg0[%c1_18, %c0_19, %c0_20] : memref<8x2x96xf32, #tpu.memory_space<vmem>>, vector<1x2x96xf32>
    %78 = vector.shape_cast %77 : vector<1x2x96xf32> to vector<2x96xf32>
    %79 = vector.extract_strided_slice %76 {offsets = [0, 0], sizes = [2, 96], strides = [1, 1]} : vector<4x192xf32> to vector<2x96xf32>
    %80 = vector.extract_strided_slice %74 {offsets = [0, 0], sizes = [2, 32], strides = [1, 1]} : vector<4x32xf32> to vector<2x32xf32>
    %81 = vector.extract_strided_slice %78 {offsets = [0, 0], sizes = [2, 32], strides = [1, 1]} : vector<2x96xf32> to vector<2x32xf32>
    %82 = vector.extract_strided_slice %79 {offsets = [0, 0], sizes = [2, 32], strides = [1, 1]} : vector<2x96xf32> to vector<2x32xf32>
    %83 = arith.addf %81, %82 : vector<2x32xf32>
    %84 = arith.negf %83 : vector<2x32xf32>
    %85 = math.exp %84 : vector<2x32xf32>
    %cst_21 = arith.constant 1.000000e+00 : f32
    %86 = vector.broadcast %cst_21 : f32 to vector<2x32xf32>
    %87 = arith.addf %86, %85 : vector<2x32xf32>
    %88 = arith.divf %86, %87 : vector<2x32xf32>
    %89 = vector.extract_strided_slice %78 {offsets = [0, 32], sizes = [2, 32], strides = [1, 1]} : vector<2x96xf32> to vector<2x32xf32>
    %90 = vector.extract_strided_slice %79 {offsets = [0, 32], sizes = [2, 32], strides = [1, 1]} : vector<2x96xf32> to vector<2x32xf32>
    %91 = arith.addf %89, %90 : vector<2x32xf32>
    %92 = arith.negf %91 : vector<2x32xf32>
    %93 = math.exp %92 : vector<2x32xf32>
    %cst_22 = arith.constant 1.000000e+00 : f32
    %94 = vector.broadcast %cst_22 : f32 to vector<2x32xf32>
    %95 = arith.addf %94, %93 : vector<2x32xf32>
    %96 = arith.divf %94, %95 : vector<2x32xf32>
    %97 = vector.extract_strided_slice %78 {offsets = [0, 64], sizes = [2, 32], strides = [1, 1]} : vector<2x96xf32> to vector<2x32xf32>
    %98 = vector.extract_strided_slice %79 {offsets = [0, 64], sizes = [2, 32], strides = [1, 1]} : vector<2x96xf32> to vector<2x32xf32>
    %99 = vector.broadcast %3 : vector<1x32xf32> to vector<2x32xf32>
    %100 = arith.addf %98, %99 : vector<2x32xf32>
    %101 = arith.mulf %88, %100 : vector<2x32xf32>
    %102 = arith.addf %97, %101 : vector<2x32xf32>
    %103 = math.tanh %102 : vector<2x32xf32>
    %cst_23 = arith.constant 1.000000e+00 : f32
    %104 = vector.broadcast %cst_23 : f32 to vector<2x32xf32>
    %105 = arith.subf %104, %96 : vector<2x32xf32>
    %106 = arith.mulf %105, %103 : vector<2x32xf32>
    %107 = arith.mulf %96, %80 : vector<2x32xf32>
    %108 = arith.addf %106, %107 : vector<2x32xf32>
    %109 = arith.truncf %108 : vector<2x32xf32> to vector<2x32xbf16>
    %cst_24 = arith.constant dense<0.000000e+00> : vector<2x96xf32>
    %110 = tpu.matmul %109, %1, %cst_24 {dimension_numbers = #tpu.dot_dimension_numbers<[1], [0], [0], [1], [0, 0, 1, 1], [], []>} : vector<2x32xbf16>, vector<32x96xbf16>, vector<2x96xf32> -> vector<2x96xf32>
    %111 = vector.broadcast %2 : vector<1x96xf32> to vector<2x96xf32>
    %112 = arith.addf %110, %111 : vector<2x96xf32>
    %113 = vector.extract_strided_slice %76 {offsets = [2, 96], sizes = [2, 96], strides = [1, 1]} : vector<4x192xf32> to vector<2x96xf32>
    %114 = vector.extract_strided_slice %74 {offsets = [2, 0], sizes = [2, 32], strides = [1, 1]} : vector<4x32xf32> to vector<2x32xf32>
    %115 = vector.extract_strided_slice %112 {offsets = [0, 0], sizes = [2, 32], strides = [1, 1]} : vector<2x96xf32> to vector<2x32xf32>
    %116 = vector.extract_strided_slice %113 {offsets = [0, 0], sizes = [2, 32], strides = [1, 1]} : vector<2x96xf32> to vector<2x32xf32>
    %117 = arith.addf %115, %116 : vector<2x32xf32>
    %118 = arith.negf %117 : vector<2x32xf32>
    %119 = math.exp %118 : vector<2x32xf32>
    %cst_25 = arith.constant 1.000000e+00 : f32
    %120 = vector.broadcast %cst_25 : f32 to vector<2x32xf32>
    %121 = arith.addf %120, %119 : vector<2x32xf32>
    %122 = arith.divf %120, %121 : vector<2x32xf32>
    %123 = vector.extract_strided_slice %112 {offsets = [0, 32], sizes = [2, 32], strides = [1, 1]} : vector<2x96xf32> to vector<2x32xf32>
    %124 = vector.extract_strided_slice %113 {offsets = [0, 32], sizes = [2, 32], strides = [1, 1]} : vector<2x96xf32> to vector<2x32xf32>
    %125 = arith.addf %123, %124 : vector<2x32xf32>
    %126 = arith.negf %125 : vector<2x32xf32>
    %127 = math.exp %126 : vector<2x32xf32>
    %cst_26 = arith.constant 1.000000e+00 : f32
    %128 = vector.broadcast %cst_26 : f32 to vector<2x32xf32>
    %129 = arith.addf %128, %127 : vector<2x32xf32>
    %130 = arith.divf %128, %129 : vector<2x32xf32>
    %131 = vector.extract_strided_slice %112 {offsets = [0, 64], sizes = [2, 32], strides = [1, 1]} : vector<2x96xf32> to vector<2x32xf32>
    %132 = vector.extract_strided_slice %113 {offsets = [0, 64], sizes = [2, 32], strides = [1, 1]} : vector<2x96xf32> to vector<2x32xf32>
    %133 = vector.broadcast %4 : vector<1x32xf32> to vector<2x32xf32>
    %134 = arith.addf %132, %133 : vector<2x32xf32>
    %135 = arith.mulf %122, %134 : vector<2x32xf32>
    %136 = arith.addf %131, %135 : vector<2x32xf32>
    %137 = math.tanh %136 : vector<2x32xf32>
    %cst_27 = arith.constant 1.000000e+00 : f32
    %138 = vector.broadcast %cst_27 : f32 to vector<2x32xf32>
    %139 = arith.subf %138, %130 : vector<2x32xf32>
    %140 = arith.mulf %139, %137 : vector<2x32xf32>
    %141 = arith.mulf %130, %114 : vector<2x32xf32>
    %142 = arith.addf %140, %141 : vector<2x32xf32>
    %143 = tpu.concatenate %108, %142 in 0 : vector<2x32xf32>, vector<2x32xf32> -> vector<4x32xf32>
    %144 = arith.truncf %143 : vector<4x32xf32> to vector<4x32xbf16>
    %cst_28 = arith.constant dense<0.000000e+00> : vector<4x192xf32>
    %145 = tpu.matmul %144, %0, %cst_28 {dimension_numbers = #tpu.dot_dimension_numbers<[1], [0], [0], [1], [0, 0, 1, 1], [], []>} : vector<4x32xbf16>, vector<32x192xbf16>, vector<4x192xf32> -> vector<4x192xf32>
    %c2_29 = arith.constant 2 : index
    %c0_30 = arith.constant 0 : index
    %c0_31 = arith.constant 0 : index
    %146 = vector.load %arg0[%c2_29, %c0_30, %c0_31] : memref<8x2x96xf32, #tpu.memory_space<vmem>>, vector<1x2x96xf32>
    %147 = vector.shape_cast %146 : vector<1x2x96xf32> to vector<2x96xf32>
    %148 = vector.extract_strided_slice %145 {offsets = [0, 0], sizes = [2, 96], strides = [1, 1]} : vector<4x192xf32> to vector<2x96xf32>
    %149 = vector.extract_strided_slice %143 {offsets = [0, 0], sizes = [2, 32], strides = [1, 1]} : vector<4x32xf32> to vector<2x32xf32>
    %150 = vector.extract_strided_slice %147 {offsets = [0, 0], sizes = [2, 32], strides = [1, 1]} : vector<2x96xf32> to vector<2x32xf32>
    %151 = vector.extract_strided_slice %148 {offsets = [0, 0], sizes = [2, 32], strides = [1, 1]} : vector<2x96xf32> to vector<2x32xf32>
    %152 = arith.addf %150, %151 : vector<2x32xf32>
    %153 = arith.negf %152 : vector<2x32xf32>
    %154 = math.exp %153 : vector<2x32xf32>
    %cst_32 = arith.constant 1.000000e+00 : f32
    %155 = vector.broadcast %cst_32 : f32 to vector<2x32xf32>
    %156 = arith.addf %155, %154 : vector<2x32xf32>
    %157 = arith.divf %155, %156 : vector<2x32xf32>
    %158 = vector.extract_strided_slice %147 {offsets = [0, 32], sizes = [2, 32], strides = [1, 1]} : vector<2x96xf32> to vector<2x32xf32>
    %159 = vector.extract_strided_slice %148 {offsets = [0, 32], sizes = [2, 32], strides = [1, 1]} : vector<2x96xf32> to vector<2x32xf32>
    %160 = arith.addf %158, %159 : vector<2x32xf32>
    %161 = arith.negf %160 : vector<2x32xf32>
    %162 = math.exp %161 : vector<2x32xf32>
    %cst_33 = arith.constant 1.000000e+00 : f32
    %163 = vector.broadcast %cst_33 : f32 to vector<2x32xf32>
    %164 = arith.addf %163, %162 : vector<2x32xf32>
    %165 = arith.divf %163, %164 : vector<2x32xf32>
    %166 = vector.extract_strided_slice %147 {offsets = [0, 64], sizes = [2, 32], strides = [1, 1]} : vector<2x96xf32> to vector<2x32xf32>
    %167 = vector.extract_strided_slice %148 {offsets = [0, 64], sizes = [2, 32], strides = [1, 1]} : vector<2x96xf32> to vector<2x32xf32>
    %168 = vector.broadcast %3 : vector<1x32xf32> to vector<2x32xf32>
    %169 = arith.addf %167, %168 : vector<2x32xf32>
    %170 = arith.mulf %157, %169 : vector<2x32xf32>
    %171 = arith.addf %166, %170 : vector<2x32xf32>
    %172 = math.tanh %171 : vector<2x32xf32>
    %cst_34 = arith.constant 1.000000e+00 : f32
    %173 = vector.broadcast %cst_34 : f32 to vector<2x32xf32>
    %174 = arith.subf %173, %165 : vector<2x32xf32>
    %175 = arith.mulf %174, %172 : vector<2x32xf32>
    %176 = arith.mulf %165, %149 : vector<2x32xf32>
    %177 = arith.addf %175, %176 : vector<2x32xf32>
    %178 = arith.truncf %177 : vector<2x32xf32> to vector<2x32xbf16>
    %cst_35 = arith.constant dense<0.000000e+00> : vector<2x96xf32>
    %179 = tpu.matmul %178, %1, %cst_35 {dimension_numbers = #tpu.dot_dimension_numbers<[1], [0], [0], [1], [0, 0, 1, 1], [], []>} : vector<2x32xbf16>, vector<32x96xbf16>, vector<2x96xf32> -> vector<2x96xf32>
    %180 = vector.broadcast %2 : vector<1x96xf32> to vector<2x96xf32>
    %181 = arith.addf %179, %180 : vector<2x96xf32>
    %182 = vector.extract_strided_slice %145 {offsets = [2, 96], sizes = [2, 96], strides = [1, 1]} : vector<4x192xf32> to vector<2x96xf32>
    %183 = vector.extract_strided_slice %143 {offsets = [2, 0], sizes = [2, 32], strides = [1, 1]} : vector<4x32xf32> to vector<2x32xf32>
    %184 = vector.extract_strided_slice %181 {offsets = [0, 0], sizes = [2, 32], strides = [1, 1]} : vector<2x96xf32> to vector<2x32xf32>
    %185 = vector.extract_strided_slice %182 {offsets = [0, 0], sizes = [2, 32], strides = [1, 1]} : vector<2x96xf32> to vector<2x32xf32>
    %186 = arith.addf %184, %185 : vector<2x32xf32>
    %187 = arith.negf %186 : vector<2x32xf32>
    %188 = math.exp %187 : vector<2x32xf32>
    %cst_36 = arith.constant 1.000000e+00 : f32
    %189 = vector.broadcast %cst_36 : f32 to vector<2x32xf32>
    %190 = arith.addf %189, %188 : vector<2x32xf32>
    %191 = arith.divf %189, %190 : vector<2x32xf32>
    %192 = vector.extract_strided_slice %181 {offsets = [0, 32], sizes = [2, 32], strides = [1, 1]} : vector<2x96xf32> to vector<2x32xf32>
    %193 = vector.extract_strided_slice %182 {offsets = [0, 32], sizes = [2, 32], strides = [1, 1]} : vector<2x96xf32> to vector<2x32xf32>
    %194 = arith.addf %192, %193 : vector<2x32xf32>
    %195 = arith.negf %194 : vector<2x32xf32>
    %196 = math.exp %195 : vector<2x32xf32>
    %cst_37 = arith.constant 1.000000e+00 : f32
    %197 = vector.broadcast %cst_37 : f32 to vector<2x32xf32>
    %198 = arith.addf %197, %196 : vector<2x32xf32>
    %199 = arith.divf %197, %198 : vector<2x32xf32>
    %200 = vector.extract_strided_slice %181 {offsets = [0, 64], sizes = [2, 32], strides = [1, 1]} : vector<2x96xf32> to vector<2x32xf32>
    %201 = vector.extract_strided_slice %182 {offsets = [0, 64], sizes = [2, 32], strides = [1, 1]} : vector<2x96xf32> to vector<2x32xf32>
    %202 = vector.broadcast %4 : vector<1x32xf32> to vector<2x32xf32>
    %203 = arith.addf %201, %202 : vector<2x32xf32>
    %204 = arith.mulf %191, %203 : vector<2x32xf32>
    %205 = arith.addf %200, %204 : vector<2x32xf32>
    %206 = math.tanh %205 : vector<2x32xf32>
    %cst_38 = arith.constant 1.000000e+00 : f32
    %207 = vector.broadcast %cst_38 : f32 to vector<2x32xf32>
    %208 = arith.subf %207, %199 : vector<2x32xf32>
    %209 = arith.mulf %208, %206 : vector<2x32xf32>
    %210 = arith.mulf %199, %183 : vector<2x32xf32>
    %211 = arith.addf %209, %210 : vector<2x32xf32>
    %212 = tpu.concatenate %177, %211 in 0 : vector<2x32xf32>, vector<2x32xf32> -> vector<4x32xf32>
    %213 = arith.truncf %212 : vector<4x32xf32> to vector<4x32xbf16>
    %cst_39 = arith.constant dense<0.000000e+00> : vector<4x192xf32>
    %214 = tpu.matmul %213, %0, %cst_39 {dimension_numbers = #tpu.dot_dimension_numbers<[1], [0], [0], [1], [0, 0, 1, 1], [], []>} : vector<4x32xbf16>, vector<32x192xbf16>, vector<4x192xf32> -> vector<4x192xf32>
    %c3 = arith.constant 3 : index
    %c0_40 = arith.constant 0 : index
    %c0_41 = arith.constant 0 : index
    %215 = vector.load %arg0[%c3, %c0_40, %c0_41] : memref<8x2x96xf32, #tpu.memory_space<vmem>>, vector<1x2x96xf32>
    %216 = vector.shape_cast %215 : vector<1x2x96xf32> to vector<2x96xf32>
    %217 = vector.extract_strided_slice %214 {offsets = [0, 0], sizes = [2, 96], strides = [1, 1]} : vector<4x192xf32> to vector<2x96xf32>
    %218 = vector.extract_strided_slice %212 {offsets = [0, 0], sizes = [2, 32], strides = [1, 1]} : vector<4x32xf32> to vector<2x32xf32>
    %219 = vector.extract_strided_slice %216 {offsets = [0, 0], sizes = [2, 32], strides = [1, 1]} : vector<2x96xf32> to vector<2x32xf32>
    %220 = vector.extract_strided_slice %217 {offsets = [0, 0], sizes = [2, 32], strides = [1, 1]} : vector<2x96xf32> to vector<2x32xf32>
    %221 = arith.addf %219, %220 : vector<2x32xf32>
    %222 = arith.negf %221 : vector<2x32xf32>
    %223 = math.exp %222 : vector<2x32xf32>
    %cst_42 = arith.constant 1.000000e+00 : f32
    %224 = vector.broadcast %cst_42 : f32 to vector<2x32xf32>
    %225 = arith.addf %224, %223 : vector<2x32xf32>
    %226 = arith.divf %224, %225 : vector<2x32xf32>
    %227 = vector.extract_strided_slice %216 {offsets = [0, 32], sizes = [2, 32], strides = [1, 1]} : vector<2x96xf32> to vector<2x32xf32>
    %228 = vector.extract_strided_slice %217 {offsets = [0, 32], sizes = [2, 32], strides = [1, 1]} : vector<2x96xf32> to vector<2x32xf32>
    %229 = arith.addf %227, %228 : vector<2x32xf32>
    %230 = arith.negf %229 : vector<2x32xf32>
    %231 = math.exp %230 : vector<2x32xf32>
    %cst_43 = arith.constant 1.000000e+00 : f32
    %232 = vector.broadcast %cst_43 : f32 to vector<2x32xf32>
    %233 = arith.addf %232, %231 : vector<2x32xf32>
    %234 = arith.divf %232, %233 : vector<2x32xf32>
    %235 = vector.extract_strided_slice %216 {offsets = [0, 64], sizes = [2, 32], strides = [1, 1]} : vector<2x96xf32> to vector<2x32xf32>
    %236 = vector.extract_strided_slice %217 {offsets = [0, 64], sizes = [2, 32], strides = [1, 1]} : vector<2x96xf32> to vector<2x32xf32>
    %237 = vector.broadcast %3 : vector<1x32xf32> to vector<2x32xf32>
    %238 = arith.addf %236, %237 : vector<2x32xf32>
    %239 = arith.mulf %226, %238 : vector<2x32xf32>
    %240 = arith.addf %235, %239 : vector<2x32xf32>
    %241 = math.tanh %240 : vector<2x32xf32>
    %cst_44 = arith.constant 1.000000e+00 : f32
    %242 = vector.broadcast %cst_44 : f32 to vector<2x32xf32>
    %243 = arith.subf %242, %234 : vector<2x32xf32>
    %244 = arith.mulf %243, %241 : vector<2x32xf32>
    %245 = arith.mulf %234, %218 : vector<2x32xf32>
    %246 = arith.addf %244, %245 : vector<2x32xf32>
    %247 = arith.truncf %246 : vector<2x32xf32> to vector<2x32xbf16>
    %cst_45 = arith.constant dense<0.000000e+00> : vector<2x96xf32>
    %248 = tpu.matmul %247, %1, %cst_45 {dimension_numbers = #tpu.dot_dimension_numbers<[1], [0], [0], [1], [0, 0, 1, 1], [], []>} : vector<2x32xbf16>, vector<32x96xbf16>, vector<2x96xf32> -> vector<2x96xf32>
    %249 = vector.broadcast %2 : vector<1x96xf32> to vector<2x96xf32>
    %250 = arith.addf %248, %249 : vector<2x96xf32>
    %251 = vector.extract_strided_slice %214 {offsets = [2, 96], sizes = [2, 96], strides = [1, 1]} : vector<4x192xf32> to vector<2x96xf32>
    %252 = vector.extract_strided_slice %212 {offsets = [2, 0], sizes = [2, 32], strides = [1, 1]} : vector<4x32xf32> to vector<2x32xf32>
    %253 = vector.extract_strided_slice %250 {offsets = [0, 0], sizes = [2, 32], strides = [1, 1]} : vector<2x96xf32> to vector<2x32xf32>
    %254 = vector.extract_strided_slice %251 {offsets = [0, 0], sizes = [2, 32], strides = [1, 1]} : vector<2x96xf32> to vector<2x32xf32>
    %255 = arith.addf %253, %254 : vector<2x32xf32>
    %256 = arith.negf %255 : vector<2x32xf32>
    %257 = math.exp %256 : vector<2x32xf32>
    %cst_46 = arith.constant 1.000000e+00 : f32
    %258 = vector.broadcast %cst_46 : f32 to vector<2x32xf32>
    %259 = arith.addf %258, %257 : vector<2x32xf32>
    %260 = arith.divf %258, %259 : vector<2x32xf32>
    %261 = vector.extract_strided_slice %250 {offsets = [0, 32], sizes = [2, 32], strides = [1, 1]} : vector<2x96xf32> to vector<2x32xf32>
    %262 = vector.extract_strided_slice %251 {offsets = [0, 32], sizes = [2, 32], strides = [1, 1]} : vector<2x96xf32> to vector<2x32xf32>
    %263 = arith.addf %261, %262 : vector<2x32xf32>
    %264 = arith.negf %263 : vector<2x32xf32>
    %265 = math.exp %264 : vector<2x32xf32>
    %cst_47 = arith.constant 1.000000e+00 : f32
    %266 = vector.broadcast %cst_47 : f32 to vector<2x32xf32>
    %267 = arith.addf %266, %265 : vector<2x32xf32>
    %268 = arith.divf %266, %267 : vector<2x32xf32>
    %269 = vector.extract_strided_slice %250 {offsets = [0, 64], sizes = [2, 32], strides = [1, 1]} : vector<2x96xf32> to vector<2x32xf32>
    %270 = vector.extract_strided_slice %251 {offsets = [0, 64], sizes = [2, 32], strides = [1, 1]} : vector<2x96xf32> to vector<2x32xf32>
    %271 = vector.broadcast %4 : vector<1x32xf32> to vector<2x32xf32>
    %272 = arith.addf %270, %271 : vector<2x32xf32>
    %273 = arith.mulf %260, %272 : vector<2x32xf32>
    %274 = arith.addf %269, %273 : vector<2x32xf32>
    %275 = math.tanh %274 : vector<2x32xf32>
    %cst_48 = arith.constant 1.000000e+00 : f32
    %276 = vector.broadcast %cst_48 : f32 to vector<2x32xf32>
    %277 = arith.subf %276, %268 : vector<2x32xf32>
    %278 = arith.mulf %277, %275 : vector<2x32xf32>
    %279 = arith.mulf %268, %252 : vector<2x32xf32>
    %280 = arith.addf %278, %279 : vector<2x32xf32>
    %281 = tpu.concatenate %246, %280 in 0 : vector<2x32xf32>, vector<2x32xf32> -> vector<4x32xf32>
    %282 = arith.truncf %281 : vector<4x32xf32> to vector<4x32xbf16>
    %cst_49 = arith.constant dense<0.000000e+00> : vector<4x192xf32>
    %283 = tpu.matmul %282, %0, %cst_49 {dimension_numbers = #tpu.dot_dimension_numbers<[1], [0], [0], [1], [0, 0, 1, 1], [], []>} : vector<4x32xbf16>, vector<32x192xbf16>, vector<4x192xf32> -> vector<4x192xf32>
    %c4 = arith.constant 4 : index
    %c0_50 = arith.constant 0 : index
    %c0_51 = arith.constant 0 : index
    %284 = vector.load %arg0[%c4, %c0_50, %c0_51] : memref<8x2x96xf32, #tpu.memory_space<vmem>>, vector<1x2x96xf32>
    %285 = vector.shape_cast %284 : vector<1x2x96xf32> to vector<2x96xf32>
    %286 = vector.extract_strided_slice %283 {offsets = [0, 0], sizes = [2, 96], strides = [1, 1]} : vector<4x192xf32> to vector<2x96xf32>
    %287 = vector.extract_strided_slice %281 {offsets = [0, 0], sizes = [2, 32], strides = [1, 1]} : vector<4x32xf32> to vector<2x32xf32>
    %288 = vector.extract_strided_slice %285 {offsets = [0, 0], sizes = [2, 32], strides = [1, 1]} : vector<2x96xf32> to vector<2x32xf32>
    %289 = vector.extract_strided_slice %286 {offsets = [0, 0], sizes = [2, 32], strides = [1, 1]} : vector<2x96xf32> to vector<2x32xf32>
    %290 = arith.addf %288, %289 : vector<2x32xf32>
    %291 = arith.negf %290 : vector<2x32xf32>
    %292 = math.exp %291 : vector<2x32xf32>
    %cst_52 = arith.constant 1.000000e+00 : f32
    %293 = vector.broadcast %cst_52 : f32 to vector<2x32xf32>
    %294 = arith.addf %293, %292 : vector<2x32xf32>
    %295 = arith.divf %293, %294 : vector<2x32xf32>
    %296 = vector.extract_strided_slice %285 {offsets = [0, 32], sizes = [2, 32], strides = [1, 1]} : vector<2x96xf32> to vector<2x32xf32>
    %297 = vector.extract_strided_slice %286 {offsets = [0, 32], sizes = [2, 32], strides = [1, 1]} : vector<2x96xf32> to vector<2x32xf32>
    %298 = arith.addf %296, %297 : vector<2x32xf32>
    %299 = arith.negf %298 : vector<2x32xf32>
    %300 = math.exp %299 : vector<2x32xf32>
    %cst_53 = arith.constant 1.000000e+00 : f32
    %301 = vector.broadcast %cst_53 : f32 to vector<2x32xf32>
    %302 = arith.addf %301, %300 : vector<2x32xf32>
    %303 = arith.divf %301, %302 : vector<2x32xf32>
    %304 = vector.extract_strided_slice %285 {offsets = [0, 64], sizes = [2, 32], strides = [1, 1]} : vector<2x96xf32> to vector<2x32xf32>
    %305 = vector.extract_strided_slice %286 {offsets = [0, 64], sizes = [2, 32], strides = [1, 1]} : vector<2x96xf32> to vector<2x32xf32>
    %306 = vector.broadcast %3 : vector<1x32xf32> to vector<2x32xf32>
    %307 = arith.addf %305, %306 : vector<2x32xf32>
    %308 = arith.mulf %295, %307 : vector<2x32xf32>
    %309 = arith.addf %304, %308 : vector<2x32xf32>
    %310 = math.tanh %309 : vector<2x32xf32>
    %cst_54 = arith.constant 1.000000e+00 : f32
    %311 = vector.broadcast %cst_54 : f32 to vector<2x32xf32>
    %312 = arith.subf %311, %303 : vector<2x32xf32>
    %313 = arith.mulf %312, %310 : vector<2x32xf32>
    %314 = arith.mulf %303, %287 : vector<2x32xf32>
    %315 = arith.addf %313, %314 : vector<2x32xf32>
    %316 = arith.truncf %315 : vector<2x32xf32> to vector<2x32xbf16>
    %cst_55 = arith.constant dense<0.000000e+00> : vector<2x96xf32>
    %317 = tpu.matmul %316, %1, %cst_55 {dimension_numbers = #tpu.dot_dimension_numbers<[1], [0], [0], [1], [0, 0, 1, 1], [], []>} : vector<2x32xbf16>, vector<32x96xbf16>, vector<2x96xf32> -> vector<2x96xf32>
    %318 = vector.broadcast %2 : vector<1x96xf32> to vector<2x96xf32>
    %319 = arith.addf %317, %318 : vector<2x96xf32>
    %320 = vector.extract_strided_slice %283 {offsets = [2, 96], sizes = [2, 96], strides = [1, 1]} : vector<4x192xf32> to vector<2x96xf32>
    %321 = vector.extract_strided_slice %281 {offsets = [2, 0], sizes = [2, 32], strides = [1, 1]} : vector<4x32xf32> to vector<2x32xf32>
    %322 = vector.extract_strided_slice %319 {offsets = [0, 0], sizes = [2, 32], strides = [1, 1]} : vector<2x96xf32> to vector<2x32xf32>
    %323 = vector.extract_strided_slice %320 {offsets = [0, 0], sizes = [2, 32], strides = [1, 1]} : vector<2x96xf32> to vector<2x32xf32>
    %324 = arith.addf %322, %323 : vector<2x32xf32>
    %325 = arith.negf %324 : vector<2x32xf32>
    %326 = math.exp %325 : vector<2x32xf32>
    %cst_56 = arith.constant 1.000000e+00 : f32
    %327 = vector.broadcast %cst_56 : f32 to vector<2x32xf32>
    %328 = arith.addf %327, %326 : vector<2x32xf32>
    %329 = arith.divf %327, %328 : vector<2x32xf32>
    %330 = vector.extract_strided_slice %319 {offsets = [0, 32], sizes = [2, 32], strides = [1, 1]} : vector<2x96xf32> to vector<2x32xf32>
    %331 = vector.extract_strided_slice %320 {offsets = [0, 32], sizes = [2, 32], strides = [1, 1]} : vector<2x96xf32> to vector<2x32xf32>
    %332 = arith.addf %330, %331 : vector<2x32xf32>
    %333 = arith.negf %332 : vector<2x32xf32>
    %334 = math.exp %333 : vector<2x32xf32>
    %cst_57 = arith.constant 1.000000e+00 : f32
    %335 = vector.broadcast %cst_57 : f32 to vector<2x32xf32>
    %336 = arith.addf %335, %334 : vector<2x32xf32>
    %337 = arith.divf %335, %336 : vector<2x32xf32>
    %338 = vector.extract_strided_slice %319 {offsets = [0, 64], sizes = [2, 32], strides = [1, 1]} : vector<2x96xf32> to vector<2x32xf32>
    %339 = vector.extract_strided_slice %320 {offsets = [0, 64], sizes = [2, 32], strides = [1, 1]} : vector<2x96xf32> to vector<2x32xf32>
    %340 = vector.broadcast %4 : vector<1x32xf32> to vector<2x32xf32>
    %341 = arith.addf %339, %340 : vector<2x32xf32>
    %342 = arith.mulf %329, %341 : vector<2x32xf32>
    %343 = arith.addf %338, %342 : vector<2x32xf32>
    %344 = math.tanh %343 : vector<2x32xf32>
    %cst_58 = arith.constant 1.000000e+00 : f32
    %345 = vector.broadcast %cst_58 : f32 to vector<2x32xf32>
    %346 = arith.subf %345, %337 : vector<2x32xf32>
    %347 = arith.mulf %346, %344 : vector<2x32xf32>
    %348 = arith.mulf %337, %321 : vector<2x32xf32>
    %349 = arith.addf %347, %348 : vector<2x32xf32>
    %350 = tpu.concatenate %315, %349 in 0 : vector<2x32xf32>, vector<2x32xf32> -> vector<4x32xf32>
    %351 = arith.truncf %350 : vector<4x32xf32> to vector<4x32xbf16>
    %cst_59 = arith.constant dense<0.000000e+00> : vector<4x192xf32>
    %352 = tpu.matmul %351, %0, %cst_59 {dimension_numbers = #tpu.dot_dimension_numbers<[1], [0], [0], [1], [0, 0, 1, 1], [], []>} : vector<4x32xbf16>, vector<32x192xbf16>, vector<4x192xf32> -> vector<4x192xf32>
    %c5 = arith.constant 5 : index
    %c0_60 = arith.constant 0 : index
    %c0_61 = arith.constant 0 : index
    %353 = vector.load %arg0[%c5, %c0_60, %c0_61] : memref<8x2x96xf32, #tpu.memory_space<vmem>>, vector<1x2x96xf32>
    %354 = vector.shape_cast %353 : vector<1x2x96xf32> to vector<2x96xf32>
    %355 = vector.extract_strided_slice %352 {offsets = [0, 0], sizes = [2, 96], strides = [1, 1]} : vector<4x192xf32> to vector<2x96xf32>
    %356 = vector.extract_strided_slice %350 {offsets = [0, 0], sizes = [2, 32], strides = [1, 1]} : vector<4x32xf32> to vector<2x32xf32>
    %357 = vector.extract_strided_slice %354 {offsets = [0, 0], sizes = [2, 32], strides = [1, 1]} : vector<2x96xf32> to vector<2x32xf32>
    %358 = vector.extract_strided_slice %355 {offsets = [0, 0], sizes = [2, 32], strides = [1, 1]} : vector<2x96xf32> to vector<2x32xf32>
    %359 = arith.addf %357, %358 : vector<2x32xf32>
    %360 = arith.negf %359 : vector<2x32xf32>
    %361 = math.exp %360 : vector<2x32xf32>
    %cst_62 = arith.constant 1.000000e+00 : f32
    %362 = vector.broadcast %cst_62 : f32 to vector<2x32xf32>
    %363 = arith.addf %362, %361 : vector<2x32xf32>
    %364 = arith.divf %362, %363 : vector<2x32xf32>
    %365 = vector.extract_strided_slice %354 {offsets = [0, 32], sizes = [2, 32], strides = [1, 1]} : vector<2x96xf32> to vector<2x32xf32>
    %366 = vector.extract_strided_slice %355 {offsets = [0, 32], sizes = [2, 32], strides = [1, 1]} : vector<2x96xf32> to vector<2x32xf32>
    %367 = arith.addf %365, %366 : vector<2x32xf32>
    %368 = arith.negf %367 : vector<2x32xf32>
    %369 = math.exp %368 : vector<2x32xf32>
    %cst_63 = arith.constant 1.000000e+00 : f32
    %370 = vector.broadcast %cst_63 : f32 to vector<2x32xf32>
    %371 = arith.addf %370, %369 : vector<2x32xf32>
    %372 = arith.divf %370, %371 : vector<2x32xf32>
    %373 = vector.extract_strided_slice %354 {offsets = [0, 64], sizes = [2, 32], strides = [1, 1]} : vector<2x96xf32> to vector<2x32xf32>
    %374 = vector.extract_strided_slice %355 {offsets = [0, 64], sizes = [2, 32], strides = [1, 1]} : vector<2x96xf32> to vector<2x32xf32>
    %375 = vector.broadcast %3 : vector<1x32xf32> to vector<2x32xf32>
    %376 = arith.addf %374, %375 : vector<2x32xf32>
    %377 = arith.mulf %364, %376 : vector<2x32xf32>
    %378 = arith.addf %373, %377 : vector<2x32xf32>
    %379 = math.tanh %378 : vector<2x32xf32>
    %cst_64 = arith.constant 1.000000e+00 : f32
    %380 = vector.broadcast %cst_64 : f32 to vector<2x32xf32>
    %381 = arith.subf %380, %372 : vector<2x32xf32>
    %382 = arith.mulf %381, %379 : vector<2x32xf32>
    %383 = arith.mulf %372, %356 : vector<2x32xf32>
    %384 = arith.addf %382, %383 : vector<2x32xf32>
    %385 = arith.truncf %384 : vector<2x32xf32> to vector<2x32xbf16>
    %cst_65 = arith.constant dense<0.000000e+00> : vector<2x96xf32>
    %386 = tpu.matmul %385, %1, %cst_65 {dimension_numbers = #tpu.dot_dimension_numbers<[1], [0], [0], [1], [0, 0, 1, 1], [], []>} : vector<2x32xbf16>, vector<32x96xbf16>, vector<2x96xf32> -> vector<2x96xf32>
    %387 = vector.broadcast %2 : vector<1x96xf32> to vector<2x96xf32>
    %388 = arith.addf %386, %387 : vector<2x96xf32>
    %389 = vector.extract_strided_slice %352 {offsets = [2, 96], sizes = [2, 96], strides = [1, 1]} : vector<4x192xf32> to vector<2x96xf32>
    %390 = vector.extract_strided_slice %350 {offsets = [2, 0], sizes = [2, 32], strides = [1, 1]} : vector<4x32xf32> to vector<2x32xf32>
    %391 = vector.extract_strided_slice %388 {offsets = [0, 0], sizes = [2, 32], strides = [1, 1]} : vector<2x96xf32> to vector<2x32xf32>
    %392 = vector.extract_strided_slice %389 {offsets = [0, 0], sizes = [2, 32], strides = [1, 1]} : vector<2x96xf32> to vector<2x32xf32>
    %393 = arith.addf %391, %392 : vector<2x32xf32>
    %394 = arith.negf %393 : vector<2x32xf32>
    %395 = math.exp %394 : vector<2x32xf32>
    %cst_66 = arith.constant 1.000000e+00 : f32
    %396 = vector.broadcast %cst_66 : f32 to vector<2x32xf32>
    %397 = arith.addf %396, %395 : vector<2x32xf32>
    %398 = arith.divf %396, %397 : vector<2x32xf32>
    %399 = vector.extract_strided_slice %388 {offsets = [0, 32], sizes = [2, 32], strides = [1, 1]} : vector<2x96xf32> to vector<2x32xf32>
    %400 = vector.extract_strided_slice %389 {offsets = [0, 32], sizes = [2, 32], strides = [1, 1]} : vector<2x96xf32> to vector<2x32xf32>
    %401 = arith.addf %399, %400 : vector<2x32xf32>
    %402 = arith.negf %401 : vector<2x32xf32>
    %403 = math.exp %402 : vector<2x32xf32>
    %cst_67 = arith.constant 1.000000e+00 : f32
    %404 = vector.broadcast %cst_67 : f32 to vector<2x32xf32>
    %405 = arith.addf %404, %403 : vector<2x32xf32>
    %406 = arith.divf %404, %405 : vector<2x32xf32>
    %407 = vector.extract_strided_slice %388 {offsets = [0, 64], sizes = [2, 32], strides = [1, 1]} : vector<2x96xf32> to vector<2x32xf32>
    %408 = vector.extract_strided_slice %389 {offsets = [0, 64], sizes = [2, 32], strides = [1, 1]} : vector<2x96xf32> to vector<2x32xf32>
    %409 = vector.broadcast %4 : vector<1x32xf32> to vector<2x32xf32>
    %410 = arith.addf %408, %409 : vector<2x32xf32>
    %411 = arith.mulf %398, %410 : vector<2x32xf32>
    %412 = arith.addf %407, %411 : vector<2x32xf32>
    %413 = math.tanh %412 : vector<2x32xf32>
    %cst_68 = arith.constant 1.000000e+00 : f32
    %414 = vector.broadcast %cst_68 : f32 to vector<2x32xf32>
    %415 = arith.subf %414, %406 : vector<2x32xf32>
    %416 = arith.mulf %415, %413 : vector<2x32xf32>
    %417 = arith.mulf %406, %390 : vector<2x32xf32>
    %418 = arith.addf %416, %417 : vector<2x32xf32>
    %419 = tpu.concatenate %384, %418 in 0 : vector<2x32xf32>, vector<2x32xf32> -> vector<4x32xf32>
    %420 = arith.truncf %419 : vector<4x32xf32> to vector<4x32xbf16>
    %cst_69 = arith.constant dense<0.000000e+00> : vector<4x192xf32>
    %421 = tpu.matmul %420, %0, %cst_69 {dimension_numbers = #tpu.dot_dimension_numbers<[1], [0], [0], [1], [0, 0, 1, 1], [], []>} : vector<4x32xbf16>, vector<32x192xbf16>, vector<4x192xf32> -> vector<4x192xf32>
    %c6 = arith.constant 6 : index
    %c0_70 = arith.constant 0 : index
    %c0_71 = arith.constant 0 : index
    %422 = vector.load %arg0[%c6, %c0_70, %c0_71] : memref<8x2x96xf32, #tpu.memory_space<vmem>>, vector<1x2x96xf32>
    %423 = vector.shape_cast %422 : vector<1x2x96xf32> to vector<2x96xf32>
    %424 = vector.extract_strided_slice %421 {offsets = [0, 0], sizes = [2, 96], strides = [1, 1]} : vector<4x192xf32> to vector<2x96xf32>
    %425 = vector.extract_strided_slice %419 {offsets = [0, 0], sizes = [2, 32], strides = [1, 1]} : vector<4x32xf32> to vector<2x32xf32>
    %426 = vector.extract_strided_slice %423 {offsets = [0, 0], sizes = [2, 32], strides = [1, 1]} : vector<2x96xf32> to vector<2x32xf32>
    %427 = vector.extract_strided_slice %424 {offsets = [0, 0], sizes = [2, 32], strides = [1, 1]} : vector<2x96xf32> to vector<2x32xf32>
    %428 = arith.addf %426, %427 : vector<2x32xf32>
    %429 = arith.negf %428 : vector<2x32xf32>
    %430 = math.exp %429 : vector<2x32xf32>
    %cst_72 = arith.constant 1.000000e+00 : f32
    %431 = vector.broadcast %cst_72 : f32 to vector<2x32xf32>
    %432 = arith.addf %431, %430 : vector<2x32xf32>
    %433 = arith.divf %431, %432 : vector<2x32xf32>
    %434 = vector.extract_strided_slice %423 {offsets = [0, 32], sizes = [2, 32], strides = [1, 1]} : vector<2x96xf32> to vector<2x32xf32>
    %435 = vector.extract_strided_slice %424 {offsets = [0, 32], sizes = [2, 32], strides = [1, 1]} : vector<2x96xf32> to vector<2x32xf32>
    %436 = arith.addf %434, %435 : vector<2x32xf32>
    %437 = arith.negf %436 : vector<2x32xf32>
    %438 = math.exp %437 : vector<2x32xf32>
    %cst_73 = arith.constant 1.000000e+00 : f32
    %439 = vector.broadcast %cst_73 : f32 to vector<2x32xf32>
    %440 = arith.addf %439, %438 : vector<2x32xf32>
    %441 = arith.divf %439, %440 : vector<2x32xf32>
    %442 = vector.extract_strided_slice %423 {offsets = [0, 64], sizes = [2, 32], strides = [1, 1]} : vector<2x96xf32> to vector<2x32xf32>
    %443 = vector.extract_strided_slice %424 {offsets = [0, 64], sizes = [2, 32], strides = [1, 1]} : vector<2x96xf32> to vector<2x32xf32>
    %444 = vector.broadcast %3 : vector<1x32xf32> to vector<2x32xf32>
    %445 = arith.addf %443, %444 : vector<2x32xf32>
    %446 = arith.mulf %433, %445 : vector<2x32xf32>
    %447 = arith.addf %442, %446 : vector<2x32xf32>
    %448 = math.tanh %447 : vector<2x32xf32>
    %cst_74 = arith.constant 1.000000e+00 : f32
    %449 = vector.broadcast %cst_74 : f32 to vector<2x32xf32>
    %450 = arith.subf %449, %441 : vector<2x32xf32>
    %451 = arith.mulf %450, %448 : vector<2x32xf32>
    %452 = arith.mulf %441, %425 : vector<2x32xf32>
    %453 = arith.addf %451, %452 : vector<2x32xf32>
    %454 = arith.truncf %453 : vector<2x32xf32> to vector<2x32xbf16>
    %cst_75 = arith.constant dense<0.000000e+00> : vector<2x96xf32>
    %455 = tpu.matmul %454, %1, %cst_75 {dimension_numbers = #tpu.dot_dimension_numbers<[1], [0], [0], [1], [0, 0, 1, 1], [], []>} : vector<2x32xbf16>, vector<32x96xbf16>, vector<2x96xf32> -> vector<2x96xf32>
    %456 = vector.broadcast %2 : vector<1x96xf32> to vector<2x96xf32>
    %457 = arith.addf %455, %456 : vector<2x96xf32>
    %458 = vector.extract_strided_slice %421 {offsets = [2, 96], sizes = [2, 96], strides = [1, 1]} : vector<4x192xf32> to vector<2x96xf32>
    %459 = vector.extract_strided_slice %419 {offsets = [2, 0], sizes = [2, 32], strides = [1, 1]} : vector<4x32xf32> to vector<2x32xf32>
    %460 = vector.extract_strided_slice %457 {offsets = [0, 0], sizes = [2, 32], strides = [1, 1]} : vector<2x96xf32> to vector<2x32xf32>
    %461 = vector.extract_strided_slice %458 {offsets = [0, 0], sizes = [2, 32], strides = [1, 1]} : vector<2x96xf32> to vector<2x32xf32>
    %462 = arith.addf %460, %461 : vector<2x32xf32>
    %463 = arith.negf %462 : vector<2x32xf32>
    %464 = math.exp %463 : vector<2x32xf32>
    %cst_76 = arith.constant 1.000000e+00 : f32
    %465 = vector.broadcast %cst_76 : f32 to vector<2x32xf32>
    %466 = arith.addf %465, %464 : vector<2x32xf32>
    %467 = arith.divf %465, %466 : vector<2x32xf32>
    %468 = vector.extract_strided_slice %457 {offsets = [0, 32], sizes = [2, 32], strides = [1, 1]} : vector<2x96xf32> to vector<2x32xf32>
    %469 = vector.extract_strided_slice %458 {offsets = [0, 32], sizes = [2, 32], strides = [1, 1]} : vector<2x96xf32> to vector<2x32xf32>
    %470 = arith.addf %468, %469 : vector<2x32xf32>
    %471 = arith.negf %470 : vector<2x32xf32>
    %472 = math.exp %471 : vector<2x32xf32>
    %cst_77 = arith.constant 1.000000e+00 : f32
    %473 = vector.broadcast %cst_77 : f32 to vector<2x32xf32>
    %474 = arith.addf %473, %472 : vector<2x32xf32>
    %475 = arith.divf %473, %474 : vector<2x32xf32>
    %476 = vector.extract_strided_slice %457 {offsets = [0, 64], sizes = [2, 32], strides = [1, 1]} : vector<2x96xf32> to vector<2x32xf32>
    %477 = vector.extract_strided_slice %458 {offsets = [0, 64], sizes = [2, 32], strides = [1, 1]} : vector<2x96xf32> to vector<2x32xf32>
    %478 = vector.broadcast %4 : vector<1x32xf32> to vector<2x32xf32>
    %479 = arith.addf %477, %478 : vector<2x32xf32>
    %480 = arith.mulf %467, %479 : vector<2x32xf32>
    %481 = arith.addf %476, %480 : vector<2x32xf32>
    %482 = math.tanh %481 : vector<2x32xf32>
    %cst_78 = arith.constant 1.000000e+00 : f32
    %483 = vector.broadcast %cst_78 : f32 to vector<2x32xf32>
    %484 = arith.subf %483, %475 : vector<2x32xf32>
    %485 = arith.mulf %484, %482 : vector<2x32xf32>
    %486 = arith.mulf %475, %459 : vector<2x32xf32>
    %487 = arith.addf %485, %486 : vector<2x32xf32>
    %488 = tpu.concatenate %453, %487 in 0 : vector<2x32xf32>, vector<2x32xf32> -> vector<4x32xf32>
    %489 = arith.truncf %488 : vector<4x32xf32> to vector<4x32xbf16>
    %cst_79 = arith.constant dense<0.000000e+00> : vector<4x192xf32>
    %490 = tpu.matmul %489, %0, %cst_79 {dimension_numbers = #tpu.dot_dimension_numbers<[1], [0], [0], [1], [0, 0, 1, 1], [], []>} : vector<4x32xbf16>, vector<32x192xbf16>, vector<4x192xf32> -> vector<4x192xf32>
    %c7 = arith.constant 7 : index
    %c0_80 = arith.constant 0 : index
    %c0_81 = arith.constant 0 : index
    %491 = vector.load %arg0[%c7, %c0_80, %c0_81] : memref<8x2x96xf32, #tpu.memory_space<vmem>>, vector<1x2x96xf32>
    %492 = vector.shape_cast %491 : vector<1x2x96xf32> to vector<2x96xf32>
    %493 = vector.extract_strided_slice %490 {offsets = [0, 0], sizes = [2, 96], strides = [1, 1]} : vector<4x192xf32> to vector<2x96xf32>
    %494 = vector.extract_strided_slice %488 {offsets = [0, 0], sizes = [2, 32], strides = [1, 1]} : vector<4x32xf32> to vector<2x32xf32>
    %495 = vector.extract_strided_slice %492 {offsets = [0, 0], sizes = [2, 32], strides = [1, 1]} : vector<2x96xf32> to vector<2x32xf32>
    %496 = vector.extract_strided_slice %493 {offsets = [0, 0], sizes = [2, 32], strides = [1, 1]} : vector<2x96xf32> to vector<2x32xf32>
    %497 = arith.addf %495, %496 : vector<2x32xf32>
    %498 = arith.negf %497 : vector<2x32xf32>
    %499 = math.exp %498 : vector<2x32xf32>
    %cst_82 = arith.constant 1.000000e+00 : f32
    %500 = vector.broadcast %cst_82 : f32 to vector<2x32xf32>
    %501 = arith.addf %500, %499 : vector<2x32xf32>
    %502 = arith.divf %500, %501 : vector<2x32xf32>
    %503 = vector.extract_strided_slice %492 {offsets = [0, 32], sizes = [2, 32], strides = [1, 1]} : vector<2x96xf32> to vector<2x32xf32>
    %504 = vector.extract_strided_slice %493 {offsets = [0, 32], sizes = [2, 32], strides = [1, 1]} : vector<2x96xf32> to vector<2x32xf32>
    %505 = arith.addf %503, %504 : vector<2x32xf32>
    %506 = arith.negf %505 : vector<2x32xf32>
    %507 = math.exp %506 : vector<2x32xf32>
    %cst_83 = arith.constant 1.000000e+00 : f32
    %508 = vector.broadcast %cst_83 : f32 to vector<2x32xf32>
    %509 = arith.addf %508, %507 : vector<2x32xf32>
    %510 = arith.divf %508, %509 : vector<2x32xf32>
    %511 = vector.extract_strided_slice %492 {offsets = [0, 64], sizes = [2, 32], strides = [1, 1]} : vector<2x96xf32> to vector<2x32xf32>
    %512 = vector.extract_strided_slice %493 {offsets = [0, 64], sizes = [2, 32], strides = [1, 1]} : vector<2x96xf32> to vector<2x32xf32>
    %513 = vector.broadcast %3 : vector<1x32xf32> to vector<2x32xf32>
    %514 = arith.addf %512, %513 : vector<2x32xf32>
    %515 = arith.mulf %502, %514 : vector<2x32xf32>
    %516 = arith.addf %511, %515 : vector<2x32xf32>
    %517 = math.tanh %516 : vector<2x32xf32>
    %cst_84 = arith.constant 1.000000e+00 : f32
    %518 = vector.broadcast %cst_84 : f32 to vector<2x32xf32>
    %519 = arith.subf %518, %510 : vector<2x32xf32>
    %520 = arith.mulf %519, %517 : vector<2x32xf32>
    %521 = arith.mulf %510, %494 : vector<2x32xf32>
    %522 = arith.addf %520, %521 : vector<2x32xf32>
    %523 = arith.truncf %522 : vector<2x32xf32> to vector<2x32xbf16>
    %cst_85 = arith.constant dense<0.000000e+00> : vector<2x96xf32>
    %524 = tpu.matmul %523, %1, %cst_85 {dimension_numbers = #tpu.dot_dimension_numbers<[1], [0], [0], [1], [0, 0, 1, 1], [], []>} : vector<2x32xbf16>, vector<32x96xbf16>, vector<2x96xf32> -> vector<2x96xf32>
    %525 = vector.broadcast %2 : vector<1x96xf32> to vector<2x96xf32>
    %526 = arith.addf %524, %525 : vector<2x96xf32>
    %527 = vector.extract_strided_slice %490 {offsets = [2, 96], sizes = [2, 96], strides = [1, 1]} : vector<4x192xf32> to vector<2x96xf32>
    %528 = vector.extract_strided_slice %488 {offsets = [2, 0], sizes = [2, 32], strides = [1, 1]} : vector<4x32xf32> to vector<2x32xf32>
    %529 = vector.extract_strided_slice %526 {offsets = [0, 0], sizes = [2, 32], strides = [1, 1]} : vector<2x96xf32> to vector<2x32xf32>
    %530 = vector.extract_strided_slice %527 {offsets = [0, 0], sizes = [2, 32], strides = [1, 1]} : vector<2x96xf32> to vector<2x32xf32>
    %531 = arith.addf %529, %530 : vector<2x32xf32>
    %532 = arith.negf %531 : vector<2x32xf32>
    %533 = math.exp %532 : vector<2x32xf32>
    %cst_86 = arith.constant 1.000000e+00 : f32
    %534 = vector.broadcast %cst_86 : f32 to vector<2x32xf32>
    %535 = arith.addf %534, %533 : vector<2x32xf32>
    %536 = arith.divf %534, %535 : vector<2x32xf32>
    %537 = vector.extract_strided_slice %526 {offsets = [0, 32], sizes = [2, 32], strides = [1, 1]} : vector<2x96xf32> to vector<2x32xf32>
    %538 = vector.extract_strided_slice %527 {offsets = [0, 32], sizes = [2, 32], strides = [1, 1]} : vector<2x96xf32> to vector<2x32xf32>
    %539 = arith.addf %537, %538 : vector<2x32xf32>
    %540 = arith.negf %539 : vector<2x32xf32>
    %541 = math.exp %540 : vector<2x32xf32>
    %cst_87 = arith.constant 1.000000e+00 : f32
    %542 = vector.broadcast %cst_87 : f32 to vector<2x32xf32>
    %543 = arith.addf %542, %541 : vector<2x32xf32>
    %544 = arith.divf %542, %543 : vector<2x32xf32>
    %545 = vector.extract_strided_slice %526 {offsets = [0, 64], sizes = [2, 32], strides = [1, 1]} : vector<2x96xf32> to vector<2x32xf32>
    %546 = vector.extract_strided_slice %527 {offsets = [0, 64], sizes = [2, 32], strides = [1, 1]} : vector<2x96xf32> to vector<2x32xf32>
    %547 = vector.broadcast %4 : vector<1x32xf32> to vector<2x32xf32>
    %548 = arith.addf %546, %547 : vector<2x32xf32>
    %549 = arith.mulf %536, %548 : vector<2x32xf32>
    %550 = arith.addf %545, %549 : vector<2x32xf32>
    %551 = math.tanh %550 : vector<2x32xf32>
    %cst_88 = arith.constant 1.000000e+00 : f32
    %552 = vector.broadcast %cst_88 : f32 to vector<2x32xf32>
    %553 = arith.subf %552, %544 : vector<2x32xf32>
    %554 = arith.mulf %553, %551 : vector<2x32xf32>
    %555 = arith.mulf %544, %528 : vector<2x32xf32>
    %556 = arith.addf %554, %555 : vector<2x32xf32>
    %557 = tpu.concatenate %73, %142, %211, %280, %349, %418, %487, %556 in 0 : vector<2x32xf32>, vector<2x32xf32>, vector<2x32xf32>, vector<2x32xf32>, vector<2x32xf32>, vector<2x32xf32>, vector<2x32xf32>, vector<2x32xf32> -> vector<16x32xf32>
    %c0_89 = arith.constant 0 : index
    %c0_90 = arith.constant 0 : index
    %558 = vector.load %arg1[%c0_89, %c0_90] : memref<16x384xf32, #tpu.memory_space<vmem>>, vector<16x45xf32>
    %c0_91 = arith.constant 0 : index
    %c128 = arith.constant 128 : index
    %559 = vector.load %arg1[%c0_91, %c128] : memref<16x384xf32, #tpu.memory_space<vmem>>, vector<16x45xf32>
    %c0_92 = arith.constant 0 : index
    %c256 = arith.constant 256 : index
    %560 = vector.load %arg1[%c0_92, %c256] : memref<16x384xf32, #tpu.memory_space<vmem>>, vector<16x33xf32>
    %561 = tpu.iota {dimensions = array<i32: 1>} : vector<1x65xi32>
    %562 = arith.truncf %560 : vector<16x33xf32> to vector<16x33xbf16>
    %c64 = arith.constant 64 : index
    %c0_93 = arith.constant 0 : index
    %563 = vector.load %arg2[%c64, %c0_93] : memref<1152x256xbf16, #tpu.memory_space<vmem>>, vector<33x65xbf16>
    %cst_94 = arith.constant dense<0.000000e+00> : vector<16x65xf32>
    %564 = tpu.matmul %562, %563, %cst_94 {dimension_numbers = #tpu.dot_dimension_numbers<[1], [0], [0], [1], [0, 0, 1, 1], [], []>} : vector<16x33xbf16>, vector<33x65xbf16>, vector<16x65xf32> -> vector<16x65xf32>
    %c64_i32 = arith.constant 64 : i32
    %565 = vector.broadcast %c64_i32 : i32 to vector<1x65xi32>
    %566 = arith.cmpi slt, %561, %565 : vector<1x65xi32>
    %567 = arith.negf %564 : vector<16x65xf32>
    %568 = math.exp %567 : vector<16x65xf32>
    %cst_95 = arith.constant 1.000000e+00 : f32
    %569 = vector.broadcast %cst_95 : f32 to vector<16x65xf32>
    %570 = arith.addf %569, %568 : vector<16x65xf32>
    %571 = arith.divf %569, %570 : vector<16x65xf32>
    %572 = arith.mulf %564, %571 : vector<16x65xf32>
    %573 = vector.shape_cast %566 : vector<1x65xi1> to vector<1x65xi1>
    %574 = vector.broadcast %573 : vector<1x65xi1> to vector<16x65xi1>
    %575 = arith.select %574, %572, %564 : vector<16x65xi1>, vector<16x65xf32>
    %576 = arith.truncf %575 : vector<16x65xf32> to vector<16x65xbf16>
    %c104 = arith.constant 104 : index
    %c0_96 = arith.constant 0 : index
    %577 = vector.load %arg2[%c104, %c0_96] : memref<1152x256xbf16, #tpu.memory_space<vmem>>, vector<65x65xbf16>
    %cst_97 = arith.constant dense<0.000000e+00> : vector<16x65xf32>
    %578 = tpu.matmul %576, %577, %cst_97 {dimension_numbers = #tpu.dot_dimension_numbers<[1], [0], [0], [1], [0, 0, 1, 1], [], []>} : vector<16x65xbf16>, vector<65x65xbf16>, vector<16x65xf32> -> vector<16x65xf32>
    %c64_i32_98 = arith.constant 64 : i32
    %579 = vector.broadcast %c64_i32_98 : i32 to vector<1x65xi32>
    %580 = arith.cmpi slt, %561, %579 : vector<1x65xi32>
    %581 = arith.negf %578 : vector<16x65xf32>
    %582 = math.exp %581 : vector<16x65xf32>
    %cst_99 = arith.constant 1.000000e+00 : f32
    %583 = vector.broadcast %cst_99 : f32 to vector<16x65xf32>
    %584 = arith.addf %583, %582 : vector<16x65xf32>
    %585 = arith.divf %583, %584 : vector<16x65xf32>
    %586 = arith.mulf %578, %585 : vector<16x65xf32>
    %587 = vector.shape_cast %580 : vector<1x65xi1> to vector<1x65xi1>
    %588 = vector.broadcast %587 : vector<1x65xi1> to vector<16x65xi1>
    %589 = arith.select %588, %586, %578 : vector<16x65xi1>, vector<16x65xf32>
    %590 = arith.truncf %589 : vector<16x65xf32> to vector<16x65xbf16>
    %c176 = arith.constant 176 : index
    %c0_100 = arith.constant 0 : index
    %591 = vector.load %arg2[%c176, %c0_100] : memref<1152x256xbf16, #tpu.memory_space<vmem>>, vector<65x12xbf16>
    %cst_101 = arith.constant dense<0.000000e+00> : vector<16x12xf32>
    %592 = tpu.matmul %590, %591, %cst_101 {dimension_numbers = #tpu.dot_dimension_numbers<[1], [0], [0], [1], [0, 0, 1, 1], [], []>} : vector<16x65xbf16>, vector<65x12xbf16>, vector<16x12xf32> -> vector<16x12xf32>
    %593 = vector.extract_strided_slice %592 {offsets = [0, 0], sizes = [16, 1], strides = [1, 1]} : vector<16x12xf32> to vector<16x1xf32>
    %594 = vector.extract_strided_slice %592 {offsets = [0, 1], sizes = [16, 1], strides = [1, 1]} : vector<16x12xf32> to vector<16x1xf32>
    %595 = vector.extract_strided_slice %592 {offsets = [0, 2], sizes = [16, 1], strides = [1, 1]} : vector<16x12xf32> to vector<16x1xf32>
    %596 = vector.extract_strided_slice %592 {offsets = [0, 3], sizes = [16, 1], strides = [1, 1]} : vector<16x12xf32> to vector<16x1xf32>
    %597 = vector.extract_strided_slice %592 {offsets = [0, 4], sizes = [16, 1], strides = [1, 1]} : vector<16x12xf32> to vector<16x1xf32>
    %598 = vector.extract_strided_slice %592 {offsets = [0, 5], sizes = [16, 1], strides = [1, 1]} : vector<16x12xf32> to vector<16x1xf32>
    %599 = vector.extract_strided_slice %592 {offsets = [0, 6], sizes = [16, 1], strides = [1, 1]} : vector<16x12xf32> to vector<16x1xf32>
    %600 = vector.extract_strided_slice %592 {offsets = [0, 7], sizes = [16, 1], strides = [1, 1]} : vector<16x12xf32> to vector<16x1xf32>
    %601 = vector.extract_strided_slice %592 {offsets = [0, 8], sizes = [16, 1], strides = [1, 1]} : vector<16x12xf32> to vector<16x1xf32>
    %602 = vector.extract_strided_slice %592 {offsets = [0, 9], sizes = [16, 1], strides = [1, 1]} : vector<16x12xf32> to vector<16x1xf32>
    %603 = vector.extract_strided_slice %592 {offsets = [0, 10], sizes = [16, 1], strides = [1, 1]} : vector<16x12xf32> to vector<16x1xf32>
    %604 = vector.extract_strided_slice %592 {offsets = [0, 11], sizes = [16, 1], strides = [1, 1]} : vector<16x12xf32> to vector<16x1xf32>
    %605 = tpu.concatenate %593, %594, %595, %596, %597, %598, %599, %600, %601, %602, %603, %604 in 0 : vector<16x1xf32>, vector<16x1xf32>, vector<16x1xf32>, vector<16x1xf32>, vector<16x1xf32>, vector<16x1xf32>, vector<16x1xf32>, vector<16x1xf32>, vector<16x1xf32>, vector<16x1xf32>, vector<16x1xf32>, vector<16x1xf32> -> vector<192x1xf32>
    %606 = arith.truncf %557 : vector<16x32xf32> to vector<16x32xbf16>
    %c248 = arith.constant 248 : index
    %c0_102 = arith.constant 0 : index
    %607 = vector.load %arg2[%c248, %c0_102] : memref<1152x256xbf16, #tpu.memory_space<vmem>>, vector<32x22xbf16>
    %cst_103 = arith.constant dense<0.000000e+00> : vector<16x22xf32>
    %608 = tpu.matmul %606, %607, %cst_103 {dimension_numbers = #tpu.dot_dimension_numbers<[1], [0], [0], [1], [0, 0, 1, 1], [], []>} : vector<16x32xbf16>, vector<32x22xbf16>, vector<16x22xf32> -> vector<16x22xf32>
    %c3_104 = arith.constant 3 : index
    %c0_105 = arith.constant 0 : index
    %609 = vector.load %arg3[%c3_104, %c0_105] : memref<72x128xf32, #tpu.memory_space<vmem>>, vector<1x22xf32>
    %610 = vector.broadcast %609 : vector<1x22xf32> to vector<16x22xf32>
    %611 = arith.addf %608, %610 : vector<16x22xf32>
    %cst_106 = arith.constant 0.000000e+00 : f32
    %612 = vector.broadcast %cst_106 : f32 to vector<16x22xf32>
    %613 = arith.cmpf ogt, %611, %612 : vector<16x22xf32>
    %cst_107 = arith.constant 4.000000e-01 : f32
    %614 = vector.broadcast %cst_107 : f32 to vector<16x22xf32>
    %615 = arith.mulf %614, %611 : vector<16x22xf32>
    %616 = arith.select %613, %611, %615 : vector<16x22xi1>, vector<16x22xf32>
    %617 = arith.truncf %616 : vector<16x22xf32> to vector<16x22xbf16>
    %c280 = arith.constant 280 : index
    %c0_108 = arith.constant 0 : index
    %618 = vector.load %arg2[%c280, %c0_108] : memref<1152x256xbf16, #tpu.memory_space<vmem>>, vector<22x45xbf16>
    %cst_109 = arith.constant dense<0.000000e+00> : vector<16x45xf32>
    %619 = tpu.matmul %617, %618, %cst_109 {dimension_numbers = #tpu.dot_dimension_numbers<[1], [0], [0], [1], [0, 0, 1, 1], [], []>} : vector<16x22xbf16>, vector<22x45xbf16>, vector<16x45xf32> -> vector<16x45xf32>
    %c4_110 = arith.constant 4 : index
    %c0_111 = arith.constant 0 : index
    %620 = vector.load %arg3[%c4_110, %c0_111] : memref<72x128xf32, #tpu.memory_space<vmem>>, vector<1x45xf32>
    %621 = vector.broadcast %620 : vector<1x45xf32> to vector<16x45xf32>
    %622 = arith.addf %619, %621 : vector<16x45xf32>
    %cst_112 = arith.constant 0.000000e+00 : f32
    %623 = vector.broadcast %cst_112 : f32 to vector<16x45xf32>
    %624 = arith.cmpf ogt, %622, %623 : vector<16x45xf32>
    %cst_113 = arith.constant 4.000000e-01 : f32
    %625 = vector.broadcast %cst_113 : f32 to vector<16x45xf32>
    %626 = arith.mulf %625, %622 : vector<16x45xf32>
    %627 = arith.select %624, %622, %626 : vector<16x45xi1>, vector<16x45xf32>
    %628 = tpu.iota {dimensions = array<i32: 1>} : vector<1x45xi32>
    %cst_114 = arith.constant 1.000000e+00 : f32
    %629 = vector.broadcast %cst_114 : f32 to vector<1x45xf32>
    %630 = tpu.concatenate %558, %558, %558, %558 in 0 : vector<16x45xf32>, vector<16x45xf32>, vector<16x45xf32>, vector<16x45xf32> -> vector<64x45xf32>
    %c8 = arith.constant 8 : index
    %c0_115 = arith.constant 0 : index
    %631 = vector.load %arg3[%c8, %c0_115] : memref<72x128xf32, #tpu.memory_space<vmem>>, vector<64x1xf32>
    %632 = vector.broadcast %631 : vector<64x1xf32> to vector<64x45xf32>
    %633 = arith.mulf %632, %630 : vector<64x45xf32>
    %c8_116 = arith.constant 8 : index
    %c1_117 = arith.constant 1 : index
    %634 = vector.load %arg3[%c8_116, %c1_117] : memref<72x128xf32, #tpu.memory_space<vmem>>, vector<64x1xf32>
    %635 = vector.broadcast %634 : vector<64x1xf32> to vector<64x45xf32>
    %636 = arith.addf %633, %635 : vector<64x45xf32>
    %cst_118 = arith.constant 0.000000e+00 : f32
    %637 = vector.broadcast %cst_118 : f32 to vector<64x45xf32>
    %638 = arith.cmpf ogt, %636, %637 : vector<64x45xf32>
    %cst_119 = arith.constant 4.000000e-01 : f32
    %639 = vector.broadcast %cst_119 : f32 to vector<64x45xf32>
    %640 = arith.mulf %639, %636 : vector<64x45xf32>
    %641 = arith.select %638, %636, %640 : vector<64x45xi1>, vector<64x45xf32>
    %cst_120 = arith.constant 0.000000e+00 : f32
    %642 = vector.broadcast %cst_120 : f32 to vector<64x45xf32>
    %643 = vector.extract_strided_slice %605 {offsets = [0, 0], sizes = [64, 1], strides = [1, 1]} : vector<192x1xf32> to vector<64x1xf32>
    %644 = vector.broadcast %643 : vector<64x1xf32> to vector<64x45xf32>
    %645 = arith.addf %641, %644 : vector<64x45xf32>
    %c1_i32 = arith.constant 1 : i32
    %646 = tpu.dynamic_rotate %645 by %c1_i32 dim 1 : vector<64x45xf32>, i32 -> vector<64x45xf32>
    %c1_i32_121 = arith.constant 1 : i32
    %647 = vector.broadcast %c1_i32_121 : i32 to vector<1x45xi32>
    %648 = arith.cmpi sge, %628, %647 : vector<1x45xi32>
    %cst_122 = arith.constant 0.000000e+00 : f32
    %649 = vector.shape_cast %648 : vector<1x45xi1> to vector<1x45xi1>
    %650 = vector.broadcast %649 : vector<1x45xi1> to vector<64x45xi1>
    %651 = vector.broadcast %cst_122 : f32 to vector<64x45xf32>
    %652 = arith.select %650, %646, %651 : vector<64x45xi1>, vector<64x45xf32>
    %c44_i32 = arith.constant 44 : i32
    %653 = tpu.dynamic_rotate %645 by %c44_i32 dim 1 : vector<64x45xf32>, i32 -> vector<64x45xf32>
    %c44_i32_123 = arith.constant 44 : i32
    %654 = vector.broadcast %c44_i32_123 : i32 to vector<1x45xi32>
    %655 = arith.cmpi slt, %628, %654 : vector<1x45xi32>
    %cst_124 = arith.constant 0.000000e+00 : f32
    %656 = vector.shape_cast %655 : vector<1x45xi1> to vector<1x45xi1>
    %657 = vector.broadcast %656 : vector<1x45xi1> to vector<64x45xi1>
    %658 = vector.broadcast %cst_124 : f32 to vector<64x45xf32>
    %659 = arith.select %657, %653, %658 : vector<64x45xi1>, vector<64x45xf32>
    %660 = tpu.concatenate %652, %645, %659, %627, %629 in 0 : vector<64x45xf32>, vector<64x45xf32>, vector<64x45xf32>, vector<16x45xf32>, vector<1x45xf32> -> vector<209x45xf32>
    %661 = arith.truncf %660 : vector<209x45xf32> to vector<209x45xbf16>
    %c304 = arith.constant 304 : index
    %c0_125 = arith.constant 0 : index
    %662 = vector.load %arg2[%c304, %c0_125] : memref<1152x256xbf16, #tpu.memory_space<vmem>>, vector<128x209xbf16>
    %cst_126 = arith.constant dense<0.000000e+00> : vector<128x45xf32>
    %663 = tpu.matmul %662, %661, %cst_126 {dimension_numbers = #tpu.dot_dimension_numbers<[1], [0], [0], [1], [0, 0, 1, 1], [], []>} : vector<128x209xbf16>, vector<209x45xbf16>, vector<128x45xf32> -> vector<128x45xf32>
    %664 = vector.extract_strided_slice %663 {offsets = [0, 0], sizes = [64, 45], strides = [1, 1]} : vector<128x45xf32> to vector<64x45xf32>
    %665 = arith.negf %664 : vector<64x45xf32>
    %666 = math.exp %665 : vector<64x45xf32>
    %cst_127 = arith.constant 1.000000e+00 : f32
    %667 = vector.broadcast %cst_127 : f32 to vector<64x45xf32>
    %668 = arith.addf %667, %666 : vector<64x45xf32>
    %669 = arith.divf %667, %668 : vector<64x45xf32>
    %670 = vector.extract_strided_slice %663 {offsets = [64, 0], sizes = [64, 45], strides = [1, 1]} : vector<128x45xf32> to vector<64x45xf32>
    %671 = math.tanh %670 : vector<64x45xf32>
    %672 = arith.mulf %669, %671 : vector<64x45xf32>
    %673 = tpu.concatenate %672, %629 in 0 : vector<64x45xf32>, vector<1x45xf32> -> vector<65x45xf32>
    %674 = arith.truncf %673 : vector<65x45xf32> to vector<65x45xbf16>
    %c688 = arith.constant 688 : index
    %c0_128 = arith.constant 0 : index
    %675 = vector.load %arg2[%c688, %c0_128] : memref<1152x256xbf16, #tpu.memory_space<vmem>>, vector<128x65xbf16>
    %cst_129 = arith.constant dense<0.000000e+00> : vector<128x45xf32>
    %676 = tpu.matmul %675, %674, %cst_129 {dimension_numbers = #tpu.dot_dimension_numbers<[1], [0], [0], [1], [0, 0, 1, 1], [], []>} : vector<128x65xbf16>, vector<65x45xbf16>, vector<128x45xf32> -> vector<128x45xf32>
    %cst_130 = arith.constant 0.000000e+00 : f32
    %677 = vector.broadcast %cst_130 : f32 to vector<128x45xf32>
    %678 = arith.cmpf ogt, %676, %677 : vector<128x45xf32>
    %cst_131 = arith.constant 4.000000e-01 : f32
    %679 = vector.broadcast %cst_131 : f32 to vector<128x45xf32>
    %680 = arith.mulf %679, %676 : vector<128x45xf32>
    %681 = arith.select %678, %676, %680 : vector<128x45xi1>, vector<128x45xf32>
    %682 = vector.extract_strided_slice %681 {offsets = [0, 0], sizes = [64, 45], strides = [1, 1]} : vector<128x45xf32> to vector<64x45xf32>
    %683 = arith.addf %641, %682 : vector<64x45xf32>
    %cst_132 = arith.constant 0.707106769 : f32
    %684 = vector.broadcast %cst_132 : f32 to vector<64x45xf32>
    %685 = arith.mulf %683, %684 : vector<64x45xf32>
    %686 = vector.extract_strided_slice %681 {offsets = [64, 0], sizes = [64, 45], strides = [1, 1]} : vector<128x45xf32> to vector<64x45xf32>
    %687 = arith.addf %642, %686 : vector<64x45xf32>
    %688 = vector.extract_strided_slice %605 {offsets = [64, 0], sizes = [64, 1], strides = [1, 1]} : vector<192x1xf32> to vector<64x1xf32>
    %689 = vector.broadcast %688 : vector<64x1xf32> to vector<64x45xf32>
    %690 = arith.addf %685, %689 : vector<64x45xf32>
    %c2_i32 = arith.constant 2 : i32
    %691 = tpu.dynamic_rotate %690 by %c2_i32 dim 1 : vector<64x45xf32>, i32 -> vector<64x45xf32>
    %c2_i32_133 = arith.constant 2 : i32
    %692 = vector.broadcast %c2_i32_133 : i32 to vector<1x45xi32>
    %693 = arith.cmpi sge, %628, %692 : vector<1x45xi32>
    %cst_134 = arith.constant 0.000000e+00 : f32
    %694 = vector.shape_cast %693 : vector<1x45xi1> to vector<1x45xi1>
    %695 = vector.broadcast %694 : vector<1x45xi1> to vector<64x45xi1>
    %696 = vector.broadcast %cst_134 : f32 to vector<64x45xf32>
    %697 = arith.select %695, %691, %696 : vector<64x45xi1>, vector<64x45xf32>
    %c43_i32 = arith.constant 43 : i32
    %698 = tpu.dynamic_rotate %690 by %c43_i32 dim 1 : vector<64x45xf32>, i32 -> vector<64x45xf32>
    %c43_i32_135 = arith.constant 43 : i32
    %699 = vector.broadcast %c43_i32_135 : i32 to vector<1x45xi32>
    %700 = arith.cmpi slt, %628, %699 : vector<1x45xi32>
    %cst_136 = arith.constant 0.000000e+00 : f32
    %701 = vector.shape_cast %700 : vector<1x45xi1> to vector<1x45xi1>
    %702 = vector.broadcast %701 : vector<1x45xi1> to vector<64x45xi1>
    %703 = vector.broadcast %cst_136 : f32 to vector<64x45xf32>
    %704 = arith.select %702, %698, %703 : vector<64x45xi1>, vector<64x45xf32>
    %705 = tpu.concatenate %697, %690, %704, %627, %629 in 0 : vector<64x45xf32>, vector<64x45xf32>, vector<64x45xf32>, vector<16x45xf32>, vector<1x45xf32> -> vector<209x45xf32>
    %706 = arith.truncf %705 : vector<209x45xf32> to vector<209x45xbf16>
    %c432 = arith.constant 432 : index
    %c0_137 = arith.constant 0 : index
    %707 = vector.load %arg2[%c432, %c0_137] : memref<1152x256xbf16, #tpu.memory_space<vmem>>, vector<128x209xbf16>
    %cst_138 = arith.constant dense<0.000000e+00> : vector<128x45xf32>
    %708 = tpu.matmul %707, %706, %cst_138 {dimension_numbers = #tpu.dot_dimension_numbers<[1], [0], [0], [1], [0, 0, 1, 1], [], []>} : vector<128x209xbf16>, vector<209x45xbf16>, vector<128x45xf32> -> vector<128x45xf32>
    %709 = vector.extract_strided_slice %708 {offsets = [0, 0], sizes = [64, 45], strides = [1, 1]} : vector<128x45xf32> to vector<64x45xf32>
    %710 = arith.negf %709 : vector<64x45xf32>
    %711 = math.exp %710 : vector<64x45xf32>
    %cst_139 = arith.constant 1.000000e+00 : f32
    %712 = vector.broadcast %cst_139 : f32 to vector<64x45xf32>
    %713 = arith.addf %712, %711 : vector<64x45xf32>
    %714 = arith.divf %712, %713 : vector<64x45xf32>
    %715 = vector.extract_strided_slice %708 {offsets = [64, 0], sizes = [64, 45], strides = [1, 1]} : vector<128x45xf32> to vector<64x45xf32>
    %716 = math.tanh %715 : vector<64x45xf32>
    %717 = arith.mulf %714, %716 : vector<64x45xf32>
    %718 = tpu.concatenate %717, %629 in 0 : vector<64x45xf32>, vector<1x45xf32> -> vector<65x45xf32>
    %719 = arith.truncf %718 : vector<65x45xf32> to vector<65x45xbf16>
    %c816 = arith.constant 816 : index
    %c0_140 = arith.constant 0 : index
    %720 = vector.load %arg2[%c816, %c0_140] : memref<1152x256xbf16, #tpu.memory_space<vmem>>, vector<128x65xbf16>
    %cst_141 = arith.constant dense<0.000000e+00> : vector<128x45xf32>
    %721 = tpu.matmul %720, %719, %cst_141 {dimension_numbers = #tpu.dot_dimension_numbers<[1], [0], [0], [1], [0, 0, 1, 1], [], []>} : vector<128x65xbf16>, vector<65x45xbf16>, vector<128x45xf32> -> vector<128x45xf32>
    %cst_142 = arith.constant 0.000000e+00 : f32
    %722 = vector.broadcast %cst_142 : f32 to vector<128x45xf32>
    %723 = arith.cmpf ogt, %721, %722 : vector<128x45xf32>
    %cst_143 = arith.constant 4.000000e-01 : f32
    %724 = vector.broadcast %cst_143 : f32 to vector<128x45xf32>
    %725 = arith.mulf %724, %721 : vector<128x45xf32>
    %726 = arith.select %723, %721, %725 : vector<128x45xi1>, vector<128x45xf32>
    %727 = vector.extract_strided_slice %726 {offsets = [0, 0], sizes = [64, 45], strides = [1, 1]} : vector<128x45xf32> to vector<64x45xf32>
    %728 = arith.addf %685, %727 : vector<64x45xf32>
    %cst_144 = arith.constant 0.707106769 : f32
    %729 = vector.broadcast %cst_144 : f32 to vector<64x45xf32>
    %730 = arith.mulf %728, %729 : vector<64x45xf32>
    %731 = vector.extract_strided_slice %726 {offsets = [64, 0], sizes = [64, 45], strides = [1, 1]} : vector<128x45xf32> to vector<64x45xf32>
    %732 = arith.addf %687, %731 : vector<64x45xf32>
    %733 = vector.extract_strided_slice %605 {offsets = [128, 0], sizes = [64, 1], strides = [1, 1]} : vector<192x1xf32> to vector<64x1xf32>
    %734 = vector.broadcast %733 : vector<64x1xf32> to vector<64x45xf32>
    %735 = arith.addf %730, %734 : vector<64x45xf32>
    %c1_i32_145 = arith.constant 1 : i32
    %736 = tpu.dynamic_rotate %735 by %c1_i32_145 dim 1 : vector<64x45xf32>, i32 -> vector<64x45xf32>
    %c1_i32_146 = arith.constant 1 : i32
    %737 = vector.broadcast %c1_i32_146 : i32 to vector<1x45xi32>
    %738 = arith.cmpi sge, %628, %737 : vector<1x45xi32>
    %cst_147 = arith.constant 0.000000e+00 : f32
    %739 = vector.shape_cast %738 : vector<1x45xi1> to vector<1x45xi1>
    %740 = vector.broadcast %739 : vector<1x45xi1> to vector<64x45xi1>
    %741 = vector.broadcast %cst_147 : f32 to vector<64x45xf32>
    %742 = arith.select %740, %736, %741 : vector<64x45xi1>, vector<64x45xf32>
    %c44_i32_148 = arith.constant 44 : i32
    %743 = tpu.dynamic_rotate %735 by %c44_i32_148 dim 1 : vector<64x45xf32>, i32 -> vector<64x45xf32>
    %c44_i32_149 = arith.constant 44 : i32
    %744 = vector.broadcast %c44_i32_149 : i32 to vector<1x45xi32>
    %745 = arith.cmpi slt, %628, %744 : vector<1x45xi32>
    %cst_150 = arith.constant 0.000000e+00 : f32
    %746 = vector.shape_cast %745 : vector<1x45xi1> to vector<1x45xi1>
    %747 = vector.broadcast %746 : vector<1x45xi1> to vector<64x45xi1>
    %748 = vector.broadcast %cst_150 : f32 to vector<64x45xf32>
    %749 = arith.select %747, %743, %748 : vector<64x45xi1>, vector<64x45xf32>
    %750 = tpu.concatenate %742, %735, %749, %627, %629 in 0 : vector<64x45xf32>, vector<64x45xf32>, vector<64x45xf32>, vector<16x45xf32>, vector<1x45xf32> -> vector<209x45xf32>
    %751 = arith.truncf %750 : vector<209x45xf32> to vector<209x45xbf16>
    %c560 = arith.constant 560 : index
    %c0_151 = arith.constant 0 : index
    %752 = vector.load %arg2[%c560, %c0_151] : memref<1152x256xbf16, #tpu.memory_space<vmem>>, vector<128x209xbf16>
    %cst_152 = arith.constant dense<0.000000e+00> : vector<128x45xf32>
    %753 = tpu.matmul %752, %751, %cst_152 {dimension_numbers = #tpu.dot_dimension_numbers<[1], [0], [0], [1], [0, 0, 1, 1], [], []>} : vector<128x209xbf16>, vector<209x45xbf16>, vector<128x45xf32> -> vector<128x45xf32>
    %754 = vector.extract_strided_slice %753 {offsets = [0, 0], sizes = [64, 45], strides = [1, 1]} : vector<128x45xf32> to vector<64x45xf32>
    %755 = arith.negf %754 : vector<64x45xf32>
    %756 = math.exp %755 : vector<64x45xf32>
    %cst_153 = arith.constant 1.000000e+00 : f32
    %757 = vector.broadcast %cst_153 : f32 to vector<64x45xf32>
    %758 = arith.addf %757, %756 : vector<64x45xf32>
    %759 = arith.divf %757, %758 : vector<64x45xf32>
    %760 = vector.extract_strided_slice %753 {offsets = [64, 0], sizes = [64, 45], strides = [1, 1]} : vector<128x45xf32> to vector<64x45xf32>
    %761 = math.tanh %760 : vector<64x45xf32>
    %762 = arith.mulf %759, %761 : vector<64x45xf32>
    %763 = tpu.concatenate %762, %629 in 0 : vector<64x45xf32>, vector<1x45xf32> -> vector<65x45xf32>
    %764 = arith.truncf %763 : vector<65x45xf32> to vector<65x45xbf16>
    %c944 = arith.constant 944 : index
    %c0_154 = arith.constant 0 : index
    %765 = vector.load %arg2[%c944, %c0_154] : memref<1152x256xbf16, #tpu.memory_space<vmem>>, vector<128x65xbf16>
    %cst_155 = arith.constant dense<0.000000e+00> : vector<128x45xf32>
    %766 = tpu.matmul %765, %764, %cst_155 {dimension_numbers = #tpu.dot_dimension_numbers<[1], [0], [0], [1], [0, 0, 1, 1], [], []>} : vector<128x65xbf16>, vector<65x45xbf16>, vector<128x45xf32> -> vector<128x45xf32>
    %cst_156 = arith.constant 0.000000e+00 : f32
    %767 = vector.broadcast %cst_156 : f32 to vector<128x45xf32>
    %768 = arith.cmpf ogt, %766, %767 : vector<128x45xf32>
    %cst_157 = arith.constant 4.000000e-01 : f32
    %769 = vector.broadcast %cst_157 : f32 to vector<128x45xf32>
    %770 = arith.mulf %769, %766 : vector<128x45xf32>
    %771 = arith.select %768, %766, %770 : vector<128x45xi1>, vector<128x45xf32>
    %772 = vector.extract_strided_slice %771 {offsets = [64, 0], sizes = [64, 45], strides = [1, 1]} : vector<128x45xf32> to vector<64x45xf32>
    %773 = arith.addf %732, %772 : vector<64x45xf32>
    %cst_158 = arith.constant 0.577350259 : f32
    %774 = vector.broadcast %cst_158 : f32 to vector<64x45xf32>
    %775 = arith.mulf %773, %774 : vector<64x45xf32>
    %c1_i32_159 = arith.constant 1 : i32
    %776 = tpu.dynamic_rotate %775 by %c1_i32_159 dim 1 : vector<64x45xf32>, i32 -> vector<64x45xf32>
    %c1_i32_160 = arith.constant 1 : i32
    %777 = vector.broadcast %c1_i32_160 : i32 to vector<1x45xi32>
    %778 = arith.cmpi sge, %628, %777 : vector<1x45xi32>
    %cst_161 = arith.constant 0.000000e+00 : f32
    %779 = vector.shape_cast %778 : vector<1x45xi1> to vector<1x45xi1>
    %780 = vector.broadcast %779 : vector<1x45xi1> to vector<64x45xi1>
    %781 = vector.broadcast %cst_161 : f32 to vector<64x45xf32>
    %782 = arith.select %780, %776, %781 : vector<64x45xi1>, vector<64x45xf32>
    %c44_i32_162 = arith.constant 44 : i32
    %783 = tpu.dynamic_rotate %775 by %c44_i32_162 dim 1 : vector<64x45xf32>, i32 -> vector<64x45xf32>
    %c44_i32_163 = arith.constant 44 : i32
    %784 = vector.broadcast %c44_i32_163 : i32 to vector<1x45xi32>
    %785 = arith.cmpi slt, %628, %784 : vector<1x45xi32>
    %cst_164 = arith.constant 0.000000e+00 : f32
    %786 = vector.shape_cast %785 : vector<1x45xi1> to vector<1x45xi1>
    %787 = vector.broadcast %786 : vector<1x45xi1> to vector<64x45xi1>
    %788 = vector.broadcast %cst_164 : f32 to vector<64x45xf32>
    %789 = arith.select %787, %783, %788 : vector<64x45xi1>, vector<64x45xf32>
    %790 = tpu.concatenate %782, %775, %789, %629 in 0 : vector<64x45xf32>, vector<64x45xf32>, vector<64x45xf32>, vector<1x45xf32> -> vector<193x45xf32>
    %791 = arith.truncf %790 : vector<193x45xf32> to vector<193x45xbf16>
    %c1072 = arith.constant 1072 : index
    %c0_165 = arith.constant 0 : index
    %792 = vector.load %arg2[%c1072, %c0_165] : memref<1152x256xbf16, #tpu.memory_space<vmem>>, vector<64x193xbf16>
    %cst_166 = arith.constant dense<0.000000e+00> : vector<64x45xf32>
    %793 = tpu.matmul %792, %791, %cst_166 {dimension_numbers = #tpu.dot_dimension_numbers<[1], [0], [0], [1], [0, 0, 1, 1], [], []>} : vector<64x193xbf16>, vector<193x45xbf16>, vector<64x45xf32> -> vector<64x45xf32>
    %cst_167 = arith.constant 0.000000e+00 : f32
    %794 = vector.broadcast %cst_167 : f32 to vector<64x45xf32>
    %795 = arith.cmpf ogt, %793, %794 : vector<64x45xf32>
    %cst_168 = arith.constant 4.000000e-01 : f32
    %796 = vector.broadcast %cst_168 : f32 to vector<64x45xf32>
    %797 = arith.mulf %796, %793 : vector<64x45xf32>
    %798 = arith.select %795, %793, %797 : vector<64x45xi1>, vector<64x45xf32>
    %c1_i32_169 = arith.constant 1 : i32
    %799 = tpu.dynamic_rotate %798 by %c1_i32_169 dim 1 : vector<64x45xf32>, i32 -> vector<64x45xf32>
    %c1_i32_170 = arith.constant 1 : i32
    %800 = vector.broadcast %c1_i32_170 : i32 to vector<1x45xi32>
    %801 = arith.cmpi sge, %628, %800 : vector<1x45xi32>
    %cst_171 = arith.constant 0.000000e+00 : f32
    %802 = vector.shape_cast %801 : vector<1x45xi1> to vector<1x45xi1>
    %803 = vector.broadcast %802 : vector<1x45xi1> to vector<64x45xi1>
    %804 = vector.broadcast %cst_171 : f32 to vector<64x45xf32>
    %805 = arith.select %803, %799, %804 : vector<64x45xi1>, vector<64x45xf32>
    %c44_i32_172 = arith.constant 44 : i32
    %806 = tpu.dynamic_rotate %798 by %c44_i32_172 dim 1 : vector<64x45xf32>, i32 -> vector<64x45xf32>
    %c44_i32_173 = arith.constant 44 : i32
    %807 = vector.broadcast %c44_i32_173 : i32 to vector<1x45xi32>
    %808 = arith.cmpi slt, %628, %807 : vector<1x45xi32>
    %cst_174 = arith.constant 0.000000e+00 : f32
    %809 = vector.shape_cast %808 : vector<1x45xi1> to vector<1x45xi1>
    %810 = vector.broadcast %809 : vector<1x45xi1> to vector<64x45xi1>
    %811 = vector.broadcast %cst_174 : f32 to vector<64x45xf32>
    %812 = arith.select %810, %806, %811 : vector<64x45xi1>, vector<64x45xf32>
    %813 = tpu.concatenate %805, %798, %812, %629 in 0 : vector<64x45xf32>, vector<64x45xf32>, vector<64x45xf32>, vector<1x45xf32> -> vector<193x45xf32>
    %814 = arith.truncf %813 : vector<193x45xf32> to vector<193x45xbf16>
    %c1136 = arith.constant 1136 : index
    %c0_175 = arith.constant 0 : index
    %815 = vector.load %arg2[%c1136, %c0_175] : memref<1152x256xbf16, #tpu.memory_space<vmem>>, vector<16x193xbf16>
    %cst_176 = arith.constant dense<0.000000e+00> : vector<16x45xf32>
    %816 = tpu.matmul %815, %814, %cst_176 {dimension_numbers = #tpu.dot_dimension_numbers<[1], [0], [0], [1], [0, 0, 1, 1], [], []>} : vector<16x193xbf16>, vector<193x45xbf16>, vector<16x45xf32> -> vector<16x45xf32>
    %817 = arith.subf %816, %559 : vector<16x45xf32>
    %818 = arith.mulf %817, %817 : vector<16x45xf32>
    %c0_177 = arith.constant 0 : index
    %c0_178 = arith.constant 0 : index
    %819 = vector.load %arg4[%c0_177, %c0_178] : memref<16x45xf32, #tpu.memory_space<vmem>>, vector<16x45xf32>
    tpu.vector_store %arg4[%c0_177, %c0_178], %818 {strides = array<i32>} : memref<16x45xf32, #tpu.memory_space<vmem>>, vector<16x45xf32>,
    return
  }
}

</mosaic_0001>

<bundles_post_ra>
// kernel: time_grad_forward.1
= control target key start
LH: loop header
LB: loop body
LE: loop exit
PB: predicated region body
PF: predicated region fallthrough
CT: control target
= control target key end

     0   :  { %9 = vsyncpa [#allocation3], 0  ;;  %s6213_s18 = smov [#allocation2]   ;;  %s6214_s20 = smov 128   ;;  %s7944_s0 = inlined_call_operand.vmem [shape: f32[8,2,96], index: 0, kind: input, shape index: {}]   ;;  %s7945_s1 = inlined_call_operand.vmem [shape: f32[16,384], index: 1, kind: input, shape index: {}]   ;;  %s7946_s2 = inlined_call_operand.hbm [shape: bf16[1152,256], index: 2, kind: input, shape index: {}]   ;;  %s7947_s3 = inlined_call_operand.vmem [shape: f32[72,128], index: 3, kind: input, shape index: {}]   ;;  %s7948_s4 = inlined_call_operand.vmem [shape: f32[16,45], index: 4, kind: output, shape index: {}]  }
   0x1   :  { %s18_s17 = sshll.u32 %s7946_s2, 4  ;;  %s20_s19 = sshll.u32 %s6213_s18, 4  ;;  %s19_s17 = int_to_ptr.hbm [resolvable:$true] %s18_s17  ;;  %s21_s19 = int_to_ptr.vmem [resolvable:$true] %s20_s19 }
   0x2   :  { %s6215_s21 = smov 8  }
   0x3   :  { %26 = dma.hbm_to_vmem [thread:$0]  %s19_s17, 18432, %s21_s19, [#allocation3], %s6214_s20, %s6214_s20, %s6215_s21  }
   0x4   :  { %6211 = dma.done.wait [#allocation3], 18432  }
   0x5   :  { %6212 = vsyncadd [#allocation3], 4294948864  ;;  %v6216_v0 = vmov 0   ;;  %v4698_v1 = vld [vmem:[#allocation2 + $0x10] sm:$0xf]  ;;  %s6217_s23 = smov 64  }
   0x6   :  { %5479 = vset.pattern.permute.xlu1 %v6216_v0  ;;  %5480 = vset.pattern.permute.xlu2 %v6216_v0  ;;  %v5354_v2 = vld [vmem:[#allocation2 + $0x14] sm:$0xf0]  ;;  %v4690_v3 = vld [vmem:[#allocation2] sm:$0xf]  ;;  %v5352_v5 = vld [vmem:[#allocation2 + $0x4] sm:$0xf0] }
   0x7   :  { %v6265_v4 = vor.u32 %v5354_v2, %v4698_v1  ;;  %v5893_v6 = vld [vmem:[%s7947_s3 + $0x1] ss:$0 sm:$0xff]  ;;  %v6271_v7 = vor.u32 %v5352_v5, %v4690_v3  ;;  %s6218_s24 = smov 32   ;;  %v5353_v30 = vld [vmem:[#allocation2 + $0x14] sm:$0xf]  ;;  %s6219_s27 = smov 96  }
   0x8   :  { %118 = vrot.lane.b32.xlu0 %v5893_v6, %s6217_s23  ;;  %v95_v13 = vld [vmem:[%s7944_s0] sm:$0x3]  ;;  %v4700_v31 = vld [vmem:[#allocation2 + $0x18] sm:$0xf0]  ;;  %v5351_v32 = vld [vmem:[#allocation2 + $0x4] sm:$0xf] }
   0x9   :  { %75 = vmatpush.bf16.msra.mxu1 %v6265_v4  ;;  %268 = vmatpush.bf16.msra.mxu3 %v6265_v4  ;;  %v6287_v33 = vor.u32 %v5353_v30, %v4700_v31  ;;  %v4692_v34 = vld [vmem:[#allocation2 + $0x8] sm:$0xf0]  ;;  %v4711_v39 = vld [vmem:[#allocation2 + $0x30] sm:$0xf]  ;;  %v5356_v40 = vld [vmem:[#allocation2 + $0x34] sm:$0xf0] }
   0xa   :  { %v6290_v35 = vor.u32 %v5351_v32, %v4692_v34  ;;  %v4707_v41 = vld [vmem:[#allocation2 + $0x20] sm:$0xf]  ;;  %v6299_v42 = vor.u32 %v5356_v40, %v4711_v39  ;;  %v5355_v43 = vld [vmem:[#allocation2 + $0x24] sm:$0xf0]  ;;  %vm65_vm4 = vcmask 261120   ;;  %vm253_vm13 = vcmask 1041408  }
   0xb   :  { %281 = vmatpush.bf16.msra.mxu0 %v6287_v33  ;;  %v6302_v44 = vor.u32 %v5355_v43, %v4707_v41  ;;  %v5894_v51 = vld [vmem:[%s7947_s3 + $0x2] ss:$0 sm:$0xff]  ;;  %v6333_v59 = vld [vmem:[%s7947_s3] ss:$0 sm:$0xff]  ;;  %s6220_s25 = smov 125   ;;  %s6221_s26 = smov 126  }
   0xc   :  { %167 = vmatpush.bf16.msra.mxu2 %v6299_v42  ;;  %s6223_s5 = smov 127   ;;  %s6224_s21 = smov 45  }
   0xd   :  { %76 = vmatpush.bf16.msra.mxu1 %v6271_v7  ;;  %269 = vmatpush.bf16.msra.mxu3 %v6271_v7  ;;  %s6227_s28 = smov 122   ;;  %s6228_s29 = smov 123  }
   0xe   :  { %s6230_s30 = smov 85   ;;  %s6231_s6 = smov 117  }
   0xf   :  { %282 = vmatpush.bf16.msra.mxu0 %v6290_v35  ;;  %s6232_s7 = smov 118   ;;  %s6233_s8 = smov 120  }
  0x10   :  { %77 = vmatmul.bf16.vlgmr.msra.gmra.mxu1 %v6216_v0  ;;  %168 = vmatpush.bf16.msra.mxu2 %v6302_v44  ;;  %s6234_s9 = smov 119  }
  0x11   :  { %88 = vmatpush.bf16.msrb.mxu1 %v6287_v33  ;;  %454 = vmatpush.bf16.msrb.mxu3 %v6287_v33 }
  0x13   :  { %516 = vmatpush.bf16.msrb.mxu0 %v6299_v42 }
  0x14   :  { %441 = vmatpush.bf16.msrb.mxu2 %v6265_v4 }
  0x15   :  { %89 = vmatpush.bf16.msrb.mxu1 %v6290_v35  ;;  %455 = vmatpush.bf16.msrb.mxu3 %v6290_v35 }
  0x17   :  { %517 = vmatpush.bf16.msrb.mxu0 %v6302_v44 }
  0x18   :  { %442 = vmatpush.bf16.msrb.mxu2 %v6271_v7 }
  0x19   :  { %343 = vmatpush.bf16.msra.mxu1 %v6299_v42 }
  0x1d   :  { %344 = vmatpush.bf16.msra.mxu1 %v6302_v44 }
  0x20   :  { %90 = vmatmul.bf16.vlgmr.msrb.gmra.mxu1 %v6216_v0 }
  0x21   :  { %614 = vmatpush.bf16.msrb.mxu1 %v6265_v4 }
  0x25   :  { %615 = vmatpush.bf16.msrb.mxu1 %v6271_v7 }
  0x7a   :  { %v6278_v8 = vpop.permute.xlu0 %118 }
  0x8d   :  { %v78_v9 = vpop.f32.mrf.mxu1 }
  0x8e   :  { %v121_v10 = vadd.f32 %v6278_v8, %v78_v9  ;;  %v175_v12 = vrot.slane %v78_v9, 2  ;;  %v96_v14 = vadd.f32 %v95_v13, %v78_v9 }
  0x90   :  { %123 = vrot.lane.b32.xlu0 %v121_v10, %s6217_s23  ;;  %v4704_v15 = vmul.f32 -1.442695, %v96_v14 }
  0x92   :  { %5898 = vpow2.f32 %v4704_v15 }
  0x95   :  { %v80_v11 = vpop.f32.mrf.mxu1 }
  0x98   :  { %176 = vrot.lane.b32.xlu0 %v175_v12, %s6218_s24  ;;  %v5899_v16 = vpop.eup %5898 }
  0x99   :  { %v100_v17 = vadd.f32 1.0, %v5899_v16 }
  0x9b   :  { %5900 = vrcp.f32 %v100_v17  ;;  %v112_v23 = vand.u32 2147483648, %v100_v17  ;;  %vm106_vm1 = vweird.f32 %v100_v17  ;;  %v110_v24 = vand.u32 2147483647, %v100_v17 }
  0x9d   :  { %v113_v26 = vor.u32 1.1754944e-38, %v112_v23  ;;  %vm111_vm3 = vcmp.eq.f32.partialorder %v110_v24, 8.507059e+37  ;;  %v91_v52 = vpop.f32.mrf.mxu1 }
  0x9e   :  { %v200_v53 = vrot.slane %v91_v52, 2 }
  0xa0   :  { %201 = vrot.lane.b32.xlu0 %v200_v53, %s6218_s24 }
  0xa1   :  { %v5901_v18 = vpop.eup %5900 }
  0xa2   :  { %v102_v19 = vmul.f32 %v5901_v18, %v100_v17  ;;  %vm107_vm0 = vweird.f32 %v5901_v18 }
  0xa3   :  { %vm108_vm2 = vmor %vm106_vm1, %vm107_vm0 }
  0xa4   :  { %v103_v20 = vsub.f32 1.0, %v102_v19 }
  0xa5   :  { %v93_v54 = vpop.f32.mrf.mxu1 }
  0xa6   :  { %v104_v21 = vmul.f32 %v5901_v18, %v103_v20 }
  0xa8   :  { %v105_v22 = vadd.f32 %v5901_v18, %v104_v21 }
  0xaa   :  { %v109_v25 = vsel %vm108_vm2, %v5901_v18, %v105_v22 }
  0xab   :  { %v114_v28 = vsel %vm111_vm3, %v113_v26, %v109_v25 }
  0xac   :  { %v133_v45 = vsub.f32 1.0, %v114_v28  ;;  %v139_v48 = vmul.f32 0.0, %v114_v28 }
 0x102   :  { %v124_v27 = vpop.permute.xlu0 %123 }
 0x103   :  { %v126_v29 = vmul.f32 %v124_v27, %v114_v28 }
 0x105   :  { %128 = vrot.lane.b32.xlu1 %v126_v29, %s6217_s23 }
 0x10a   :  { %v177_v62 = vpop.permute.xlu0 %176 }
 0x112   :  { %v202_v23 = vpop.permute.xlu0 %201 }
 0x177   :  { %v129_v36 = vpop.permute.xlu1 %128 }
 0x178   :  { %v131_v37 = vadd.f32 %v129_v36, %v95_v13 }
 0x17a   :  { %5902 = vtanh.f32 %v131_v37 }
 0x180   :  { %v5903_v38 = vpop.eup %5902 }
 0x181   :  { %135 = vrot.lane.b32.xlu1 %v5903_v38, %s6219_s27 }
 0x1f3   :  { %v136_v46 = vpop.permute.xlu1 %135 }
 0x1f4   :  { %v138_v47 = vmul.f32 %v136_v46, %v133_v45 }
 0x1f6   :  { %v6313_v49 = vadd.f32 %v139_v48, %v138_v47 }
 0x1f8   :  { %v141_v50 = vpack.c.bf16 %v6313_v49, %v6313_v49 }
 0x1fa   :  { %144 = vrot.lane.b32.xlu2 %v141_v50, %s6219_s27 }
 0x202   :  { %226 = vrot.lane.b32.xlu2 %v5894_v51, %s6218_s24 }
 0x254   :  { %v145_v55 = vpop.permute.xlu2 %144 }
 0x255   :  { %4713 = vmatmul.msk.bf16.vlgmr.msra.gmra.mxu2 %vm65_vm4, %v145_v55 }
 0x256   :  { %627 = vmatpush.bf16.msra.mxu2 %v6287_v33 }
 0x25a   :  { %628 = vmatpush.bf16.msra.mxu2 %v6290_v35 }
 0x25c   :  { %v6326_v56 = vpop.permute.xlu2 %226 }
 0x25d   :  { %v229_v57 = vadd.f32 %v6326_v56, %v91_v52 }
 0x25f   :  { %v231_v58 = vrot.slane %v229_v57, 2  ;;  %v4718_v57 = vld [vmem:[%s7944_s0 + $0x2] sm:$0x3] }
 0x261   :  { %232 = vrot.lane.b32.xlu1 %v231_v58, %s6219_s27 }
 0x2d3   :  { %v233_v16 = vpop.permute.xlu1 %232 }
 0x2d8   :  { %v170_v60 = vpop.f32.mrf.mxu2 }
 0x2d9   :  { %v171_v61 = vadd.f32 %v6333_v59, %v170_v60 }
 0x2db   :  { %v179_v63 = vadd.f32 %v177_v62, %v171_v61  ;;  %v204_v24 = vadd.f32 %v202_v23, %v171_v61 }
 0x2dd   :  { %v4714_v1 = vmul.f32 -1.442695, %v179_v63  ;;  %v4715_v25 = vmul.f32 -1.442695, %v204_v24 }
 0x2df   :  { %5904 = vpow2.f32 %v4714_v1 }
 0x2e0   :  { %v172_v2 = vpop.f32.mrf.mxu2 }
 0x2e5   :  { %v5905_v3 = vpop.eup %5904 }
 0x2e6   :  { %v183_v5 = vadd.f32 1.0, %v5905_v3 }
 0x2e8   :  { %5906 = vrcp.f32 %v183_v5  ;;  %v195_v11 = vand.u32 2147483648, %v183_v5  ;;  %v193_v13 = vand.u32 2147483647, %v183_v5  ;;  %vm189_vm6 = vweird.f32 %v183_v5 }
 0x2ea   :  { %v196_v15 = vor.u32 1.1754944e-38, %v195_v11  ;;  %vm194_vm8 = vcmp.eq.f32.partialorder %v193_v13, 8.507059e+37 }
 0x2ee   :  { %v5907_v6 = vpop.eup %5906 }
 0x2ef   :  { %v185_v9 = vmul.f32 %v5907_v6, %v183_v5  ;;  %vm190_vm5 = vweird.f32 %v5907_v6 }
 0x2f0   :  { %vm191_vm7 = vmor %vm189_vm6, %vm190_vm5 }
 0x2f1   :  { %v186_v10 = vsub.f32 1.0, %v185_v9 }
 0x2f3   :  { %v187_v12 = vmul.f32 %v5907_v6, %v186_v10 }
 0x2f5   :  { %v188_v14 = vadd.f32 %v5907_v6, %v187_v12 }
 0x2f7   :  { %v192_v17 = vsel %vm191_vm7, %v5907_v6, %v188_v14 }
 0x2f8   :  { %v197_v18 = vsel %vm194_vm8, %v196_v15, %v192_v17 }
 0x2f9   :  { %v235_v19 = vmul.f32 %v233_v16, %v197_v18 }
 0x2fb   :  { %237 = vrot.lane.b32.xlu2 %v235_v19, %s6217_s23 }
 0x355   :  { %v238_v20 = vpop.permute.xlu2 %237 }
 0x356   :  { %v240_v21 = vadd.f32 %v238_v20, %v171_v61 }
 0x358   :  { %5908 = vtanh.f32 %v240_v21 }
 0x359   :  { %5910 = vpow2.f32 %v4715_v25 }
 0x35e   :  { %v5909_v22 = vpop.eup %5908 }
 0x35f   :  { %244 = vrot.lane.b32.xlu1 %v5909_v22, %s6219_s27  ;;  %v5911_v26 = vpop.eup %5910 }
 0x360   :  { %v208_v27 = vadd.f32 1.0, %v5911_v26 }
 0x362   :  { %5912 = vrcp.f32 %v208_v27  ;;  %v220_v34 = vand.u32 2147483648, %v208_v27  ;;  %vm214_vm10 = vweird.f32 %v208_v27  ;;  %v218_v36 = vand.u32 2147483647, %v208_v27 }
 0x364   :  { %v221_v38 = vor.u32 1.1754944e-38, %v220_v34  ;;  %vm219_vm12 = vcmp.eq.f32.partialorder %v218_v36, 8.507059e+37 }
 0x368   :  { %v5913_v28 = vpop.eup %5912 }
 0x369   :  { %v210_v29 = vmul.f32 %v5913_v28, %v208_v27  ;;  %vm215_vm9 = vweird.f32 %v5913_v28 }
 0x36a   :  { %vm216_vm11 = vmor %vm214_vm10, %vm215_vm9 }
 0x36b   :  { %v211_v30 = vsub.f32 1.0, %v210_v29 }
 0x36d   :  { %v212_v31 = vmul.f32 %v5913_v28, %v211_v30 }
 0x36f   :  { %v213_v32 = vadd.f32 %v5913_v28, %v212_v31 }
 0x371   :  { %v217_v37 = vsel %vm216_vm11, %v5913_v28, %v213_v32 }
 0x372   :  { %v222_v39 = vsel %vm219_vm12, %v221_v38, %v217_v37 }
 0x373   :  { %v242_v40 = vsub.f32 1.0, %v222_v39  ;;  %v248_v45 = vmul.f32 0.0, %v222_v39 }
 0x3d1   :  { %v245_v41 = vpop.permute.xlu1 %244 }
 0x3d2   :  { %v247_v43 = vmul.f32 %v245_v41, %v242_v40 }
 0x3d4   :  { %v6338_v46 = vadd.f32 %v248_v45, %v247_v43 }
 0x3d6   :  { %v251_v47 = vrot.slane %v6338_v46, 6 }
 0x3d8   :  { %v6343_v48 = vsel %vm253_vm13, %v6313_v49, %v251_v47 }
 0x3d9   :  { %v255_v50 = vpack.c.bf16 %v6343_v48, %v6343_v48 }
 0x3db   :  { %257 = vrot.lane.b32.xlu2 %v255_v50, %s6219_s27 }
 0x435   :  { %v258_v51 = vpop.permute.xlu2 %257 }
 0x436   :  { %4716 = vmatmul.msk.bf16.vlgmr.msra.gmra.mxu3 %vm65_vm4, %v258_v51  ;;  %4717 = vmatmul.msk.bf16.vlgmr.msra.gmra.mxu0 %vm65_vm4, %v258_v51 }
 0x437   :  { %689 = vmatpush.bf16.msra.mxu3 %v6299_v42  ;;  %787 = vmatpush.bf16.msra.mxu0 %v6265_v4 }
 0x43b   :  { %690 = vmatpush.bf16.msra.mxu3 %v6302_v44  ;;  %788 = vmatpush.bf16.msra.mxu0 %v6271_v7 }
 0x4b3   :  { %v284_v49 = vpop.f32.mrf.mxu0 }
 0x4b4   :  { %v376_v16 = vrot.slane %v284_v49, 2  ;;  %v400_v20 = vadd.f32 %v284_v49, %v6326_v56 }
 0x4b6   :  { %v402_v21 = vrot.slane %v400_v20, 2 }
 0x4b9   :  { %v271_v52 = vpop.f32.mrf.mxu3 }
 0x4ba   :  { %v310_v53 = vadd.f32 %v271_v52, %v6278_v8  ;;  %v290_v58 = vadd.f32 %v4718_v57, %v271_v52  ;;  %v351_v15 = vrot.slane %v271_v52, 2 }
 0x4bb   :  { %v286_v54 = vpop.f32.mrf.mxu0 }
 0x4bc   :  { %312 = vrot.lane.b32.xlu0 %v310_v53, %s6217_s23  ;;  %v4719_v60 = vmul.f32 -1.442695, %v290_v58 }
 0x4be   :  { %5914 = vpow2.f32 %v4719_v60 }
 0x4c1   :  { %v273_v55 = vpop.f32.mrf.mxu3 }
 0x4c4   :  { %v5915_v61 = vpop.eup %5914 }
 0x4c5   :  { %v294_v62 = vadd.f32 1.0, %v5915_v61 }
 0x4c7   :  { %5916 = vrcp.f32 %v294_v62  ;;  %v306_v6 = vand.u32 2147483648, %v294_v62  ;;  %vm300_vm15 = vweird.f32 %v294_v62  ;;  %v304_v9 = vand.u32 2147483647, %v294_v62 }
 0x4c9   :  { %v307_v11 = vor.u32 1.1754944e-38, %v306_v6  ;;  %vm305_vm1 = vcmp.eq.f32.partialorder %v304_v9, 8.507059e+37 }
 0x4cd   :  { %v5917_v63 = vpop.eup %5916 }
 0x4ce   :  { %v296_v1 = vmul.f32 %v5917_v63, %v294_v62  ;;  %vm301_vm14 = vweird.f32 %v5917_v63 }
 0x4cf   :  { %vm302_vm0 = vmor %vm300_vm15, %vm301_vm14 }
 0x4d0   :  { %v297_v2 = vsub.f32 1.0, %v296_v1 }
 0x4d2   :  { %v298_v3 = vmul.f32 %v5917_v63, %v297_v2 }
 0x4d4   :  { %v299_v5 = vadd.f32 %v5917_v63, %v298_v3 }
 0x4d6   :  { %v303_v10 = vsel %vm302_vm0, %v5917_v63, %v299_v5 }
 0x4d7   :  { %v308_v13 = vsel %vm305_vm1, %v307_v11, %v303_v10 }
 0x4d8   :  { %v322_v22 = vsub.f32 1.0, %v308_v13  ;;  %v328_v24 = vmul.f32 %v308_v13, %v6343_v48 }
 0x52e   :  { %v313_v12 = vpop.permute.xlu0 %312 }
 0x52f   :  { %v315_v14 = vmul.f32 %v313_v12, %v308_v13 }
 0x531   :  { %317 = vrot.lane.b32.xlu1 %v315_v14, %s6217_s23 }
 0x539   :  { %352 = vrot.lane.b32.xlu1 %v351_v15, %s6218_s24 }
 0x541   :  { %377 = vrot.lane.b32.xlu1 %v376_v16, %s6218_s24  ;;  %v420_v16 = vrot.slane %v6343_v48, 2 }
 0x5a3   :  { %v318_v17 = vpop.permute.xlu1 %317 }
 0x5a4   :  { %v320_v18 = vadd.f32 %v4718_v57, %v318_v17 }
 0x5a6   :  { %5918 = vtanh.f32 %v320_v18 }
 0x5ab   :  { %v353_v31 = vpop.permute.xlu1 %352 }
 0x5ac   :  { %v5919_v19 = vpop.eup %5918 }
 0x5ad   :  { %324 = vrot.lane.b32.xlu2 %v5919_v19, %s6219_s27 }
 0x5b3   :  { %v378_v60 = vpop.permute.xlu1 %377 }
 0x5b5   :  { %403 = vrot.lane.b32.xlu2 %v402_v21, %s6219_s27 }
 0x607   :  { %v325_v23 = vpop.permute.xlu2 %324 }
 0x608   :  { %v327_v25 = vmul.f32 %v325_v23, %v322_v22 }
 0x60a   :  { %v6366_v26 = vadd.f32 %v328_v24, %v327_v25 }
 0x60c   :  { %v330_v27 = vpack.c.bf16 %v6366_v26, %v6366_v26 }
 0x60e   :  { %332 = vrot.lane.b32.xlu0 %v330_v27, %s6219_s27 }
 0x60f   :  { %v404_v52 = vpop.permute.xlu2 %403 }
 0x680   :  { %v333_v28 = vpop.permute.xlu0 %332 }
 0x681   :  { %4720 = vmatmul.msk.bf16.vlgmr.msra.gmra.mxu1 %vm65_vm4, %v333_v28 }
 0x682   :  { %800 = vmatpush.bf16.msra.mxu1 %v6287_v33 }
 0x686   :  { %801 = vmatpush.bf16.msra.mxu1 %v6290_v35 }
 0x6fe   :  { %v346_v29 = vpop.f32.mrf.mxu1 }
 0x6ff   :  { %v347_v30 = vadd.f32 %v6333_v59, %v346_v29  ;;  %v4725_v29 = vld [vmem:[%s7944_s0 + $0x4] sm:$0x3] }
 0x701   :  { %v355_v32 = vadd.f32 %v353_v31, %v347_v30  ;;  %v380_v61 = vadd.f32 %v378_v60, %v347_v30 }
 0x703   :  { %v4721_v34 = vmul.f32 -1.442695, %v355_v32  ;;  %v4722_v62 = vmul.f32 -1.442695, %v380_v61 }
 0x705   :  { %5920 = vpow2.f32 %v4721_v34 }
 0x706   :  { %v348_v36 = vpop.f32.mrf.mxu1 }
 0x70b   :  { %v5921_v37 = vpop.eup %5920 }
 0x70c   :  { %v359_v38 = vadd.f32 1.0, %v5921_v37 }
 0x70e   :  { %5922 = vrcp.f32 %v359_v38  ;;  %v371_v43 = vand.u32 2147483648, %v359_v38  ;;  %v369_v47 = vand.u32 2147483647, %v359_v38  ;;  %vm365_vm3 = vweird.f32 %v359_v38 }
 0x710   :  { %v372_v51 = vor.u32 1.1754944e-38, %v371_v43  ;;  %vm370_vm6 = vcmp.eq.f32.partialorder %v369_v47, 8.507059e+37 }
 0x714   :  { %v5923_v39 = vpop.eup %5922 }
 0x715   :  { %v361_v40 = vmul.f32 %v5923_v39, %v359_v38  ;;  %vm366_vm2 = vweird.f32 %v5923_v39 }
 0x716   :  { %vm367_vm5 = vmor %vm365_vm3, %vm366_vm2 }
 0x717   :  { %v362_v41 = vsub.f32 1.0, %v361_v40 }
 0x719   :  { %v363_v45 = vmul.f32 %v5923_v39, %v362_v41 }
 0x71b   :  { %v364_v50 = vadd.f32 %v5923_v39, %v363_v45 }
 0x71d   :  { %v368_v49 = vsel %vm367_vm5, %v5923_v39, %v364_v50 }
 0x71e   :  { %v373_v53 = vsel %vm370_vm6, %v372_v51, %v368_v49 }
 0x71f   :  { %v406_v54 = vmul.f32 %v404_v52, %v373_v53 }
 0x721   :  { %408 = vrot.lane.b32.xlu0 %v406_v54, %s6217_s23 }
 0x793   :  { %v409_v55 = vpop.permute.xlu0 %408 }
 0x794   :  { %v411_v57 = vadd.f32 %v409_v55, %v347_v30 }
 0x796   :  { %5924 = vtanh.f32 %v411_v57 }
 0x797   :  { %5926 = vpow2.f32 %v4722_v62 }
 0x79c   :  { %v5925_v58 = vpop.eup %5924 }
 0x79d   :  { %415 = vrot.lane.b32.xlu2 %v5925_v58, %s6219_s27  ;;  %v5927_v63 = vpop.eup %5926 }
 0x79e   :  { %v384_v1 = vadd.f32 1.0, %v5927_v63 }
 0x7a0   :  { %5928 = vrcp.f32 %v384_v1  ;;  %v396_v10 = vand.u32 2147483648, %v384_v1  ;;  %vm390_vm8 = vweird.f32 %v384_v1  ;;  %v394_v11 = vand.u32 2147483647, %v384_v1 }
 0x7a2   :  { %v397_v13 = vor.u32 1.1754944e-38, %v396_v10  ;;  %vm395_vm10 = vcmp.eq.f32.partialorder %v394_v11, 8.507059e+37 }
 0x7a6   :  { %v5929_v2 = vpop.eup %5928 }
 0x7a7   :  { %v386_v3 = vmul.f32 %v5929_v2, %v384_v1  ;;  %vm391_vm7 = vweird.f32 %v5929_v2 }
 0x7a8   :  { %vm392_vm9 = vmor %vm390_vm8, %vm391_vm7 }
 0x7a9   :  { %v387_v5 = vsub.f32 1.0, %v386_v3 }
 0x7ab   :  { %v388_v6 = vmul.f32 %v5929_v2, %v387_v5 }
 0x7ad   :  { %v389_v9 = vadd.f32 %v5929_v2, %v388_v6 }
 0x7af   :  { %v393_v12 = vsel %vm392_vm9, %v5929_v2, %v389_v9  ;;  %vm1472_vm9 = vcmask 1043456  }
 0x7b0   :  { %v398_v14 = vsel %vm395_vm10, %v397_v13, %v393_v12 }
 0x7b1   :  { %v413_v15 = vsub.f32 1.0, %v398_v14  ;;  %v422_v18 = vmul.f32 %v420_v16, %v398_v14 }
 0x7f7   :  { %v416_v17 = vpop.permute.xlu2 %415 }
 0x7f8   :  { %v418_v19 = vmul.f32 %v416_v17, %v413_v15 }
 0x7fa   :  { %v6378_v20 = vadd.f32 %v422_v18, %v418_v19 }
 0x7fc   :  { %v425_v21 = vrot.slane %v6378_v20, 6 }
 0x7fe   :  { %v6385_v22 = vsel %vm253_vm13, %v6366_v26, %v425_v21 }
 0x7ff   :  { %v428_v23 = vpack.c.bf16 %v6385_v22, %v6385_v22 }
 0x801   :  { %430 = vrot.lane.b32.xlu0 %v428_v23, %s6219_s27 }
 0x873   :  { %v431_v24 = vpop.permute.xlu0 %430 }
 0x874   :  { %4723 = vmatmul.msk.bf16.vlgmr.msrb.gmra.mxu2 %vm65_vm4, %v431_v24  ;;  %4724 = vmatmul.msk.bf16.vlgmr.msrb.gmra.mxu3 %vm65_vm4, %v431_v24 }
 0x875   :  { %862 = vmatpush.bf16.msrb.mxu2 %v6299_v42  ;;  %960 = vmatpush.bf16.msrb.mxu3 %v6265_v4 }
 0x879   :  { %863 = vmatpush.bf16.msrb.mxu2 %v6302_v44  ;;  %961 = vmatpush.bf16.msrb.mxu3 %v6271_v7 }
 0x8f7   :  { %v444_v48 = vpop.f32.mrf.mxu2  ;;  %v457_v25 = vpop.f32.mrf.mxu3 }
 0x8f8   :  { %v483_v26 = vadd.f32 %v444_v48, %v6278_v8  ;;  %v463_v30 = vadd.f32 %v4725_v29, %v444_v48  ;;  %v524_v52 = vrot.slane %v444_v48, 2  ;;  %v549_v53 = vrot.slane %v457_v25, 2 }
 0x8f9   :  { %v573_v58 = vadd.f32 %v457_v25, %v6326_v56 }
 0x8fa   :  { %485 = vrot.lane.b32.xlu1 %v483_v26, %s6217_s23  ;;  %v4726_v31 = vmul.f32 -1.442695, %v463_v30 }
 0x8fb   :  { %v575_v60 = vrot.slane %v573_v58, 2 }
 0x8fc   :  { %5930 = vpow2.f32 %v4726_v31 }
 0x8ff   :  { %v446_v27 = vpop.f32.mrf.mxu2  ;;  %v459_v28 = vpop.f32.mrf.mxu3 }
 0x902   :  { %v5931_v32 = vpop.eup %5930 }
 0x903   :  { %v467_v34 = vadd.f32 1.0, %v5931_v32 }
 0x905   :  { %5932 = vrcp.f32 %v467_v34  ;;  %v479_v41 = vand.u32 2147483648, %v467_v34  ;;  %vm473_vm12 = vweird.f32 %v467_v34  ;;  %v477_v43 = vand.u32 2147483647, %v467_v34 }
 0x907   :  { %v480_v47 = vor.u32 1.1754944e-38, %v479_v41  ;;  %vm478_vm15 = vcmp.eq.f32.partialorder %v477_v43, 8.507059e+37 }
 0x90b   :  { %v5933_v36 = vpop.eup %5932 }
 0x90c   :  { %v469_v37 = vmul.f32 %v5933_v36, %v467_v34  ;;  %vm474_vm11 = vweird.f32 %v5933_v36 }
 0x90d   :  { %vm475_vm14 = vmor %vm473_vm12, %vm474_vm11 }
 0x90e   :  { %v470_v38 = vsub.f32 1.0, %v469_v37 }
 0x910   :  { %v471_v39 = vmul.f32 %v5933_v36, %v470_v38 }
 0x912   :  { %v472_v40 = vadd.f32 %v5933_v36, %v471_v39 }
 0x914   :  { %v476_v45 = vsel %vm475_vm14, %v5933_v36, %v472_v40 }
 0x915   :  { %v481_v51 = vsel %vm478_vm15, %v480_v47, %v476_v45 }
 0x916   :  { %v495_v61 = vsub.f32 1.0, %v481_v51  ;;  %v501_v63 = vmul.f32 %v481_v51, %v6385_v22 }
 0x96c   :  { %v486_v50 = vpop.permute.xlu1 %485 }
 0x96d   :  { %v488_v49 = vmul.f32 %v486_v50, %v481_v51 }
 0x96f   :  { %490 = vrot.lane.b32.xlu2 %v488_v49, %s6217_s23 }
 0x977   :  { %525 = vrot.lane.b32.xlu2 %v524_v52, %s6218_s24 }
 0x97f   :  { %550 = vrot.lane.b32.xlu2 %v549_v53, %s6218_s24 }
 0x9c9   :  { %v491_v54 = vpop.permute.xlu2 %490 }
 0x9ca   :  { %v493_v55 = vadd.f32 %v4725_v29, %v491_v54  ;;  %v593_v54 = vrot.slane %v6385_v22, 2 }
 0x9cc   :  { %5934 = vtanh.f32 %v493_v55 }
 0x9d1   :  { %v526_v10 = vpop.permute.xlu2 %525 }
 0x9d2   :  { %v5935_v57 = vpop.eup %5934 }
 0x9d3   :  { %497 = vrot.lane.b32.xlu0 %v5935_v57, %s6219_s27 }
 0x9d9   :  { %v551_v34 = vpop.permute.xlu2 %550 }
 0x9db   :  { %576 = vrot.lane.b32.xlu0 %v575_v60, %s6219_s27 }
 0xa45   :  { %v498_v62 = vpop.permute.xlu0 %497 }
 0xa46   :  { %v500_v1 = vmul.f32 %v498_v62, %v495_v61 }
 0xa48   :  { %v6408_v2 = vadd.f32 %v501_v63, %v500_v1  ;;  %v1471_v1 = vsel %vm253_vm13, %v6338_v46, %v425_v21 }
 0xa4a   :  { %v503_v3 = vpack.c.bf16 %v6408_v2, %v6408_v2 }
 0xa4c   :  { %505 = vrot.lane.b32.xlu1 %v503_v3, %s6219_s27 }
 0xa4d   :  { %v577_v27 = vpop.permute.xlu0 %576 }
 0xabe   :  { %v506_v5 = vpop.permute.xlu1 %505 }
 0xabf   :  { %4727 = vmatmul.msk.bf16.vlgmr.msrb.gmra.mxu0 %vm65_vm4, %v506_v5 }
 0xac0   :  { %973 = vmatpush.bf16.msrb.mxu0 %v6287_v33 }
 0xac4   :  { %974 = vmatpush.bf16.msrb.mxu0 %v6290_v35 }
 0xb3c   :  { %v519_v6 = vpop.f32.mrf.mxu0 }
 0xb3d   :  { %v520_v9 = vadd.f32 %v6333_v59, %v519_v6 }
 0xb3f   :  { %v528_v11 = vadd.f32 %v526_v10, %v520_v9  ;;  %v553_v36 = vadd.f32 %v551_v34, %v520_v9  ;;  %v4732_v10 = vld [vmem:[%s7944_s0 + $0x6] sm:$0x3] }
 0xb41   :  { %v4728_v12 = vmul.f32 -1.442695, %v528_v11  ;;  %v4729_v37 = vmul.f32 -1.442695, %v553_v36 }
 0xb43   :  { %5936 = vpow2.f32 %v4728_v12 }
 0xb44   :  { %v521_v13 = vpop.f32.mrf.mxu0 }
 0xb49   :  { %v5937_v14 = vpop.eup %5936 }
 0xb4a   :  { %v532_v15 = vadd.f32 1.0, %v5937_v14 }
 0xb4c   :  { %5938 = vrcp.f32 %v532_v15  ;;  %v544_v19 = vand.u32 2147483648, %v532_v15  ;;  %v542_v24 = vand.u32 2147483647, %v532_v15  ;;  %vm538_vm1 = vweird.f32 %v532_v15 }
 0xb4e   :  { %v545_v25 = vor.u32 1.1754944e-38, %v544_v19  ;;  %vm543_vm3 = vcmp.eq.f32.partialorder %v542_v24, 8.507059e+37 }
 0xb52   :  { %v5939_v16 = vpop.eup %5938 }
 0xb53   :  { %v534_v17 = vmul.f32 %v5939_v16, %v532_v15  ;;  %vm539_vm0 = vweird.f32 %v5939_v16 }
 0xb54   :  { %vm540_vm2 = vmor %vm538_vm1, %vm539_vm0 }
 0xb55   :  { %v535_v18 = vsub.f32 1.0, %v534_v17 }
 0xb57   :  { %v536_v23 = vmul.f32 %v5939_v16, %v535_v18 }
 0xb59   :  { %v537_v48 = vadd.f32 %v5939_v16, %v536_v23 }
 0xb5b   :  { %v541_v26 = vsel %vm540_vm2, %v5939_v16, %v537_v48 }
 0xb5c   :  { %v546_v28 = vsel %vm543_vm3, %v545_v25, %v541_v26 }
 0xb5d   :  { %v579_v29 = vmul.f32 %v577_v27, %v546_v28 }
 0xb5f   :  { %581 = vrot.lane.b32.xlu1 %v579_v29, %s6217_s23 }
 0xbd1   :  { %v582_v30 = vpop.permute.xlu1 %581 }
 0xbd2   :  { %v584_v31 = vadd.f32 %v582_v30, %v520_v9 }
 0xbd4   :  { %5940 = vtanh.f32 %v584_v31 }
 0xbd5   :  { %5942 = vpow2.f32 %v4729_v37 }
 0xbda   :  { %v5941_v32 = vpop.eup %5940 }
 0xbdb   :  { %588 = vrot.lane.b32.xlu0 %v5941_v32, %s6219_s27  ;;  %v5943_v38 = vpop.eup %5942 }
 0xbdc   :  { %v557_v39 = vadd.f32 1.0, %v5943_v38 }
 0xbde   :  { %5944 = vrcp.f32 %v557_v39  ;;  %v569_v50 = vand.u32 2147483648, %v557_v39  ;;  %vm563_vm6 = vweird.f32 %v557_v39  ;;  %v567_v51 = vand.u32 2147483647, %v557_v39 }
 0xbe0   :  { %v570_v52 = vor.u32 1.1754944e-38, %v569_v50  ;;  %vm568_vm8 = vcmp.eq.f32.partialorder %v567_v51, 8.507059e+37 }
 0xbe4   :  { %v5945_v40 = vpop.eup %5944 }
 0xbe5   :  { %v559_v41 = vmul.f32 %v5945_v40, %v557_v39  ;;  %vm564_vm5 = vweird.f32 %v5945_v40 }
 0xbe6   :  { %vm565_vm7 = vmor %vm563_vm6, %vm564_vm5 }
 0xbe7   :  { %v560_v43 = vsub.f32 1.0, %v559_v41 }
 0xbe9   :  { %v561_v45 = vmul.f32 %v5945_v40, %v560_v43 }
 0xbeb   :  { %v562_v47 = vadd.f32 %v5945_v40, %v561_v45 }
 0xbed   :  { %v566_v49 = vsel %vm565_vm7, %v5945_v40, %v562_v47 }
 0xbee   :  { %v571_v53 = vsel %vm568_vm8, %v570_v52, %v566_v49  ;;  %vm1474_vm8 = vcmask 1045504  }
 0xbef   :  { %v586_v55 = vsub.f32 1.0, %v571_v53  ;;  %v595_v60 = vmul.f32 %v593_v54, %v571_v53 }
 0xc4d   :  { %v589_v57 = vpop.permute.xlu0 %588 }
 0xc4e   :  { %v591_v58 = vmul.f32 %v589_v57, %v586_v55 }
 0xc50   :  { %v596_v61 = vadd.f32 %v595_v60, %v591_v58 }
 0xc52   :  { %v598_v62 = vrot.slane %v596_v61, 6  ;;  %v1462_v63 = vrot.slane %v596_v61, 4 }
 0xc54   :  { %v6426_v3 = vsel %vm253_vm13, %v6408_v2, %v598_v62  ;;  %v6429_v5 = vsel %vm1472_vm9, %v1471_v1, %v1462_v63 }
 0xc55   :  { %v601_v22 = vpack.c.bf16 %v6426_v3, %v6426_v3 }
 0xc57   :  { %603 = vrot.lane.b32.xlu1 %v601_v22, %s6219_s27 }
 0xcc9   :  { %v604_v6 = vpop.permute.xlu1 %603 }
 0xcca   :  { %4730 = vmatmul.msk.bf16.vlgmr.msrb.gmra.mxu1 %vm65_vm4, %v604_v6  ;;  %4731 = vmatmul.msk.bf16.vlgmr.msra.gmra.mxu2 %vm65_vm4, %v604_v6 }
 0xccb   :  { %1035 = vmatpush.bf16.msrb.mxu1 %v6299_v42  ;;  %1133 = vmatpush.bf16.msra.mxu2 %v6265_v4 }
 0xccf   :  { %1036 = vmatpush.bf16.msrb.mxu1 %v6302_v44  ;;  %1134 = vmatpush.bf16.msra.mxu2 %v6271_v7 }
 0xd47   :  { %v617_v46 = vpop.f32.mrf.mxu1 }
 0xd48   :  { %v656_v20 = vadd.f32 %v617_v46, %v6278_v8  ;;  %v636_v11 = vadd.f32 %v4732_v10, %v617_v46  ;;  %v697_v29 = vrot.slane %v617_v46, 2 }
 0xd4a   :  { %658 = vrot.lane.b32.xlu2 %v656_v20, %s6217_s23  ;;  %v4733_v12 = vmul.f32 -1.442695, %v636_v11 }
 0xd4c   :  { %5946 = vpow2.f32 %v4733_v12 }
 0xd4d   :  { %v630_v21 = vpop.f32.mrf.mxu2 }
 0xd4e   :  { %v722_v30 = vrot.slane %v630_v21, 2  ;;  %v746_v36 = vadd.f32 %v630_v21, %v6326_v56 }
 0xd4f   :  { %v619_v2 = vpop.f32.mrf.mxu1 }
 0xd50   :  { %v748_v37 = vrot.slane %v746_v36, 2 }
 0xd52   :  { %v5947_v13 = vpop.eup %5946 }
 0xd53   :  { %v640_v14 = vadd.f32 1.0, %v5947_v13 }
 0xd55   :  { %v632_v9 = vpop.f32.mrf.mxu2  ;;  %5948 = vrcp.f32 %v640_v14  ;;  %v652_v23 = vand.u32 2147483648, %v640_v14  ;;  %vm646_vm11 = vweird.f32 %v640_v14  ;;  %v650_v24 = vand.u32 2147483647, %v640_v14 }
 0xd57   :  { %v653_v25 = vor.u32 1.1754944e-38, %v652_v23  ;;  %vm651_vm14 = vcmp.eq.f32.partialorder %v650_v24, 8.507059e+37 }
 0xd5b   :  { %v5949_v15 = vpop.eup %5948 }
 0xd5c   :  { %v642_v16 = vmul.f32 %v5949_v15, %v640_v14  ;;  %vm647_vm10 = vweird.f32 %v5949_v15 }
 0xd5d   :  { %vm648_vm12 = vmor %vm646_vm11, %vm647_vm10 }
 0xd5e   :  { %v643_v17 = vsub.f32 1.0, %v642_v16 }
 0xd60   :  { %v644_v18 = vmul.f32 %v5949_v15, %v643_v17 }
 0xd62   :  { %v645_v19 = vadd.f32 %v5949_v15, %v644_v18 }
 0xd64   :  { %v649_v48 = vsel %vm648_vm12, %v5949_v15, %v645_v19 }
 0xd65   :  { %v654_v27 = vsel %vm651_vm14, %v653_v25, %v649_v48 }
 0xd66   :  { %v668_v38 = vsub.f32 1.0, %v654_v27  ;;  %v674_v40 = vmul.f32 %v654_v27, %v6426_v3 }
 0xda4   :  { %v659_v26 = vpop.permute.xlu2 %658 }
 0xda5   :  { %v661_v28 = vmul.f32 %v659_v26, %v654_v27 }
 0xda7   :  { %663 = vrot.lane.b32.xlu0 %v661_v28, %s6217_s23 }
 0xdaf   :  { %698 = vrot.lane.b32.xlu0 %v697_v29, %s6218_s24  ;;  %v766_v29 = vrot.slane %v6426_v3, 2 }
 0xdb7   :  { %723 = vrot.lane.b32.xlu0 %v722_v30, %s6218_s24 }
 0xe19   :  { %v664_v31 = vpop.permute.xlu0 %663 }
 0xe1a   :  { %v666_v32 = vadd.f32 %v4732_v10, %v664_v31 }
 0xe1c   :  { %5950 = vtanh.f32 %v666_v32 }
 0xe21   :  { %v699_v49 = vpop.permute.xlu0 %698 }
 0xe22   :  { %v5951_v34 = vpop.eup %5950 }
 0xe23   :  { %670 = vrot.lane.b32.xlu1 %v5951_v34, %s6219_s27 }
 0xe29   :  { %v724_v12 = vpop.permute.xlu0 %723 }
 0xe2b   :  { %749 = vrot.lane.b32.xlu1 %v748_v37, %s6219_s27 }
 0xe95   :  { %v671_v39 = vpop.permute.xlu1 %670 }
 0xe96   :  { %v673_v41 = vmul.f32 %v671_v39, %v668_v38 }
 0xe98   :  { %v6452_v43 = vadd.f32 %v674_v40, %v673_v41 }
 0xe9a   :  { %v676_v45 = vpack.c.bf16 %v6452_v43, %v6452_v43 }
 0xe9c   :  { %678 = vrot.lane.b32.xlu2 %v676_v45, %s6219_s27 }
 0xe9d   :  { %v750_v20 = vpop.permute.xlu1 %749 }
 0xef6   :  { %v679_v47 = vpop.permute.xlu2 %678 }
 0xef7   :  { %4734 = vmatmul.msk.bf16.vlgmr.msra.gmra.mxu3 %vm65_vm4, %v679_v47 }
 0xef8   :  { %1146 = vmatpush.bf16.msra.mxu3 %v6287_v33 }
 0xefc   :  { %1147 = vmatpush.bf16.msra.mxu3 %v6290_v35 }
 0xf7a   :  { %v692_v50 = vpop.f32.mrf.mxu3 }
 0xf7b   :  { %v693_v51 = vadd.f32 %v6333_v59, %v692_v50 }
 0xf7d   :  { %v701_v52 = vadd.f32 %v699_v49, %v693_v51  ;;  %v726_v13 = vadd.f32 %v724_v12, %v693_v51 }
 0xf7f   :  { %v4735_v53 = vmul.f32 -1.442695, %v701_v52  ;;  %v4736_v14 = vmul.f32 -1.442695, %v726_v13 }
 0xf81   :  { %5952 = vpow2.f32 %v4735_v53 }
 0xf82   :  { %v694_v54 = vpop.f32.mrf.mxu3 }
 0xf87   :  { %v5953_v55 = vpop.eup %5952 }
 0xf88   :  { %v705_v57 = vadd.f32 1.0, %v5953_v55 }
 0xf8a   :  { %5954 = vrcp.f32 %v705_v57  ;;  %v717_v62 = vand.u32 2147483648, %v705_v57  ;;  %v715_v1 = vand.u32 2147483647, %v705_v57  ;;  %vm711_vm0 = vweird.f32 %v705_v57 }
 0xf8c   :  { %v718_v6 = vor.u32 1.1754944e-38, %v717_v62  ;;  %vm716_vm2 = vcmp.eq.f32.partialorder %v715_v1, 8.507059e+37 }
 0xf90   :  { %v5955_v58 = vpop.eup %5954 }
 0xf91   :  { %v707_v60 = vmul.f32 %v5955_v58, %v705_v57  ;;  %vm712_vm15 = vweird.f32 %v5955_v58 }
 0xf92   :  { %vm713_vm1 = vmor %vm711_vm0, %vm712_vm15 }
 0xf93   :  { %v708_v61 = vsub.f32 1.0, %v707_v60 }
 0xf95   :  { %v709_v63 = vmul.f32 %v5955_v58, %v708_v61 }
 0xf97   :  { %v710_v22 = vadd.f32 %v5955_v58, %v709_v63 }
 0xf99   :  { %v714_v46 = vsel %vm713_vm1, %v5955_v58, %v710_v22 }
 0xf9a   :  { %v719_v21 = vsel %vm716_vm2, %v718_v6, %v714_v46 }
 0xf9b   :  { %v752_v2 = vmul.f32 %v750_v20, %v719_v21 }
 0xf9d   :  { %754 = vrot.lane.b32.xlu2 %v752_v2, %s6217_s23 }
 0xff7   :  { %v755_v9 = vpop.permute.xlu2 %754 }
 0xff8   :  { %v757_v10 = vadd.f32 %v755_v9, %v693_v51  ;;  %v4739_v51 = vld [vmem:[%s7944_s0 + $0x8] sm:$0x3] }
 0xffa   :  { %5956 = vtanh.f32 %v757_v10 }
 0xffb   :  { %5958 = vpow2.f32 %v4736_v14 }
0x1000   :  { %v5957_v11 = vpop.eup %5956 }
0x1001   :  { %761 = vrot.lane.b32.xlu1 %v5957_v11, %s6219_s27  ;;  %v5959_v15 = vpop.eup %5958 }
0x1002   :  { %v730_v16 = vadd.f32 1.0, %v5959_v15 }
0x1004   :  { %5960 = vrcp.f32 %v730_v16  ;;  %v742_v48 = vand.u32 2147483648, %v730_v16  ;;  %vm736_vm5 = vweird.f32 %v730_v16  ;;  %v740_v25 = vand.u32 2147483647, %v730_v16 }
0x1006   :  { %v743_v27 = vor.u32 1.1754944e-38, %v742_v48  ;;  %vm741_vm7 = vcmp.eq.f32.partialorder %v740_v25, 8.507059e+37 }
0x100a   :  { %v5961_v17 = vpop.eup %5960 }
0x100b   :  { %v732_v18 = vmul.f32 %v5961_v17, %v730_v16  ;;  %vm737_vm3 = vweird.f32 %v5961_v17 }
0x100c   :  { %vm738_vm6 = vmor %vm736_vm5, %vm737_vm3 }
0x100d   :  { %v733_v19 = vsub.f32 1.0, %v732_v18 }
0x100f   :  { %v734_v23 = vmul.f32 %v5961_v17, %v733_v19 }
0x1011   :  { %v735_v24 = vadd.f32 %v5961_v17, %v734_v23 }
0x1013   :  { %v739_v26 = vsel %vm738_vm6, %v5961_v17, %v735_v24 }
0x1014   :  { %v744_v28 = vsel %vm741_vm7, %v743_v27, %v739_v26 }
0x1015   :  { %v759_v30 = vsub.f32 1.0, %v744_v28  ;;  %v768_v34 = vmul.f32 %v766_v29, %v744_v28 }
0x1073   :  { %v762_v31 = vpop.permute.xlu1 %761 }
0x1074   :  { %v764_v32 = vmul.f32 %v762_v31, %v759_v30 }
0x1076   :  { %v769_v36 = vadd.f32 %v768_v34, %v764_v32 }
0x1078   :  { %v771_v37 = vrot.slane %v769_v36, 6  ;;  %v1464_v38 = vrot.slane %v769_v36, 2 }
0x107a   :  { %v6466_v39 = vsel %vm253_vm13, %v6452_v43, %v771_v37  ;;  %v6470_v40 = vsel %vm1474_vm8, %v6429_v5, %v1464_v38 }
0x107b   :  { %v774_v41 = vpack.c.bf16 %v6466_v39, %v6466_v39 }
0x107d   :  { %776 = vrot.lane.b32.xlu2 %v774_v41, %s6219_s27 }
0x10d7   :  { %v777_v3 = vpop.permute.xlu2 %776 }
0x10d8   :  { %4737 = vmatmul.msk.bf16.vlgmr.msra.gmra.mxu0 %vm65_vm4, %v777_v3  ;;  %4738 = vmatmul.msk.bf16.vlgmr.msra.gmra.mxu1 %vm65_vm4, %v777_v3 }
0x10d9   :  { %1208 = vmatpush.bf16.msra.mxu0 %v6299_v42  ;;  %1306 = vmatpush.bf16.msra.mxu1 %v6265_v4 }
0x10dd   :  { %1209 = vmatpush.bf16.msra.mxu0 %v6302_v44  ;;  %1307 = vmatpush.bf16.msra.mxu1 %v6271_v7 }
0x1155   :  { %v790_v5 = vpop.f32.mrf.mxu0  ;;  %v803_v43 = vpop.f32.mrf.mxu1 }
0x1156   :  { %v829_v45 = vadd.f32 %v790_v5, %v6278_v8  ;;  %v809_v49 = vadd.f32 %v4739_v51, %v790_v5  ;;  %v870_v46 = vrot.slane %v790_v5, 2  ;;  %v895_v20 = vrot.slane %v803_v43, 2 }
0x1157   :  { %v919_v10 = vadd.f32 %v803_v43, %v6326_v56 }
0x1158   :  { %831 = vrot.lane.b32.xlu0 %v829_v45, %s6217_s23  ;;  %v4740_v52 = vmul.f32 -1.442695, %v809_v49 }
0x1159   :  { %v921_v11 = vrot.slane %v919_v10, 2 }
0x115a   :  { %5962 = vpow2.f32 %v4740_v52 }
0x115d   :  { %v792_v47 = vpop.f32.mrf.mxu0  ;;  %v805_v50 = vpop.f32.mrf.mxu1 }
0x1160   :  { %v5963_v4 = vpop.eup %5962 }
0x1161   :  { %v813_v53 = vadd.f32 1.0, %v5963_v4 }
0x1163   :  { %5964 = vrcp.f32 %v813_v53  ;;  %v825_v60 = vand.u32 2147483648, %v813_v53  ;;  %vm819_vm11 = vweird.f32 %v813_v53  ;;  %v823_v61 = vand.u32 2147483647, %v813_v53 }
0x1165   :  { %v826_v63 = vor.u32 1.1754944e-38, %v825_v60  ;;  %vm824_vm14 = vcmp.eq.f32.partialorder %v823_v61, 8.507059e+37 }
0x1169   :  { %v5965_v54 = vpop.eup %5964 }
0x116a   :  { %v815_v7 = vmul.f32 %v5965_v54, %v813_v53  ;;  %vm820_vm10 = vweird.f32 %v5965_v54 }
0x116b   :  { %vm821_vm12 = vmor %vm819_vm11, %vm820_vm10 }
0x116c   :  { %v816_v55 = vsub.f32 1.0, %v815_v7 }
0x116e   :  { %v817_v57 = vmul.f32 %v5965_v54, %v816_v55 }
0x1170   :  { %v818_v58 = vadd.f32 %v5965_v54, %v817_v57 }
0x1172   :  { %v822_v62 = vsel %vm821_vm12, %v5965_v54, %v818_v58 }
0x1173   :  { %v827_v22 = vsel %vm824_vm14, %v826_v63, %v822_v62  ;;  %v939_v63 = vrot.slane %v6466_v39, 2 }
0x1174   :  { %v841_v12 = vsub.f32 1.0, %v827_v22  ;;  %v847_v14 = vmul.f32 %v827_v22, %v6466_v39 }
0x11ca   :  { %v832_v1 = vpop.permute.xlu0 %831 }
0x11cb   :  { %v834_v6 = vmul.f32 %v832_v1, %v827_v22 }
0x11cd   :  { %836 = vrot.lane.b32.xlu1 %v834_v6, %s6217_s23 }
0x11d5   :  { %871 = vrot.lane.b32.xlu1 %v870_v46, %s6218_s24 }
0x11dd   :  { %896 = vrot.lane.b32.xlu1 %v895_v20, %s6218_s24 }
0x123f   :  { %v837_v21 = vpop.permute.xlu1 %836 }
0x1240   :  { %v839_v2 = vadd.f32 %v4739_v51, %v837_v21 }
0x1242   :  { %5966 = vtanh.f32 %v839_v2 }
0x1247   :  { %v872_v24 = vpop.permute.xlu1 %871 }
0x1248   :  { %v5967_v9 = vpop.eup %5966 }
0x1249   :  { %843 = vrot.lane.b32.xlu2 %v5967_v9, %s6219_s27 }
0x124f   :  { %v897_v45 = vpop.permute.xlu1 %896 }
0x1251   :  { %922 = vrot.lane.b32.xlu2 %v921_v11, %s6219_s27 }
0x12a3   :  { %v844_v13 = vpop.permute.xlu2 %843 }
0x12a4   :  { %v846_v15 = vmul.f32 %v844_v13, %v841_v12 }
0x12a6   :  { %v6493_v16 = vadd.f32 %v847_v14, %v846_v15  ;;  %v4746_v14 = vld [vmem:[%s7944_s0 + $0xa] sm:$0x3] }
0x12a8   :  { %v849_v17 = vpack.c.bf16 %v6493_v16, %v6493_v16 }
0x12aa   :  { %851 = vrot.lane.b32.xlu0 %v849_v17, %s6219_s27 }
0x12ab   :  { %v923_v37 = vpop.permute.xlu2 %922 }
0x131c   :  { %v852_v18 = vpop.permute.xlu0 %851 }
0x131d   :  { %4741 = vmatmul.msk.bf16.vlgmr.msrb.gmra.mxu2 %vm65_vm4, %v852_v18 }
0x131e   :  { %1319 = vmatpush.bf16.msrb.mxu2 %v6287_v33 }
0x1322   :  { %1320 = vmatpush.bf16.msrb.mxu2 %v6290_v35 }
0x13a0   :  { %v865_v19 = vpop.f32.mrf.mxu2 }
0x13a1   :  { %v866_v23 = vadd.f32 %v6333_v59, %v865_v19 }
0x13a3   :  { %v874_v48 = vadd.f32 %v872_v24, %v866_v23  ;;  %v899_v47 = vadd.f32 %v897_v45, %v866_v23 }
0x13a5   :  { %v4742_v25 = vmul.f32 -1.442695, %v874_v48  ;;  %v4743_v50 = vmul.f32 -1.442695, %v899_v47 }
0x13a7   :  { %5968 = vpow2.f32 %v4742_v25 }
0x13a8   :  { %v867_v26 = vpop.f32.mrf.mxu2 }
0x13ad   :  { %v5969_v27 = vpop.eup %5968 }
0x13ae   :  { %v878_v28 = vadd.f32 1.0, %v5969_v27 }
0x13b0   :  { %5970 = vrcp.f32 %v878_v28  ;;  %v890_v32 = vand.u32 2147483648, %v878_v28  ;;  %v888_v33 = vand.u32 2147483647, %v878_v28  ;;  %vm884_vm0 = vweird.f32 %v878_v28 }
0x13b2   :  { %v891_v35 = vor.u32 1.1754944e-38, %v890_v32  ;;  %vm889_vm2 = vcmp.eq.f32.partialorder %v888_v33, 8.507059e+37 }
0x13b6   :  { %v5971_v29 = vpop.eup %5970 }
0x13b7   :  { %v880_v30 = vmul.f32 %v5971_v29, %v878_v28  ;;  %vm885_vm15 = vweird.f32 %v5971_v29 }
0x13b8   :  { %vm886_vm1 = vmor %vm884_vm0, %vm885_vm15 }
0x13b9   :  { %v881_v31 = vsub.f32 1.0, %v880_v30 }
0x13bb   :  { %v882_v34 = vmul.f32 %v5971_v29, %v881_v31 }
0x13bd   :  { %v883_v36 = vadd.f32 %v5971_v29, %v882_v34 }
0x13bf   :  { %v887_v59 = vsel %vm886_vm1, %v5971_v29, %v883_v36 }
0x13c0   :  { %v892_v38 = vsel %vm889_vm2, %v891_v35, %v887_v59 }
0x13c1   :  { %v925_v41 = vmul.f32 %v923_v37, %v892_v38 }
0x13c3   :  { %927 = vrot.lane.b32.xlu0 %v925_v41, %s6217_s23 }
0x1435   :  { %v928_v3 = vpop.permute.xlu0 %927 }
0x1436   :  { %v930_v5 = vadd.f32 %v928_v3, %v866_v23 }
0x1438   :  { %5972 = vtanh.f32 %v930_v5 }
0x1439   :  { %5974 = vpow2.f32 %v4743_v50  ;;  %v6540_v50 = vld [vmem:[%s7947_s3] ss:$0 sm:$0xff] }
0x143e   :  { %v5973_v43 = vpop.eup %5972 }
0x143f   :  { %934 = vrot.lane.b32.xlu2 %v5973_v43, %s6219_s27  ;;  %v5975_v51 = vpop.eup %5974 }
0x1440   :  { %v903_v49 = vadd.f32 1.0, %v5975_v51 }
0x1442   :  { %5976 = vrcp.f32 %v903_v49  ;;  %v915_v55 = vand.u32 2147483648, %v903_v49  ;;  %vm909_vm5 = vweird.f32 %v903_v49  ;;  %v913_v57 = vand.u32 2147483647, %v903_v49 }
0x1444   :  { %v916_v60 = vor.u32 1.1754944e-38, %v915_v55  ;;  %vm914_vm7 = vcmp.eq.f32.partialorder %v913_v57, 8.507059e+37 }
0x1448   :  { %v5977_v52 = vpop.eup %5976 }
0x1449   :  { %v905_v4 = vmul.f32 %v5977_v52, %v903_v49  ;;  %vm910_vm3 = vweird.f32 %v5977_v52 }
0x144a   :  { %vm911_vm6 = vmor %vm909_vm5, %vm910_vm3 }
0x144b   :  { %v906_v53 = vsub.f32 1.0, %v905_v4 }
0x144d   :  { %v907_v54 = vmul.f32 %v5977_v52, %v906_v53 }
0x144f   :  { %v908_v7 = vadd.f32 %v5977_v52, %v907_v54 }
0x1451   :  { %v912_v58 = vsel %vm911_vm6, %v5977_v52, %v908_v7 }
0x1452   :  { %v917_v61 = vsel %vm914_vm7, %v916_v60, %v912_v58 }
0x1453   :  { %v932_v62 = vsub.f32 1.0, %v917_v61  ;;  %v941_v22 = vmul.f32 %v939_v63, %v917_v61 }
0x1499   :  { %v935_v1 = vpop.permute.xlu2 %934 }
0x149a   :  { %v937_v6 = vmul.f32 %v935_v1, %v932_v62 }
0x149c   :  { %v6505_v46 = vadd.f32 %v941_v22, %v937_v6 }
0x149e   :  { %v944_v20 = vrot.slane %v6505_v46, 6 }
0x14a0   :  { %v6510_v21 = vsel %vm253_vm13, %v6493_v16, %v944_v20 }
0x14a1   :  { %v947_v2 = vpack.c.bf16 %v6510_v21, %v6510_v21 }
0x14a3   :  { %949 = vrot.lane.b32.xlu0 %v947_v2, %s6219_s27 }
0x1515   :  { %v950_v9 = vpop.permute.xlu0 %949 }
0x1516   :  { %4744 = vmatmul.msk.bf16.vlgmr.msrb.gmra.mxu3 %vm65_vm4, %v950_v9  ;;  %4745 = vmatmul.msk.bf16.vlgmr.msrb.gmra.mxu0 %vm65_vm4, %v950_v9 }
0x1517   :  { %1381 = vmatpush.bf16.msrb.mxu3 %v6299_v42 }
0x151b   :  { %1382 = vmatpush.bf16.msrb.mxu3 %v6302_v44 }
0x1593   :  { %v976_v39 = vpop.f32.mrf.mxu0 }
0x1594   :  { %v1068_v32 = vrot.slane %v976_v39, 2  ;;  %v1092_v35 = vadd.f32 %v976_v39, %v6326_v56 }
0x1596   :  { %v1094_v59 = vrot.slane %v1092_v35, 2 }
0x1599   :  { %v963_v10 = vpop.f32.mrf.mxu3 }
0x159a   :  { %v1002_v11 = vadd.f32 %v963_v10, %v6278_v8  ;;  %v982_v15 = vadd.f32 %v4746_v14, %v963_v10  ;;  %v1043_v31 = vrot.slane %v963_v10, 2 }
0x159b   :  { %v978_v12 = vpop.f32.mrf.mxu0 }
0x159c   :  { %1004 = vrot.lane.b32.xlu1 %v1002_v11, %s6217_s23  ;;  %v4747_v16 = vmul.f32 -1.442695, %v982_v15 }
0x159e   :  { %5978 = vpow2.f32 %v4747_v16 }
0x15a1   :  { %v965_v13 = vpop.f32.mrf.mxu3 }
0x15a4   :  { %v5979_v17 = vpop.eup %5978 }
0x15a5   :  { %v986_v18 = vadd.f32 1.0, %v5979_v17 }
0x15a7   :  { %5980 = vrcp.f32 %v986_v18  ;;  %v998_v48 = vand.u32 2147483648, %v986_v18  ;;  %vm992_vm11 = vweird.f32 %v986_v18  ;;  %v996_v25 = vand.u32 2147483647, %v986_v18 }
0x15a9   :  { %v999_v27 = vor.u32 1.1754944e-38, %v998_v48  ;;  %vm997_vm14 = vcmp.eq.f32.partialorder %v996_v25, 8.507059e+37 }
0x15ad   :  { %v5981_v42 = vpop.eup %5980 }
0x15ae   :  { %v988_v44 = vmul.f32 %v5981_v42, %v986_v18  ;;  %vm993_vm10 = vweird.f32 %v5981_v42 }
0x15af   :  { %vm994_vm12 = vmor %vm992_vm11, %vm993_vm10 }
0x15b0   :  { %v989_v19 = vsub.f32 1.0, %v988_v44 }
0x15b2   :  { %v990_v23 = vmul.f32 %v5981_v42, %v989_v19 }
0x15b4   :  { %v991_v24 = vadd.f32 %v5981_v42, %v990_v23 }
0x15b6   :  { %v995_v26 = vsel %vm994_vm12, %v5981_v42, %v991_v24 }
0x15b7   :  { %v1000_v29 = vsel %vm997_vm14, %v999_v27, %v995_v26  ;;  %v1112_v26 = vrot.slane %v6510_v21, 2 }
0x15b8   :  { %v1014_v37 = vsub.f32 1.0, %v1000_v29  ;;  %v1020_v41 = vmul.f32 %v1000_v29, %v6510_v21 }
0x160e   :  { %v1005_v28 = vpop.permute.xlu1 %1004 }
0x160f   :  { %v1007_v30 = vmul.f32 %v1005_v28, %v1000_v29 }
0x1611   :  { %1009 = vrot.lane.b32.xlu2 %v1007_v30, %s6217_s23 }
0x1619   :  { %1044 = vrot.lane.b32.xlu2 %v1043_v31, %s6218_s24 }
0x1621   :  { %1069 = vrot.lane.b32.xlu2 %v1068_v32, %s6218_s24 }
0x166b   :  { %v1010_v34 = vpop.permute.xlu2 %1009 }
0x166c   :  { %v1012_v33 = vadd.f32 %v4746_v14, %v1010_v34 }
0x166e   :  { %5982 = vtanh.f32 %v1012_v33 }
0x1673   :  { %v1045_v49 = vpop.permute.xlu2 %1044 }
0x1674   :  { %v5983_v36 = vpop.eup %5982 }
0x1675   :  { %1016 = vrot.lane.b32.xlu0 %v5983_v36, %s6219_s27 }
0x167b   :  { %v1070_v11 = vpop.permute.xlu2 %1069 }
0x167d   :  { %1095 = vrot.lane.b32.xlu0 %v1094_v59, %s6219_s27 }
0x16e7   :  { %v1017_v38 = vpop.permute.xlu0 %1016 }
0x16e8   :  { %v1019_v3 = vmul.f32 %v1017_v38, %v1014_v37 }
0x16ea   :  { %v6531_v5 = vadd.f32 %v1020_v41, %v1019_v3  ;;  %v4753_v41 = vld [vmem:[%s7944_s0 + $0xc] sm:$0x3] }
0x16ec   :  { %v1022_v43 = vpack.c.bf16 %v6531_v5, %v6531_v5 }
0x16ee   :  { %1024 = vrot.lane.b32.xlu1 %v1022_v43, %s6219_s27 }
0x16ef   :  { %v1096_v6 = vpop.permute.xlu0 %1095 }
0x1760   :  { %v1025_v45 = vpop.permute.xlu1 %1024 }
0x1761   :  { %4748 = vmatmul.msk.bf16.vlgmr.msrb.gmra.mxu1 %vm65_vm4, %v1025_v45 }
0x17de   :  { %v1038_v47 = vpop.f32.mrf.mxu1 }
0x17df   :  { %v1039_v51 = vadd.f32 %v6540_v50, %v1038_v47 }
0x17e1   :  { %v1047_v52 = vadd.f32 %v1045_v49, %v1039_v51  ;;  %v1072_v12 = vadd.f32 %v1070_v11, %v1039_v51 }
0x17e3   :  { %v4749_v4 = vmul.f32 -1.442695, %v1047_v52  ;;  %v4750_v13 = vmul.f32 -1.442695, %v1072_v12 }
0x17e5   :  { %5984 = vpow2.f32 %v4749_v4 }
0x17e6   :  { %v1040_v53 = vpop.f32.mrf.mxu1 }
0x17eb   :  { %v5985_v54 = vpop.eup %5984 }
0x17ec   :  { %v1051_v7 = vadd.f32 1.0, %v5985_v54 }
0x17ee   :  { %5986 = vrcp.f32 %v1051_v7  ;;  %v1063_v60 = vand.u32 2147483648, %v1051_v7  ;;  %v1061_v62 = vand.u32 2147483647, %v1051_v7  ;;  %vm1057_vm0 = vweird.f32 %v1051_v7 }
0x17f0   :  { %v1064_v1 = vor.u32 1.1754944e-38, %v1063_v60  ;;  %vm1062_vm2 = vcmp.eq.f32.partialorder %v1061_v62, 8.507059e+37 }
0x17f4   :  { %v5987_v55 = vpop.eup %5986 }
0x17f5   :  { %v1053_v57 = vmul.f32 %v5987_v55, %v1051_v7  ;;  %vm1058_vm15 = vweird.f32 %v5987_v55 }
0x17f6   :  { %vm1059_vm1 = vmor %vm1057_vm0, %vm1058_vm15 }
0x17f7   :  { %v1054_v58 = vsub.f32 1.0, %v1053_v57 }
0x17f9   :  { %v1055_v61 = vmul.f32 %v5987_v55, %v1054_v58 }
0x17fb   :  { %v1056_v63 = vadd.f32 %v5987_v55, %v1055_v61 }
0x17fd   :  { %v1060_v22 = vsel %vm1059_vm1, %v5987_v55, %v1056_v63 }
0x17fe   :  { %v1065_v20 = vsel %vm1062_vm2, %v1064_v1, %v1060_v22 }
0x17ff   :  { %v1098_v2 = vmul.f32 %v1096_v6, %v1065_v20 }
0x1801   :  { %1100 = vrot.lane.b32.xlu1 %v1098_v2, %s6217_s23 }
0x1873   :  { %v1101_v9 = vpop.permute.xlu1 %1100 }
0x1874   :  { %v1103_v39 = vadd.f32 %v1101_v9, %v1039_v51 }
0x1876   :  { %5988 = vtanh.f32 %v1103_v39 }
0x1877   :  { %5990 = vpow2.f32 %v4750_v13 }
0x187c   :  { %v5989_v10 = vpop.eup %5988 }
0x187d   :  { %1107 = vrot.lane.b32.xlu0 %v5989_v10, %s6219_s27  ;;  %v5991_v14 = vpop.eup %5990 }
0x187e   :  { %v1076_v15 = vadd.f32 1.0, %v5991_v14 }
0x1880   :  { %5992 = vrcp.f32 %v1076_v15  ;;  %v1088_v19 = vand.u32 2147483648, %v1076_v15  ;;  %vm1082_vm5 = vweird.f32 %v1076_v15  ;;  %v1086_v23 = vand.u32 2147483647, %v1076_v15 }
0x1882   :  { %v1089_v48 = vor.u32 1.1754944e-38, %v1088_v19  ;;  %vm1087_vm7 = vcmp.eq.f32.partialorder %v1086_v23, 8.507059e+37 }
0x1886   :  { %v5993_v16 = vpop.eup %5992 }
0x1887   :  { %v1078_v17 = vmul.f32 %v5993_v16, %v1076_v15  ;;  %vm1083_vm3 = vweird.f32 %v5993_v16 }
0x1888   :  { %vm1084_vm6 = vmor %vm1082_vm5, %vm1083_vm3 }
0x1889   :  { %v1079_v18 = vsub.f32 1.0, %v1078_v17 }
0x188b   :  { %v1080_v42 = vmul.f32 %v5993_v16, %v1079_v18 }
0x188d   :  { %v1081_v44 = vadd.f32 %v5993_v16, %v1080_v42 }
0x188f   :  { %v1085_v24 = vsel %vm1084_vm6, %v5993_v16, %v1081_v44 }
0x1890   :  { %v1090_v25 = vsel %vm1087_vm7, %v1089_v48, %v1085_v24 }
0x1891   :  { %v1105_v27 = vsub.f32 1.0, %v1090_v25  ;;  %v1114_v30 = vmul.f32 %v1112_v26, %v1090_v25 }
0x18ef   :  { %v1108_v28 = vpop.permute.xlu0 %1107 }
0x18f0   :  { %v1110_v29 = vmul.f32 %v1108_v28, %v1105_v27 }
0x18f2   :  { %v6546_v31 = vadd.f32 %v1114_v30, %v1110_v29 }
0x18f4   :  { %v1117_v32 = vrot.slane %v6546_v31, 6 }
0x18f6   :  { %v6553_v34 = vsel %vm253_vm13, %v6531_v5, %v1117_v32 }
0x18f7   :  { %v1120_v33 = vpack.c.bf16 %v6553_v34, %v6553_v34 }
0x18f9   :  { %1122 = vrot.lane.b32.xlu1 %v1120_v33, %s6219_s27 }
0x196b   :  { %v1123_v21 = vpop.permute.xlu1 %1122 }
0x196c   :  { %4751 = vmatmul.msk.bf16.vlgmr.msra.gmra.mxu2 %vm65_vm4, %v1123_v21  ;;  %4752 = vmatmul.msk.bf16.vlgmr.msra.gmra.mxu3 %vm65_vm4, %v1123_v21 }
0x19ef   :  { %v1136_v36 = vpop.f32.mrf.mxu2  ;;  %v1149_v35 = vpop.f32.mrf.mxu3 }
0x19f0   :  { %v1175_v59 = vadd.f32 %v1136_v36, %v6278_v8  ;;  %v1155_v3 = vadd.f32 %v4753_v41, %v1136_v36  ;;  %v1216_v61 = vrot.slane %v1136_v36, 2  ;;  %v1241_v62 = vrot.slane %v1149_v35, 2 }
0x19f1   :  { %v1265_v6 = vadd.f32 %v1149_v35, %v6326_v56 }
0x19f2   :  { %1177 = vrot.lane.b32.xlu2 %v1175_v59, %s6217_s23  ;;  %v4754_v5 = vmul.f32 -1.442695, %v1155_v3 }
0x19f3   :  { %v1267_v20 = vrot.slane %v1265_v6, 2  ;;  %v1476_v6 = vsel %vm253_vm13, %v6505_v46, %v1117_v32 }
0x19f4   :  { %5994 = vpow2.f32 %v4754_v5 }
0x19f7   :  { %v1138_v37 = vpop.f32.mrf.mxu2  ;;  %v1151_v38 = vpop.f32.mrf.mxu3 }
0x19fa   :  { %v5995_v43 = vpop.eup %5994 }
0x19fb   :  { %v1159_v45 = vadd.f32 1.0, %v5995_v43 }
0x19fd   :  { %5996 = vrcp.f32 %v1159_v45  ;;  %v1171_v53 = vand.u32 2147483648, %v1159_v45  ;;  %vm1165_vm11 = vweird.f32 %v1159_v45  ;;  %v1169_v54 = vand.u32 2147483647, %v1159_v45 }
0x19ff   :  { %v1172_v55 = vor.u32 1.1754944e-38, %v1171_v53  ;;  %vm1170_vm14 = vcmp.eq.f32.partialorder %v1169_v54, 8.507059e+37 }
0x1a03   :  { %v5997_v47 = vpop.eup %5996 }
0x1a04   :  { %v1161_v51 = vmul.f32 %v5997_v47, %v1159_v45  ;;  %vm1166_vm10 = vweird.f32 %v5997_v47 }
0x1a05   :  { %vm1167_vm12 = vmor %vm1165_vm11, %vm1166_vm10 }
0x1a06   :  { %v1162_v49 = vsub.f32 1.0, %v1161_v51 }
0x1a08   :  { %v1163_v52 = vmul.f32 %v5997_v47, %v1162_v49 }
0x1a0a   :  { %v1164_v4 = vadd.f32 %v5997_v47, %v1163_v52 }
0x1a0c   :  { %v1168_v7 = vsel %vm1167_vm12, %v5997_v47, %v1164_v4  ;;  %vm1512_vm12 = vcmask 1040384  }
0x1a0d   :  { %v1173_v58 = vsel %vm1170_vm14, %v1172_v55, %v1168_v7  ;;  %vm1508_vm14 = vcmask 269312  }
0x1a0e   :  { %v1187_v2 = vsub.f32 1.0, %v1173_v58  ;;  %v1193_v39 = vmul.f32 %v1173_v58, %v6553_v34 }
0x1a4c   :  { %v1178_v57 = vpop.permute.xlu2 %1177 }
0x1a4d   :  { %v1180_v60 = vmul.f32 %v1178_v57, %v1173_v58  ;;  %v1285_v57 = vrot.slane %v6553_v34, 2 }
0x1a4f   :  { %1182 = vrot.lane.b32.xlu0 %v1180_v60, %s6217_s23 }
0x1a57   :  { %1217 = vrot.lane.b32.xlu0 %v1216_v61, %s6218_s24 }
0x1a5f   :  { %1242 = vrot.lane.b32.xlu0 %v1241_v62, %s6218_s24 }
0x1ac1   :  { %v1183_v63 = vpop.permute.xlu0 %1182 }
0x1ac2   :  { %v1185_v1 = vadd.f32 %v4753_v41, %v1183_v63 }
0x1ac4   :  { %5998 = vtanh.f32 %v1185_v1 }
0x1ac9   :  { %v1218_v16 = vpop.permute.xlu0 %1217 }
0x1aca   :  { %v5999_v22 = vpop.eup %5998 }
0x1acb   :  { %1189 = vrot.lane.b32.xlu1 %v5999_v22, %s6219_s27 }
0x1ad1   :  { %v1243_v38 = vpop.permute.xlu0 %1242 }
0x1ad3   :  { %1268 = vrot.lane.b32.xlu1 %v1267_v20, %s6219_s27 }
0x1b3d   :  { %v1190_v9 = vpop.permute.xlu1 %1189 }
0x1b3e   :  { %v1192_v10 = vmul.f32 %v1190_v9, %v1187_v2 }
0x1b40   :  { %v6572_v11 = vadd.f32 %v1193_v39, %v1192_v10 }
0x1b42   :  { %v1195_v12 = vpack.c.bf16 %v6572_v11, %v6572_v11 }
0x1b44   :  { %1197 = vrot.lane.b32.xlu2 %v1195_v12, %s6219_s27 }
0x1b45   :  { %v1269_v33 = vpop.permute.xlu1 %1268 }
0x1b9e   :  { %v1198_v13 = vpop.permute.xlu2 %1197 }
0x1b9f   :  { %4755 = vmatmul.msk.bf16.vlgmr.msra.gmra.mxu0 %vm65_vm4, %v1198_v13 }
0x1c1c   :  { %v1211_v14 = vpop.f32.mrf.mxu0 }
0x1c1d   :  { %v1212_v15 = vadd.f32 %v6540_v50, %v1211_v14 }
0x1c1f   :  { %v1220_v17 = vadd.f32 %v1218_v16, %v1212_v15  ;;  %v1245_v41 = vadd.f32 %v1243_v38, %v1212_v15  ;;  %v4767_v38 = vld [vmem:[#allocation2 + $0x40] sm:$0xf] }
0x1c21   :  { %v4756_v18 = vmul.f32 -1.442695, %v1220_v17  ;;  %v4757_v3 = vmul.f32 -1.442695, %v1245_v41  ;;  %v5357_v41 = vld [vmem:[#allocation2 + $0x44] sm:$0xf0] }
0x1c23   :  { %6000 = vpow2.f32 %v4756_v18 }
0x1c24   :  { %v1213_v42 = vpop.f32.mrf.mxu0 }
0x1c29   :  { %v6001_v44 = vpop.eup %6000 }
0x1c2a   :  { %v1224_v19 = vadd.f32 1.0, %v6001_v44 }
0x1c2c   :  { %6002 = vrcp.f32 %v1224_v19  ;;  %v1236_v25 = vand.u32 2147483648, %v1224_v19  ;;  %v1234_v27 = vand.u32 2147483647, %v1224_v19  ;;  %vm1230_vm0 = vweird.f32 %v1224_v19 }
0x1c2e   :  { %v1237_v29 = vor.u32 1.1754944e-38, %v1236_v25  ;;  %vm1235_vm2 = vcmp.eq.f32.partialorder %v1234_v27, 8.507059e+37 }
0x1c32   :  { %v6003_v23 = vpop.eup %6002 }
0x1c33   :  { %v1226_v24 = vmul.f32 %v6003_v23, %v1224_v19  ;;  %vm1231_vm15 = vweird.f32 %v6003_v23 }
0x1c34   :  { %vm1232_vm1 = vmor %vm1230_vm0, %vm1231_vm15 }
0x1c35   :  { %v1227_v48 = vsub.f32 1.0, %v1226_v24 }
0x1c37   :  { %v1228_v26 = vmul.f32 %v6003_v23, %v1227_v48 }
0x1c39   :  { %v1229_v28 = vadd.f32 %v6003_v23, %v1228_v26 }
0x1c3b   :  { %v1233_v30 = vsel %vm1232_vm1, %v6003_v23, %v1229_v28 }
0x1c3c   :  { %v1238_v21 = vsel %vm1235_vm2, %v1237_v29, %v1233_v30  ;;  %v1492_v29 = vld [vmem:[#allocation2 + $0x60] sm:$0x1] }
0x1c3d   :  { %v1271_v36 = vmul.f32 %v1269_v33, %v1238_v21  ;;  %v1502_v30 = vunpack.c.l.b16 %v1492_v29  ;;  %v6607_v33 = vsel %vm1512_vm12, 65535, %v6216_v0 }
0x1c3f   :  { %1273 = vrot.lane.b32.xlu2 %v1271_v36, %s6217_s23  ;;  %v1505_v21 = vpack.c.b16 %v1502_v30, %v1502_v30  ;;  %v4771_v36 = vld [vmem:[#allocation2 + $0x50] sm:$0xf] }
0x1c99   :  { %v1274_v35 = vpop.permute.xlu2 %1273 }
0x1c9a   :  { %v1276_v59 = vadd.f32 %v1274_v35, %v1212_v15  ;;  %v5358_v35 = vld [vmem:[#allocation2 + $0x54] sm:$0xf0] }
0x1c9c   :  { %6004 = vtanh.f32 %v1276_v59  ;;  %v1516_v59 = vand.u32 %v6607_v33, %v1505_v21 }
0x1c9d   :  { %6006 = vpow2.f32 %v4757_v3  ;;  %v4768_v3 = vor.u32 %v5357_v41, %v4767_v38 }
0x1c9e   :  { %1523 = vmatpush.bf16.msrb.mxu0 %v1516_v59 }
0x1ca2   :  { %v6005_v37 = vpop.eup %6004 }
0x1ca3   :  { %1280 = vrot.lane.b32.xlu1 %v6005_v37, %s6219_s27  ;;  %v6007_v5 = vpop.eup %6006  ;;  %v4772_v37 = vor.u32 %v5358_v35, %v4771_v36  ;;  %v6635_v36 = vand.u32 1.0|1.0, %v6607_v33 }
0x1ca4   :  { %v1249_v43 = vadd.f32 1.0, %v6007_v5  ;;  %v1483_v5 = vld [vmem:[%s7945_s1 + $0x10] sm:$0xff] }
0x1ca5   :  { %1524 = vmatpush.bf16.msrb.mxu0 %v4772_v37 }
0x1ca6   :  { %6008 = vrcp.f32 %v1249_v43  ;;  %v1261_v4 = vand.u32 2147483648, %v1249_v43  ;;  %vm1255_vm5 = vweird.f32 %v1249_v43  ;;  %v1259_v53 = vand.u32 2147483647, %v1249_v43 }
0x1ca8   :  { %v1262_v7 = vor.u32 1.1754944e-38, %v1261_v4  ;;  %vm1260_vm7 = vcmp.eq.f32.partialorder %v1259_v53, 8.507059e+37 }
0x1ca9   :  { %1525 = vmatpush.bf16.msrb.mxu0 %v4768_v3 }
0x1cac   :  { %v6009_v45 = vpop.eup %6008 }
0x1cad   :  { %v1251_v47 = vmul.f32 %v6009_v45, %v1249_v43  ;;  %vm1256_vm3 = vweird.f32 %v6009_v45  ;;  %v1484_v43 = vld [vmem:[%s7945_s1 + $0x28] sm:$0xff] }
0x1cae   :  { %vm1257_vm6 = vmor %vm1255_vm5, %vm1256_vm3 }
0x1caf   :  { %v1252_v51 = vsub.f32 1.0, %v1251_v47 }
0x1cb1   :  { %v1253_v49 = vmul.f32 %v6009_v45, %v1252_v51 }
0x1cb3   :  { %v1254_v52 = vadd.f32 %v6009_v45, %v1253_v49 }
0x1cb5   :  { %v1258_v54 = vsel %vm1257_vm6, %v6009_v45, %v1254_v52  ;;  %v1487_v45 = vpack.c.bf16 %v1484_v43, %v1483_v5 }
0x1cb6   :  { %v1263_v55 = vsel %vm1260_vm7, %v1262_v7, %v1258_v54 }
0x1cb7   :  { %v1278_v58 = vsub.f32 1.0, %v1263_v55  ;;  %v1287_v62 = vmul.f32 %v1285_v57, %v1263_v55  ;;  %4773 = vmatmul.msk.bf16.vlgmr.msrb.gmra.mxu0 %vm1508_vm14, %v1487_v45 }
0x1d15   :  { %v1281_v60 = vpop.permute.xlu1 %1280 }
0x1d16   :  { %v1283_v61 = vmul.f32 %v1281_v60, %v1278_v58 }
0x1d18   :  { %v1288_v63 = vadd.f32 %v1287_v62, %v1283_v61 }
0x1d1a   :  { %v1290_v1 = vrot.slane %v1288_v63, 6  ;;  %v1466_v22 = vrot.slane %v1288_v63, 4 }
0x1d1c   :  { %v6588_v20 = vsel %vm253_vm13, %v6572_v11, %v1290_v1  ;;  %v6591_v2 = vsel %vm1472_vm9, %v1476_v6, %v1466_v22  ;;  %v4760_v11 = vld [vmem:[%s7944_s0 + $0xe] sm:$0x3] }
0x1d1d   :  { %v1293_v34 = vpack.c.bf16 %v6588_v20, %v6588_v20 }
0x1d1f   :  { %1295 = vrot.lane.b32.xlu2 %v1293_v34, %s6219_s27 }
0x1d34   :  { %v6621_v60 = vpop.f32.mrf.mxu0 }
0x1d35   :  { %v4774_v61 = vmul.f32 -1.442695, %v6621_v60 }
0x1d3c   :  { %v6624_v62 = vpop.f32.mrf.mxu0 }
0x1d3d   :  { %v4775_v1 = vmul.f32 -1.442695, %v6624_v62 }
0x1d79   :  { %v1296_v9 = vpop.permute.xlu2 %1295 }
0x1d7a   :  { %4758 = vmatmul.msk.bf16.vlgmr.msra.gmra.mxu1 %vm65_vm4, %v1296_v9  ;;  %4759 = vmatmul.msk.bf16.vlgmr.msrb.gmra.mxu2 %vm65_vm4, %v1296_v9  ;;  %v4790_v9 = vld [vmem:[#allocation2 + $0x98] sm:$0xf] }
0x1df7   :  { %v1309_v31 = vpop.f32.mrf.mxu1 }
0x1df8   :  { %v1348_v46 = vadd.f32 %v1309_v31, %v6278_v8  ;;  %v1328_v12 = vadd.f32 %v4760_v11, %v1309_v31  ;;  %v1389_v27 = vrot.slane %v1309_v31, 2  ;;  %v5362_v31 = vld [vmem:[#allocation2 + $0x9c] sm:$0xf0] }
0x1dfa   :  { %1350 = vrot.lane.b32.xlu0 %v1348_v46, %s6217_s23  ;;  %v4761_v13 = vmul.f32 -1.442695, %v1328_v12 }
0x1dfc   :  { %6010 = vpow2.f32 %v4761_v13 }
0x1dfd   :  { %v1322_v32 = vpop.f32.mrf.mxu2 }
0x1dfe   :  { %v1414_v28 = vrot.slane %v1322_v32, 2  ;;  %v1438_v52 = vadd.f32 %v1322_v32, %v6326_v56  ;;  %v1586_v56 = vld [vmem:[#allocation2 + $0xa8] sm:$0x1]  ;;  %v4791_v32 = vor.u32 %v5362_v31, %v4790_v9 }
0x1dff   :  { %v1311_v39 = vpop.f32.mrf.mxu1  ;;  %v1604_v22 = vunpack.c.l.b16 %v1586_v56 }
0x1e00   :  { %v1440_v4 = vrot.slane %v1438_v52, 2  ;;  %v4786_v39 = vld [vmem:[#allocation2 + $0x88] sm:$0xf] }
0x1e01   :  { %v1609_v34 = vpack.c.b16 %v1604_v22, %v1604_v22 }
0x1e02   :  { %v6011_v14 = vpop.eup %6010 }
0x1e03   :  { %v1332_v15 = vadd.f32 1.0, %v6011_v14  ;;  %v1619_v46 = vand.u32 %v1609_v34, %v6607_v33 }
0x1e05   :  { %v1324_v10 = vpop.f32.mrf.mxu2  ;;  %6012 = vrcp.f32 %v1332_v15  ;;  %v1344_v44 = vand.u32 2147483648, %v1332_v15  ;;  %vm1338_vm9 = vweird.f32 %v1332_v15  ;;  %v1342_v19 = vand.u32 2147483647, %v1332_v15  ;;  %1624 = vmatpush.bf16.msrb.mxu1 %v1619_v46 }
0x1e06   :  { %v5361_v10 = vld [vmem:[#allocation2 + $0x8c] sm:$0xf0] }
0x1e07   :  { %v1345_v24 = vor.u32 1.1754944e-38, %v1344_v44  ;;  %vm1343_vm11 = vcmp.eq.f32.partialorder %v1342_v19, 8.507059e+37 }
0x1e09   :  { %1625 = vmatpush.bf16.msrb.mxu1 %v4791_v32 }
0x1e0b   :  { %v6013_v16 = vpop.eup %6012 }
0x1e0c   :  { %v1334_v17 = vmul.f32 %v6013_v16, %v1332_v15  ;;  %vm1339_vm13 = vweird.f32 %v6013_v16  ;;  %v4787_v15 = vor.u32 %v5361_v10, %v4786_v39  ;;  %v1875_v10 = vld [vmem:[%s7947_s3 + $0x40] sm:$0xff] }
0x1e0d   :  { %vm1340_vm10 = vmor %vm1338_vm9, %vm1339_vm13  ;;  %vm1614_vm9 = vcmask 531456  }
0x1e0e   :  { %v1335_v18 = vsub.f32 1.0, %v1334_v17  ;;  %v5360_v17 = vld [vmem:[#allocation2 + $0x7c] sm:$0xf0]  ;;  %1626 = vmatpush.bf16.msrb.mxu1 %v4787_v15 }
0x1e10   :  { %v1336_v42 = vmul.f32 %v6013_v16, %v1335_v18 }
0x1e12   :  { %v1337_v8 = vadd.f32 %v6013_v16, %v1336_v42 }
0x1e14   :  { %v1341_v23 = vsel %vm1340_vm10, %v6013_v16, %v1337_v8  ;;  %v4782_v16 = vld [vmem:[#allocation2 + $0x78] sm:$0xf] }
0x1e15   :  { %v1346_v25 = vsel %vm1343_vm11, %v1345_v24, %v1341_v23  ;;  %v4783_v19 = vor.u32 %v5360_v17, %v4782_v16  ;;  %v4778_v24 = vld [vmem:[#allocation2 + $0x68] sm:$0xf] }
0x1e16   :  { %v1360_v53 = vsub.f32 1.0, %v1346_v25  ;;  %v1366_v7 = vmul.f32 %v1346_v25, %v6588_v20 }
0x1e17   :  { %1627 = vmatpush.bf16.msrb.mxu1 %v4783_v19 }
0x1e6c   :  { %v1351_v48 = vpop.permute.xlu0 %1350 }
0x1e6d   :  { %v1353_v26 = vmul.f32 %v1351_v48, %v1346_v25  ;;  %v5359_v48 = vld [vmem:[#allocation2 + $0x6c] sm:$0xf0] }
0x1e6e   :  { %v4779_v21 = vor.u32 %v5359_v48, %v4778_v24 }
0x1e6f   :  { %1355 = vrot.lane.b32.xlu1 %v1353_v26, %s6217_s23 }
0x1e70   :  { %1628 = vmatpush.bf16.msrb.mxu1 %v4779_v21 }
0x1e74   :  { %2336 = vmatpush.bf16.msra.mxu1 %v6635_v36 }
0x1e77   :  { %1390 = vrot.lane.b32.xlu1 %v1389_v27, %s6218_s24  ;;  %v1485_v27 = vlaneseq }
0x1e79   :  { %v6637_v38 = vand.u32 127, %v1485_v27  ;;  %v5364_v27 = vld [vmem:[#allocation2 + $0xc4] sm:$0xf0] }
0x1e7b   :  { %vm1532_vm13 = vcmp.lt.s32.totalorder %v6637_v38, 64 }
0x1e7f   :  { %1415 = vrot.lane.b32.xlu1 %v1414_v28, %s6218_s24 }
0x1ee1   :  { %v1356_v47 = vpop.permute.xlu1 %1355 }
0x1ee2   :  { %v1358_v51 = vadd.f32 %v4760_v11, %v1356_v47 }
0x1ee4   :  { %6014 = vtanh.f32 %v1358_v51 }
0x1ee5   :  { %6016 = vpow2.f32 %v4774_v61 }
0x1ee6   :  { %6018 = vpow2.f32 %v4775_v1 }
0x1eea   :  { %v6015_v49 = vpop.eup %6014 }
0x1eeb   :  { %1362 = vrot.lane.b32.xlu2 %v6015_v49, %s6219_s27  ;;  %v6017_v63 = vpop.eup %6016 }
0x1eec   :  { %v1539_v6 = vadd.f32 1.0, %v6017_v63  ;;  %v6019_v11 = vpop.eup %6018 }
0x1eed   :  { %v1540_v13 = vadd.f32 1.0, %v6019_v11  ;;  %v4809_v11 = vld [vmem:[#allocation2 + $0xe0] sm:$0xf] }
0x1eee   :  { %6020 = vrcp.f32 %v1539_v6  ;;  %vm1546_vm15 = vweird.f32 %v1539_v6  ;;  %v1552_v42 = vand.u32 2147483648, %v1539_v6  ;;  %v1550_v44 = vand.u32 2147483647, %v1539_v6 }
0x1eef   :  { %6022 = vrcp.f32 %v1540_v13  ;;  %v1567_v35 = vand.u32 2147483648, %v1540_v13  ;;  %vm1561_vm3 = vweird.f32 %v1540_v13  ;;  %v1565_v37 = vand.u32 2147483647, %v1540_v13 }
0x1ef0   :  { %v1553_v28 = vor.u32 1.1754944e-38, %v1552_v42  ;;  %vm1551_vm2 = vcmp.eq.f32.partialorder %v1550_v44, 8.507059e+37  ;;  %v4805_v42 = vld [vmem:[#allocation2 + $0xd0] sm:$0xf] }
0x1ef1   :  { %v1568_v5 = vor.u32 1.1754944e-38, %v1567_v35  ;;  %vm1566_vm7 = vcmp.eq.f32.partialorder %v1565_v37, 8.507059e+37  ;;  %v5363_v37 = vld [vmem:[#allocation2 + $0xb4] sm:$0xf0] }
0x1ef3   :  { %1441 = vrot.lane.b32.xlu2 %v1440_v4, %s6219_s27 }
0x1ef4   :  { %v6021_v12 = vpop.eup %6020 }
0x1ef5   :  { %v1542_v14 = vmul.f32 %v6021_v12, %v1539_v6  ;;  %vm1547_vm0 = vweird.f32 %v6021_v12  ;;  %v6023_v26 = vpop.eup %6022 }
0x1ef6   :  { %vm6628_vm1 = vmor %vm1546_vm15, %vm1547_vm0  ;;  %v1557_v30 = vmul.f32 %v6023_v26, %v1540_v13  ;;  %vm1562_vm5 = vweird.f32 %v6023_v26 }
0x1ef7   :  { %v1543_v18 = vsub.f32 1.0, %v1542_v14  ;;  %vm1563_vm6 = vmor %vm1561_vm3, %vm1562_vm5 }
0x1ef8   :  { %v1558_v59 = vsub.f32 1.0, %v1557_v30 }
0x1ef9   :  { %v1544_v8 = vmul.f32 %v6021_v12, %v1543_v18 }
0x1efa   :  { %v1559_v3 = vmul.f32 %v6023_v26, %v1558_v59  ;;  %v4797_v59 = vld [vmem:[#allocation2 + $0xb0] sm:$0xf] }
0x1efb   :  { %v1545_v25 = vadd.f32 %v6021_v12, %v1544_v8  ;;  %v5365_v8 = vld [vmem:[#allocation2 + $0xd4] sm:$0xf0] }
0x1efc   :  { %v1560_v45 = vadd.f32 %v6023_v26, %v1559_v3  ;;  %v4806_v23 = vor.u32 %v5365_v8, %v4805_v42  ;;  %v1873_v42 = vld [vmem:[%s7947_s3 + $0x30] sm:$0xff] }
0x1efd   :  { %v1549_v29 = vsel %vm6628_vm1, %v6021_v12, %v1545_v25  ;;  %v5366_v12 = vld [vmem:[#allocation2 + $0xe4] sm:$0xf0] }
0x1efe   :  { %v1554_v41 = vsel %vm1551_vm2, %v1553_v28, %v1549_v29  ;;  %v1564_v47 = vsel %vm1563_vm6, %v6023_v26, %v1560_v45  ;;  %v4801_v26 = vld [vmem:[#allocation2 + $0xc0] sm:$0xf] }
0x1eff   :  { %v1571_v43 = vmul.f32 %v1554_v41, %v6621_v60  ;;  %v1569_v51 = vsel %vm1566_vm7, %v1568_v5, %v1564_v47  ;;  %v4802_v30 = vor.u32 %v5364_v27, %v4801_v26  ;;  %v4798_v5 = vor.u32 %v5363_v37, %v4797_v59 }
0x1f00   :  { %v1572_v52 = vmul.f32 %v1569_v51, %v6624_v62 }
0x1f01   :  { %v1575_v49 = vsel %vm1532_vm13, %v1571_v43, %v6621_v60 }
0x1f02   :  { %v1576_v4 = vsel %vm1532_vm13, %v1572_v52, %v6624_v62 }
0x1f45   :  { %v1363_v54 = vpop.permute.xlu2 %1362 }
0x1f46   :  { %v1365_v55 = vmul.f32 %v1363_v54, %v1360_v53  ;;  %v1577_v53 = vpack.c.bf16 %v1576_v4, %v1575_v49  ;;  %v1391_v49 = vpop.permute.xlu1 %1390 }
0x1f48   :  { %v1367_v57 = vadd.f32 %v1366_v7, %v1365_v55  ;;  %4792 = vmatmul.msk.bf16.vlgmr.msrb.gmra.mxu1 %vm1614_vm9, %v1577_v53 }
0x1f4a   :  { %v1368_v58 = vpack.c.bf16 %v1367_v57, %v1367_v57 }
0x1f4c   :  { %1370 = vrot.lane.b32.xlu0 %v1368_v58, %s6219_s27  ;;  %v1686_v58 = vld [vmem:[#allocation2 + $0xf0] sm:$0x1] }
0x1f4d   :  { %v1704_v56 = vunpack.c.l.b16 %v1686_v58 }
0x1f4f   :  { %v1709_v1 = vpack.c.b16 %v1704_v56, %v1704_v56 }
0x1f51   :  { %v1718_v62 = vand.u32 %v1709_v1, %v6607_v33  ;;  %v4810_v33 = vor.u32 %v5366_v12, %v4809_v11  ;;  %v1872_v12 = vld [vmem:[%s7947_s3 + $0x28] sm:$0xff] }
0x1f53   :  { %1723 = vmatpush.bf16.msra.mxu2 %v1718_v62  ;;  %v1442_v62 = vpop.permute.xlu2 %1441 }
0x1f57   :  { %1724 = vmatpush.bf16.msra.mxu2 %v4810_v33 }
0x1f5b   :  { %1725 = vmatpush.bf16.msra.mxu2 %v4806_v23 }
0x1f5f   :  { %1726 = vmatpush.bf16.msra.mxu2 %v4802_v30 }
0x1f63   :  { %1727 = vmatpush.bf16.msra.mxu2 %v4798_v5 }
0x1f67   :  { %5452 = vmatpush.bf16.msrb.mxu2 %v6635_v36 }
0x1fbe   :  { %v1371_v54 = vpop.permute.xlu0 %1370 }
0x1fbf   :  { %4762 = vmatmul.msk.bf16.vlgmr.msrb.gmra.mxu3 %vm65_vm4, %v1371_v54 }
0x1fc5   :  { %v1630_v7 = vpop.f32.mrf.mxu1 }
0x1fc6   :  { %v4793_v55 = vmul.f32 -1.442695, %v1630_v7 }
0x1fc8   :  { %6024 = vpow2.f32 %v4793_v55 }
0x1fcd   :  { %v1632_v57 = vpop.f32.mrf.mxu1 }
0x1fce   :  { %v6025_v61 = vpop.eup %6024  ;;  %v4794_v60 = vmul.f32 -1.442695, %v1632_v57 }
0x1fcf   :  { %v1641_v63 = vadd.f32 1.0, %v6025_v61 }
0x1fd0   :  { %6026 = vpow2.f32 %v4794_v60 }
0x1fd1   :  { %6028 = vrcp.f32 %v1641_v63  ;;  %vm1648_vm10 = vweird.f32 %v1641_v63  ;;  %v1654_v46 = vand.u32 2147483648, %v1641_v63  ;;  %v1652_v39 = vand.u32 2147483647, %v1641_v63 }
0x1fd3   :  { %v1655_v15 = vor.u32 1.1754944e-38, %v1654_v46  ;;  %vm1653_vm14 = vcmp.eq.f32.partialorder %v1652_v39, 8.507059e+37  ;;  %v6222_v46 = vmov 1  }
0x1fd4   :  { %5481 = vset.pattern.permute.xlu0 %v6222_v46 }
0x1fd6   :  { %v6027_v22 = vpop.eup %6026 }
0x1fd7   :  { %v6029_v6 = vpop.eup %6028  ;;  %v1642_v34 = vadd.f32 1.0, %v6027_v22 }
0x1fd8   :  { %v1644_v9 = vmul.f32 %v6029_v6, %v1641_v63  ;;  %vm1649_vm11 = vweird.f32 %v6029_v6 }
0x1fd9   :  { %6030 = vrcp.f32 %v1642_v34  ;;  %vm6652_vm12 = vmor %vm1648_vm10, %vm1649_vm11  ;;  %vm1663_vm15 = vweird.f32 %v1642_v34  ;;  %v1669_v18 = vand.u32 2147483648, %v1642_v34  ;;  %v1667_v19 = vand.u32 2147483647, %v1642_v34 }
0x1fda   :  { %v1645_v31 = vsub.f32 1.0, %v1644_v9 }
0x1fdb   :  { %v1670_v25 = vor.u32 1.1754944e-38, %v1669_v18  ;;  %vm1668_vm2 = vcmp.eq.f32.partialorder %v1667_v19, 8.507059e+37 }
0x1fdc   :  { %v1646_v32 = vmul.f32 %v6029_v6, %v1645_v31  ;;  %v6676_v31 = vld [vmem:[%s7947_s3 + $0x38] sm:$0xff] }
0x1fde   :  { %v1647_v13 = vadd.f32 %v6029_v6, %v1646_v32 }
0x1fdf   :  { %v6031_v14 = vpop.eup %6030 }
0x1fe0   :  { %v1651_v16 = vsel %vm6652_vm12, %v6029_v6, %v1647_v13  ;;  %v1659_v17 = vmul.f32 %v6031_v14, %v1642_v34  ;;  %vm1664_vm0 = vweird.f32 %v6031_v14  ;;  %v1416_v13 = vpop.permute.xlu1 %1415 }
0x1fe1   :  { %v1656_v24 = vsel %vm1653_vm14, %v1655_v15, %v1651_v16  ;;  %vm1665_vm1 = vmor %vm1663_vm15, %vm1664_vm0  ;;  %vm1844_vm0 = vcmask 1042432  }
0x1fe2   :  { %v1660_v44 = vsub.f32 1.0, %v1659_v17  ;;  %v1673_v28 = vmul.f32 %v1656_v24, %v1630_v7 }
0x1fe4   :  { %v1661_v48 = vmul.f32 %v6031_v14, %v1660_v44  ;;  %v1675_v41 = vsel %vm1532_vm13, %v1673_v28, %v1630_v7 }
0x1fe6   :  { %v1662_v29 = vadd.f32 %v6031_v14, %v1661_v48 }
0x1fe8   :  { %v1666_v21 = vsel %vm1665_vm1, %v6031_v14, %v1662_v29  ;;  %v1458_v29 = vrot.slane %v6588_v20, 2  ;;  %v1870_v20 = vld [vmem:[%s7947_s3 + $0x18] sm:$0xff] }
0x1fe9   :  { %v1671_v35 = vsel %vm1668_vm2, %v1670_v25, %v1666_v21 }
0x1fea   :  { %v1674_v3 = vmul.f32 %v1671_v35, %v1632_v57 }
0x1fec   :  { %v1676_v43 = vsel %vm1532_vm13, %v1674_v3, %v1632_v57 }
0x1fed   :  { %v1677_v45 = vpack.c.bf16 %v1676_v43, %v1675_v41  ;;  %v1871_v43 = vld [vmem:[%s7947_s3 + $0x20] sm:$0xff] }
0x1fef   :  { %4811 = vmatmul.msk.bf16.vlgmr.msra.gmra.mxu2 %vm1614_vm9, %v1677_v45  ;;  %v1868_v45 = vld [vmem:[%s7947_s3 + $0x8] sm:$0xff] }
0x2042   :  { %v1384_v47 = vpop.f32.mrf.mxu3 }
0x2043   :  { %v1385_v51 = vadd.f32 %v6540_v50, %v1384_v47 }
0x2045   :  { %v1393_v52 = vadd.f32 %v1391_v49, %v1385_v51  ;;  %v1418_v33 = vadd.f32 %v1416_v13, %v1385_v51 }
0x2047   :  { %v4763_v4 = vmul.f32 -1.442695, %v1393_v52  ;;  %v4764_v14 = vmul.f32 -1.442695, %v1418_v33 }
0x2049   :  { %6032 = vpow2.f32 %v4763_v4 }
0x204a   :  { %v1386_v53 = vpop.f32.mrf.mxu3 }
0x204f   :  { %v6033_v54 = vpop.eup %6032 }
0x2050   :  { %v1397_v7 = vadd.f32 1.0, %v6033_v54  ;;  %v4818_v54 = vld [vmem:[#allocation2 + $0x108] sm:$0xf] }
0x2052   :  { %6034 = vrcp.f32 %v1397_v7  ;;  %v1409_v61 = vand.u32 2147483648, %v1397_v7  ;;  %v1407_v56 = vand.u32 2147483647, %v1397_v7  ;;  %vm1403_vm5 = vweird.f32 %v1397_v7 }
0x2054   :  { %v1410_v1 = vor.u32 1.1754944e-38, %v1409_v61  ;;  %vm1408_vm7 = vcmp.eq.f32.partialorder %v1407_v56, 8.507059e+37  ;;  %v5367_v61 = vld [vmem:[#allocation2 + $0xfc] sm:$0xf0] }
0x2058   :  { %v6035_v55 = vpop.eup %6034 }
0x2059   :  { %v1399_v58 = vmul.f32 %v6035_v55, %v1397_v7  ;;  %vm1404_vm3 = vweird.f32 %v6035_v55  ;;  %v5368_v7 = vld [vmem:[#allocation2 + $0x10c] sm:$0xf0] }
0x205a   :  { %vm1405_vm6 = vmor %vm1403_vm5, %vm1404_vm3 }
0x205b   :  { %v1400_v57 = vsub.f32 1.0, %v1399_v58  ;;  %v4819_v58 = vor.u32 %v5368_v7, %v4818_v54 }
0x205d   :  { %v1401_v60 = vmul.f32 %v6035_v55, %v1400_v57  ;;  %v4814_v57 = vld [vmem:[#allocation2 + $0xf8] sm:$0xf]  ;;  %1811 = vmatpush.bf16.msra.mxu3 %v4819_v58 }
0x205f   :  { %v1402_v63 = vadd.f32 %v6035_v55, %v1401_v60  ;;  %v4815_v60 = vor.u32 %v5367_v61, %v4814_v57 }
0x2061   :  { %v1406_v50 = vsel %vm1405_vm6, %v6035_v55, %v1402_v63  ;;  %v1869_v55 = vld [vmem:[%s7947_s3 + $0x10] sm:$0xff]  ;;  %1812 = vmatpush.bf16.msra.mxu3 %v4815_v60 }
0x2062   :  { %v1411_v22 = vsel %vm1408_vm7, %v1410_v1, %v1406_v50 }
0x2063   :  { %v1444_v6 = vmul.f32 %v1442_v62, %v1411_v22  ;;  %v6739_v62 = vld [vmem:[%s7945_s1 + $0x18] sm:$0xff] }
0x2065   :  { %1446 = vrot.lane.b32.xlu0 %v1444_v6, %s6217_s23  ;;  %s6229_s23 = smov 124  }
0x2072   :  { %v6666_v34 = vpop.f32.mrf.mxu2 }
0x2073   :  { %1744 = vrot.lane.b32.xlu1 %v6666_v34, %s6220_s25 }
0x207a   :  { %v6669_v9 = vpop.f32.mrf.mxu2 }
0x207b   :  { %1742 = vrot.lane.b32.xlu1 %v6669_v9, %s6221_s26 }
0x2083   :  { %1908 = vperm.xlu1 %5479, %v6676_v31  }
0x208b   :  { %5482 = vset.pattern.permute.xlu1 %v6222_v46 }
0x208c   :  { %1953 = vperm.xlu1 %5482, %v1875_v10  }
0x2094   :  { %5483 = vset.pattern.permute.xlu1 %v6216_v0 }
0x2095   :  { %1903 = vperm.xlu1 %5483, %v1873_v42  }
0x20d7   :  { %v1447_v32 = vpop.permute.xlu0 %1446 }
0x20d8   :  { %v1449_v39 = vadd.f32 %v1447_v32, %v1385_v51  ;;  %v6722_v51 = vld [vmem:[%s7945_s1] sm:$0xff] }
0x20da   :  { %6036 = vtanh.f32 %v1449_v39 }
0x20db   :  { %6038 = vpow2.f32 %v4764_v14 }
0x20e0   :  { %v6037_v11 = vpop.eup %6036 }
0x20e1   :  { %1453 = vrot.lane.b32.xlu2 %v6037_v11, %s6219_s27  ;;  %v6039_v15 = vpop.eup %6038 }
0x20e2   :  { %v1422_v16 = vadd.f32 1.0, %v6039_v15 }
0x20e4   :  { %6040 = vrcp.f32 %v1422_v16  ;;  %v1434_v24 = vand.u32 2147483648, %v1422_v16  ;;  %vm1428_vm10 = vweird.f32 %v1422_v16  ;;  %v1432_v48 = vand.u32 2147483647, %v1422_v16 }
0x20e5   :  { %v1745_v19 = vpop.permute.xlu1 %1744 }
0x20e6   :  { %2013 = vperm.xlu1 %5483, %v1745_v19   ;;  %v1435_v26 = vor.u32 1.1754944e-38, %v1434_v24  ;;  %vm1433_vm12 = vcmp.eq.f32.partialorder %v1432_v48, 8.507059e+37 }
0x20e9   :  { %1746 = vrot.lane.b32.xlu2 %v6669_v9, %s6220_s25  ;;  %s6225_s25 = smov 84  }
0x20ea   :  { %v6041_v17 = vpop.eup %6040 }
0x20eb   :  { %v1424_v18 = vmul.f32 %v6041_v17, %v1422_v16  ;;  %vm1429_vm13 = vweird.f32 %v6041_v17 }
0x20ec   :  { %vm1430_vm11 = vmor %vm1428_vm10, %vm1429_vm13  ;;  %vm1840_vm13 = vcmask 179200   ;;  %vm7950_vm10 = vcmask 1047912  }
0x20ed   :  { %v1425_v8 = vsub.f32 1.0, %v1424_v18  ;;  %v1743_v53 = vpop.permute.xlu1 %1742 }
0x20ee   :  { %1893 = vperm.xlu1 %5483, %v1871_v43  }
0x20ef   :  { %v1426_v44 = vmul.f32 %v6041_v17, %v1425_v8 }
0x20f1   :  { %1736 = vrot.lane.b32.xlu2 %v6666_v34, %s6223_s5  ;;  %v1427_v23 = vadd.f32 %v6041_v17, %v1426_v44 }
0x20f3   :  { %v1431_v25 = vsel %vm1430_vm11, %v6041_v17, %v1427_v23 }
0x20f4   :  { %v1436_v27 = vsel %vm1433_vm12, %v1435_v26, %v1431_v25 }
0x20f5   :  { %v1451_v28 = vsub.f32 1.0, %v1436_v27  ;;  %v1460_v21 = vmul.f32 %v1458_v29, %v1436_v27  ;;  %v1909_v63 = vpop.permute.xlu1 %1908 }
0x20f6   :  { %5487 = vset.pattern.permute.xlu1 %v6222_v46 }
0x20f7   :  { %1937 = vperm.xlu1 %5487, %v1871_v43  }
0x20f9   :  { %1913 = vperm.xlu2 %5480, %v1875_v10  }
0x20fe   :  { %v1954_v50 = vpop.permute.xlu1 %1953 }
0x20ff   :  { %5489 = vset.pattern.permute.xlu1 %v6216_v0 }
0x2100   :  { %1878 = vperm.xlu1 %5489, %v1868_v45  }
0x2101   :  { %1898 = vperm.xlu2 %5480, %v1872_v12  }
0x2108   :  { %5491 = vset.pattern.permute.xlu1 %v6222_v46 }
0x2109   :  { %5484 = vset.pattern.permute.xlu2 %v6222_v46  ;;  %1929 = vperm.xlu1 %5491, %v1869_v55  }
0x210a   :  { %1941 = vperm.xlu2 %5484, %v1872_v12  }
0x2111   :  { %5492 = vset.pattern.permute.xlu1 %v6216_v0 }
0x2112   :  { %5485 = vset.pattern.permute.xlu2 %v6216_v0 }
0x213b   :  { %v1454_v30 = vpop.permute.xlu2 %1453 }
0x213c   :  { %v1456_v35 = vmul.f32 %v1454_v30, %v1451_v28 }
0x213e   :  { %v1461_v59 = vadd.f32 %v1460_v21, %v1456_v35 }
0x2140   :  { %v1469_v37 = vrot.slane %v1461_v59, 2 }
0x2142   :  { %v1478_v41 = vsel %vm1474_vm8, %v6591_v2, %v1469_v37 }
0x2143   :  { %v1747_v3 = vpop.permute.xlu2 %1746  ;;  %v1780_v5 = vpack.c.bf16 %v1478_v41, %v6470_v40 }
0x2144   :  { %2017 = vperm.xlu2 %5485, %v1747_v3  }
0x2145   :  { %1788 = vrot.lane.b32.xlu0 %v1780_v5, %s6219_s27  ;;  %v1828_v5 = vld [vmem:[#allocation2 + $0x128] sm:$0x7] }
0x214b   :  { %v1737_v2 = vpop.permute.xlu2 %1736 }
0x214c   :  { %5486 = vset.pattern.permute.xlu2 %v6222_v46  ;;  %v1904_v46 = vpop.permute.xlu1 %1903 }
0x214d   :  { %1740 = vrot.lane.b32.xlu0 %v6666_v34, %s6221_s26  ;;  %1933 = vperm.xlu2 %5486, %v1870_v20   ;;  %v1921_v19 = vmul.f32 %v1904_v46, %v6739_v62 }
0x2153   :  { %v1914_v40 = vpop.permute.xlu2 %1913 }
0x2154   :  { %v1923_v22 = vmul.f32 %v1914_v40, %v6739_v62 }
0x2155   :  { %1738 = vrot.lane.b32.xlu0 %v6669_v9, %s6223_s5  ;;  %5488 = vset.pattern.permute.xlu2 %v6216_v0 }
0x2158   :  { %v2014_v33 = vpop.permute.xlu1 %2013 }
0x215b   :  { %v1899_v47 = vpop.permute.xlu2 %1898 }
0x215c   :  { %v1920_v49 = vmul.f32 %v1899_v47, %v6722_v51 }
0x215d   :  { %1949 = vperm.xlu0 %5481, %v6676_v31   ;;  %v1963_v31 = vadd.f32 %v1954_v50, %v1923_v22 }
0x215f   :  { %v1979_v32 = vmul.f32 0.4, %v1963_v31  ;;  %vm1971_vm8 = vcmp.gt.f32.partialorder %v1963_v31, 0.0 }
0x2160   :  { %v1894_v44 = vpop.permute.xlu1 %1893 }
0x2161   :  { %v6743_v11 = vsel %vm1971_vm8, %v1963_v31, %v1979_v32  ;;  %v1919_v61 = vmul.f32 %v1894_v44, %v6739_v62  ;;  %vm2077_vm8 = vcmp.ge.s32.totalorder %v6637_v38, 1 }
0x2164   :  { %v1942_v52 = vpop.permute.xlu2 %1941 }
0x2165   :  { %1945 = vperm.xlu0 %5481, %v1873_v42   ;;  %v6726_v4 = vadd.f32 %v1942_v52, %v1920_v49  ;;  %v4823_v52 = vld [vmem:[#allocation2 + $0x118] sm:$0xf] }
0x2167   :  { %v1976_v27 = vmul.f32 0.4, %v6726_v4  ;;  %vm1968_vm15 = vcmp.gt.f32.partialorder %v6726_v4, 0.0 }
0x2169   :  { %v1938_v26 = vpop.permute.xlu1 %1937  ;;  %v6765_v30 = vsel %vm1968_vm15, %v6726_v4, %v1976_v27  ;;  %v5369_v4 = vld [vmem:[#allocation2 + $0x11c] sm:$0xf0] }
0x216d   :  { %1925 = vperm.xlu0 %5481, %v1868_v45  }
0x2172   :  { %v1879_v37 = vpop.permute.xlu1 %1878 }
0x2173   :  { %v1916_v49 = vmul.f32 %v1879_v37, %v6722_v51 }
0x2175   :  { %5490 = vset.pattern.permute.xlu0 %v6216_v0  ;;  %v1922_v0 = vmul.f32 %v1909_v63, %v6722_v51 }
0x2176   :  { %1888 = vperm.xlu0 %5490, %v1870_v20   ;;  %v1836_v20 = vunpack.c.l.b16 %v1828_v5 }
0x2178   :  { %v1838_v40 = vpack.c.b16 %v1836_v20, %v1836_v20 }
0x217a   :  { %v1846_v45 = vsel %vm1844_vm0, %v1838_v40, 0  ;;  %vm7949_vm0 = vcmask 662528  }
0x217b   :  { %v1930_v47 = vpop.permute.xlu1 %1929  ;;  %1854 = vmatpush.bf16.msra.mxu0 %v1846_v45 }
0x217e   :  { %2009 = vperm.xlu0 %5490, %v1743_v53   ;;  %v4824_v53 = vor.u32 %v5369_v4, %v4823_v52 }
0x2180   :  { %1855 = vmatpush.bf16.msra.mxu0 %v4824_v53 }
0x2184   :  { %2638 = vmatpush.bf16.msrb.mxu0 %v6635_v36 }
0x2186   :  { %1993 = vperm.xlu0 %5490, %v6669_v9  }
0x219e   :  { %v2018_v12 = vpop.permute.xlu2 %2017 }
0x219f   :  { %v6748_v15 = vadd.f32 %v2018_v12, %v6743_v11 }
0x21a7   :  { %v1934_v48 = vpop.permute.xlu2 %1933 }
0x21b7   :  { %v1789_v56 = vpop.permute.xlu0 %1788 }
0x21b8   :  { %4820 = vmatmul.msk.bf16.vlgmr.msra.gmra.mxu3 %vm65_vm4, %v1789_v56 }
0x21bf   :  { %v1741_v1 = vpop.permute.xlu0 %1740 }
0x21c0   :  { %2005 = vperm.xlu2 %5488, %v1741_v1   ;;  %v1959_v1 = vadd.f32 %v1938_v26, %v1919_v61 }
0x21c2   :  { %vm1967_vm5 = vcmp.gt.f32.partialorder %v1959_v1, 0.0 }
0x21c7   :  { %v1739_v6 = vpop.permute.xlu0 %1738 }
0x21c8   :  { %2001 = vperm.xlu1 %5492, %v1739_v6   ;;  %1883 = vperm.xlu2 %5488, %v1869_v55  }
0x21cf   :  { %v1950_v39 = vpop.permute.xlu0 %1949 }
0x21d0   :  { %v1962_v10 = vadd.f32 %v1950_v39, %v1922_v0  ;;  %1997 = vperm.xlu2 %5488, %v1737_v2  }
0x21d2   :  { %vm1970_vm4 = vcmp.gt.f32.partialorder %v1962_v10, 0.0  ;;  %v1978_v13 = vmul.f32 0.4, %v1962_v10 }
0x21d4   :  { %v6745_v14 = vsel %vm1970_vm4, %v1962_v10, %v1978_v13  ;;  %vm2120_vm4 = vcmp.lt.s32.totalorder %v6637_v38, 44 }
0x21d5   :  { %v6751_v16 = vadd.f32 %v2014_v33, %v6745_v14  ;;  %vm6880_vm15 = vmpackc.low %vm2120_vm4, %vm2120_vm4 }
0x21d7   :  { %v5493_v17 = vpack.i.bf16 %v6748_v15, %v6751_v16  ;;  %v2162_v18 = vpack.c.bf16 %v6748_v15, %v6751_v16  ;;  %v1946_v42 = vpop.permute.xlu0 %1945 }
0x21d8   :  { %1989 = vperm.xlu2 %5488, %v6666_v34   ;;  %v1961_v24 = vadd.f32 %v1946_v42, %v1921_v19 }
0x21d9   :  { %5494 = vrot.lane.b32.xlu1 %v5493_v17, %s6224_s21  ;;  %2285 = vmatpush.bf16.msrb.mxu3 %v2162_v18  ;;  %v5896_v17 = vld [vmem:[%s7947_s3 + $0x3] ss:$0 sm:$0xff] }
0x21da   :  { %v1977_v25 = vmul.f32 0.4, %v1961_v24  ;;  %vm1969_vm14 = vcmp.gt.f32.partialorder %v1961_v24, 0.0 }
0x21dc   :  { %v6762_v28 = vsel %vm1969_vm14, %v1961_v24, %v1977_v25  ;;  %vm6876_vm14 = vmpackc.low %vm2077_vm8, %vm2077_vm8 }
0x21df   :  { %v1926_v8 = vpop.permute.xlu0 %1925 }
0x21e0   :  { %v1956_v7 = vadd.f32 %v1926_v8, %v1916_v49 }
0x21e2   :  { %v1972_v60 = vmul.f32 0.4, %v1956_v7  ;;  %vm1964_vm2 = vcmp.gt.f32.partialorder %v1956_v7, 0.0 }
0x21e4   :  { %v6785_v22 = vsel %vm1964_vm2, %v1956_v7, %v1972_v60 }
0x21e8   :  { %v1889_v23 = vpop.permute.xlu0 %1888 }
0x21e9   :  { %v1918_v57 = vmul.f32 %v1889_v23, %v6722_v51 }
0x21eb   :  { %v1958_v50 = vadd.f32 %v1934_v48, %v1918_v57 }
0x21ed   :  { %v1974_v0 = vmul.f32 0.4, %v1958_v50  ;;  %vm1966_vm3 = vcmp.gt.f32.partialorder %v1958_v50, 0.0 }
0x21ef   :  { %v6796_v32 = vsel %vm1966_vm3, %v1958_v50, %v1974_v0 }
0x21f0   :  { %v2010_v29 = vpop.permute.xlu0 %2009 }
0x21f1   :  { %v6768_v35 = vadd.f32 %v2010_v29, %v6762_v28 }
0x21f8   :  { %v1994_v63 = vpop.permute.xlu0 %1993 }
0x221a   :  { %v2006_v21 = vpop.permute.xlu2 %2005 }
0x221b   :  { %v6771_v59 = vadd.f32 %v2006_v21, %v6765_v30 }
0x221d   :  { %v5498_v41 = vpack.i.bf16 %v6768_v35, %v6771_v59  ;;  %v2161_v3 = vpack.c.bf16 %v6768_v35, %v6771_v59 }
0x221f   :  { %5499 = vrot.lane.b32.xlu2 %v5498_v41, %s6224_s21  ;;  %2286 = vmatpush.bf16.msrb.mxu3 %v2161_v3 }
0x2222   :  { %v1884_v2 = vpop.permute.xlu2 %1883 }
0x2223   :  { %v1917_v43 = vmul.f32 %v1884_v2, %v6739_v62  ;;  %v1975_v62 = vmul.f32 0.4, %v1959_v1 }
0x2225   :  { %v1957_v54 = vadd.f32 %v1930_v47, %v1917_v43  ;;  %v6798_v39 = vsel %vm1967_vm5, %v1959_v1, %v1975_v62 }
0x2227   :  { %v1973_v58 = vmul.f32 0.4, %v1957_v54  ;;  %vm1965_vm1 = vcmp.gt.f32.partialorder %v1957_v54, 0.0 }
0x2229   :  { %v6783_v56 = vsel %vm1965_vm1, %v1957_v54, %v1973_v58 }
0x222a   :  { %v1998_v55 = vpop.permute.xlu2 %1997  ;;  %v6788_v31 = vadd.f32 %v1994_v63, %v6783_v56 }
0x222b   :  { %v6801_v12 = vadd.f32 %v1998_v55, %v6796_v32 }
0x2232   :  { %v1990_v6 = vpop.permute.xlu2 %1989 }
0x2233   :  { %v6791_v46 = vadd.f32 %v1990_v6, %v6785_v22 }
0x2235   :  { %v5508_v51 = vpack.i.bf16 %v6788_v31, %v6791_v46  ;;  %v2159_v44 = vpack.c.bf16 %v6788_v31, %v6791_v46 }
0x2237   :  { %5509 = vrot.lane.b32.xlu2 %v5508_v51, %s6224_s21 }
0x223a   :  { %v2002_v10 = vpop.permute.xlu1 %2001 }
0x223b   :  { %v6804_v13 = vadd.f32 %v2002_v10, %v6798_v39  ;;  %v1814_v33 = vpop.f32.mrf.mxu3 }
0x223c   :  { %v1815_v8 = vadd.f32 %v5896_v17, %v1814_v33  ;;  %v5897_v33 = vld [vmem:[%s7947_s3 + $0x4] ss:$0 sm:$0xff]  ;;  %s6226_s3 = smov 121  }
0x223d   :  { %v5503_v18 = vpack.i.bf16 %v6804_v13, %v6801_v12  ;;  %v2160_v42 = vpack.c.bf16 %v6804_v13, %v6801_v12 }
0x223e   :  { %v1821_v23 = vmul.f32 0.4, %v1815_v8  ;;  %vm1819_vm6 = vcmp.gt.f32.partialorder %v1815_v8, 0.0 }
0x223f   :  { %5504 = vrot.lane.b32.xlu1 %v5503_v18, %s6224_s21  ;;  %2287 = vmatpush.bf16.msrb.mxu3 %v2160_v42 }
0x2240   :  { %v1823_v25 = vsel %vm1819_vm6, %v1815_v8, %v1821_v23 }
0x2243   :  { %v1816_v19 = vpop.f32.mrf.mxu3  ;;  %2288 = vmatpush.bf16.msrb.mxu3 %v2159_v44 }
0x2244   :  { %v1817_v24 = vadd.f32 %v5896_v17, %v1816_v19 }
0x2246   :  { %vm1820_vm7 = vcmp.gt.f32.partialorder %v1817_v24, 0.0  ;;  %v1822_v48 = vmul.f32 0.4, %v1817_v24 }
0x2248   :  { %v1824_v26 = vsel %vm1820_vm7, %v1817_v24, %v1822_v48 }
0x2249   :  { %v1825_v27 = vpack.c.bf16 %v1824_v26, %v1823_v25 }
0x224b   :  { %4825 = vmatmul.msk.bf16.vlgmr.msra.gmra.mxu0 %vm1840_vm13, %v1825_v27  ;;  %v5495_v29 = vpop.permute.xlu1 %5494 }
0x224c   :  { %v5497_v21 = vunpack.i.h.bf16 %v5495_v29  ;;  %v5496_v37 = vunpack.i.l.bf16 %v5495_v29 }
0x224e   :  { %v2049_v41 = vsel %vm7950_vm10, %v5496_v37, %v6751_v16  ;;  %v2052_v3 = vsel %vm7950_vm10, %v5497_v21, %v6748_v15 }
0x224f   :  { %v5513_v5 = vpack.i.bf16 %v2052_v3, %v2049_v41 }
0x2251   :  { %5514 = vrot.lane.b32.xlu0 %v5513_v5, %s6224_s21 }
0x2279   :  { %v5500_v20 = vpop.permute.xlu2 %5499 }
0x227a   :  { %v5502_v2 = vunpack.i.h.bf16 %v5500_v20  ;;  %v5501_v40 = vunpack.i.l.bf16 %v5500_v20 }
0x227c   :  { %v2043_v43 = vsel %vm7950_vm10, %v5501_v40, %v6771_v59  ;;  %v2046_v45 = vsel %vm7950_vm10, %v5502_v2, %v6768_v35 }
0x227d   :  { %v5518_v47 = vpack.i.bf16 %v2046_v45, %v2043_v43 }
0x227f   :  { %5519 = vrot.lane.b32.xlu1 %v5518_v47, %s6224_s21 }
0x2291   :  { %v5510_v49 = vpop.permute.xlu2 %5509 }
0x2292   :  { %v5512_v52 = vunpack.i.h.bf16 %v5510_v49  ;;  %v5511_v4 = vunpack.i.l.bf16 %v5510_v49 }
0x2294   :  { %v2031_v53 = vsel %vm7950_vm10, %v5511_v4, %v6791_v46  ;;  %v2034_v54 = vsel %vm7950_vm10, %v5512_v52, %v6788_v31  ;;  %v1482_v52 = vld [vmem:[%s7945_s1 + $0x20] sm:$0xff] }
0x2295   :  { %v5528_v7 = vpack.i.bf16 %v2034_v54, %v2031_v53 }
0x2297   :  { %5529 = vrot.lane.b32.xlu0 %v5528_v7, %s6224_s21 }
0x22b1   :  { %v5505_v55 = vpop.permute.xlu1 %5504 }
0x22b2   :  { %v5507_v58 = vunpack.i.h.bf16 %v5505_v55  ;;  %v5506_v57 = vunpack.i.l.bf16 %v5505_v55 }
0x22b4   :  { %v2037_v61 = vsel %vm7950_vm10, %v5506_v57, %v6801_v12  ;;  %v2040_v60 = vsel %vm7950_vm10, %v5507_v58, %v6804_v13 }
0x22b5   :  { %v5523_v63 = vpack.i.bf16 %v2040_v60, %v2037_v61 }
0x22b7   :  { %5524 = vrot.lane.b32.xlu2 %v5523_v63, %s6224_s21 }
0x22c3   :  { %v5515_v1 = vpop.permute.xlu0 %5514 }
0x22c4   :  { %v5517_v50 = vunpack.i.h.bf16 %v5515_v1  ;;  %v5516_v6 = vunpack.i.l.bf16 %v5515_v1 }
0x22c6   :  { %v2075_v51 = vsel %vm7950_vm10, %v5516_v6, %v6751_v16  ;;  %v2076_v62 = vsel %vm7950_vm10, %v5517_v50, %v6748_v15 }
0x22c7   :  { %v5543_v0 = vpack.i.bf16 %v2076_v62, %v2075_v51 }
0x22c8   :  { %v1857_v10 = vpop.f32.mrf.mxu0 }
0x22c9   :  { %5544 = vrot.lane.b32.xlu0 %v5543_v0, %s6223_s5  ;;  %5534 = vrot.lane.b32.xlu1 %v5543_v0, %s6225_s25  ;;  %v1858_v17 = vadd.f32 %v5897_v33, %v1857_v10 }
0x22cb   :  { %v1864_v42 = vmul.f32 0.4, %v1858_v17  ;;  %vm1862_vm11 = vcmp.gt.f32.partialorder %v1858_v17, 0.0 }
0x22cd   :  { %v1866_v44 = vsel %vm1862_vm11, %v1858_v17, %v1864_v42 }
0x22d0   :  { %v1859_v18 = vpop.f32.mrf.mxu0 }
0x22d1   :  { %v1860_v8 = vadd.f32 %v5897_v33, %v1859_v18 }
0x22d3   :  { %vm1863_vm12 = vcmp.gt.f32.partialorder %v1860_v8, 0.0  ;;  %v1865_v16 = vmul.f32 0.4, %v1860_v8 }
0x22d5   :  { %v1867_v15 = vsel %vm1863_vm12, %v1860_v8, %v1865_v16  ;;  %v4828_v8 = vld [vmem:[#allocation2 + $0x130] sm:$0xf]  ;;  %v5371_v16 = vld [vmem:[#allocation2 + $0x134] sm:$0xf0] }
0x22d6   :  { %v6845_v19 = vpack.c.bf16 %v1867_v15, %v1866_v44 }
0x22d8   :  { %2337 = vmatpush.bf16.msra.mxu1 %v6845_v19 }
0x22f1   :  { %v5520_v23 = vpop.permute.xlu1 %5519 }
0x22f2   :  { %v5522_v24 = vunpack.i.h.bf16 %v5520_v23  ;;  %v5521_v48 = vunpack.i.l.bf16 %v5520_v23 }
0x22f4   :  { %v2073_v25 = vsel %vm7950_vm10, %v5521_v48, %v6771_v59  ;;  %v2074_v26 = vsel %vm7950_vm10, %v5522_v24, %v6768_v35  ;;  %v4829_v24 = vor.u32 %v5371_v16, %v4828_v8  ;;  %v4876_v8 = vld [vmem:[#allocation2 + $0x190] sm:$0xf]  ;;  %v5383_v16 = vld [vmem:[#allocation2 + $0x194] sm:$0xf0] }
0x22f5   :  { %v5538_v27 = vpack.i.bf16 %v2074_v26, %v2073_v25 }
0x22f7   :  { %5539 = vrot.lane.b32.xlu2 %v5538_v27, %s6225_s25 }
0x22ff   :  { %5554 = vrot.lane.b32.xlu2 %v5538_v27, %s6223_s5 }
0x2309   :  { %v5530_v29 = vpop.permute.xlu0 %5529 }
0x230a   :  { %v5532_v21 = vunpack.i.h.bf16 %v5530_v29  ;;  %v5531_v37 = vunpack.i.l.bf16 %v5530_v29 }
0x230c   :  { %v2069_v41 = vsel %vm7950_vm10, %v5531_v37, %v6791_v46  ;;  %v2070_v3 = vsel %vm7950_vm10, %v5532_v21, %v6788_v31  ;;  %v5370_v21 = vld [vmem:[#allocation2 + $0x134] sm:$0xf]  ;;  %v4830_v37 = vld [vmem:[#allocation2 + $0x138] sm:$0xf0] }
0x230d   :  { %v5558_v5 = vpack.i.bf16 %v2070_v3, %v2069_v41 }
0x230f   :  { %5559 = vrot.lane.b32.xlu0 %v5558_v5, %s6225_s25  ;;  %5569 = vrot.lane.b32.xlu2 %v5558_v5, %s6223_s5 }
0x2311   :  { %v5525_v35 = vpop.permute.xlu2 %5524 }
0x2312   :  { %v5527_v59 = vunpack.i.h.bf16 %v5525_v35  ;;  %v5526_v20 = vunpack.i.l.bf16 %v5525_v35  ;;  %v4833_v35 = vor.u32 %v5370_v21, %v4830_v37 }
0x2314   :  { %v2071_v2 = vsel %vm7950_vm10, %v5526_v20, %v6801_v12  ;;  %v2072_v40 = vsel %vm7950_vm10, %v5527_v59, %v6804_v13  ;;  %v4836_v59 = vld [vmem:[#allocation2 + $0x140] sm:$0xf]  ;;  %v5373_v20 = vld [vmem:[#allocation2 + $0x144] sm:$0xf0] }
0x2315   :  { %v5548_v43 = vpack.i.bf16 %v2072_v40, %v2071_v2  ;;  %v4837_v40 = vor.u32 %v5373_v20, %v4836_v59 }
0x2317   :  { %1760 = vrot.lane.b32.xlu0 %v6666_v34, %s6226_s3  ;;  %5549 = vrot.lane.b32.xlu1 %v5548_v43, %s6225_s25 }
0x2318   :  { %1756 = vrot.lane.b32.xlu2 %v6666_v34, %s6227_s28 }
0x231f   :  { %1758 = vrot.lane.b32.xlu0 %v6669_v9, %s6227_s28  ;;  %5564 = vrot.lane.b32.xlu1 %v5548_v43, %s6223_s5  ;;  %v5372_v43 = vld [vmem:[#allocation2 + $0x144] sm:$0xf] }
0x2320   :  { %1754 = vrot.lane.b32.xlu2 %v6669_v9, %s6228_s29 }
0x2327   :  { %1748 = vrot.lane.b32.xlu0 %v6666_v34, %s6229_s23  ;;  %1762 = vrot.lane.b32.xlu1 %v6669_v9, %s6226_s3 }
0x232f   :  { %1752 = vrot.lane.b32.xlu1 %v6666_v34, %s6228_s29 }
0x2337   :  { %1750 = vrot.lane.b32.xlu1 %v6669_v9, %s6229_s23 }
0x233b   :  { %v5545_v31 = vpop.permute.xlu0 %5544  ;;  %v5535_v46 = vpop.permute.xlu1 %5534 }
0x233c   :  { %v5547_v13 = vunpack.i.h.bf16 %v5545_v31  ;;  %v5546_v45 = vunpack.i.l.bf16 %v5545_v31  ;;  %v5537_v47 = vunpack.i.h.bf16 %v5535_v46  ;;  %v5536_v49 = vunpack.i.l.bf16 %v5535_v46  ;;  %v4838_v31 = vld [vmem:[#allocation2 + $0x148] sm:$0xf0] }
0x233e   :  { %v4903_v4 = vpack.c.bf16 %v5547_v13, %v5546_v45  ;;  %v4891_v53 = vpack.c.bf16 %v5537_v47, %v5536_v49  ;;  %v4841_v13 = vor.u32 %v5372_v43, %v4838_v31  ;;  %v4844_v45 = vld [vmem:[#allocation2 + $0x150] sm:$0xf]  ;;  %v5375_v47 = vld [vmem:[#allocation2 + $0x154] sm:$0xf0] }
0x233f   :  { %v4845_v49 = vor.u32 %v5375_v47, %v4844_v45 }
0x2340   :  { %4892 = vmatpush.bf16.msk.msrb.mxu3 %vm6876_vm14, %v4891_v53  ;;  %4904 = vmatpush.bf16.msk.msra.mxu1 %vm6880_vm15, %v4903_v4  ;;  %v5374_v4 = vld [vmem:[#allocation2 + $0x154] sm:$0xf]  ;;  %v4846_v53 = vld [vmem:[#allocation2 + $0x158] sm:$0xf0] }
0x2351   :  { %v5540_v54 = vpop.permute.xlu2 %5539 }
0x2352   :  { %v5542_v7 = vunpack.i.h.bf16 %v5540_v54  ;;  %v5541_v55 = vunpack.i.l.bf16 %v5540_v54  ;;  %v4849_v54 = vor.u32 %v5374_v4, %v4846_v53 }
0x2354   :  { %v4894_v58 = vpack.c.bf16 %v5542_v7, %v5541_v55  ;;  %v4852_v7 = vld [vmem:[#allocation2 + $0x160] sm:$0xf]  ;;  %v5377_v55 = vld [vmem:[#allocation2 + $0x164] sm:$0xf0] }
0x2356   :  { %4895 = vmatpush.bf16.msk.msrb.mxu3 %vm6876_vm14, %v4894_v58  ;;  %v4853_v58 = vor.u32 %v5377_v55, %v4852_v7 }
0x2359   :  { %v5555_v57 = vpop.permute.xlu2 %5554 }
0x235a   :  { %v5557_v61 = vunpack.i.h.bf16 %v5555_v57  ;;  %v5556_v60 = vunpack.i.l.bf16 %v5555_v57  ;;  %v5376_v57 = vld [vmem:[#allocation2 + $0x164] sm:$0xf] }
0x235c   :  { %v4906_v63 = vpack.c.bf16 %v5557_v61, %v5556_v60  ;;  %v4854_v61 = vld [vmem:[#allocation2 + $0x168] sm:$0xf0] }
0x235d   :  { %v4857_v60 = vor.u32 %v5376_v57, %v4854_v61 }
0x235e   :  { %4907 = vmatpush.bf16.msk.msra.mxu1 %vm6880_vm15, %v4906_v63  ;;  %v4860_v63 = vld [vmem:[#allocation2 + $0x170] sm:$0xf] }
0x2369   :  { %v5570_v1 = vpop.permute.xlu2 %5569 }
0x236a   :  { %v5572_v27 = vunpack.i.h.bf16 %v5570_v1  ;;  %v5571_v29 = vunpack.i.l.bf16 %v5570_v1  ;;  %v5379_v1 = vld [vmem:[#allocation2 + $0x174] sm:$0xf0] }
0x236c   :  { %v4912_v41 = vpack.c.bf16 %v5572_v27, %v5571_v29  ;;  %v5384_v27 = vld [vmem:[#allocation2 + $0x1a4] sm:$0xf]  ;;  %v4886_v29 = vld [vmem:[#allocation2 + $0x1a8] sm:$0xf0] }
0x236d   :  { %v4889_v21 = vor.u32 %v5384_v27, %v4886_v29 }
0x2372   :  { %v1757_v50 = vpop.permute.xlu2 %1756 }
0x2373   :  { %2773 = vperm.xlu1 %5492, %v1757_v50   ;;  %v4861_v50 = vor.u32 %v5379_v1, %v4860_v63 }
0x237a   :  { %v1755_v6 = vpop.permute.xlu2 %1754 }
0x237b   :  { %2769 = vperm.xlu1 %5492, %v1755_v6   ;;  %v5378_v6 = vld [vmem:[#allocation2 + $0x174] sm:$0xf] }
0x2381   :  { %v5560_v51 = vpop.permute.xlu0 %5559 }
0x2382   :  { %v5562_v17 = vunpack.i.h.bf16 %v5560_v51  ;;  %v5561_v18 = vunpack.i.l.bf16 %v5560_v51  ;;  %v4862_v51 = vld [vmem:[#allocation2 + $0x178] sm:$0xf0] }
0x2384   :  { %v4900_v44 = vpack.c.bf16 %v5562_v17, %v5561_v18  ;;  %v5380_v17 = vld [vmem:[#allocation2 + $0x184] sm:$0xf]  ;;  %v4870_v18 = vld [vmem:[#allocation2 + $0x188] sm:$0xf0] }
0x2389   :  { %v1761_v62 = vpop.permute.xlu0 %1760  ;;  %v5550_v0 = vpop.permute.xlu1 %5549 }
0x238a   :  { %v5552_v10 = vunpack.i.h.bf16 %v5550_v0  ;;  %v5551_v33 = vunpack.i.l.bf16 %v5550_v0  ;;  %2781 = vperm.xlu2 %5488, %v1761_v62   ;;  %v4865_v62 = vor.u32 %v5378_v6, %v4862_v51  ;;  %v4868_v0 = vld [vmem:[#allocation2 + $0x180] sm:$0xf] }
0x238c   :  { %v4897_v42 = vpack.c.bf16 %v5552_v10, %v5551_v33  ;;  %v5381_v10 = vld [vmem:[#allocation2 + $0x184] sm:$0xf0] }
0x238d   :  { %v4869_v33 = vor.u32 %v5381_v10, %v4868_v0 }
0x238e   :  { %4898 = vmatpush.bf16.msk.msrb.mxu3 %vm6876_vm14, %v4897_v42  ;;  %v4873_v42 = vor.u32 %v5380_v17, %v4870_v18 }
0x2391   :  { %v1759_v15 = vpop.permute.xlu0 %1758  ;;  %v5565_v23 = vpop.permute.xlu1 %5564 }
0x2392   :  { %v5567_v48 = vunpack.i.h.bf16 %v5565_v23  ;;  %v5566_v25 = vunpack.i.l.bf16 %v5565_v23  ;;  %2777 = vperm.xlu2 %5488, %v1759_v15   ;;  %4901 = vmatpush.bf16.msk.msrb.mxu3 %vm6876_vm14, %v4900_v44  ;;  %v4877_v44 = vor.u32 %v5383_v16, %v4876_v8  ;;  %v5382_v15 = vld [vmem:[#allocation2 + $0x194] sm:$0xf]  ;;  %v4878_v23 = vld [vmem:[#allocation2 + $0x198] sm:$0xf0] }
0x2394   :  { %v4909_v26 = vpack.c.bf16 %v5567_v48, %v5566_v25  ;;  %v4884_v48 = vld [vmem:[#allocation2 + $0x1a0] sm:$0xf]  ;;  %v5385_v25 = vld [vmem:[#allocation2 + $0x1a4] sm:$0xf0] }
0x2395   :  { %2293 = vmatmul.bf16.vlgmr.msrb.gmra.mxu3 %v4829_v24  ;;  %v4881_v24 = vor.u32 %v5382_v15, %v4878_v23 }
0x2396   :  { %4910 = vmatpush.bf16.msk.msra.mxu1 %vm6880_vm15, %v4909_v26  ;;  %v4885_v26 = vor.u32 %v5385_v25, %v4884_v48 }
0x2399   :  { %v1749_v3 = vpop.permute.xlu0 %1748  ;;  %v1763_v5 = vpop.permute.xlu1 %1762 }
0x239a   :  { %2785 = vperm.xlu0 %5490, %v1763_v5   ;;  %2757 = vperm.xlu2 %5488, %v1749_v3  }
0x239b   :  { %4913 = vmatpush.bf16.msk.msra.mxu1 %vm6880_vm15, %v4912_v41 }
0x239e   :  { %4914 = vmatmul.msk.bf16.vlgmr.msra.gmra.mxu1 %vm7949_vm0, %v4833_v35 }
0x239f   :  { %3399 = vmatpush.bf16.msrb.mxu1 %v6635_v36 }
0x23a1   :  { %v1753_v2 = vpop.permute.xlu1 %1752 }
0x23a2   :  { %2765 = vperm.xlu0 %5490, %v1753_v2  }
0x23a5   :  { %2298 = vmatmul.bf16.gmra.mxu3 %v4837_v40 }
0x23a9   :  { %v1751_v46 = vpop.permute.xlu1 %1750 }
0x23aa   :  { %2761 = vperm.xlu0 %5490, %v1751_v46  }
0x23ae   :  { %4915 = vmatmul.msk.bf16.gmra.mxu1 %vm7949_vm0, %v4841_v13 }
0x23b5   :  { %2303 = vmatmul.bf16.gmra.mxu3 %v4845_v49 }
0x23be   :  { %4916 = vmatmul.msk.bf16.gmra.mxu1 %vm7949_vm0, %v4849_v54 }
0x23c5   :  { %2308 = vmatmul.bf16.gmra.mxu3 %v4853_v58 }
0x23ce   :  { %4917 = vmatmul.msk.bf16.gmra.mxu1 %vm7949_vm0, %v4857_v60 }
0x23d5   :  { %2313 = vmatmul.bf16.gmra.mxu3 %v4861_v50 }
0x23de   :  { %4918 = vmatmul.msk.bf16.gmra.mxu1 %vm7949_vm0, %v4865_v62 }
0x23e5   :  { %2318 = vmatmul.bf16.gmra.mxu3 %v4869_v33 }
0x23ee   :  { %4919 = vmatmul.msk.bf16.gmra.mxu1 %vm7949_vm0, %v4873_v42 }
0x23f5   :  { %2323 = vmatmul.bf16.gmra.mxu3 %v4877_v44 }
0x23fe   :  { %4920 = vmatmul.msk.bf16.gmra.mxu1 %vm7949_vm0, %v4881_v24 }
0x2405   :  { %2328 = vmatmul.bf16.gmra.mxu3 %v4885_v26 }
0x240e   :  { %4921 = vmatmul.msk.bf16.gmra.mxu1 %vm7949_vm0, %v4889_v21 }
0x2418   :  { %v2294_v37 = vpop.f32.mrf.mxu3 }
0x241b   :  { %v2343_v41 = vpop.f32.mrf.mxu1 }
0x241c   :  { %v2344_v3 = vadd.f32 %v2343_v41, %v2294_v37 }
0x241e   :  { %v4922_v31 = vmul.f32 -1.442695, %v2344_v3 }
0x2420   :  { %v2296_v5 = vpop.f32.mrf.mxu3  ;;  %6042 = vpow2.f32 %v4922_v31 }
0x2423   :  { %v2345_v35 = vpop.f32.mrf.mxu1 }
0x2424   :  { %v2346_v44 = vadd.f32 %v2345_v35, %v2296_v5 }
0x2426   :  { %v6043_v49 = vpop.eup %6042  ;;  %v4923_v27 = vmul.f32 -1.442695, %v2346_v44 }
0x2427   :  { %v2407_v53 = vadd.f32 1.0, %v6043_v49 }
0x2428   :  { %v2299_v59 = vpop.f32.mrf.mxu3 }
0x2429   :  { %6044 = vrcp.f32 %v2407_v53  ;;  %v2426_v62 = vand.u32 2147483648, %v2407_v53  ;;  %vm2420_vm2 = vweird.f32 %v2407_v53  ;;  %v2424_v0 = vand.u32 2147483647, %v2407_v53 }
0x242b   :  { %v2348_v20 = vpop.f32.mrf.mxu1  ;;  %v2427_v17 = vor.u32 1.1754944e-38, %v2426_v62  ;;  %vm2425_vm5 = vcmp.eq.f32.partialorder %v2424_v0, 8.507059e+37 }
0x242c   :  { %v2349_v2 = vadd.f32 %v2348_v20, %v2299_v59 }
0x242e   :  { %v4924_v48 = vmul.f32 -1.442695, %v2349_v2 }
0x242f   :  { %v6045_v55 = vpop.eup %6044 }
0x2430   :  { %v2301_v40 = vpop.f32.mrf.mxu3  ;;  %v2416_v57 = vmul.f32 %v6045_v55, %v2407_v53  ;;  %vm2421_vm1 = vweird.f32 %v6045_v55 }
0x2431   :  { %vm2422_vm3 = vmor %vm2420_vm2, %vm2421_vm1 }
0x2432   :  { %v2417_v60 = vsub.f32 1.0, %v2416_v57 }
0x2433   :  { %v2350_v43 = vpop.f32.mrf.mxu1 }
0x2434   :  { %v2418_v1 = vmul.f32 %v6045_v55, %v2417_v60  ;;  %v2351_v23 = vadd.f32 %v2350_v43, %v2301_v40 }
0x2436   :  { %v2419_v51 = vadd.f32 %v6045_v55, %v2418_v1  ;;  %v4925_v29 = vmul.f32 -1.442695, %v2351_v23 }
0x2438   :  { %v2304_v46 = vpop.f32.mrf.mxu3  ;;  %v2423_v33 = vsel %vm2422_vm3, %v6045_v55, %v2419_v51 }
0x2439   :  { %v2428_v8 = vsel %vm2425_vm5, %v2427_v17, %v2423_v33 }
0x243b   :  { %v2353_v13 = vpop.f32.mrf.mxu1 }
0x243c   :  { %v2354_v45 = vadd.f32 %v2353_v13, %v2304_v46 }
0x243e   :  { %v4926_v3 = vmul.f32 -1.442695, %v2354_v45 }
0x2440   :  { %v2306_v47 = vpop.f32.mrf.mxu3 }
0x2443   :  { %v2355_v4 = vpop.f32.mrf.mxu1 }
0x2444   :  { %v2356_v21 = vadd.f32 %v2355_v4, %v2306_v47 }
0x2446   :  { %v4927_v5 = vmul.f32 -1.442695, %v2356_v21 }
0x2448   :  { %v2309_v54 = vpop.f32.mrf.mxu3 }
0x244b   :  { %v2358_v7 = vpop.f32.mrf.mxu1 }
0x244c   :  { %v2359_v24 = vadd.f32 %v2358_v7, %v2309_v54 }
0x244e   :  { %v4928_v37 = vmul.f32 -1.442695, %v2359_v24 }
0x2450   :  { %v2311_v58 = vpop.f32.mrf.mxu3 }
0x2453   :  { %v2360_v61 = vpop.f32.mrf.mxu1 }
0x2454   :  { %v2361_v25 = vadd.f32 %v2360_v61, %v2311_v58 }
0x2456   :  { %v4929_v41 = vmul.f32 -1.442695, %v2361_v25 }
0x2458   :  { %v2314_v63 = vpop.f32.mrf.mxu3 }
0x245b   :  { %v2363_v50 = vpop.f32.mrf.mxu1 }
0x245c   :  { %v2364_v6 = vadd.f32 %v2363_v50, %v2314_v63 }
0x245e   :  { %6046 = vtanh.f32 %v2364_v6 }
0x245f   :  { %6048 = vpow2.f32 %v4924_v48 }
0x2460   :  { %v6909_v10 = vpop.f32.mrf.mxu3  ;;  %6050 = vpow2.f32 %v4923_v27 }
0x2461   :  { %6052 = vpow2.f32 %v4925_v29 }
0x2462   :  { %6054 = vpow2.f32 %v4928_v37 }
0x2463   :  { %v6911_v18 = vpop.f32.mrf.mxu1  ;;  %6056 = vpow2.f32 %v4929_v41 }
0x2464   :  { %v6047_v42 = vpop.eup %6046  ;;  %6058 = vpow2.f32 %v4926_v3 }
0x2465   :  { %v6913_v16 = vmul.f32 %v6047_v42, %v2428_v8  ;;  %v6049_v20 = vpop.eup %6048  ;;  %6060 = vpow2.f32 %v4927_v5 }
0x2466   :  { %v6051_v2 = vpop.eup %6050  ;;  %v6923_v31 = vadd.f32 1.0, %v6049_v20 }
0x2467   :  { %v6053_v40 = vpop.eup %6052  ;;  %v6927_v45 = vadd.f32 1.0, %v6051_v2 }
0x2468   :  { %v6915_v15 = vpop.f32.mrf.mxu3  ;;  %v6055_v43 = vpop.eup %6054  ;;  %v6929_v49 = vadd.f32 1.0, %v6053_v40  ;;  %6062 = vrcp.f32 %v6923_v31  ;;  %v2454_v20 = vand.u32 2147483647, %v6923_v31  ;;  %v2456_v2 = vand.u32 2147483648, %v6923_v31 }
0x2469   :  { %v6057_v13 = vpop.eup %6056  ;;  %v6931_v53 = vadd.f32 1.0, %v6055_v43  ;;  %6064 = vrcp.f32 %v6927_v45  ;;  %vm2450_vm0 = vweird.f32 %v6923_v31 }
0x246a   :  { %v6059_v47 = vpop.eup %6058  ;;  %v6934_v7 = vadd.f32 1.0, %v6057_v13  ;;  %6066 = vrcp.f32 %v6929_v49  ;;  %v2469_v43 = vand.u32 2147483647, %v6929_v49  ;;  %v2471_v13 = vand.u32 2147483648, %v6929_v49 }
0x246b   :  { %v6917_v26 = vpop.f32.mrf.mxu1  ;;  %v6061_v4 = vpop.eup %6060  ;;  %v6937_v55 = vadd.f32 1.0, %v6059_v47  ;;  %6068 = vrcp.f32 %v6931_v53  ;;  %vm2510_vm7 = vweird.f32 %v6931_v53  ;;  %vm2465_vm2 = vweird.f32 %v6929_v49 }
0x246c   :  { %v6940_v58 = vadd.f32 1.0, %v6061_v4  ;;  %6070 = vrcp.f32 %v6934_v7  ;;  %vm2525_vm5 = vweird.f32 %v6934_v7 }
0x246d   :  { %6072 = vrcp.f32 %v6937_v55  ;;  %vm2480_vm13 = vweird.f32 %v6937_v55 }
0x246e   :  { %v6945_v61 = vpop.eup %6062  ;;  %6074 = vrcp.f32 %v6940_v58 }
0x246f   :  { %v6948_v60 = vpop.eup %6064  ;;  %v2446_v6 = vmul.f32 %v6945_v61, %v6923_v31  ;;  %vm2451_vm1 = vweird.f32 %v6945_v61  ;;  %v5389_v31 = vld [vmem:[#allocation2 + $0x2e4] sm:$0xf0] }
0x2470   :  { %v6919_v59 = vpop.f32.mrf.mxu3  ;;  %v6950_v1 = vpop.eup %6066  ;;  %v2431_v33 = vmul.f32 %v6948_v60, %v6927_v45  ;;  %vm2436_vm10 = vweird.f32 %v6948_v60 }
0x2471   :  { %v6952_v50 = vpop.eup %6068  ;;  %v2447_v17 = vsub.f32 1.0, %v2446_v6  ;;  %v2461_v23 = vmul.f32 %v6950_v1, %v6929_v49  ;;  %vm2466_vm12 = vweird.f32 %v6950_v1 }
0x2472   :  { %v6956_v51 = vpop.eup %6070  ;;  %v2506_v42 = vmul.f32 %v6952_v50, %v6931_v53  ;;  %v2432_v27 = vsub.f32 1.0, %v2431_v33  ;;  %vm2511_vm8 = vweird.f32 %v6952_v50 }
0x2473   :  { %v6921_v35 = vpop.f32.mrf.mxu1  ;;  %v6958_v62 = vpop.eup %6072  ;;  %v2521_v8 = vmul.f32 %v6956_v51, %v6934_v7  ;;  %v2448_v37 = vmul.f32 %v6945_v61, %v2447_v17  ;;  %v2462_v41 = vsub.f32 1.0, %v2461_v23  ;;  %vm2526_vm4 = vweird.f32 %v6956_v51  ;;  %vm7010_vm3 = vmor %vm2510_vm7, %vm2511_vm8 }
0x2474   :  { %v6960_v0 = vpop.eup %6074  ;;  %v2476_v24 = vmul.f32 %v6958_v62, %v6937_v55  ;;  %v2507_v29 = vsub.f32 1.0, %v2506_v42  ;;  %v6980_v47 = vmul.f32 %v6948_v60, %v2432_v27  ;;  %vm2481_vm6 = vweird.f32 %v6958_v62  ;;  %vm7024_vm7 = vmor %vm2525_vm5, %vm2526_vm4 }
0x2475   :  { %v2491_v48 = vmul.f32 %v6960_v0, %v6940_v58  ;;  %v2522_v21 = vsub.f32 1.0, %v2521_v8  ;;  %v6985_v17 = vadd.f32 %v6945_v61, %v2448_v37  ;;  %v2484_v42 = vand.u32 2147483647, %v6937_v55 }
0x2476   :  { %v2477_v3 = vsub.f32 1.0, %v2476_v24  ;;  %v2508_v6 = vmul.f32 %v6952_v50, %v2507_v29  ;;  %v2486_v8 = vand.u32 2147483648, %v6937_v55  ;;  %vm2496_vm11 = vweird.f32 %v6960_v0 }
0x2477   :  { %v2492_v5 = vsub.f32 1.0, %v2491_v48  ;;  %v2523_v33 = vmul.f32 %v6956_v51, %v2522_v21  ;;  %v2371_v21 = vadd.f32 %v6921_v35, %v6919_v59  ;;  %v2369_v59 = vadd.f32 %v6917_v26, %v6915_v15 }
0x2478   :  { %v6925_v46 = vpop.f32.mrf.mxu3  ;;  %v2509_v27 = vadd.f32 %v6952_v50, %v2508_v6  ;;  %vm2495_vm8 = vweird.f32 %v6940_v58  ;;  %v2499_v26 = vand.u32 2147483647, %v6940_v58  ;;  %v2366_v6 = vadd.f32 %v6911_v18, %v6909_v10 }
0x2479   :  { %v2524_v29 = vadd.f32 %v6956_v51, %v2523_v33  ;;  %vm7042_vm4 = vmor %vm2495_vm8, %vm2496_vm11  ;;  %v2441_v55 = vand.u32 2147483648, %v6927_v45  ;;  %vm2455_vm8 = vcmp.eq.f32.partialorder %v2454_v20, 8.507059e+37 }
0x247a   :  { %vm7054_vm11 = vmor %vm2480_vm13, %vm2481_vm6  ;;  %vm2485_vm13 = vcmp.eq.f32.partialorder %v2484_v42, 8.507059e+37 }
0x247b   :  { %v2373_v54 = vpop.f32.mrf.mxu1  ;;  %vm7065_vm6 = vmor %vm2465_vm2, %vm2466_vm12  ;;  %vm2435_vm2 = vweird.f32 %v6927_v45 }
0x247c   :  { %v2374_v48 = vadd.f32 %v2373_v54, %v6925_v46  ;;  %v2516_v46 = vand.u32 2147483648, %v6931_v53  ;;  %v2531_v54 = vand.u32 2147483648, %v6934_v7  ;;  %vm7080_vm12 = vmor %vm2450_vm0, %vm2451_vm1  ;;  %vm2470_vm0 = vcmp.eq.f32.partialorder %v2469_v43, 8.507059e+37 }
0x247d   :  { %v2453_v42 = vsel %vm7080_vm12, %v6945_v61, %v6985_v17  ;;  %vm2437_vm1 = vmor %vm2435_vm2, %vm2436_vm10  ;;  %v2442_v43 = vor.u32 1.1754944e-38, %v2441_v55  ;;  %vm7973_vm2 = vcmask 1047912  }
0x247e   :  { %v2517_v33 = vor.u32 1.1754944e-38, %v2516_v46 }
0x2480   :  { %v2326_v57 = vpop.f32.mrf.mxu3 }
0x2483   :  { %v2375_v63 = vpop.f32.mrf.mxu1 }
0x2484   :  { %v2376_v4 = vadd.f32 %v2375_v63, %v2326_v57  ;;  %v2478_v57 = vmul.f32 %v6958_v62, %v2477_v3  ;;  %v2493_v63 = vmul.f32 %v6960_v0, %v2492_v5  ;;  %v2529_v3 = vand.u32 2147483647, %v6934_v7 }
0x2485   :  { %v2513_v7 = vsel %vm7010_vm3, %v6952_v50, %v2509_v27 }
0x2486   :  { %v2494_v5 = vadd.f32 %v6960_v0, %v2493_v63  ;;  %v2479_v15 = vadd.f32 %v6958_v62, %v2478_v57  ;;  %vm2530_vm5 = vcmp.eq.f32.partialorder %v2529_v3, 8.507059e+37  ;;  %v2786_v63 = vpop.permute.xlu0 %2785 }
0x2488   :  { %v2329_v44 = vpop.f32.mrf.mxu3 }
0x248b   :  { %v2378_v25 = vpop.f32.mrf.mxu1 }
0x248c   :  { %v2379_v40 = vadd.f32 %v2378_v25, %v2329_v44  ;;  %v2463_v44 = vmul.f32 %v6950_v1, %v2462_v41  ;;  %v2514_v41 = vand.u32 2147483647, %v6931_v53  ;;  %v2501_v53 = vand.u32 2147483648, %v6940_v58 }
0x248d   :  { %v2498_v58 = vsel %vm7042_vm4, %v6960_v0, %v2494_v5  ;;  %v2483_v0 = vsel %vm7054_vm11, %v6958_v62, %v2479_v15 }
0x248e   :  { %6076 = vtanh.f32 %v2379_v40  ;;  %v2528_v40 = vsel %vm7024_vm7, %v6956_v51, %v2524_v29  ;;  %vm2515_vm3 = vcmp.eq.f32.partialorder %v2514_v41, 8.507059e+37  ;;  %v2464_v51 = vadd.f32 %v6950_v1, %v2463_v44 }
0x248f   :  { %6078 = vtanh.f32 %v2376_v4  ;;  %v2518_v10 = vsel %vm2515_vm3, %v2517_v33, %v2513_v7  ;;  %vm2500_vm7 = vcmp.eq.f32.partialorder %v2499_v26, 8.507059e+37  ;;  %v2487_v29 = vor.u32 1.1754944e-38, %v2486_v8  ;;  %v4944_v33 = vld [vmem:[#allocation2 + $0x2e0] sm:$0xf] }
0x2490   :  { %v2331_v23 = vpop.f32.mrf.mxu3  ;;  %v2468_v8 = vsel %vm7065_vm6, %v6950_v1, %v2464_v51  ;;  %v4940_v51 = vld [vmem:[#allocation2 + $0x2d0] sm:$0xf] }
0x2491   :  { %v2488_v3 = vsel %vm2485_vm13, %v2487_v29, %v2483_v0 }
0x2493   :  { %v2380_v24 = vpop.f32.mrf.mxu1 }
0x2494   :  { %v2381_v25 = vadd.f32 %v2380_v24, %v2331_v23  ;;  %v6077_v4 = vpop.eup %6076  ;;  %v2532_v23 = vor.u32 1.1754944e-38, %v2531_v54  ;;  %v2434_v54 = vadd.f32 %v6948_v60, %v6980_v47  ;;  %v2472_v47 = vor.u32 1.1754944e-38, %v2471_v13  ;;  %v4936_v24 = vld [vmem:[#allocation2 + $0x2c0] sm:$0xf] }
0x2495   :  { %v6079_v50 = vpop.eup %6078  ;;  %v2457_v13 = vor.u32 1.1754944e-38, %v2456_v2 }
0x2496   :  { %6080 = vtanh.f32 %v2381_v25  ;;  %v2533_v18 = vsel %vm2530_vm5, %v2532_v23, %v2528_v40  ;;  %v2549_v25 = vmul.f32 %v6077_v4, %v2518_v10  ;;  %v2438_v61 = vsel %vm2437_vm1, %v6948_v60, %v2434_v54  ;;  %v4932_v4 = vld [vmem:[#allocation2 + $0x2b0] sm:$0xf] }
0x2497   :  { %6082 = vtanh.f32 %v2374_v48  ;;  %v2502_v48 = vor.u32 1.1754944e-38, %v2501_v53  ;;  %v2473_v53 = vsel %vm2470_vm0, %v2472_v47, %v2468_v8  ;;  %v2458_v49 = vsel %vm2455_vm8, %v2457_v13, %v2453_v42  ;;  %vm7974_vm0 = vmmov %vm7973_vm2 }
0x2498   :  { %6084 = vtanh.f32 %v2371_v21  ;;  %v4945_v60 = vor.u32 %v5389_v31, %v4944_v33  ;;  %vm7975_vm1 = vmmov %vm7974_vm0 }
0x2499   :  { %6086 = vtanh.f32 %v2369_v59  ;;  %v2503_v21 = vsel %vm2500_vm7, %v2502_v48, %v2498_v58  ;;  %v2439_v59 = vand.u32 2147483647, %v6927_v45  ;;  %vm7976_vm8 = vmmov %vm7974_vm0 }
0x249a   :  { %6088 = vtanh.f32 %v2366_v6  ;;  %v2548_v62 = vmul.f32 %v6079_v50, %v2503_v21  ;;  %v5386_v6 = vld [vmem:[#allocation2 + $0x2b4] sm:$0xf0]  ;;  %v5387_v50 = vld [vmem:[#allocation2 + $0x2c4] sm:$0xf0] }
0x249b   :  { %vm2440_vm4 = vcmp.eq.f32.partialorder %v2439_v59, 8.507059e+37  ;;  %v4933_v23 = vor.u32 %v5386_v6, %v4932_v4  ;;  %v4937_v58 = vor.u32 %v5387_v50, %v4936_v24  ;;  %v2774_v59 = vpop.permute.xlu1 %2773 }
0x249c   :  { %v6081_v57 = vpop.eup %6080  ;;  %v2443_v15 = vsel %vm2440_vm4, %v2442_v43, %v2438_v61  ;;  %vm7977_vm4 = vmmov %vm7974_vm0 }
0x249d   :  { %v2550_v27 = vmul.f32 %v6081_v57, %v2533_v18  ;;  %v6083_v44 = vpop.eup %6082  ;;  %v5388_v57 = vld [vmem:[#allocation2 + $0x2d4] sm:$0xf0] }
0x249e   :  { %v6085_v41 = vpop.eup %6084  ;;  %v2547_v1 = vmul.f32 %v6083_v44, %v2488_v3 }
0x249f   :  { %v2554_v37 = vpack.c.bf16 %v2550_v27, %v2549_v25  ;;  %v6087_v35 = vpop.eup %6086  ;;  %v2546_v40 = vmul.f32 %v6085_v41, %v2473_v53  ;;  %v2782_v27 = vpop.permute.xlu2 %2781 }
0x24a0   :  { %v2553_v7 = vpack.c.bf16 %v2548_v62, %v2547_v1  ;;  %v6089_v17 = vpop.eup %6088  ;;  %v2545_v45 = vmul.f32 %v6087_v35, %v2458_v49  ;;  %v2766_v62 = vpop.permute.xlu0 %2765 }
0x24a1   :  { %2639 = vmatpush.bf16.msrb.mxu0 %v2554_v37  ;;  %5453 = vmatpush.bf16.msrb.mxu2 %v2554_v37  ;;  %v2544_v26 = vmul.f32 %v6089_v17, %v2443_v15 }
0x24a2   :  { %v2552_v2 = vpack.c.bf16 %v2546_v40, %v2545_v45 }
0x24a3   :  { %v2551_v20 = vpack.c.bf16 %v2544_v26, %v6913_v16  ;;  %v4941_v16 = vor.u32 %v5388_v57, %v4940_v51  ;;  %v2770_v33 = vpop.permute.xlu1 %2769 }
0x24a5   :  { %2640 = vmatpush.bf16.msrb.mxu0 %v2553_v7  ;;  %5454 = vmatpush.bf16.msrb.mxu2 %v2553_v7 }
0x24a7   :  { %v2778_v55 = vpop.permute.xlu2 %2777 }
0x24a8   :  { %v2762_v43 = vpop.permute.xlu0 %2761 }
0x24a9   :  { %2641 = vmatpush.bf16.msrb.mxu0 %v2552_v2  ;;  %5455 = vmatpush.bf16.msrb.mxu2 %v2552_v2 }
0x24ad   :  { %2642 = vmatpush.bf16.msrb.mxu0 %v2551_v20  ;;  %5456 = vmatpush.bf16.msrb.mxu2 %v2551_v20 }
0x24af   :  { %v2758_v26 = vpop.permute.xlu2 %2757 }
0x24b0   :  { %4962 = vmatmul.msk.bf16.vlgmr.msrb.gmra.mxu0 %vm1614_vm9, %v4933_v23  ;;  %4965 = vmatmul.msk.bf16.vlgmr.msrb.gmra.mxu2 %vm1614_vm9, %v4945_v60 }
0x24b1   :  { %3097 = vmatpush.bf16.msra.mxu2 %v6635_v36 }
0x24b5   :  { %3098 = vmatpush.bf16.msra.mxu2 %v6845_v19 }
0x24c0   :  { %4963 = vmatmul.msk.bf16.gmra.mxu0 %vm1614_vm9, %v4937_v58 }
0x24d0   :  { %4964 = vmatmul.msk.bf16.gmra.mxu0 %vm1614_vm9, %v4941_v16 }
0x252d   :  { %v2644_v10 = vpop.f32.mrf.mxu0 }
0x252e   :  { %v2700_v46 = vmul.f32 0.4, %v2644_v10  ;;  %vm2684_vm11 = vcmp.gt.f32.partialorder %v2644_v10, 0.0 }
0x2530   :  { %v2716_v1 = vsel %vm2684_vm11, %v2644_v10, %v2700_v46  ;;  %vm7981_vm11 = vmmov %vm7974_vm0 }
0x2531   :  { %v2732_v13 = vadd.f32 %v2716_v1, %v6785_v22 }
0x2533   :  { %v2659_v18 = vpop.f32.mrf.mxu2  ;;  %v7130_v22 = vmul.f32 0.70710677, %v2732_v13 }
0x2534   :  { %v2706_v48 = vmul.f32 0.4, %v2659_v18  ;;  %vm2690_vm10 = vcmp.gt.f32.partialorder %v2659_v18, 0.0 }
0x2535   :  { %v2646_v25 = vpop.f32.mrf.mxu0  ;;  %v7140_v4 = vadd.f32 %v2758_v26, %v7130_v22 }
0x2536   :  { %v2722_v0 = vsel %vm2690_vm10, %v2659_v18, %v2706_v48  ;;  %v2701_v44 = vmul.f32 0.4, %v2646_v25  ;;  %vm2685_vm3 = vcmp.gt.f32.partialorder %v2646_v25, 0.0  ;;  %vm7978_vm10 = vmmov %vm7974_vm0 }
0x2537   :  { %v2738_v29 = vadd.f32 %v2722_v0, %v6745_v14 }
0x2538   :  { %v2717_v8 = vsel %vm2685_vm3, %v2646_v25, %v2701_v44  ;;  %vm7979_vm3 = vmmov %vm7974_vm0 }
0x2539   :  { %v7110_v5 = vmul.f32 0.70710677, %v2738_v29  ;;  %v2733_v14 = vadd.f32 %v2717_v8, %v6783_v56 }
0x253b   :  { %v2661_v21 = vpop.f32.mrf.mxu2  ;;  %v7118_v53 = vadd.f32 %v2782_v27, %v7110_v5  ;;  %v7123_v40 = vmul.f32 0.70710677, %v2733_v14 }
0x253c   :  { %vm2691_vm5 = vcmp.gt.f32.partialorder %v2661_v21, 0.0  ;;  %v2707_v54 = vmul.f32 0.4, %v2661_v21 }
0x253d   :  { %v2649_v37 = vpop.f32.mrf.mxu0  ;;  %v7134_v15 = vadd.f32 %v2762_v43, %v7123_v40 }
0x253e   :  { %v2723_v41 = vsel %vm2691_vm5, %v2661_v21, %v2707_v54  ;;  %v2702_v3 = vmul.f32 0.4, %v2649_v37  ;;  %vm2686_vm7 = vcmp.gt.f32.partialorder %v2649_v37, 0.0  ;;  %vm7980_vm5 = vmmov %vm7974_vm0 }
0x253f   :  { %v2739_v47 = vadd.f32 %v2723_v41, %v6743_v11  ;;  %v5588_v60 = vpack.i.bf16 %v7134_v15, %v7140_v4  ;;  %v2926_v44 = vpack.c.bf16 %v7134_v15, %v7140_v4 }
0x2540   :  { %v2718_v35 = vsel %vm2686_vm7, %v2649_v37, %v2702_v3  ;;  %vm7982_vm7 = vmmov %vm7974_vm0 }
0x2541   :  { %v7114_v42 = vmul.f32 0.70710677, %v2739_v47  ;;  %v2734_v11 = vadd.f32 %v2718_v35, %v6796_v32 }
0x2543   :  { %v7121_v7 = vadd.f32 %v2786_v63, %v7114_v42  ;;  %v7136_v32 = vmul.f32 0.70710677, %v2734_v11 }
0x2545   :  { %v2651_v61 = vpop.f32.mrf.mxu0  ;;  %v5573_v56 = vpack.i.bf16 %v7121_v7, %v7118_v53  ;;  %v2929_v17 = vpack.c.bf16 %v7121_v7, %v7118_v53  ;;  %v7145_v31 = vadd.f32 %v2766_v62, %v7136_v32 }
0x2546   :  { %vm2687_vm6 = vcmp.gt.f32.partialorder %v2651_v61, 0.0  ;;  %v2703_v49 = vmul.f32 0.4, %v2651_v61 }
0x2547   :  { %5574 = vrot.lane.b32.xlu1 %v5573_v56, %s6224_s21  ;;  %3046 = vmatpush.bf16.msra.mxu0 %v2929_v17 }
0x2548   :  { %v2719_v45 = vsel %vm2687_vm6, %v2651_v61, %v2703_v49  ;;  %vm7983_vm6 = vmmov %vm7974_vm0 }
0x2549   :  { %v2735_v2 = vadd.f32 %v2719_v45, %v6798_v39 }
0x254b   :  { %v7142_v6 = vmul.f32 0.70710677, %v2735_v2 }
0x254d   :  { %v7148_v20 = vadd.f32 %v2770_v33, %v7142_v6  ;;  %v2654_v23 = vpop.f32.mrf.mxu0 }
0x254e   :  { %v2704_v24 = vmul.f32 0.4, %v2654_v23  ;;  %vm2688_vm13 = vcmp.gt.f32.partialorder %v2654_v23, 0.0 }
0x254f   :  { %5589 = vrot.lane.b32.xlu1 %v5588_v60, %s6224_s21  ;;  %v5583_v39 = vpack.i.bf16 %v7148_v20, %v7145_v31 }
0x2550   :  { %v2720_v50 = vsel %vm2688_vm13, %v2654_v23, %v2704_v24  ;;  %vm7984_vm13 = vmmov %vm7974_vm0 }
0x2551   :  { %5584 = vrot.lane.b32.xlu0 %v5583_v39, %s6224_s21  ;;  %v2736_v58 = vadd.f32 %v2720_v50, %v6765_v30  ;;  %v2927_v30 = vpack.c.bf16 %v7148_v20, %v7145_v31 }
0x2553   :  { %v7157_v10 = vmul.f32 0.70710677, %v2736_v58 }
0x2555   :  { %v2656_v51 = vpop.f32.mrf.mxu0  ;;  %v2792_v48 = vadd.f32 %v2774_v59, %v7157_v10 }
0x2556   :  { %vm2689_vm12 = vcmp.gt.f32.partialorder %v2656_v51, 0.0  ;;  %v2705_v57 = vmul.f32 0.4, %v2656_v51 }
0x2558   :  { %v2721_v16 = vsel %vm2689_vm12, %v2656_v51, %v2705_v57  ;;  %vm7985_vm12 = vmmov %vm7974_vm0 }
0x2559   :  { %v2737_v18 = vadd.f32 %v2721_v16, %v6762_v28 }
0x255b   :  { %v7160_v63 = vmul.f32 0.70710677, %v2737_v18 }
0x255d   :  { %v2793_v25 = vadd.f32 %v2778_v55, %v7160_v63 }
0x255f   :  { %v5578_v27 = vpack.i.bf16 %v2793_v25, %v2792_v48  ;;  %v2928_v0 = vpack.c.bf16 %v2793_v25, %v2792_v48 }
0x2561   :  { %5579 = vrot.lane.b32.xlu2 %v5578_v27, %s6224_s21  ;;  %3047 = vmatpush.bf16.msra.mxu0 %v2928_v0 }
0x2565   :  { %3048 = vmatpush.bf16.msra.mxu0 %v2927_v30 }
0x2569   :  { %3049 = vmatpush.bf16.msra.mxu0 %v2926_v44 }
0x25b9   :  { %v5575_v28 = vpop.permute.xlu1 %5574 }
0x25ba   :  { %v5577_v29 = vunpack.i.h.bf16 %v5575_v28  ;;  %v5576_v21 = vunpack.i.l.bf16 %v5575_v28 }
0x25bb   :  { %v5580_v46 = vpop.permute.xlu2 %5579 }
0x25bc   :  { %v2819_v54 = vsel %vm7973_vm2, %v5577_v29, %v7121_v7  ;;  %v2816_v37 = vsel %vm7974_vm0, %v5576_v21, %v7118_v53  ;;  %v5582_v62 = vunpack.i.h.bf16 %v5580_v46  ;;  %v5581_v8 = vunpack.i.l.bf16 %v5580_v46  ;;  %vm7986_vm2 = vmmov %vm7974_vm0 }
0x25bd   :  { %v5593_v41 = vpack.i.bf16 %v2819_v54, %v2816_v37  ;;  %v4956_v37 = vld [vmem:[#allocation2 + $0x310] sm:$0xf] }
0x25be   :  { %v2810_v3 = vsel %vm7975_vm1, %v5581_v8, %v2792_v48  ;;  %v2813_v47 = vsel %vm7976_vm8, %v5582_v62, %v2793_v25  ;;  %vm7987_vm1 = vmmov %vm7974_vm0  ;;  %v5392_v62 = vld [vmem:[#allocation2 + $0x314] sm:$0xf0]  ;;  %vm2844_vm8 = vcmp.ge.s32.totalorder %v6637_v38, 2 }
0x25bf   :  { %5594 = vrot.lane.b32.xlu2 %v5593_v41, %s6224_s21  ;;  %v5598_v55 = vpack.i.bf16 %v2813_v47, %v2810_v3  ;;  %v4957_v8 = vor.u32 %v5392_v62, %v4956_v37  ;;  %v4982_v37 = vld [vmem:[#allocation2 + $0x1c8] sm:$0xf0] }
0x25c1   :  { %v5590_v1 = vpop.permute.xlu1 %5589  ;;  %5599 = vrot.lane.b32.xlu0 %v5598_v55, %s6224_s21 }
0x25c2   :  { %v5592_v14 = vunpack.i.h.bf16 %v5590_v1  ;;  %v5591_v59 = vunpack.i.l.bf16 %v5590_v1  ;;  %v4960_v1 = vld [vmem:[#allocation2 + $0x320] sm:$0xf] }
0x25c3   :  { %v5585_v35 = vpop.permute.xlu0 %5584 }
0x25c4   :  { %v2801_v13 = vsel %vm7977_vm4, %v5592_v14, %v7134_v15  ;;  %v2798_v11 = vsel %vm7978_vm10, %v5591_v59, %v7140_v4  ;;  %v5587_v61 = vunpack.i.h.bf16 %v5585_v35  ;;  %v5586_v56 = vunpack.i.l.bf16 %v5585_v35  ;;  %vm7221_vm4 = vmpackc.low %vm2844_vm8, %vm2844_vm8  ;;  %v5393_v14 = vld [vmem:[#allocation2 + $0x324] sm:$0xf0] }
0x25c5   :  { %v5608_v17 = vpack.i.bf16 %v2801_v13, %v2798_v11  ;;  %v4961_v59 = vor.u32 %v5393_v14, %v4960_v1  ;;  %vm2887_vm10 = vcmp.lt.s32.totalorder %v6637_v38, 43  ;;  %v4990_v1 = vld [vmem:[#allocation2 + $0x1d8] sm:$0xf0] }
0x25c6   :  { %v2807_v49 = vsel %vm7979_vm3, %v5587_v61, %v7148_v20  ;;  %v2804_v43 = vsel %vm7980_vm5, %v5586_v56, %v7145_v31  ;;  %vm7229_vm3 = vmpackc.low %vm2887_vm10, %vm2887_vm10  ;;  %vm7992_vm5 = vcmask 662528  }
0x25c7   :  { %v5603_v45 = vpack.i.bf16 %v2807_v49, %v2804_v43  ;;  %5609 = vrot.lane.b32.xlu2 %v5608_v17, %s6224_s21  ;;  %v5401_v17 = vld [vmem:[#allocation2 + $0x1e4] sm:$0xf0] }
0x25c9   :  { %5604 = vrot.lane.b32.xlu1 %v5603_v45, %s6224_s21 }
0x2619   :  { %v5595_v2 = vpop.permute.xlu2 %5594 }
0x261a   :  { %v5597_v26 = vunpack.i.h.bf16 %v5595_v2  ;;  %v5596_v33 = vunpack.i.l.bf16 %v5595_v2 }
0x261c   :  { %v2843_v23 = vsel %vm7981_vm11, %v5597_v26, %v7121_v7  ;;  %v2842_v60 = vsel %vm7982_vm7, %v5596_v33, %v7118_v53  ;;  %vm7993_vm11 = vmmov %vm7992_vm5 }
0x261d   :  { %v5618_v24 = vpack.i.bf16 %v2843_v23, %v2842_v60  ;;  %vm7994_vm7 = vmmov %vm7992_vm5 }
0x261f   :  { %5619 = vrot.lane.b32.xlu2 %v5618_v24, %s6230_s30  ;;  %5614 = vrot.lane.b32.xlu0 %v5618_v24, %s6221_s26 }
0x2621   :  { %v5610_v39 = vpop.permute.xlu2 %5609 }
0x2622   :  { %v5612_v50 = vunpack.i.h.bf16 %v5610_v39  ;;  %v5611_v58 = vunpack.i.l.bf16 %v5610_v39 }
0x2624   :  { %v2837_v51 = vsel %vm7983_vm6, %v5612_v50, %v7134_v15  ;;  %v2836_v57 = vsel %vm7984_vm13, %v5611_v58, %v7140_v4  ;;  %vm7995_vm6 = vmmov %vm7992_vm5 }
0x2625   :  { %v5623_v16 = vpack.i.bf16 %v2837_v51, %v2836_v57  ;;  %vm7997_vm13 = vmmov %vm7992_vm5 }
0x2627   :  { %5624 = vrot.lane.b32.xlu2 %v5623_v16, %s6221_s26 }
0x262f   :  { %1776 = vrot.lane.b32.xlu2 %v6666_v34, %s6231_s6 }
0x2633   :  { %v5600_v53 = vpop.permute.xlu0 %5599 }
0x2634   :  { %v5602_v7 = vunpack.i.h.bf16 %v5600_v53  ;;  %v5601_v18 = vunpack.i.l.bf16 %v5600_v53  ;;  %v5394_v53 = vld [vmem:[#allocation2 + $0x1b4] sm:$0xf] }
0x2636   :  { %v2841_v27 = vsel %vm7985_vm12, %v5602_v7, %v2793_v25  ;;  %v2840_v0 = vsel %vm7986_vm2, %v5601_v18, %v2792_v48  ;;  %v4948_v48 = vld [vmem:[#allocation2 + $0x2f0] sm:$0xf]  ;;  %v5390_v25 = vld [vmem:[#allocation2 + $0x2f4] sm:$0xf0]  ;;  %v4974_v7 = vld [vmem:[#allocation2 + $0x1b8] sm:$0xf0] }
0x2637   :  { %v5638_v30 = vpack.i.bf16 %v2841_v27, %v2840_v0  ;;  %1774 = vrot.lane.b32.xlu2 %v6669_v9, %s6232_s7  ;;  %v4949_v46 = vor.u32 %v5390_v25, %v4948_v48  ;;  %v5395_v48 = vld [vmem:[#allocation2 + $0x1b4] sm:$0xf0]  ;;  %vm7998_vm12 = vmmov %vm7992_vm5 }
0x2638   :  { %vm7999_vm2 = vmmov %vm7992_vm5 }
0x2639   :  { %5639 = vrot.lane.b32.xlu1 %v5638_v30, %s6221_s26  ;;  %4966 = vmatmul.msk.bf16.gmra.mxu2 %vm1614_vm9, %v4949_v46 }
0x263b   :  { %v5605_v15 = vpop.permute.xlu1 %5604 }
0x263c   :  { %v5607_v4 = vunpack.i.h.bf16 %v5605_v15  ;;  %v5606_v44 = vunpack.i.l.bf16 %v5605_v15 }
0x263e   :  { %v2839_v28 = vsel %vm7974_vm0, %v5607_v4, %v7148_v20  ;;  %v2838_v29 = vsel %vm7987_vm1, %v5606_v44, %v7145_v31  ;;  %v4952_v31 = vld [vmem:[#allocation2 + $0x300] sm:$0xf]  ;;  %v5391_v20 = vld [vmem:[#allocation2 + $0x304] sm:$0xf0]  ;;  %vm8000_vm0 = vmmov %vm7999_vm2 }
0x263f   :  { %v5628_v21 = vpack.i.bf16 %v2839_v28, %v2838_v29  ;;  %1764 = vrot.lane.b32.xlu2 %v6666_v34, %s6233_s8  ;;  %v4953_v54 = vor.u32 %v5391_v20, %v4952_v31 }
0x2641   :  { %5629 = vrot.lane.b32.xlu0 %v5628_v21, %s6221_s26  ;;  %5644 = vrot.lane.b32.xlu1 %v5638_v30, %s6230_s30  ;;  %v4977_v30 = vor.u32 %v5394_v53, %v4974_v7  ;;  %v5406_v7 = vld [vmem:[#allocation2 + $0x214] sm:$0xf] }
0x2649   :  { %5634 = vrot.lane.b32.xlu0 %v5628_v21, %s6230_s30  ;;  %5649 = vrot.lane.b32.xlu1 %v5623_v16, %s6230_s30  ;;  %v4972_v21 = vld [vmem:[#allocation2 + $0x1b0] sm:$0xf] }
0x264a   :  { %4967 = vmatmul.msk.bf16.gmra.mxu2 %vm1614_vm9, %v4953_v54  ;;  %v4973_v20 = vor.u32 %v5395_v48, %v4972_v21  ;;  %v5396_v54 = vld [vmem:[#allocation2 + $0x1c4] sm:$0xf] }
0x2651   :  { %1778 = vrot.lane.b32.xlu0 %v6669_v9, %s6231_s6  ;;  %1772 = vrot.lane.b32.xlu1 %v6666_v34, %s6232_s7 }
0x2659   :  { %1768 = vrot.lane.b32.xlu0 %v6666_v34, %s6234_s9  ;;  %1770 = vrot.lane.b32.xlu1 %v6669_v9, %s6234_s9 }
0x265a   :  { %4968 = vmatmul.msk.bf16.gmra.mxu2 %vm1614_vm9, %v4957_v8 }
0x2661   :  { %1766 = vrot.lane.b32.xlu0 %v6669_v9, %s6233_s8 }
0x266a   :  { %4969 = vmatmul.msk.bf16.gmra.mxu2 %vm1614_vm9, %v4961_v59  ;;  %v4988_v59 = vld [vmem:[#allocation2 + $0x1d0] sm:$0xf] }
0x2679   :  { %v5620_v41 = vpop.permute.xlu2 %5619 }
0x267a   :  { %v5622_v3 = vunpack.i.h.bf16 %v5620_v41  ;;  %v5621_v47 = vunpack.i.l.bf16 %v5620_v41  ;;  %v4985_v41 = vor.u32 %v5396_v54, %v4982_v37 }
0x267c   :  { %v5035_v9 = vpack.c.bf16 %v5622_v3, %v5621_v47  ;;  %v4980_v3 = vld [vmem:[#allocation2 + $0x1c0] sm:$0xf]  ;;  %v5397_v47 = vld [vmem:[#allocation2 + $0x1c4] sm:$0xf0] }
0x267d   :  { %v4981_v34 = vor.u32 %v5397_v47, %v4980_v3 }
0x267e   :  { %5036 = vmatpush.bf16.msk.msra.mxu0 %vm7221_vm4, %v5035_v9 }
0x2681   :  { %v5625_v55 = vpop.permute.xlu2 %5624 }
0x2682   :  { %v5627_v58 = vunpack.i.h.bf16 %v5625_v55  ;;  %v5626_v51 = vunpack.i.l.bf16 %v5625_v55  ;;  %v5398_v55 = vld [vmem:[#allocation2 + $0x1d4] sm:$0xf] }
0x2683   :  { %v4993_v14 = vor.u32 %v5398_v55, %v4990_v1 }
0x2684   :  { %v5056_v18 = vpack.c.bf16 %v5627_v58, %v5626_v51  ;;  %v5012_v51 = vld [vmem:[#allocation2 + $0x200] sm:$0xf] }
0x2689   :  { %v1777_v35 = vpop.permute.xlu2 %1776 }
0x268a   :  { %3542 = vperm.xlu1 %5492, %v1777_v35  }
0x2691   :  { %v1775_v13 = vpop.permute.xlu2 %1774  ;;  %v5615_v11 = vpop.permute.xlu0 %5614 }
0x2692   :  { %v5617_v61 = vunpack.i.h.bf16 %v5615_v11  ;;  %v5616_v56 = vunpack.i.l.bf16 %v5615_v11  ;;  %3538 = vperm.xlu1 %5492, %v1775_v13   ;;  %v5400_v13 = vld [vmem:[#allocation2 + $0x1e4] sm:$0xf]  ;;  %v4998_v11 = vld [vmem:[#allocation2 + $0x1e8] sm:$0xf0] }
0x2694   :  { %v5047_v49 = vpack.c.bf16 %v5617_v61, %v5616_v56  ;;  %v5001_v61 = vor.u32 %v5400_v13, %v4998_v11  ;;  %v4996_v56 = vld [vmem:[#allocation2 + $0x1e0] sm:$0xf] }
0x2696   :  { %5048 = vmatpush.bf16.msk.msra.mxu2 %vm7229_vm3, %v5047_v49  ;;  %v4997_v49 = vor.u32 %v5401_v17, %v4996_v56 }
0x2699   :  { %v1765_v43 = vpop.permute.xlu2 %1764 }
0x269a   :  { %3518 = vperm.xlu1 %5492, %v1765_v43  }
0x26ab   :  { %v5640_v45 = vpop.permute.xlu1 %5639 }
0x26ac   :  { %v5642_v2 = vunpack.i.h.bf16 %v5640_v45  ;;  %v5641_v26 = vunpack.i.l.bf16 %v5640_v45  ;;  %v5402_v45 = vld [vmem:[#allocation2 + $0x1f4] sm:$0xf] }
0x26ae   :  { %v5050_v33 = vpack.c.bf16 %v5642_v2, %v5641_v26  ;;  %v5006_v2 = vld [vmem:[#allocation2 + $0x1f8] sm:$0xf0] }
0x26af   :  { %v5009_v26 = vor.u32 %v5402_v45, %v5006_v2 }
0x26b0   :  { %5051 = vmatpush.bf16.msk.msra.mxu2 %vm7229_vm3, %v5050_v33 }
0x26b3   :  { %v5630_v38 = vpop.permute.xlu0 %5629  ;;  %v5645_v23 = vpop.permute.xlu1 %5644 }
0x26b4   :  { %v5632_v60 = vunpack.i.h.bf16 %v5630_v38  ;;  %v5631_v24 = vunpack.i.l.bf16 %v5630_v38  ;;  %v5647_v39 = vunpack.i.h.bf16 %v5645_v23  ;;  %v5646_v50 = vunpack.i.l.bf16 %v5645_v23  ;;  %v5004_v38 = vld [vmem:[#allocation2 + $0x1f0] sm:$0xf]  ;;  %v5403_v23 = vld [vmem:[#allocation2 + $0x1f4] sm:$0xf0] }
0x26b6   :  { %v5053_v57 = vpack.c.bf16 %v5632_v60, %v5631_v24  ;;  %v5038_v16 = vpack.c.bf16 %v5647_v39, %v5646_v50  ;;  %v5005_v60 = vor.u32 %v5403_v23, %v5004_v38  ;;  %v5404_v39 = vld [vmem:[#allocation2 + $0x204] sm:$0xf]  ;;  %v5014_v50 = vld [vmem:[#allocation2 + $0x208] sm:$0xf0] }
0x26b7   :  { %v5017_v58 = vor.u32 %v5404_v39, %v5014_v50 }
0x26b8   :  { %5039 = vmatpush.bf16.msk.msra.mxu0 %vm7221_vm4, %v5038_v16  ;;  %5054 = vmatpush.bf16.msk.msra.mxu2 %vm7229_vm3, %v5053_v57  ;;  %v5405_v57 = vld [vmem:[#allocation2 + $0x204] sm:$0xf0] }
0x26b9   :  { %v5013_v53 = vor.u32 %v5405_v57, %v5012_v51 }
0x26bb   :  { %v5635_v27 = vpop.permute.xlu0 %5634  ;;  %v5650_v0 = vpop.permute.xlu1 %5649 }
0x26bc   :  { %v5637_v15 = vunpack.i.h.bf16 %v5635_v27  ;;  %v5636_v4 = vunpack.i.l.bf16 %v5635_v27  ;;  %5057 = vmatpush.bf16.msk.msra.mxu2 %vm7229_vm3, %v5056_v18  ;;  %v5652_v28 = vunpack.i.h.bf16 %v5650_v0  ;;  %v5651_v29 = vunpack.i.l.bf16 %v5650_v0  ;;  %v7254_v43 = vpop.f32.mrf.mxu2  ;;  %v5022_v18 = vld [vmem:[#allocation2 + $0x218] sm:$0xf0] }
0x26bd   :  { %v5025_v27 = vor.u32 %v5406_v7, %v5022_v18 }
0x26be   :  { %v5041_v44 = vpack.c.bf16 %v5637_v15, %v5636_v4  ;;  %v5044_v25 = vpack.c.bf16 %v5652_v28, %v5651_v29  ;;  %v5407_v15 = vld [vmem:[#allocation2 + $0x214] sm:$0xf0]  ;;  %v5408_v28 = vld [vmem:[#allocation2 + $0x224] sm:$0xf]  ;;  %v5030_v29 = vld [vmem:[#allocation2 + $0x228] sm:$0xf0] }
0x26bf   :  { %5058 = vmatmul.msk.bf16.vlgmr.msra.gmra.mxu2 %vm7992_vm5, %v4977_v30  ;;  %v5020_v30 = vld [vmem:[#allocation2 + $0x210] sm:$0xf]  ;;  %v5033_v21 = vor.u32 %v5408_v28, %v5030_v29 }
0x26c0   :  { %4154 = vmatpush.bf16.msrb.mxu2 %v6635_v36  ;;  %5042 = vmatpush.bf16.msk.msra.mxu0 %vm7221_vm4, %v5041_v44  ;;  %v5021_v4 = vor.u32 %v5407_v15, %v5020_v30 }
0x26c3   :  { %v1779_v46 = vpop.permute.xlu0 %1778  ;;  %v1773_v31 = vpop.permute.xlu1 %1772 }
0x26c4   :  { %3546 = vperm.xlu2 %5488, %v1779_v46   ;;  %3534 = vperm.xlu0 %5490, %v1773_v31   ;;  %v7256_v33 = vpop.f32.mrf.mxu2  ;;  %v5409_v46 = vld [vmem:[#allocation2 + $0x224] sm:$0xf0] }
0x26c5   :  { %5045 = vmatpush.bf16.msk.msra.mxu0 %vm7221_vm4, %v5044_v25  ;;  %7996 = vst [vmem:[#allocation5_spill] sm:$0xff] %v7256_v33  ;;  %v5028_v25 = vld [vmem:[#allocation2 + $0x220] sm:$0xf] }
0x26c6   :  { %v5029_v31 = vor.u32 %v5409_v46, %v5028_v25 }
0x26c8   :  { %3054 = vmatmul.bf16.vlgmr.msra.gmra.mxu0 %v4973_v20 }
0x26c9   :  { %3852 = vmatpush.bf16.msrb.mxu0 %v6635_v36 }
0x26cb   :  { %v1769_v62 = vpop.permute.xlu0 %1768  ;;  %v1771_v8 = vpop.permute.xlu1 %1770 }
0x26cc   :  { %3526 = vperm.xlu2 %5488, %v1769_v62   ;;  %3530 = vperm.xlu0 %5490, %v1771_v8  }
0x26cd   :  { %3853 = vmatpush.bf16.msrb.mxu0 %v6845_v19  ;;  %v5399_v19 = vld [vmem:[#allocation2 + $0x1d4] sm:$0xf0]  ;;  %v7259_v24 = vpop.f32.mrf.mxu2 }
0x26ce   :  { %v4989_v35 = vor.u32 %v5399_v19, %v4988_v59 }
0x26cf   :  { %5059 = vmatmul.msk.bf16.gmra.mxu2 %vm7993_vm11, %v4985_v41 }
0x26d3   :  { %v1767_v9 = vpop.permute.xlu0 %1766 }
0x26d4   :  { %3522 = vperm.xlu2 %5488, %v1767_v9  }
0x26d5   :  { %v7262_v16 = vpop.f32.mrf.mxu2 }
0x26d8   :  { %3059 = vmatmul.bf16.gmra.mxu0 %v4981_v34 }
0x26dd   :  { %v7264_v0 = vpop.f32.mrf.mxu2 }
0x26df   :  { %5060 = vmatmul.msk.bf16.gmra.mxu2 %vm7994_vm7, %v4993_v14 }
0x26e5   :  { %v7267_v44 = vpop.f32.mrf.mxu2 }
0x26e8   :  { %3064 = vmatmul.bf16.gmra.mxu0 %v4989_v35 }
0x26ed   :  { %v7270_v48 = vpop.f32.mrf.mxu2 }
0x26ef   :  { %5061 = vmatmul.msk.bf16.gmra.mxu2 %vm7995_vm6, %v5001_v61 }
0x26f5   :  { %v7272_v20 = vpop.f32.mrf.mxu2 }
0x26f6   :  { %8001 = vst [vmem:[#allocation6_spill] sm:$0xff] %v7272_v20 }
0x26f8   :  { %3069 = vmatmul.bf16.gmra.mxu0 %v4997_v49 }
0x26ff   :  { %5062 = vmatmul.msk.bf16.gmra.mxu2 %vm7997_vm13, %v5009_v26 }
0x2708   :  { %3074 = vmatmul.bf16.gmra.mxu0 %v5005_v60 }
0x270f   :  { %5063 = vmatmul.msk.bf16.gmra.mxu2 %vm7998_vm12, %v5017_v58 }
0x2718   :  { %3079 = vmatmul.bf16.gmra.mxu0 %v5013_v53 }
0x271f   :  { %5064 = vmatmul.msk.bf16.gmra.mxu2 %vm7999_vm2, %v5025_v27 }
0x2728   :  { %3084 = vmatmul.bf16.gmra.mxu0 %v5021_v4 }
0x272f   :  { %5065 = vmatmul.msk.bf16.gmra.mxu2 %vm8000_vm0, %v5033_v21 }
0x2738   :  { %3089 = vmatmul.bf16.gmra.mxu0 %v5029_v31 }
0x2742   :  { %v3104_v54 = vpop.f32.mrf.mxu2 }
0x2745   :  { %v3055_v37 = vpop.f32.mrf.mxu0 }
0x2746   :  { %v3105_v62 = vadd.f32 %v3104_v54, %v3055_v37 }
0x2748   :  { %v5066_v1 = vmul.f32 -1.442695, %v3105_v62 }
0x274a   :  { %v3106_v8 = vpop.f32.mrf.mxu2  ;;  %6090 = vpow2.f32 %v5066_v1 }
0x274d   :  { %v3057_v41 = vpop.f32.mrf.mxu0 }
0x274e   :  { %v3107_v28 = vadd.f32 %v3106_v8, %v3057_v41 }
0x2750   :  { %v6091_v13 = vpop.eup %6090  ;;  %v5067_v37 = vmul.f32 -1.442695, %v3107_v28 }
0x2751   :  { %v3168_v61 = vadd.f32 1.0, %v6091_v13 }
0x2752   :  { %v3109_v3 = vpop.f32.mrf.mxu2 }
0x2753   :  { %6092 = vrcp.f32 %v3168_v61  ;;  %v3187_v51 = vand.u32 2147483648, %v3168_v61  ;;  %vm3181_vm8 = vweird.f32 %v3168_v61  ;;  %v3185_v57 = vand.u32 2147483647, %v3168_v61 }
0x2755   :  { %v3060_v47 = vpop.f32.mrf.mxu0  ;;  %v3188_v18 = vor.u32 1.1754944e-38, %v3187_v51  ;;  %vm3186_vm10 = vcmp.eq.f32.partialorder %v3185_v57, 8.507059e+37 }
0x2756   :  { %v3110_v9 = vadd.f32 %v3109_v3, %v3060_v47 }
0x2758   :  { %v5068_v46 = vmul.f32 -1.442695, %v3110_v9 }
0x2759   :  { %v6093_v49 = vpop.eup %6092 }
0x275a   :  { %v3111_v34 = vpop.f32.mrf.mxu2  ;;  %v3177_v2 = vmul.f32 %v6093_v49, %v3168_v61  ;;  %vm3182_vm1 = vweird.f32 %v6093_v49 }
0x275b   :  { %vm3183_vm4 = vmor %vm3181_vm8, %vm3182_vm1 }
0x275c   :  { %v3178_v38 = vsub.f32 1.0, %v3177_v2 }
0x275d   :  { %v3062_v55 = vpop.f32.mrf.mxu0 }
0x275e   :  { %v3179_v60 = vmul.f32 %v6093_v49, %v3178_v38  ;;  %v3112_v21 = vadd.f32 %v3111_v34, %v3062_v55 }
0x2760   :  { %v3180_v58 = vadd.f32 %v6093_v49, %v3179_v60  ;;  %v5069_v62 = vmul.f32 -1.442695, %v3112_v21 }
0x2762   :  { %v3114_v14 = vpop.f32.mrf.mxu2  ;;  %v3184_v7 = vsel %vm3183_vm4, %v6093_v49, %v3180_v58 }
0x2763   :  { %v3189_v15 = vsel %vm3186_vm10, %v3188_v18, %v3184_v7 }
0x2765   :  { %v3065_v59 = vpop.f32.mrf.mxu0 }
0x2766   :  { %v3115_v19 = vadd.f32 %v3114_v14, %v3065_v59 }
0x2768   :  { %v5070_v14 = vmul.f32 -1.442695, %v3115_v19 }
0x276a   :  { %v3116_v35 = vpop.f32.mrf.mxu2 }
0x276d   :  { %v3067_v11 = vpop.f32.mrf.mxu0 }
0x276e   :  { %v3117_v3 = vadd.f32 %v3116_v35, %v3067_v11 }
0x2770   :  { %v5071_v8 = vmul.f32 -1.442695, %v3117_v3 }
0x2772   :  { %v3119_v56 = vpop.f32.mrf.mxu2 }
0x2775   :  { %v3070_v17 = vpop.f32.mrf.mxu0 }
0x2776   :  { %v3120_v25 = vadd.f32 %v3119_v56, %v3070_v17 }
0x2778   :  { %v5072_v47 = vmul.f32 -1.442695, %v3120_v25 }
0x277a   :  { %v3121_v45 = vpop.f32.mrf.mxu2 }
0x277d   :  { %v3072_v26 = vpop.f32.mrf.mxu0 }
0x277e   :  { %v3122_v31 = vadd.f32 %v3121_v45, %v3072_v26 }
0x2780   :  { %v5073_v1 = vmul.f32 -1.442695, %v3122_v31 }
0x2782   :  { %v3124_v23 = vpop.f32.mrf.mxu2 }
0x2785   :  { %v3075_v39 = vpop.f32.mrf.mxu0 }
0x2786   :  { %v3125_v50 = vadd.f32 %v3124_v23, %v3075_v39 }
0x2788   :  { %6094 = vtanh.f32 %v3125_v50 }
0x2789   :  { %6096 = vpow2.f32 %v5068_v46 }
0x278a   :  { %v7274_v53 = vpop.f32.mrf.mxu2  ;;  %6098 = vpow2.f32 %v5067_v37 }
0x278b   :  { %6100 = vpow2.f32 %v5069_v62 }
0x278c   :  { %6102 = vpow2.f32 %v5072_v47 }
0x278d   :  { %v7276_v27 = vpop.f32.mrf.mxu0  ;;  %6104 = vpow2.f32 %v5073_v1 }
0x278e   :  { %v6095_v30 = vpop.eup %6094  ;;  %6106 = vpow2.f32 %v5070_v14 }
0x278f   :  { %v7278_v4 = vmul.f32 %v6095_v30, %v3189_v15  ;;  %v6097_v9 = vpop.eup %6096  ;;  %6108 = vpow2.f32 %v5071_v8 }
0x2790   :  { %v6099_v34 = vpop.eup %6098  ;;  %v7288_v35 = vadd.f32 1.0, %v6097_v9 }
0x2791   :  { %v6101_v55 = vpop.eup %6100  ;;  %v7292_v19 = vadd.f32 1.0, %v6099_v34 }
0x2792   :  { %v7280_v29 = vpop.f32.mrf.mxu2  ;;  %v6103_v13 = vpop.eup %6102  ;;  %v7294_v17 = vadd.f32 1.0, %v6101_v55  ;;  %6110 = vrcp.f32 %v7288_v35  ;;  %vm3211_vm4 = vweird.f32 %v7288_v35 }
0x2793   :  { %v6105_v61 = vpop.eup %6104  ;;  %v7296_v45 = vadd.f32 1.0, %v6103_v13  ;;  %6112 = vrcp.f32 %v7292_v19 }
0x2794   :  { %v6107_v56 = vpop.eup %6106  ;;  %v7299_v26 = vadd.f32 1.0, %v6105_v61  ;;  %6114 = vrcp.f32 %v7294_v17  ;;  %v3215_v61 = vand.u32 2147483647, %v7288_v35  ;;  %v3232_v33 = vand.u32 2147483648, %v7294_v17 }
0x2795   :  { %v7282_v54 = vpop.f32.mrf.mxu0  ;;  %v6109_v49 = vpop.eup %6108  ;;  %v7302_v38 = vadd.f32 1.0, %v6107_v56  ;;  %6116 = vrcp.f32 %v7296_v45  ;;  %v3217_v56 = vand.u32 2147483648, %v7288_v35  ;;  %vm3271_vm5 = vweird.f32 %v7296_v45 }
0x2796   :  { %v7305_v23 = vadd.f32 1.0, %v6109_v49  ;;  %6118 = vrcp.f32 %v7299_v26  ;;  %vm3226_vm0 = vweird.f32 %v7294_v17  ;;  %vm3286_vm8 = vweird.f32 %v7299_v26 }
0x2797   :  { %6120 = vrcp.f32 %v7302_v38  ;;  %vm3241_vm11 = vweird.f32 %v7302_v38 }
0x2798   :  { %v7310_v39 = vpop.eup %6110  ;;  %6122 = vrcp.f32 %v7305_v23 }
0x2799   :  { %v7313_v50 = vpop.eup %6112  ;;  %v3207_v7 = vmul.f32 %v7310_v39, %v7288_v35  ;;  %vm3212_vm2 = vweird.f32 %v7310_v39  ;;  %v5080_v35 = vld [vmem:[#allocation2 + $0x340] sm:$0xf] }
0x279a   :  { %v7284_v59 = vpop.f32.mrf.mxu2  ;;  %v7315_v51 = vpop.eup %6114  ;;  %v3192_v28 = vmul.f32 %v7313_v50, %v7292_v19  ;;  %vm3197_vm10 = vweird.f32 %v7313_v50 }
0x279b   :  { %v7317_v57 = vpop.eup %6116  ;;  %v3208_v21 = vsub.f32 1.0, %v3207_v7  ;;  %v3222_v37 = vmul.f32 %v7315_v51, %v7294_v17  ;;  %v3230_v7 = vand.u32 2147483647, %v7294_v17  ;;  %vm3227_vm6 = vweird.f32 %v7315_v51 }
0x279c   :  { %v7321_v18 = vpop.eup %6118  ;;  %v3267_v25 = vmul.f32 %v7317_v57, %v7296_v45  ;;  %v3193_v1 = vsub.f32 1.0, %v3192_v28  ;;  %vm3272_vm13 = vweird.f32 %v7317_v57 }
0x279d   :  { %v7286_v41 = vpop.f32.mrf.mxu0  ;;  %v7323_v30 = vpop.eup %6120  ;;  %v3282_v46 = vmul.f32 %v7321_v18, %v7299_v26  ;;  %v3209_v9 = vmul.f32 %v7310_v39, %v3208_v21  ;;  %v3223_v34 = vsub.f32 1.0, %v3222_v37  ;;  %v3245_v37 = vand.u32 2147483647, %v7302_v38  ;;  %vm7375_vm1 = vmor %vm3271_vm5, %vm3272_vm13 }
0x279e   :  { %v7325_v15 = vpop.eup %6122  ;;  %v3237_v62 = vmul.f32 %v7323_v30, %v7302_v38  ;;  %v3268_v14 = vsub.f32 1.0, %v3267_v25  ;;  %v7345_v20 = vmul.f32 %v7313_v50, %v3193_v1  ;;  %vm3242_vm3 = vweird.f32 %v7323_v30 }
0x279f   :  { %v3252_v3 = vmul.f32 %v7325_v15, %v7305_v23  ;;  %v3283_v8 = vsub.f32 1.0, %v3282_v46  ;;  %v7350_v46 = vadd.f32 %v7310_v39, %v3209_v9  ;;  %vm3257_vm7 = vweird.f32 %v7325_v15 }
0x27a0   :  { %v3238_v55 = vsub.f32 1.0, %v3237_v62  ;;  %v3269_v25 = vmul.f32 %v7317_v57, %v3268_v14  ;;  %v3224_v62 = vmul.f32 %v7315_v51, %v3223_v34  ;;  %vm3287_vm12 = vweird.f32 %v7321_v18 }
0x27a1   :  { %v3253_v13 = vsub.f32 1.0, %v3252_v3  ;;  %v3284_v21 = vmul.f32 %v7321_v18, %v3283_v8  ;;  %v3132_v34 = vadd.f32 %v7284_v59, %v7286_v41  ;;  %v3130_v59 = vadd.f32 %v7280_v29, %v7282_v54  ;;  %vm7389_vm5 = vmor %vm3286_vm8, %vm3287_vm12 }
0x27a2   :  { %v7290_v11 = vpop.f32.mrf.mxu2  ;;  %v3270_v8 = vadd.f32 %v7317_v57, %v3269_v25  ;;  %vm3256_vm13 = vweird.f32 %v7305_v23  ;;  %v3260_v54 = vand.u32 2147483647, %v7305_v23 }
0x27a3   :  { %v3285_v9 = vadd.f32 %v7321_v18, %v3284_v21  ;;  %vm7407_vm12 = vmor %vm3256_vm13, %vm3257_vm7  ;;  %vm3216_vm13 = vcmp.eq.f32.partialorder %v3215_v61, 8.507059e+37 }
0x27a4   :  { %vm7419_vm7 = vmor %vm3241_vm11, %vm3242_vm3  ;;  %vm3246_vm11 = vcmp.eq.f32.partialorder %v3245_v37, 8.507059e+37 }
0x27a5   :  { %v3085_v2 = vpop.f32.mrf.mxu0  ;;  %v3289_v25 = vsel %vm7389_vm5, %v7321_v18, %v3285_v9  ;;  %v3225_v18 = vadd.f32 %v7315_v51, %v3224_v62  ;;  %vm3261_vm5 = vcmp.eq.f32.partialorder %v3260_v54, 8.507059e+37  ;;  %vm7430_vm3 = vmor %vm3226_vm0, %vm3227_vm6  ;;  %vm3196_vm0 = vweird.f32 %v7292_v19 }
0x27a6   :  { %v3135_v1 = vadd.f32 %v7290_v11, %v3085_v2  ;;  %v3277_v11 = vand.u32 2147483648, %v7296_v45  ;;  %v3292_v2 = vand.u32 2147483648, %v7299_v26  ;;  %vm7445_vm6 = vmor %vm3211_vm4, %vm3212_vm2  ;;  %vm3231_vm2 = vcmp.eq.f32.partialorder %v3230_v7, 8.507059e+37 }
0x27a7   :  { %vm3198_vm4 = vmor %vm3196_vm0, %vm3197_vm10  ;;  %vm2692_vm0 = vcmp.gt.f32.partialorder %v7254_v43, 0.0 }
0x27aa   :  { %v3136_v60 = vpop.f32.mrf.mxu2 }
0x27ad   :  { %v3087_v58 = vpop.f32.mrf.mxu0 }
0x27ae   :  { %v3137_v28 = vadd.f32 %v3136_v60, %v3087_v58  ;;  %v3239_v60 = vmul.f32 %v7323_v30, %v3238_v55  ;;  %v3254_v58 = vmul.f32 %v7325_v15, %v3253_v13  ;;  %v3275_v13 = vand.u32 2147483647, %v7296_v45 }
0x27af   :  { %v3262_v45 = vand.u32 2147483648, %v7305_v23 }
0x27b0   :  { %v3240_v29 = vadd.f32 %v7323_v30, %v3239_v60 }
0x27b2   :  { %v3139_v31 = vpop.f32.mrf.mxu2 }
0x27b5   :  { %v3090_v47 = vpop.f32.mrf.mxu0 }
0x27b6   :  { %v3140_v49 = vadd.f32 %v3139_v31, %v3090_v47  ;;  %v3247_v31 = vand.u32 2147483648, %v7302_v38  ;;  %v3202_v38 = vand.u32 2147483648, %v7292_v19 }
0x27b8   :  { %6124 = vtanh.f32 %v3140_v49  ;;  %v3290_v49 = vand.u32 2147483647, %v7299_v26  ;;  %v3274_v26 = vsel %vm7375_vm1, %v7317_v57, %v3270_v8  ;;  %vm3276_vm1 = vcmp.eq.f32.partialorder %v3275_v13, 8.507059e+37 }
0x27b9   :  { %6126 = vtanh.f32 %v3137_v28  ;;  %v3255_v28 = vadd.f32 %v7325_v15, %v3254_v58  ;;  %v3293_v58 = vor.u32 1.1754944e-38, %v3292_v2  ;;  %v3263_v8 = vor.u32 1.1754944e-38, %v3262_v45 }
0x27ba   :  { %v3141_v3 = vpop.f32.mrf.mxu2  ;;  %vm3291_vm8 = vcmp.eq.f32.partialorder %v3290_v49, 8.507059e+37  ;;  %v3195_v13 = vadd.f32 %v7313_v50, %v7345_v20  ;;  %v3233_v20 = vor.u32 1.1754944e-38, %v3232_v33  ;;  %v3200_v45 = vand.u32 2147483647, %v7292_v19 }
0x27bb   :  { %v3259_v23 = vsel %vm7407_vm12, %v7325_v15, %v3255_v28  ;;  %v3244_v15 = vsel %vm7419_vm7, %v7323_v30, %v3240_v29  ;;  %v3218_v33 = vor.u32 1.1754944e-38, %v3217_v56  ;;  %v3203_v7 = vor.u32 1.1754944e-38, %v3202_v38  ;;  %v3535_v38 = vpop.permute.xlu0 %3534 }
0x27bc   :  { %v3264_v2 = vsel %vm3261_vm5, %v3263_v8, %v3259_v23  ;;  %vm3201_vm12 = vcmp.eq.f32.partialorder %v3200_v45, 8.507059e+37  ;;  %v5084_v23 = vld [vmem:[#allocation2 + $0x350] sm:$0xf]  ;;  %v5414_v8 = vld [vmem:[#allocation2 + $0x374] sm:$0xf0] }
0x27bd   :  { %v3092_v47 = vpop.f32.mrf.mxu0 }
0x27be   :  { %v3142_v14 = vadd.f32 %v3141_v3, %v3092_v47  ;;  %v6125_v21 = vpop.eup %6124  ;;  %v3127_v3 = vadd.f32 %v7274_v53, %v7276_v27  ;;  %v3278_v47 = vor.u32 1.1754944e-38, %v3277_v11  ;;  %v3294_v27 = vsel %vm3291_vm8, %v3293_v58, %v3289_v25  ;;  %v5410_v58 = vld [vmem:[#allocation2 + $0x334] sm:$0xf0] }
0x27bf   :  { %v6127_v57 = vpop.eup %6126  ;;  %v3248_v11 = vor.u32 1.1754944e-38, %v3247_v31  ;;  %v3229_v31 = vsel %vm7430_vm3, %v7315_v51, %v3225_v18  ;;  %v3214_v51 = vsel %vm7445_vm6, %v7310_v39, %v7350_v46  ;;  %v3199_v39 = vsel %vm3198_vm4, %v7313_v50, %v3195_v13  ;;  %v5411_v50 = vld [vmem:[#allocation2 + $0x344] sm:$0xf0]  ;;  %v5412_v18 = vld [vmem:[#allocation2 + $0x354] sm:$0xf0] }
0x27c0   :  { %6128 = vtanh.f32 %v3142_v14  ;;  %v3279_v53 = vsel %vm3276_vm1, %v3278_v47, %v3274_v26  ;;  %v3309_v30 = vmul.f32 %v6127_v57, %v3264_v2  ;;  %v3234_v25 = vsel %vm3231_vm2, %v3233_v20, %v3229_v31  ;;  %v5076_v47 = vld [vmem:[#allocation2 + $0x330] sm:$0xf]  ;;  %v5416_v2 = vld [vmem:[#allocation2 + $0x394] sm:$0xf0]  ;;  %v5104_v13 = vld [vmem:[#allocation2 + $0x3a0] sm:$0xf]  ;;  %v3547_v20 = vpop.permute.xlu2 %3546 }
0x27c1   :  { %6130 = vtanh.f32 %v3135_v1  ;;  %v3310_v9 = vmul.f32 %v6125_v21, %v3279_v53  ;;  %v3219_v17 = vsel %vm3216_vm13, %v3218_v33, %v3214_v51  ;;  %v3204_v21 = vsel %vm3201_vm12, %v3203_v7, %v3199_v39  ;;  %v5088_v53 = vld [vmem:[#allocation2 + $0x360] sm:$0xf] }
0x27c2   :  { %6132 = vtanh.f32 %v3132_v34  ;;  %v5077_v57 = vor.u32 %v5410_v58, %v5076_v47  ;;  %v5081_v61 = vor.u32 %v5411_v50, %v5080_v35  ;;  %vm8014_vm4 = vcmask 1047912  }
0x27c3   :  { %6134 = vtanh.f32 %v3130_v59  ;;  %v3249_v59 = vsel %vm3246_vm11, %v3248_v11, %v3244_v15  ;;  %v5415_v15 = vld [vmem:[#allocation2 + $0x384] sm:$0xf0]  ;;  %v5100_v11 = vld [vmem:[#allocation2 + $0x390] sm:$0xf]  ;;  %vm8015_vm13 = vmmov %vm8014_vm4 }
0x27c4   :  { %6136 = vtanh.f32 %v3127_v3  ;;  %v5101_v55 = vor.u32 %v5416_v2, %v5100_v11  ;;  %vm8016_vm12 = vmmov %vm8014_vm4 }
0x27c6   :  { %v6129_v60 = vpop.eup %6128 }
0x27c7   :  { %v3311_v34 = vmul.f32 %v6129_v60, %v3294_v27  ;;  %v6131_v62 = vpop.eup %6130  ;;  %v5085_v60 = vor.u32 %v5412_v18, %v5084_v23  ;;  %v5413_v27 = vld [vmem:[#allocation2 + $0x364] sm:$0xf0] }
0x27c8   :  { %v6133_v28 = vpop.eup %6132  ;;  %v3308_v37 = vmul.f32 %v6131_v62, %v3249_v59  ;;  %v5089_v14 = vor.u32 %v5413_v27, %v5088_v53  ;;  %v3527_v39 = vpop.permute.xlu2 %3526 }
0x27c9   :  { %v3315_v49 = vpack.c.bf16 %v3311_v34, %v3310_v9  ;;  %v6135_v26 = vpop.eup %6134  ;;  %v3307_v54 = vmul.f32 %v6133_v28, %v3234_v25  ;;  %v5096_v34 = vld [vmem:[#allocation2 + $0x380] sm:$0xf] }
0x27ca   :  { %v3314_v29 = vpack.c.bf16 %v3309_v30, %v3308_v37  ;;  %v6137_v46 = vpop.eup %6136  ;;  %v3306_v19 = vmul.f32 %v6135_v26, %v3219_v17  ;;  %v5097_v62 = vor.u32 %v5415_v15, %v5096_v34 }
0x27cb   :  { %3400 = vmatpush.bf16.msrb.mxu1 %v3315_v49  ;;  %v3305_v56 = vmul.f32 %v6137_v46, %v3204_v21  ;;  %v5417_v49 = vld [vmem:[#allocation2 + $0x3a4] sm:$0xf0]  ;;  %v3531_v46 = vpop.permute.xlu0 %3530 }
0x27cc   :  { %v3313_v3 = vpack.c.bf16 %v3307_v54, %v3306_v19  ;;  %v5105_v30 = vor.u32 %v5417_v49, %v5104_v13  ;;  %v2708_v49 = vmul.f32 0.4, %v7254_v43 }
0x27cd   :  { %v3312_v1 = vpack.c.bf16 %v3305_v56, %v7278_v4  ;;  %v5092_v4 = vld [vmem:[#allocation2 + $0x370] sm:$0xf] }
0x27ce   :  { %v5093_v9 = vor.u32 %v5414_v8, %v5092_v4 }
0x27cf   :  { %3401 = vmatpush.bf16.msrb.mxu1 %v3314_v29 }
0x27d3   :  { %3402 = vmatpush.bf16.msrb.mxu1 %v3313_v3  ;;  %v3543_v3 = vpop.permute.xlu1 %3542 }
0x27d7   :  { %3403 = vmatpush.bf16.msrb.mxu1 %v3312_v1 }
0x27da   :  { %5106 = vmatmul.msk.bf16.vlgmr.msrb.gmra.mxu1 %vm1614_vm9, %v5077_v57 }
0x27ea   :  { %5107 = vmatmul.msk.bf16.gmra.mxu1 %vm1614_vm9, %v5081_v61  ;;  %v3539_v61 = vpop.permute.xlu1 %3538 }
0x27fa   :  { %5108 = vmatmul.msk.bf16.gmra.mxu1 %vm1614_vm9, %v5085_v60 }
0x280a   :  { %5109 = vmatmul.msk.bf16.gmra.mxu1 %vm1614_vm9, %v5089_v14 }
0x281a   :  { %5110 = vmatmul.msk.bf16.gmra.mxu1 %vm1614_vm9, %v5093_v9 }
0x282a   :  { %5111 = vmatmul.msk.bf16.gmra.mxu1 %vm1614_vm9, %v5097_v62 }
0x283a   :  { %5112 = vmatmul.msk.bf16.gmra.mxu1 %vm1614_vm9, %v5101_v55 }
0x284a   :  { %5113 = vmatmul.msk.bf16.gmra.mxu1 %vm1614_vm9, %v5105_v30 }
0x2857   :  { %v3405_v31 = vpop.f32.mrf.mxu1 }
0x2858   :  { %v3461_v8 = vmul.f32 0.4, %v3405_v31  ;;  %vm3445_vm6 = vcmp.gt.f32.partialorder %v3405_v31, 0.0 }
0x285a   :  { %v3477_v2 = vsel %vm3445_vm6, %v3405_v31, %v3461_v8  ;;  %v2724_v31 = vsel %vm2692_vm0, %v7254_v43, %v2708_v49 }
0x285f   :  { %v3407_v28 = vpop.f32.mrf.mxu1 }
0x2860   :  { %v3462_v14 = vmul.f32 0.4, %v3407_v28  ;;  %vm3446_vm3 = vcmp.gt.f32.partialorder %v3407_v28, 0.0 }
0x2862   :  { %v3478_v34 = vsel %vm3446_vm3, %v3407_v28, %v3462_v14 }
0x2863   :  { %v3494_v55 = vadd.f32 %v3478_v34, %v7123_v40 }
0x2867   :  { %v3410_v59 = vpop.f32.mrf.mxu1 }
0x2868   :  { %v3463_v41 = vmul.f32 0.4, %v3410_v59  ;;  %vm3447_vm10 = vcmp.gt.f32.partialorder %v3410_v59, 0.0 }
0x286a   :  { %v3479_v37 = vsel %vm3447_vm10, %v3410_v59, %v3463_v41  ;;  %vm8017_vm10 = vmmov %vm8014_vm4 }
0x286b   :  { %v3495_v51 = vadd.f32 %v3479_v37, %v7136_v32 }
0x286d   :  { %v3503_v25 = vmul.f32 0.70710677, %v3495_v51 }
0x286f   :  { %v3412_v45 = vpop.f32.mrf.mxu1  ;;  %v7478_v17 = vadd.f32 %v3527_v39, %v3503_v25 }
0x2870   :  { %vm3448_vm1 = vcmp.gt.f32.partialorder %v3412_v45, 0.0  ;;  %v3464_v26 = vmul.f32 0.4, %v3412_v45 }
0x2872   :  { %v3480_v33 = vsel %vm3448_vm1, %v3412_v45, %v3464_v26  ;;  %vm8018_vm1 = vmmov %vm8014_vm4 }
0x2873   :  { %v3496_v29 = vadd.f32 %v3480_v33, %v7142_v6  ;;  %v3519_v33 = vpop.permute.xlu1 %3518  ;;  %vm8022_vm3 = vmmov %vm8018_vm1 }
0x2874   :  { %vm8024_vm6 = vmmov %vm8018_vm1 }
0x2875   :  { %v3504_v54 = vmul.f32 0.70710677, %v3496_v29  ;;  %vm8025_vm0 = vmmov %vm8018_vm1 }
0x2877   :  { %v7480_v7 = vadd.f32 %v3531_v46, %v3504_v54  ;;  %v3415_v19 = vpop.f32.mrf.mxu1 }
0x2878   :  { %v3465_v21 = vmul.f32 0.4, %v3415_v19  ;;  %vm3449_vm8 = vcmp.gt.f32.partialorder %v3415_v19, 0.0 }
0x2879   :  { %v5663_v32 = vpack.i.bf16 %v7480_v7, %v7478_v17  ;;  %v3682_v43 = vpack.c.bf16 %v7480_v7, %v7478_v17 }
0x287a   :  { %v3481_v56 = vsel %vm3449_vm8, %v3415_v19, %v3465_v21  ;;  %vm8019_vm8 = vmmov %vm8018_vm1 }
0x287b   :  { %5664 = vrot.lane.b32.xlu2 %v5663_v32, %s6224_s21  ;;  %v3497_v47 = vadd.f32 %v3481_v56, %v7157_v10 }
0x287d   :  { %v3505_v57 = vmul.f32 0.70710677, %v3497_v47 }
0x287f   :  { %v3417_v6 = vpop.f32.mrf.mxu1  ;;  %v7487_v23 = vadd.f32 %v3535_v38, %v3505_v57  ;;  %v3502_v38 = vmul.f32 0.70710677, %v3494_v55 }
0x2880   :  { %vm3450_vm7 = vcmp.gt.f32.partialorder %v3417_v6, 0.0  ;;  %v3466_v58 = vmul.f32 0.4, %v3417_v6 }
0x2882   :  { %v3482_v1 = vsel %vm3450_vm7, %v3417_v6, %v3466_v58  ;;  %vm8020_vm7 = vmmov %vm8018_vm1 }
0x2883   :  { %v3498_v35 = vadd.f32 %v3482_v1, %v7160_v63 }
0x2885   :  { %v3506_v50 = vmul.f32 0.70710677, %v3498_v35 }
0x2887   :  { %v7489_v18 = vadd.f32 %v3539_v61, %v3506_v50  ;;  %v3420_v60 = vpop.f32.mrf.mxu1 }
0x2888   :  { %v3467_v53 = vmul.f32 0.4, %v3420_v60  ;;  %vm3451_vm5 = vcmp.gt.f32.partialorder %v3420_v60, 0.0 }
0x2889   :  { %v5658_v27 = vpack.i.bf16 %v7489_v18, %v7487_v23  ;;  %v3683_v26 = vpack.c.bf16 %v7489_v18, %v7487_v23 }
0x288a   :  { %v3483_v10 = vsel %vm3451_vm5, %v3420_v60, %v3467_v53  ;;  %vm8021_vm5 = vmmov %vm8018_vm1 }
0x288b   :  { %5659 = vrot.lane.b32.xlu1 %v5658_v27, %s6224_s21  ;;  %v3499_v4 = vadd.f32 %v3483_v10, %v7110_v5  ;;  %v3493_v5 = vadd.f32 %v3477_v2, %v7130_v22  ;;  %v3523_v22 = vpop.permute.xlu2 %3522 }
0x288d   :  { %v3507_v62 = vmul.f32 0.70710677, %v3499_v4  ;;  %v3501_v51 = vmul.f32 0.70710677, %v3493_v5 }
0x288f   :  { %v3422_v63 = vpop.f32.mrf.mxu1  ;;  %v7500_v30 = vadd.f32 %v3543_v3, %v3507_v62  ;;  %v3549_v25 = vadd.f32 %v3519_v33, %v3501_v51 }
0x2890   :  { %vm3452_vm11 = vcmp.gt.f32.partialorder %v3422_v63, 0.0  ;;  %v3468_v9 = vmul.f32 0.4, %v3422_v63 }
0x2892   :  { %v3484_v15 = vsel %vm3452_vm11, %v3422_v63, %v3468_v9  ;;  %vm8023_vm11 = vmmov %vm8018_vm1 }
0x2893   :  { %v3500_v11 = vadd.f32 %v3484_v15, %v7114_v42 }
0x2895   :  { %v3508_v13 = vmul.f32 0.70710677, %v3500_v11 }
0x2897   :  { %v7502_v59 = vadd.f32 %v3547_v20, %v3508_v13  ;;  %v3425_v41 = vpop.f32.mrf.mxu1  ;;  %v7512_v20 = vadd.f32 %v3523_v22, %v3502_v38 }
0x2898   :  { %vm3453_vm2 = vcmp.gt.f32.partialorder %v3425_v41, 0.0  ;;  %v3469_v28 = vmul.f32 0.4, %v3425_v41 }
0x2899   :  { %v5653_v42 = vpack.i.bf16 %v7502_v59, %v7500_v30  ;;  %v3684_v40 = vpack.c.bf16 %v7502_v59, %v7500_v30  ;;  %v5668_v29 = vpack.i.bf16 %v7512_v20, %v3549_v25  ;;  %v3681_v54 = vpack.c.bf16 %v7512_v20, %v3549_v25 }
0x289a   :  { %v3485_v37 = vsel %vm3453_vm2, %v3425_v41, %v3469_v28  ;;  %vm8026_vm2 = vmmov %vm8025_vm0 }
0x289b   :  { %v7509_v45 = vadd.f32 %v3485_v37, %v2724_v31  ;;  %5654 = vrot.lane.b32.xlu0 %v5653_v42, %s6224_s21  ;;  %3801 = vmatpush.bf16.msra.mxu3 %v3684_v40 }
0x289f   :  { %3802 = vmatpush.bf16.msra.mxu3 %v3683_v26 }
0x28a3   :  { %5669 = vrot.lane.b32.xlu0 %v5668_v29, %s6224_s21  ;;  %3803 = vmatpush.bf16.msra.mxu3 %v3682_v43 }
0x28a7   :  { %3804 = vmatpush.bf16.msra.mxu3 %v3681_v54 }
0x28d5   :  { %v5665_v39 = vpop.permute.xlu2 %5664 }
0x28d6   :  { %v5667_v46 = vunpack.i.h.bf16 %v5665_v39  ;;  %v5666_v19 = vunpack.i.l.bf16 %v5665_v39 }
0x28d8   :  { %v3568_v21 = vsel %vm8014_vm4, %v5667_v46, %v7480_v7  ;;  %v3565_v32 = vsel %vm8015_vm13, %v5666_v19, %v7478_v17  ;;  %vm8027_vm4 = vmmov %vm8025_vm0 }
0x28d9   :  { %v5683_v3 = vpack.i.bf16 %v3568_v21, %v3565_v32  ;;  %vm8028_vm13 = vmmov %vm8025_vm0 }
0x28db   :  { %5684 = vrot.lane.b32.xlu0 %v5683_v3, %s6224_s21 }
0x28fd   :  { %v5660_v56 = vpop.permute.xlu1 %5659 }
0x28fe   :  { %v5662_v47 = vunpack.i.h.bf16 %v5660_v56  ;;  %v5661_v6 = vunpack.i.l.bf16 %v5660_v56 }
0x2900   :  { %v3574_v58 = vsel %vm8016_vm12, %v5662_v47, %v7489_v18  ;;  %v3571_v1 = vsel %vm8017_vm10, %v5661_v6, %v7487_v23  ;;  %vm8029_vm12 = vmmov %vm8025_vm0  ;;  %vm8030_vm10 = vcmask 662528  }
0x2901   :  { %v5678_v57 = vpack.i.bf16 %v3574_v58, %v3571_v1 }
0x2903   :  { %5679 = vrot.lane.b32.xlu2 %v5678_v57, %s6224_s21 }
0x290d   :  { %v5655_v35 = vpop.permute.xlu0 %5654 }
0x290e   :  { %v5657_v50 = vunpack.i.h.bf16 %v5655_v35  ;;  %v5656_v61 = vunpack.i.l.bf16 %v5655_v35 }
0x2910   :  { %v3580_v60 = vsel %vm8018_vm1, %v5657_v50, %v7502_v59  ;;  %v3577_v53 = vsel %vm8019_vm8, %v5656_v61, %v7500_v30  ;;  %vm8031_vm1 = vmmov %vm8030_vm10 }
0x2911   :  { %v5673_v27 = vpack.i.bf16 %v3580_v60, %v3577_v53  ;;  %vm8032_vm8 = vmmov %vm8031_vm1 }
0x2913   :  { %5674 = vrot.lane.b32.xlu1 %v5673_v27, %s6224_s21 }
0x2915   :  { %v5670_v10 = vpop.permute.xlu0 %5669 }
0x2916   :  { %v5672_v14 = vunpack.i.h.bf16 %v5670_v10  ;;  %v5671_v4 = vunpack.i.l.bf16 %v5670_v10 }
0x2918   :  { %v3562_v63 = vsel %vm8020_vm7, %v5672_v14, %v7512_v20  ;;  %v3559_v8 = vsel %vm8021_vm5, %v5671_v4, %v3549_v25  ;;  %v5116_v4 = vld [vmem:[#allocation2 + $0x230] sm:$0xf]  ;;  %vm8033_vm7 = vmmov %vm8031_vm1 }
0x2919   :  { %v5688_v9 = vpack.i.bf16 %v3562_v63, %v3559_v8  ;;  %v5419_v63 = vld [vmem:[#allocation2 + $0x234] sm:$0xf0]  ;;  %vm8034_vm5 = vmmov %vm8031_vm1 }
0x291b   :  { %5689 = vrot.lane.b32.xlu1 %v5688_v9, %s6224_s21 }
0x294d   :  { %v5685_v41 = vpop.permute.xlu0 %5684 }
0x294e   :  { %v5686_v40 = vunpack.i.l.bf16 %v5685_v41 }
0x2950   :  { %v3599_v22 = vsel %vm8027_vm4, %v5686_v40, %v7478_v17  ;;  %v5423_v40 = vld [vmem:[#allocation2 + $0x254] sm:$0xf0] }
0x295d   :  { %v5680_v34 = vpop.permute.xlu2 %5679 }
0x295e   :  { %v5682_v15 = vunpack.i.h.bf16 %v5680_v34  ;;  %v5681_v62 = vunpack.i.l.bf16 %v5680_v34 }
0x2960   :  { %v3602_v11 = vsel %vm8022_vm3, %v5682_v15, %v7489_v18  ;;  %v3601_v2 = vsel %vm8023_vm11, %v5681_v62, %v7487_v23  ;;  %v5687_v18 = vunpack.i.h.bf16 %v5685_v41  ;;  %v5117_v62 = vor.u32 %v5419_v63, %v5116_v4  ;;  %vm8035_vm3 = vmmov %vm8031_vm1 }
0x2961   :  { %v5693_v55 = vpack.i.bf16 %v3602_v11, %v3601_v2  ;;  %v5418_v11 = vld [vmem:[#allocation2 + $0x234] sm:$0xf]  ;;  %v5118_v2 = vld [vmem:[#allocation2 + $0x238] sm:$0xf0]  ;;  %vm8036_vm11 = vmmov %vm8031_vm1 }
0x2962   :  { %v3600_v51 = vsel %vm8026_vm2, %v5687_v18, %v7480_v7  ;;  %v5132_v18 = vld [vmem:[#allocation2 + $0x250] sm:$0xf] }
0x2963   :  { %5694 = vrot.lane.b32.xlu0 %v5693_v55, %s6225_s25  ;;  %v5703_v33 = vpack.i.bf16 %v3600_v51, %v3599_v22  ;;  %v5140_v22 = vld [vmem:[#allocation2 + $0x260] sm:$0xf] }
0x296b   :  { %5709 = vrot.lane.b32.xlu0 %v5693_v55, %s6223_s5 }
0x2985   :  { %v5675_v13 = vpop.permute.xlu1 %5674 }
0x2986   :  { %v5677_v49 = vunpack.i.h.bf16 %v5675_v13  ;;  %v5676_v5 = vunpack.i.l.bf16 %v5675_v13  ;;  %v5121_v13 = vor.u32 %v5418_v11, %v5118_v2 }
0x2988   :  { %v3604_v28 = vsel %vm8024_vm6, %v5677_v49, %v7502_v59  ;;  %v3603_v38 = vsel %vm8025_vm0, %v5676_v5, %v7500_v30  ;;  %v5124_v49 = vld [vmem:[#allocation2 + $0x240] sm:$0xf]  ;;  %v5421_v5 = vld [vmem:[#allocation2 + $0x244] sm:$0xf0]  ;;  %vm8037_vm6 = vmmov %vm8031_vm1 }
0x2989   :  { %v5713_v42 = vpack.i.bf16 %v3604_v28, %v3603_v38  ;;  %v5125_v41 = vor.u32 %v5421_v5, %v5124_v49  ;;  %v5420_v28 = vld [vmem:[#allocation2 + $0x244] sm:$0xf]  ;;  %v5126_v38 = vld [vmem:[#allocation2 + $0x248] sm:$0xf0] }
0x298b   :  { %5714 = vrot.lane.b32.xlu1 %v5713_v42, %s6223_s5  ;;  %5699 = vrot.lane.b32.xlu2 %v5713_v42, %s6225_s25  ;;  %v5129_v42 = vor.u32 %v5420_v28, %v5126_v38 }
0x298d   :  { %v5690_v23 = vpop.permute.xlu1 %5689 }
0x298e   :  { %v5692_v31 = vunpack.i.h.bf16 %v5690_v23  ;;  %v5691_v37 = vunpack.i.l.bf16 %v5690_v23  ;;  %v5133_v23 = vor.u32 %v5423_v40, %v5132_v18 }
0x2990   :  { %v3598_v59 = vsel %vm8028_vm13, %v5692_v31, %v7512_v20  ;;  %v3597_v30 = vsel %vm8029_vm12, %v5691_v37, %v3549_v25  ;;  %v5422_v31 = vld [vmem:[#allocation2 + $0x254] sm:$0xf]  ;;  %v5134_v37 = vld [vmem:[#allocation2 + $0x258] sm:$0xf0] }
0x2991   :  { %v5728_v26 = vpack.i.bf16 %v3598_v59, %v3597_v30  ;;  %v5137_v51 = vor.u32 %v5422_v31, %v5134_v37  ;;  %v5425_v59 = vld [vmem:[#allocation2 + $0x264] sm:$0xf0] }
0x2992   :  { %v5141_v30 = vor.u32 %v5425_v59, %v5140_v22 }
0x2993   :  { %5729 = vrot.lane.b32.xlu0 %v5728_v26, %s6223_s5  ;;  %5719 = vrot.lane.b32.xlu1 %v5728_v26, %s6225_s25  ;;  %v5424_v26 = vld [vmem:[#allocation2 + $0x264] sm:$0xf] }
0x2994   :  { %5704 = vrot.lane.b32.xlu2 %v5703_v33, %s6225_s25 }
0x299c   :  { %5724 = vrot.lane.b32.xlu2 %v5703_v33, %s6223_s5  ;;  %v5142_v33 = vld [vmem:[#allocation2 + $0x268] sm:$0xf0] }
0x29d5   :  { %v5695_v29 = vpop.permute.xlu0 %5694 }
0x29d6   :  { %v5697_v17 = vunpack.i.h.bf16 %v5695_v29  ;;  %v5696_v39 = vunpack.i.l.bf16 %v5695_v29  ;;  %v5145_v29 = vor.u32 %v5424_v26, %v5142_v33 }
0x29d8   :  { %v5182_v20 = vpack.c.bf16 %v5697_v17, %v5696_v39  ;;  %v5426_v17 = vld [vmem:[#allocation2 + $0x274] sm:$0xf]  ;;  %v5150_v39 = vld [vmem:[#allocation2 + $0x278] sm:$0xf0] }
0x29dd   :  { %v5710_v3 = vpop.permute.xlu0 %5709 }
0x29de   :  { %v5712_v58 = vunpack.i.h.bf16 %v5710_v3  ;;  %v5711_v1 = vunpack.i.l.bf16 %v5710_v3 }
0x29e0   :  { %v5194_v50 = vpack.c.bf16 %v5712_v58, %v5711_v1  ;;  %v5430_v58 = vld [vmem:[#allocation2 + $0x294] sm:$0xf]  ;;  %v5166_v1 = vld [vmem:[#allocation2 + $0x298] sm:$0xf0] }
0x29e5   :  { %v5700_v7 = vpop.permute.xlu2 %5699 }
0x29e6   :  { %v5702_v43 = vunpack.i.h.bf16 %v5700_v7  ;;  %v5701_v54 = vunpack.i.l.bf16 %v5700_v7  ;;  %v5148_v7 = vld [vmem:[#allocation2 + $0x270] sm:$0xf] }
0x29e8   :  { %v5179_v46 = vpack.c.bf16 %v5702_v43, %v5701_v54  ;;  %v5427_v43 = vld [vmem:[#allocation2 + $0x274] sm:$0xf0] }
0x29e9   :  { %v5149_v54 = vor.u32 %v5427_v43, %v5148_v7 }
0x29ea   :  { %5180 = vmatpush.bf16.msk.msra.mxu3 %vm6876_vm14, %v5179_v46  ;;  %v5153_v46 = vor.u32 %v5426_v17, %v5150_v39 }
0x29ee   :  { %v5705_v25 = vpop.permute.xlu2 %5704  ;;  %5183 = vmatpush.bf16.msk.msra.mxu3 %vm6876_vm14, %v5182_v20  ;;  %v5156_v20 = vld [vmem:[#allocation2 + $0x280] sm:$0xf] }
0x29ef   :  { %v5707_v19 = vunpack.i.h.bf16 %v5705_v25  ;;  %v5706_v21 = vunpack.i.l.bf16 %v5705_v25  ;;  %v5429_v25 = vld [vmem:[#allocation2 + $0x284] sm:$0xf0] }
0x29f1   :  { %v5185_v32 = vpack.c.bf16 %v5707_v19, %v5706_v21  ;;  %v5157_v19 = vor.u32 %v5429_v25, %v5156_v20  ;;  %v5428_v21 = vld [vmem:[#allocation2 + $0x284] sm:$0xf] }
0x29f3   :  { %5186 = vmatpush.bf16.msk.msra.mxu3 %vm6876_vm14, %v5185_v32  ;;  %v5158_v32 = vld [vmem:[#allocation2 + $0x288] sm:$0xf0] }
0x29f4   :  { %v5161_v3 = vor.u32 %v5428_v21, %v5158_v32 }
0x29f6   :  { %v5725_v35 = vpop.permute.xlu2 %5724 }
0x29f7   :  { %v5727_v61 = vunpack.i.h.bf16 %v5725_v35  ;;  %v5726_v60 = vunpack.i.l.bf16 %v5725_v35  ;;  %v5172_v35 = vld [vmem:[#allocation2 + $0x2a0] sm:$0xf] }
0x29f9   :  { %v5197_v8 = vpack.c.bf16 %v5727_v61, %v5726_v60  ;;  %v5432_v60 = vld [vmem:[#allocation2 + $0x2a4] sm:$0xf] }
0x29fd   :  { %v5715_v56 = vpop.permute.xlu1 %5714 }
0x29fe   :  { %v5717_v47 = vunpack.i.h.bf16 %v5715_v56  ;;  %v5716_v6 = vunpack.i.l.bf16 %v5715_v56  ;;  %v5164_v56 = vld [vmem:[#allocation2 + $0x290] sm:$0xf] }
0x2a00   :  { %v5191_v57 = vpack.c.bf16 %v5717_v47, %v5716_v6  ;;  %v5431_v47 = vld [vmem:[#allocation2 + $0x294] sm:$0xf0] }
0x2a01   :  { %v5165_v6 = vor.u32 %v5431_v47, %v5164_v56 }
0x2a02   :  { %5192 = vmatpush.bf16.msk.msrb.mxu0 %vm6880_vm15, %v5191_v57  ;;  %v5169_v57 = vor.u32 %v5430_v58, %v5166_v1 }
0x2a05   :  { %v5730_v53 = vpop.permute.xlu0 %5729  ;;  %v5720_v27 = vpop.permute.xlu1 %5719 }
0x2a06   :  { %v5722_v10 = vunpack.i.h.bf16 %v5720_v27  ;;  %v5721_v14 = vunpack.i.l.bf16 %v5720_v27  ;;  %5195 = vmatpush.bf16.msk.msrb.mxu0 %vm6880_vm15, %v5194_v50  ;;  %v5732_v9 = vunpack.i.h.bf16 %v5730_v53  ;;  %v5731_v34 = vunpack.i.l.bf16 %v5730_v53  ;;  %v5433_v50 = vld [vmem:[#allocation2 + $0x2a4] sm:$0xf0]  ;;  %v5174_v53 = vld [vmem:[#allocation2 + $0x2a8] sm:$0xf0] }
0x2a07   :  { %v5173_v61 = vor.u32 %v5433_v50, %v5172_v35  ;;  %v5177_v27 = vor.u32 %v5432_v60, %v5174_v53 }
0x2a08   :  { %v5188_v15 = vpack.c.bf16 %v5722_v10, %v5721_v14  ;;  %v5200_v55 = vpack.c.bf16 %v5732_v9, %v5731_v34 }
0x2a0a   :  { %5189 = vmatpush.bf16.msk.msra.mxu3 %vm6876_vm14, %v5188_v15  ;;  %5198 = vmatpush.bf16.msk.msrb.mxu0 %vm6880_vm15, %v5197_v8 }
0x2a0d   :  { %3809 = vmatmul.bf16.vlgmr.msra.gmra.mxu3 %v5117_v62 }
0x2a0e   :  { %4452 = vmatpush.bf16.msrb.mxu3 %v6635_v36  ;;  %5201 = vmatpush.bf16.msk.msrb.mxu0 %vm6880_vm15, %v5200_v55 }
0x2a11   :  { %5202 = vmatmul.msk.bf16.vlgmr.msrb.gmra.mxu0 %vm8030_vm10, %v5121_v13 }
0x2a1d   :  { %3814 = vmatmul.bf16.gmra.mxu3 %v5125_v41 }
0x2a21   :  { %5203 = vmatmul.msk.bf16.gmra.mxu0 %vm8031_vm1, %v5129_v42 }
0x2a2d   :  { %3819 = vmatmul.bf16.gmra.mxu3 %v5133_v23 }
0x2a31   :  { %5204 = vmatmul.msk.bf16.gmra.mxu0 %vm8032_vm8, %v5137_v51 }
0x2a3d   :  { %3824 = vmatmul.bf16.gmra.mxu3 %v5141_v30 }
0x2a41   :  { %5205 = vmatmul.msk.bf16.gmra.mxu0 %vm8033_vm7, %v5145_v29 }
0x2a4d   :  { %3829 = vmatmul.bf16.gmra.mxu3 %v5149_v54 }
0x2a51   :  { %5206 = vmatmul.msk.bf16.gmra.mxu0 %vm8034_vm5, %v5153_v46 }
0x2a5d   :  { %3834 = vmatmul.bf16.gmra.mxu3 %v5157_v19 }
0x2a61   :  { %5207 = vmatmul.msk.bf16.gmra.mxu0 %vm8035_vm3, %v5161_v3 }
0x2a6d   :  { %3839 = vmatmul.bf16.gmra.mxu3 %v5165_v6 }
0x2a71   :  { %5208 = vmatmul.msk.bf16.gmra.mxu0 %vm8036_vm11, %v5169_v57 }
0x2a7d   :  { %3844 = vmatmul.bf16.gmra.mxu3 %v5173_v61 }
0x2a81   :  { %5209 = vmatmul.msk.bf16.gmra.mxu0 %vm8037_vm6, %v5177_v27 }
0x2a8e   :  { %v3859_v10 = vpop.f32.mrf.mxu0 }
0x2a90   :  { %v3810_v14 = vpop.f32.mrf.mxu3 }
0x2a91   :  { %v3860_v4 = vadd.f32 %v3859_v10, %v3810_v14 }
0x2a93   :  { %v5210_v13 = vmul.f32 -1.442695, %v3860_v4 }
0x2a95   :  { %6138 = vpow2.f32 %v5210_v13 }
0x2a96   :  { %v3861_v63 = vpop.f32.mrf.mxu0 }
0x2a98   :  { %v3812_v8 = vpop.f32.mrf.mxu3 }
0x2a99   :  { %v3862_v9 = vadd.f32 %v3861_v63, %v3812_v8 }
0x2a9b   :  { %v5211_v28 = vmul.f32 -1.442695, %v3862_v9  ;;  %v6139_v38 = vpop.eup %6138 }
0x2a9c   :  { %v3923_v40 = vadd.f32 1.0, %v6139_v38 }
0x2a9d   :  { %6140 = vpow2.f32 %v5211_v28 }
0x2a9e   :  { %v3864_v34 = vpop.f32.mrf.mxu0  ;;  %6142 = vrcp.f32 %v3923_v40  ;;  %v3942_v47 = vand.u32 2147483648, %v3923_v40  ;;  %vm3936_vm2 = vweird.f32 %v3923_v40  ;;  %v3940_v6 = vand.u32 2147483647, %v3923_v40 }
0x2aa0   :  { %v3815_v15 = vpop.f32.mrf.mxu3  ;;  %v3943_v35 = vor.u32 1.1754944e-38, %v3942_v47  ;;  %vm3941_vm13 = vcmp.eq.f32.partialorder %v3940_v6, 8.507059e+37 }
0x2aa1   :  { %v3865_v62 = vadd.f32 %v3864_v34, %v3815_v15 }
0x2aa3   :  { %v6141_v23 = vpop.eup %6140  ;;  %v5212_v59 = vmul.f32 -1.442695, %v3865_v62 }
0x2aa4   :  { %v3924_v51 = vadd.f32 1.0, %v6141_v23  ;;  %v6143_v22 = vpop.eup %6142 }
0x2aa5   :  { %v3932_v26 = vmul.f32 %v6143_v22, %v3923_v40  ;;  %vm3937_vm0 = vweird.f32 %v6143_v22 }
0x2aa6   :  { %v3866_v11 = vpop.f32.mrf.mxu0  ;;  %6144 = vrcp.f32 %v3924_v51  ;;  %vm3938_vm4 = vmor %vm3936_vm2, %vm3937_vm0  ;;  %v3957_v63 = vand.u32 2147483648, %v3924_v51  ;;  %vm3951_vm10 = vweird.f32 %v3924_v51  ;;  %v3955_v8 = vand.u32 2147483647, %v3924_v51 }
0x2aa7   :  { %6146 = vpow2.f32 %v5212_v59  ;;  %v3933_v7 = vsub.f32 1.0, %v3932_v26 }
0x2aa8   :  { %v3817_v2 = vpop.f32.mrf.mxu3  ;;  %vm3956_vm8 = vcmp.eq.f32.partialorder %v3955_v8, 8.507059e+37 }
0x2aa9   :  { %v3867_v55 = vadd.f32 %v3866_v11, %v3817_v2  ;;  %v3934_v20 = vmul.f32 %v6143_v22, %v3933_v7  ;;  %v3958_v2 = vor.u32 1.1754944e-38, %v3957_v63 }
0x2aab   :  { %v5213_v30 = vmul.f32 -1.442695, %v3867_v55  ;;  %v3935_v56 = vadd.f32 %v6143_v22, %v3934_v20 }
0x2aac   :  { %v6145_v43 = vpop.eup %6144 }
0x2aad   :  { %6148 = vpow2.f32 %v5213_v30  ;;  %v6147_v54 = vpop.eup %6146  ;;  %v3947_v39 = vmul.f32 %v6145_v43, %v3924_v51  ;;  %v3939_v1 = vsel %vm3938_vm4, %v6143_v22, %v3935_v56  ;;  %vm3952_vm12 = vweird.f32 %v6145_v43 }
0x2aae   :  { %v3869_v49 = vpop.f32.mrf.mxu0  ;;  %v7594_v25 = vadd.f32 1.0, %v6147_v54  ;;  %v3944_v53 = vsel %vm3941_vm13, %v3943_v35, %v3939_v1  ;;  %vm3953_vm1 = vmor %vm3951_vm10, %vm3952_vm12 }
0x2aaf   :  { %v3948_v3 = vsub.f32 1.0, %v3947_v39 }
0x2ab0   :  { %v3820_v5 = vpop.f32.mrf.mxu3  ;;  %vm3966_vm3 = vweird.f32 %v7594_v25 }
0x2ab1   :  { %v7588_v41 = vadd.f32 %v3869_v49, %v3820_v5  ;;  %v3949_v57 = vmul.f32 %v6145_v43, %v3948_v3 }
0x2ab3   :  { %v6149_v17 = vpop.eup %6148  ;;  %v3950_v10 = vadd.f32 %v6145_v43, %v3949_v57  ;;  %v5214_v5 = vmul.f32 -1.442695, %v7588_v41 }
0x2ab4   :  { %v7596_v21 = vadd.f32 1.0, %v6149_v17 }
0x2ab5   :  { %v3954_v62 = vsel %vm3953_vm1, %v6145_v43, %v3950_v10  ;;  %v3972_v43 = vand.u32 2147483648, %v7594_v25 }
0x2ab6   :  { %v7590_v42 = vpop.f32.mrf.mxu0  ;;  %v3959_v28 = vsel %vm3956_vm8, %v3958_v2, %v3954_v62  ;;  %v3987_v54 = vand.u32 2147483648, %v7596_v21  ;;  %vm3981_vm6 = vweird.f32 %v7596_v21  ;;  %v3985_v20 = vand.u32 2147483647, %v7596_v21 }
0x2ab8   :  { %v7592_v18 = vpop.f32.mrf.mxu3  ;;  %v3988_v1 = vor.u32 1.1754944e-38, %v3987_v54  ;;  %vm3986_vm4 = vcmp.eq.f32.partialorder %v3985_v20, 8.507059e+37  ;;  %v5441_v20 = vld [vmem:[#allocation2 + $0x424] sm:$0xf0] }
0x2ab9   :  { %v3872_v23 = vadd.f32 %v7590_v42, %v7592_v18 }
0x2abb   :  { %v5215_v30 = vmul.f32 -1.442695, %v3872_v23 }
0x2abe   :  { %v3874_v31 = vpop.f32.mrf.mxu0 }
0x2ac0   :  { %v3825_v37 = vpop.f32.mrf.mxu3 }
0x2ac1   :  { %v3875_v11 = vadd.f32 %v3874_v31, %v3825_v37 }
0x2ac3   :  { %v5216_v22 = vmul.f32 -1.442695, %v3875_v11 }
0x2ac6   :  { %v3876_v33 = vpop.f32.mrf.mxu0 }
0x2ac8   :  { %v3827_v29 = vpop.f32.mrf.mxu3 }
0x2ac9   :  { %v3877_v55 = vadd.f32 %v3876_v33, %v3827_v29 }
0x2acb   :  { %v5217_v59 = vmul.f32 -1.442695, %v3877_v55 }
0x2ace   :  { %v3879_v46 = vpop.f32.mrf.mxu0 }
0x2ad0   :  { %v3830_v19 = vpop.f32.mrf.mxu3 }
0x2ad1   :  { %v3880_v32 = vadd.f32 %v3879_v46, %v3830_v19  ;;  %v3970_v46 = vand.u32 2147483647, %v7594_v25 }
0x2ad3   :  { %6150 = vtanh.f32 %v3880_v32  ;;  %vm3971_vm2 = vcmp.eq.f32.partialorder %v3970_v46, 8.507059e+37 }
0x2ad4   :  { %6152 = vrcp.f32 %v7594_v25 }
0x2ad5   :  { %6154 = vrcp.f32 %v7596_v21 }
0x2ad6   :  { %v3881_v58 = vpop.f32.mrf.mxu0 }
0x2ad8   :  { %v3832_v50 = vpop.f32.mrf.mxu3 }
0x2ad9   :  { %v6151_v61 = vpop.eup %6150  ;;  %v3882_v60 = vadd.f32 %v3881_v58, %v3832_v50  ;;  %v3973_v58 = vor.u32 1.1754944e-38, %v3972_v43 }
0x2ada   :  { %v7600_v27 = vpop.eup %6152  ;;  %v7602_v14 = vmul.f32 %v6151_v61, %v3944_v53 }
0x2adb   :  { %v7604_v4 = vpop.eup %6154  ;;  %6156 = vtanh.f32 %v3882_v60  ;;  %v3962_v9 = vmul.f32 %v7600_v27, %v7594_v25  ;;  %vm3967_vm7 = vweird.f32 %v7600_v27 }
0x2adc   :  { %v3977_v34 = vmul.f32 %v7604_v4, %v7596_v21  ;;  %6158 = vpow2.f32 %v5214_v5  ;;  %vm3982_vm5 = vweird.f32 %v7604_v4  ;;  %vm7626_vm11 = vmor %vm3966_vm3, %vm3967_vm7 }
0x2add   :  { %v3963_v38 = vsub.f32 1.0, %v3962_v9  ;;  %6160 = vpow2.f32 %v5216_v22  ;;  %vm7633_vm0 = vmor %vm3981_vm6, %vm3982_vm5 }
0x2ade   :  { %v3884_v15 = vpop.f32.mrf.mxu0  ;;  %v3978_v40 = vsub.f32 1.0, %v3977_v34  ;;  %6162 = vpow2.f32 %v5217_v59 }
0x2adf   :  { %v3964_v33 = vmul.f32 %v7600_v27, %v3963_v38 }
0x2ae0   :  { %v3835_v13 = vpop.f32.mrf.mxu3  ;;  %v3979_v41 = vmul.f32 %v7604_v4, %v3978_v40 }
0x2ae1   :  { %v6157_v49 = vpop.eup %6156  ;;  %v3885_v37 = vadd.f32 %v3884_v15, %v3835_v13  ;;  %v3965_v18 = vadd.f32 %v7600_v27, %v3964_v33 }
0x2ae2   :  { %v7613_v51 = vmul.f32 %v6157_v49, %v3959_v28  ;;  %v3980_v7 = vadd.f32 %v7604_v4, %v3979_v41  ;;  %v6159_v17 = vpop.eup %6158 }
0x2ae3   :  { %6164 = vtanh.f32 %v3885_v37  ;;  %v6161_v19 = vpop.eup %6160  ;;  %v3969_v47 = vsel %vm7626_vm11, %v7600_v27, %v3965_v18  ;;  %v7647_v10 = vadd.f32 1.0, %v6159_v17 }
0x2ae4   :  { %v4067_v31 = vpack.c.bf16 %v7613_v51, %v7602_v14  ;;  %6166 = vpow2.f32 %v5215_v30  ;;  %v6163_v3 = vpop.eup %6162  ;;  %v3984_v6 = vsel %vm7633_vm0, %v7604_v4, %v3980_v7  ;;  %v7643_v21 = vadd.f32 1.0, %v6161_v19  ;;  %v5438_v14 = vld [vmem:[#allocation2 + $0x3f4] sm:$0xf0] }
0x2ae5   :  { %v7645_v61 = vadd.f32 1.0, %v6163_v3  ;;  %v3974_v60 = vsel %vm3971_vm2, %v3973_v58, %v3969_v47  ;;  %v3989_v53 = vsel %vm3986_vm4, %v3988_v1, %v3984_v6  ;;  %vm3996_vm6 = vweird.f32 %v7647_v10 }
0x2ae6   :  { %v3886_v26 = vpop.f32.mrf.mxu0  ;;  %vm4026_vm1 = vweird.f32 %v7643_v21  ;;  %v4032_v39 = vand.u32 2147483648, %v7643_v21  ;;  %v4030_v19 = vand.u32 2147483647, %v7643_v21 }
0x2ae7   :  { %v4047_v46 = vand.u32 2147483648, %v7645_v61  ;;  %vm4041_vm7 = vweird.f32 %v7645_v61  ;;  %v4045_v32 = vand.u32 2147483647, %v7645_v61 }
0x2ae8   :  { %v3837_v29 = vpop.f32.mrf.mxu3  ;;  %vm4031_vm2 = vcmp.eq.f32.partialorder %v4030_v19, 8.507059e+37 }
0x2ae9   :  { %v3887_v42 = vadd.f32 %v3886_v26, %v3837_v29  ;;  %v6165_v25 = vpop.eup %6164  ;;  %vm4046_vm4 = vcmp.eq.f32.partialorder %v4045_v32, 8.507059e+37 }
0x2aea   :  { %v6167_v57 = vpop.eup %6166  ;;  %v7649_v27 = vmul.f32 %v6165_v25, %v3974_v60 }
0x2aeb   :  { %6168 = vtanh.f32 %v3887_v42  ;;  %v7653_v4 = vadd.f32 1.0, %v6167_v57 }
0x2aec   :  { %6170 = vrcp.f32 %v7643_v21 }
0x2aed   :  { %6172 = vrcp.f32 %v7645_v61  ;;  %vm4011_vm11 = vweird.f32 %v7653_v4  ;;  %v4017_v47 = vand.u32 2147483648, %v7653_v4  ;;  %v4015_v1 = vand.u32 2147483647, %v7653_v4 }
0x2aee   :  { %v3889_v56 = vpop.f32.mrf.mxu0  ;;  %6174 = vrcp.f32 %v7647_v10 }
0x2aef   :  { %6176 = vrcp.f32 %v7653_v4 }
0x2af0   :  { %v3840_v35 = vpop.f32.mrf.mxu3 }
0x2af1   :  { %v6169_v50 = vpop.eup %6168  ;;  %v3890_v7 = vadd.f32 %v3889_v56, %v3840_v35  ;;  %v4048_v35 = vor.u32 1.1754944e-38, %v4047_v46  ;;  %v5248_v46 = vld [vmem:[#allocation2 + $0x420] sm:$0xf] }
0x2af2   :  { %v7651_v63 = vmul.f32 %v6169_v50, %v3989_v53  ;;  %v7661_v15 = vpop.eup %6170  ;;  %v4002_v50 = vand.u32 2147483648, %v7647_v10  ;;  %v4000_v53 = vand.u32 2147483647, %v7647_v10  ;;  %v5249_v19 = vor.u32 %v5441_v20, %v5248_v46 }
0x2af3   :  { %v7663_v62 = vpop.eup %6172  ;;  %v4022_v55 = vmul.f32 %v7661_v15, %v7643_v21  ;;  %vm4027_vm12 = vweird.f32 %v7661_v15  ;;  %v4033_v21 = vor.u32 1.1754944e-38, %v4032_v39 }
0x2af4   :  { %v4068_v8 = vpack.c.bf16 %v7651_v63, %v7649_v27  ;;  %v7665_v11 = vpop.eup %6174  ;;  %v4037_v13 = vmul.f32 %v7663_v62, %v7645_v61  ;;  %vm4042_vm10 = vweird.f32 %v7663_v62  ;;  %vm7689_vm8 = vmor %vm4026_vm1, %vm4027_vm12  ;;  %v5232_v27 = vld [vmem:[#allocation2 + $0x3e0] sm:$0xf]  ;;  %v5437_v63 = vld [vmem:[#allocation2 + $0x3e4] sm:$0xf0] }
0x2af5   :  { %v7667_v2 = vpop.eup %6176  ;;  %v3992_v5 = vmul.f32 %v7665_v11, %v7647_v10  ;;  %v4023_v40 = vsub.f32 1.0, %v4022_v55  ;;  %vm7697_vm5 = vmor %vm4041_vm7, %vm4042_vm10  ;;  %vm3997_vm3 = vweird.f32 %v7665_v11  ;;  %vm4001_vm10 = vcmp.eq.f32.partialorder %v4000_v53, 8.507059e+37 }
0x2af6   :  { %v3891_v9 = vpop.f32.mrf.mxu0  ;;  %v4007_v28 = vmul.f32 %v7667_v2, %v7653_v4  ;;  %v4038_v23 = vsub.f32 1.0, %v4037_v13  ;;  %vm4012_vm13 = vweird.f32 %v7667_v2  ;;  %vm3998_vm12 = vmor %vm3996_vm6, %vm3997_vm3  ;;  %vm2694_vm7 = vcmp.gt.f32.partialorder %v7259_v24, 0.0 }
0x2af7   :  { %v3993_v22 = vsub.f32 1.0, %v3992_v5  ;;  %v4024_v26 = vmul.f32 %v7661_v15, %v4023_v40  ;;  %vm7716_vm0 = vmor %vm4011_vm11, %vm4012_vm13  ;;  %vm4016_vm13 = vcmp.eq.f32.partialorder %v4015_v1, 8.507059e+37  ;;  %v7741_v1 = vpop.f32.mrf.mxu1  ;;  %vm2695_vm11 = vcmp.gt.f32.partialorder %v7262_v16, 0.0 }
0x2af8   :  { %v3842_v34 = vpop.f32.mrf.mxu3  ;;  %v4008_v59 = vsub.f32 1.0, %v4007_v28  ;;  %v4039_v33 = vmul.f32 %v7663_v62, %v4038_v23  ;;  %v4003_v28 = vor.u32 1.1754944e-38, %v4002_v50 }
0x2af9   :  { %v3892_v30 = vadd.f32 %v3891_v9, %v3842_v34  ;;  %v3994_v42 = vmul.f32 %v7665_v11, %v3993_v22  ;;  %v4025_v54 = vadd.f32 %v7661_v15, %v4024_v26  ;;  %v5435_v26 = vld [vmem:[#allocation2 + $0x3c4] sm:$0xf0] }
0x2afa   :  { %v4009_v18 = vmul.f32 %v7667_v2, %v4008_v59  ;;  %v4040_v17 = vadd.f32 %v7663_v62, %v4039_v33  ;;  %v5220_v59 = vld [vmem:[#allocation2 + $0x3b0] sm:$0xf] }
0x2afb   :  { %v4029_v6 = vsel %vm7689_vm8, %v7661_v15, %v4025_v54  ;;  %v3995_v58 = vadd.f32 %v7665_v11, %v3994_v42  ;;  %v5244_v54 = vld [vmem:[#allocation2 + $0x410] sm:$0xf] }
0x2afc   :  { %v4010_v3 = vadd.f32 %v7667_v2, %v4009_v18  ;;  %v4044_v25 = vsel %vm7697_vm5, %v7663_v62, %v4040_v17  ;;  %v4034_v34 = vsel %vm4031_vm2, %v4033_v21, %v4029_v6  ;;  %v4018_v62 = vor.u32 1.1754944e-38, %v4017_v47  ;;  %v5236_v18 = vld [vmem:[#allocation2 + $0x3f0] sm:$0xf]  ;;  %v5440_v17 = vld [vmem:[#allocation2 + $0x414] sm:$0xf0] }
0x2afd   :  { %v4049_v15 = vsel %vm4046_vm4, %v4048_v35, %v4044_v25  ;;  %v5237_v51 = vor.u32 %v5438_v14, %v5236_v18  ;;  %v5245_v39 = vor.u32 %v5440_v17, %v5244_v54  ;;  %vm2696_vm2 = vcmp.gt.f32.partialorder %v7264_v0, 0.0 }
0x2afe   :  { %v3894_v49 = vpop.f32.mrf.mxu0  ;;  %v4014_v4 = vsel %vm7716_vm0, %v7667_v2, %v4010_v3 }
0x2aff   :  { %v3430_v21 = vpop.f32.mrf.mxu1 }
0x2b00   :  { %v3845_v38 = vpop.f32.mrf.mxu3  ;;  %vm3455_vm8 = vcmp.gt.f32.partialorder %v3430_v21, 0.0 }
0x2b01   :  { %v3895_v37 = vadd.f32 %v3894_v49, %v3845_v38  ;;  %v3999_v49 = vsel %vm3998_vm12, %v7665_v11, %v3995_v58  ;;  %v4019_v38 = vsel %vm4016_vm13, %v4018_v62, %v4014_v4  ;;  %v5224_v11 = vld [vmem:[#allocation2 + $0x3c0] sm:$0xf]  ;;  %v2710_v62 = vmul.f32 0.4, %v7259_v24 }
0x2b02   :  { %v4004_v23 = vsel %vm4001_vm10, %v4003_v28, %v3999_v49  ;;  %v5225_v33 = vor.u32 %v5435_v26, %v5224_v11  ;;  %v2711_v49 = vmul.f32 0.4, %v7262_v16  ;;  %vm2697_vm13 = vcmp.gt.f32.partialorder %v7267_v44, 0.0 }
0x2b03   :  { %6178 = vtanh.f32 %v3895_v37  ;;  %v5434_v37 = vld [vmem:[#allocation2 + $0x3b4] sm:$0xf0] }
0x2b04   :  { %6180 = vtanh.f32 %v3892_v30  ;;  %v5221_v30 = vor.u32 %v5434_v37, %v5220_v59 }
0x2b06   :  { %v3896_v41 = vpop.f32.mrf.mxu0 }
0x2b07   :  { %v3432_v53 = vpop.f32.mrf.mxu1 }
0x2b08   :  { %v3847_v29 = vpop.f32.mrf.mxu3  ;;  %vm3456_vm5 = vcmp.gt.f32.partialorder %v3432_v53, 0.0 }
0x2b09   :  { %v3897_v43 = vadd.f32 %v3896_v41, %v3847_v29  ;;  %v6179_v57 = vpop.eup %6178  ;;  %v5228_v41 = vld [vmem:[#allocation2 + $0x3d0] sm:$0xf]  ;;  %v5436_v29 = vld [vmem:[#allocation2 + $0x3d4] sm:$0xf0] }
0x2b0a   :  { %v6181_v60 = vpop.eup %6180  ;;  %v4065_v55 = vmul.f32 %v6179_v57, %v4034_v34  ;;  %v5229_v42 = vor.u32 %v5436_v29, %v5228_v41  ;;  %v3471_v34 = vmul.f32 0.4, %v3430_v21 }
0x2b0b   :  { %6182 = vtanh.f32 %v3897_v43  ;;  %v4064_v40 = vmul.f32 %v6181_v60, %v4019_v38 }
0x2b0c   :  { %6184 = vtanh.f32 %v3890_v7  ;;  %v5439_v7 = vld [vmem:[#allocation2 + $0x404] sm:$0xf0] }
0x2b11   :  { %v6183_v9 = vpop.eup %6182 }
0x2b12   :  { %v4066_v13 = vmul.f32 %v6183_v9, %v4049_v15  ;;  %v6185_v5 = vpop.eup %6184  ;;  %v3435_v15 = vpop.f32.mrf.mxu1 }
0x2b13   :  { %v4063_v2 = vmul.f32 %v6185_v5, %v4004_v23  ;;  %v3487_v5 = vsel %vm3455_vm8, %v3430_v21, %v3471_v34  ;;  %v2727_v23 = vsel %vm2695_vm11, %v7262_v16, %v2711_v49  ;;  %v3473_v29 = vmul.f32 0.4, %v3435_v15  ;;  %v8049_v34 = vld [vmem:[#allocation5_spill] sm:$0xff] }
0x2b14   :  { %v4070_v10 = vpack.c.bf16 %v4066_v13, %v4065_v55  ;;  %v3472_v55 = vmul.f32 0.4, %v3432_v53  ;;  %vm3457_vm0 = vcmp.gt.f32.partialorder %v3435_v15, 0.0  ;;  %v2712_v16 = vmul.f32 0.4, %v7264_v0 }
0x2b15   :  { %v4069_v22 = vpack.c.bf16 %v4064_v40, %v4063_v2  ;;  %vm2698_vm8 = vcmp.gt.f32.partialorder %v7270_v48, 0.0  ;;  %vm3454_vm11 = vcmp.gt.f32.partialorder %v7741_v1, 0.0 }
0x2b16   :  { %4155 = vmatpush.bf16.msrb.mxu2 %v4070_v10  ;;  %v3488_v28 = vsel %vm3456_vm5, %v3432_v53, %v3472_v55  ;;  %v2728_v14 = vsel %vm2696_vm2, %v7264_v0, %v2712_v16 }
0x2b1a   :  { %4156 = vmatpush.bf16.msrb.mxu2 %v4069_v22  ;;  %v3512_v22 = vadd.f32 %v3488_v28, %v2727_v23 }
0x2b1e   :  { %4157 = vmatpush.bf16.msrb.mxu2 %v4068_v8  ;;  %v5233_v8 = vor.u32 %v5437_v63, %v5232_v27  ;;  %v2713_v63 = vmul.f32 0.4, %v7267_v44 }
0x2b20   :  { %v2729_v54 = vsel %vm2697_vm13, %v7267_v44, %v2713_v63  ;;  %v2714_v44 = vmul.f32 0.4, %v7270_v48 }
0x2b22   :  { %4158 = vmatpush.bf16.msrb.mxu2 %v4067_v31  ;;  %v5240_v31 = vld [vmem:[#allocation2 + $0x400] sm:$0xf] }
0x2b23   :  { %v5241_v43 = vor.u32 %v5439_v7, %v5240_v31 }
0x2b25   :  { %5250 = vmatmul.msk.bf16.vlgmr.msrb.gmra.mxu2 %vm1614_vm9, %v5221_v30  ;;  %v3437_v30 = vpop.f32.mrf.mxu1 }
0x2b26   :  { %vm3458_vm4 = vcmp.gt.f32.partialorder %v3437_v30, 0.0 }
0x2b2d   :  { %v3440_v18 = vpop.f32.mrf.mxu1 }
0x2b35   :  { %5251 = vmatmul.msk.bf16.gmra.mxu2 %vm1614_vm9, %v5225_v33 }
0x2b45   :  { %5252 = vmatmul.msk.bf16.gmra.mxu2 %vm1614_vm9, %v5229_v42  ;;  %v3474_v42 = vmul.f32 0.4, %v3437_v30 }
0x2b55   :  { %5253 = vmatmul.msk.bf16.gmra.mxu2 %vm1614_vm9, %v5233_v8  ;;  %v3489_v8 = vsel %vm3457_vm0, %v3435_v15, %v3473_v29  ;;  %v2709_v15 = vmul.f32 0.4, %v8049_v34  ;;  %vm2693_vm0 = vcmp.gt.f32.partialorder %v8049_v34, 0.0 }
0x2b56   :  { %v3513_v7 = vadd.f32 %v3489_v8, %v2728_v14 }
0x2b65   :  { %5254 = vmatmul.msk.bf16.gmra.mxu2 %vm1614_vm9, %v5237_v51  ;;  %v3490_v51 = vsel %vm3458_vm4, %v3437_v30, %v3474_v42  ;;  %vm8050_vm4 = vcmask 1047912  }
0x2b66   :  { %vm8052_vm13 = vmmov %vm8050_vm4 }
0x2b75   :  { %5255 = vmatmul.msk.bf16.gmra.mxu2 %vm1614_vm9, %v5241_v43 }
0x2b85   :  { %5256 = vmatmul.msk.bf16.gmra.mxu2 %vm1614_vm9, %v5245_v39  ;;  %v3514_v39 = vadd.f32 %v3490_v51, %v2729_v54 }
0x2b95   :  { %5257 = vmatmul.msk.bf16.gmra.mxu2 %vm1614_vm9, %v5249_v19 }
0x2ba8   :  { %v4160_v32 = vpop.f32.mrf.mxu2 }
0x2bb0   :  { %v4161_v3 = vpop.f32.mrf.mxu2 }
0x2bb8   :  { %v4163_v56 = vpop.f32.mrf.mxu2 }
0x2bb9   :  { %v3442_v56 = vpop.f32.mrf.mxu1 }
0x2bc0   :  { %v4164_v47 = vpop.f32.mrf.mxu2 }
0x2bc8   :  { %v4166_v6 = vpop.f32.mrf.mxu2 }
0x2bc9   :  { %v3475_v6 = vmul.f32 0.4, %v3440_v18 }
0x2bd0   :  { %v4167_v25 = vpop.f32.mrf.mxu2 }
0x2bd1   :  { %v3476_v25 = vmul.f32 0.4, %v3442_v56 }
0x2bd8   :  { %v4169_v58 = vpop.f32.mrf.mxu2 }
0x2be0   :  { %v4170_v57 = vpop.f32.mrf.mxu2 }
0x2be1   :  { %v8048_v57 = vld [vmem:[#allocation6_spill] sm:$0xff] }
0x2be2   :  { %v2715_v21 = vmul.f32 0.4, %v8048_v57 }
0x2be8   :  { %v4172_v35 = vpop.f32.mrf.mxu2 }
0x2be9   :  { %vm4192_vm1 = vcmp.gt.f32.partialorder %v4172_v35, 0.0  ;;  %v4200_v50 = vmul.f32 0.4, %v4172_v35 }
0x2beb   :  { %v4208_v61 = vsel %vm4192_vm1, %v4172_v35, %v4200_v50  ;;  %vm3459_vm1 = vcmp.gt.f32.partialorder %v3440_v18, 0.0  ;;  %v2730_v50 = vsel %vm2698_vm8, %v7270_v48, %v2714_v44 }
0x2bec   :  { %v7744_v60 = vadd.f32 %v4208_v61, %v7509_v45  ;;  %v2726_v45 = vsel %vm2694_vm7, %v7259_v24, %v2710_v62  ;;  %vm3460_vm7 = vcmp.gt.f32.partialorder %v3442_v56, 0.0  ;;  %v3491_v35 = vsel %vm3459_vm1, %v3440_v18, %v3475_v6  ;;  %vm8054_vm1 = vmmov %vm8050_vm4 }
0x2bed   :  { %v3511_v10 = vadd.f32 %v3487_v5, %v2726_v45  ;;  %v3470_v61 = vmul.f32 0.4, %v7741_v1  ;;  %v3492_v53 = vsel %vm3460_vm7, %v3442_v56, %v3476_v25  ;;  %v3515_v62 = vadd.f32 %v3491_v35, %v2730_v50  ;;  %vm8055_vm8 = vmmov %vm8054_vm1 }
0x2bee   :  { %vm8056_vm7 = vmmov %vm8054_vm1 }
0x2bef   :  { %v3486_v28 = vsel %vm3454_vm11, %v7741_v1, %v3470_v61  ;;  %vm8059_vm11 = vmmov %vm8054_vm1 }
0x2bf0   :  { %v7746_v4 = vpop.f32.mrf.mxu2 }
0x2bf1   :  { %v4201_v49 = vmul.f32 0.4, %v7746_v4  ;;  %vm4193_vm2 = vcmp.gt.f32.partialorder %v7746_v4, 0.0 }
0x2bf3   :  { %v4209_v23 = vsel %vm4193_vm2, %v7746_v4, %v4201_v49 }
0x2bf8   :  { %v4177_v9 = vpop.f32.mrf.mxu2 }
0x2bf9   :  { %v4202_v13 = vmul.f32 0.4, %v4177_v9  ;;  %vm4194_vm3 = vcmp.gt.f32.partialorder %v4177_v9, 0.0 }
0x2bfb   :  { %v4210_v38 = vsel %vm4194_vm3, %v4177_v9, %v4202_v13  ;;  %vm2699_vm3 = vcmp.gt.f32.partialorder %v8048_v57, 0.0 }
0x2bfc   :  { %v4218_v59 = vadd.f32 %v4210_v38, %v3511_v10  ;;  %v2731_v13 = vsel %vm2699_vm3, %v8048_v57, %v2715_v21  ;;  %vm8058_vm3 = vmmov %vm8054_vm1 }
0x2bfd   :  { %v3516_v45 = vadd.f32 %v3492_v53, %v2731_v13 }
0x2bfe   :  { %v7754_v26 = vmul.f32 0.57735026, %v4218_v59 }
0x2c00   :  { %v4179_v40 = vpop.f32.mrf.mxu2 }
0x2c01   :  { %vm4195_vm6 = vcmp.gt.f32.partialorder %v4179_v40, 0.0  ;;  %v4203_v2 = vmul.f32 0.4, %v4179_v40 }
0x2c03   :  { %v4211_v37 = vsel %vm4195_vm6, %v4179_v40, %v4203_v2  ;;  %v2725_v40 = vsel %vm2693_vm0, %v8049_v34, %v2709_v15  ;;  %vm8061_vm0 = vmmov %vm8054_vm1 }
0x2c04   :  { %v4219_v11 = vadd.f32 %v4211_v37, %v3512_v22  ;;  %v3510_v2 = vadd.f32 %v3486_v28, %v2725_v40  ;;  %vm8062_vm2 = vmmov %vm8061_vm0 }
0x2c06   :  { %v7756_v33 = vmul.f32 0.57735026, %v4219_v11  ;;  %v4217_v37 = vadd.f32 %v4209_v23, %v3510_v2 }
0x2c08   :  { %v4182_v41 = vpop.f32.mrf.mxu2  ;;  %v5743_v24 = vpack.i.bf16 %v7756_v33, %v7754_v26  ;;  %v4357_v4 = vpack.c.bf16 %v7756_v33, %v7754_v26 }
0x2c09   :  { %v4204_v27 = vmul.f32 0.4, %v4182_v41  ;;  %vm4196_vm12 = vcmp.gt.f32.partialorder %v4182_v41, 0.0 }
0x2c0a   :  { %5744 = vrot.lane.b32.xlu0 %v5743_v24, %s6224_s21  ;;  %v4224_v24 = vmul.f32 0.57735026, %v7744_v60 }
0x2c0b   :  { %v4212_v31 = vsel %vm4196_vm12, %v4182_v41, %v4204_v27  ;;  %v7790_v41 = vmul.f32 0.57735026, %v4217_v37  ;;  %vm8051_vm12 = vmmov %vm8050_vm4 }
0x2c0c   :  { %v4220_v46 = vadd.f32 %v4212_v31, %v3513_v7 }
0x2c0d   :  { %v5748_v29 = vpack.i.bf16 %v7790_v41, %v4224_v24  ;;  %v4356_v16 = vpack.c.bf16 %v7790_v41, %v4224_v24 }
0x2c0e   :  { %v7767_v32 = vmul.f32 0.57735026, %v4220_v46 }
0x2c10   :  { %v4184_v43 = vpop.f32.mrf.mxu2 }
0x2c11   :  { %vm4197_vm10 = vcmp.gt.f32.partialorder %v4184_v43, 0.0  ;;  %v4205_v17 = vmul.f32 0.4, %v4184_v43 }
0x2c13   :  { %v4213_v20 = vsel %vm4197_vm10, %v4184_v43, %v4205_v17  ;;  %vm8053_vm10 = vmmov %vm8050_vm4 }
0x2c14   :  { %v4221_v19 = vadd.f32 %v4213_v20, %v3514_v39 }
0x2c16   :  { %v7769_v3 = vmul.f32 0.57735026, %v4221_v19 }
0x2c18   :  { %v4187_v47 = vpop.f32.mrf.mxu2  ;;  %v5738_v0 = vpack.i.bf16 %v7769_v3, %v7767_v32  ;;  %v4358_v1 = vpack.c.bf16 %v7769_v3, %v7767_v32 }
0x2c19   :  { %v4206_v58 = vmul.f32 0.4, %v4187_v47  ;;  %vm4198_vm5 = vcmp.gt.f32.partialorder %v4187_v47, 0.0 }
0x2c1a   :  { %5739 = vrot.lane.b32.xlu2 %v5738_v0, %s6224_s21 }
0x2c1b   :  { %v4214_v9 = vsel %vm4198_vm5, %v4187_v47, %v4206_v58  ;;  %vm8057_vm5 = vmmov %vm8054_vm1 }
0x2c1c   :  { %v4222_v48 = vadd.f32 %v4214_v9, %v3515_v62 }
0x2c1e   :  { %v4230_v22 = vmul.f32 0.57735026, %v4222_v48 }
0x2c20   :  { %v4189_v55 = vpop.f32.mrf.mxu2 }
0x2c21   :  { %vm4199_vm6 = vcmp.gt.f32.partialorder %v4189_v55, 0.0  ;;  %v4207_v5 = vmul.f32 0.4, %v4189_v55 }
0x2c23   :  { %v4215_v38 = vsel %vm4199_vm6, %v4189_v55, %v4207_v5  ;;  %vm8060_vm6 = vmmov %vm8054_vm1 }
0x2c24   :  { %v4223_v10 = vadd.f32 %v4215_v38, %v3516_v45 }
0x2c26   :  { %v4231_v59 = vmul.f32 0.57735026, %v4223_v10 }
0x2c28   :  { %v5733_v30 = vpack.i.bf16 %v4231_v59, %v4230_v22  ;;  %v4359_v11 = vpack.c.bf16 %v4231_v59, %v4230_v22 }
0x2c2a   :  { %5734 = vrot.lane.b32.xlu1 %v5733_v30, %s6224_s21  ;;  %4420 = vmatpush.bf16.msra.mxu1 %v4359_v11 }
0x2c2e   :  { %4421 = vmatpush.bf16.msra.mxu1 %v4358_v1 }
0x2c32   :  { %5749 = vrot.lane.b32.xlu1 %v5748_v29, %s6224_s21  ;;  %4422 = vmatpush.bf16.msra.mxu1 %v4357_v4 }
0x2c36   :  { %4423 = vmatpush.bf16.msra.mxu1 %v4356_v16 }
0x2c74   :  { %v5740_v42 = vpop.permute.xlu2 %5739 }
0x2c75   :  { %v5742_v27 = vunpack.i.h.bf16 %v5740_v42  ;;  %v5741_v63 = vunpack.i.l.bf16 %v5740_v42 }
0x2c77   :  { %v4249_v8 = vsel %vm8050_vm4, %v5742_v27, %v7769_v3  ;;  %v4246_v60 = vsel %vm8051_vm12, %v5741_v63, %v7767_v32  ;;  %vm8063_vm4 = vmmov %vm8061_vm0 }
0x2c78   :  { %v5758_v18 = vpack.i.bf16 %v4249_v8, %v4246_v60  ;;  %vm8064_vm12 = vmmov %vm8061_vm0 }
0x2c7a   :  { %5759 = vrot.lane.b32.xlu0 %v5758_v18, %s6224_s21 }
0x2c7c   :  { %v5745_v14 = vpop.permute.xlu0 %5744 }
0x2c7d   :  { %v5747_v51 = vunpack.i.h.bf16 %v5745_v14  ;;  %v5746_v31 = vunpack.i.l.bf16 %v5745_v14 }
0x2c7f   :  { %v4243_v7 = vsel %vm8052_vm13, %v5747_v51, %v7756_v33  ;;  %v4240_v43 = vsel %vm8053_vm10, %v5746_v31, %v7754_v26  ;;  %vm8065_vm13 = vmmov %vm8061_vm0 }
0x2c80   :  { %v5763_v54 = vpack.i.bf16 %v4243_v7, %v4240_v43  ;;  %v5442_v43 = vld [vmem:[#allocation2 + $0x434] sm:$0xf] }
0x2c82   :  { %5764 = vrot.lane.b32.xlu1 %v5763_v54, %s6224_s21  ;;  %v5262_v54 = vld [vmem:[#allocation2 + $0x438] sm:$0xf0] }
0x2c9c   :  { %v5735_v17 = vpop.permute.xlu1 %5734 }
0x2c9d   :  { %v5737_v39 = vunpack.i.h.bf16 %v5735_v17  ;;  %v5736_v46 = vunpack.i.l.bf16 %v5735_v17 }
0x2c9f   :  { %v4255_v20 = vsel %vm8054_vm1, %v5737_v39, %v4231_v59  ;;  %v4252_v19 = vsel %vm8055_vm8, %v5736_v46, %v4230_v22 }
0x2ca0   :  { %v5753_v56 = vpack.i.bf16 %v4255_v20, %v4252_v19  ;;  %v5265_v20 = vor.u32 %v5442_v43, %v5262_v54 }
0x2ca2   :  { %5754 = vrot.lane.b32.xlu2 %v5753_v56, %s6224_s21 }
0x2ca4   :  { %v5750_v47 = vpop.permute.xlu1 %5749 }
0x2ca5   :  { %v5752_v0 = vunpack.i.h.bf16 %v5750_v47  ;;  %v5751_v6 = vunpack.i.l.bf16 %v5750_v47 }
0x2ca7   :  { %v4237_v44 = vsel %vm8056_vm7, %v5752_v0, %v7790_v41  ;;  %v4234_v25 = vsel %vm8057_vm5, %v5751_v6, %v4224_v24 }
0x2ca8   :  { %v5768_v58 = vpack.i.bf16 %v4237_v44, %v4234_v25  ;;  %v5260_v44 = vld [vmem:[#allocation2 + $0x430] sm:$0xf]  ;;  %v5443_v25 = vld [vmem:[#allocation2 + $0x434] sm:$0xf0] }
0x2caa   :  { %5769 = vrot.lane.b32.xlu2 %v5768_v58, %s6224_s21 }
0x2cec   :  { %v5760_v57 = vpop.permute.xlu0 %5759 }
0x2ced   :  { %v5762_v21 = vunpack.i.h.bf16 %v5760_v57  ;;  %v5761_v35 = vunpack.i.l.bf16 %v5760_v57  ;;  %v5261_v57 = vor.u32 %v5443_v25, %v5260_v44 }
0x2cef   :  { %v4277_v50 = vsel %vm8058_vm3, %v5762_v21, %v7769_v3  ;;  %v4276_v61 = vsel %vm8059_vm11, %v5761_v35, %v7767_v32  ;;  %v5444_v21 = vld [vmem:[#allocation2 + $0x444] sm:$0xf]  ;;  %v5270_v35 = vld [vmem:[#allocation2 + $0x448] sm:$0xf0] }
0x2cf0   :  { %v5773_v53 = vpack.i.bf16 %v4277_v50, %v4276_v61  ;;  %v5273_v50 = vor.u32 %v5444_v21, %v5270_v35  ;;  %v5268_v61 = vld [vmem:[#allocation2 + $0x440] sm:$0xf] }
0x2cf2   :  { %5774 = vrot.lane.b32.xlu1 %v5773_v53, %s6223_s5 }
0x2cf4   :  { %v5765_v62 = vpop.permute.xlu1 %5764 }
0x2cf5   :  { %v5767_v5 = vunpack.i.h.bf16 %v5765_v62  ;;  %v5766_v45 = vunpack.i.l.bf16 %v5765_v62 }
0x2cf7   :  { %v4275_v28 = vsel %vm8062_vm2, %v5767_v5, %v7756_v33  ;;  %v4274_v38 = vsel %vm8063_vm4, %v5766_v45, %v7754_v26  ;;  %v5448_v5 = vld [vmem:[#allocation2 + $0x464] sm:$0xf]  ;;  %v5286_v45 = vld [vmem:[#allocation2 + $0x468] sm:$0xf0]  ;;  %vm8066_vm2 = vmmov %vm8061_vm0 }
0x2cf8   :  { %v5783_v2 = vpack.i.bf16 %v4275_v28, %v4274_v38  ;;  %vm8067_vm4 = vmmov %vm8061_vm0 }
0x2cfa   :  { %5789 = vrot.lane.b32.xlu1 %v5773_v53, %s6225_s25  ;;  %v5445_v53 = vld [vmem:[#allocation2 + $0x444] sm:$0xf0] }
0x2cfc   :  { %v5755_v9 = vpop.permute.xlu2 %5754 }
0x2cfd   :  { %v5757_v34 = vunpack.i.h.bf16 %v5755_v9  ;;  %v5756_v15 = vunpack.i.l.bf16 %v5755_v9  ;;  %v5269_v9 = vor.u32 %v5445_v53, %v5268_v61 }
0x2cff   :  { %v4279_v55 = vsel %vm8060_vm6, %v5757_v34, %v4231_v59  ;;  %v4278_v13 = vsel %vm8061_vm0, %v5756_v15, %v4230_v22  ;;  %v5446_v34 = vld [vmem:[#allocation2 + $0x454] sm:$0xf]  ;;  %v5278_v15 = vld [vmem:[#allocation2 + $0x458] sm:$0xf0] }
0x2d00   :  { %v5793_v49 = vpack.i.bf16 %v4279_v55, %v4278_v13  ;;  %v5281_v62 = vor.u32 %v5446_v34, %v5278_v15  ;;  %v5276_v55 = vld [vmem:[#allocation2 + $0x450] sm:$0xf]  ;;  %v5447_v13 = vld [vmem:[#allocation2 + $0x454] sm:$0xf0] }
0x2d02   :  { %5794 = vrot.lane.b32.xlu2 %v5793_v49, %s6225_s25  ;;  %5779 = vrot.lane.b32.xlu0 %v5793_v49, %s6223_s5  ;;  %v5277_v49 = vor.u32 %v5447_v13, %v5276_v55 }
0x2d04   :  { %v5770_v32 = vpop.permute.xlu2 %5769 }
0x2d05   :  { %v5772_v3 = vunpack.i.h.bf16 %v5770_v32  ;;  %v5771_v48 = vunpack.i.l.bf16 %v5770_v32  ;;  %v5289_v32 = vor.u32 %v5448_v5, %v5286_v45 }
0x2d07   :  { %v4273_v10 = vsel %vm8064_vm12, %v5772_v3, %v7790_v41  ;;  %v4272_v40 = vsel %vm8065_vm13, %v5771_v48, %v4224_v24  ;;  %v5284_v3 = vld [vmem:[#allocation2 + $0x460] sm:$0xf]  ;;  %v5449_v48 = vld [vmem:[#allocation2 + $0x464] sm:$0xf0]  ;;  %vm8068_vm12 = vmmov %vm8061_vm0 }
0x2d08   :  { %v5808_v23 = vpack.i.bf16 %v4273_v10, %v4272_v40  ;;  %v5285_v28 = vor.u32 %v5449_v48, %v5284_v3  ;;  %vm8069_vm13 = vmmov %vm8061_vm0 }
0x2d0a   :  { %5809 = vrot.lane.b32.xlu1 %v5808_v23, %s6225_s25  ;;  %5799 = vrot.lane.b32.xlu2 %v5808_v23, %s6223_s5 }
0x2d0b   :  { %5784 = vrot.lane.b32.xlu0 %v5783_v2, %s6223_s5 }
0x2d13   :  { %5804 = vrot.lane.b32.xlu0 %v5783_v2, %s6225_s25 }
0x2d5c   :  { %v5795_v22 = vpop.permute.xlu2 %5794 }
0x2d5d   :  { %v5797_v33 = vunpack.i.h.bf16 %v5795_v22  ;;  %v5796_v59 = vunpack.i.l.bf16 %v5795_v22 }
0x2d5f   :  { %v5291_v37 = vpack.c.bf16 %v5797_v33, %v5796_v59 }
0x2d61   :  { %5292 = vmatpush.bf16.msk.msra.mxu1 %vm6876_vm14, %v5291_v37 }
0x2d64   :  { %v5775_v26 = vpop.permute.xlu1 %5774  ;;  %v5800_v8 = vpop.permute.xlu2 %5799 }
0x2d65   :  { %v5777_v16 = vunpack.i.h.bf16 %v5775_v26  ;;  %v5776_v42 = vunpack.i.l.bf16 %v5775_v26  ;;  %v5802_v51 = vunpack.i.h.bf16 %v5800_v8  ;;  %v5801_v31 = vunpack.i.l.bf16 %v5800_v8 }
0x2d67   :  { %v5306_v63 = vpack.c.bf16 %v5777_v16, %v5776_v42  ;;  %v5312_v17 = vpack.c.bf16 %v5802_v51, %v5801_v31 }
0x2d6c   :  { %v5790_v30 = vpop.permute.xlu1 %5789 }
0x2d6d   :  { %v5792_v11 = vunpack.i.h.bf16 %v5790_v30  ;;  %v5791_v41 = vunpack.i.l.bf16 %v5790_v30 }
0x2d6f   :  { %v5294_v1 = vpack.c.bf16 %v5792_v11, %v5791_v41 }
0x2d71   :  { %5295 = vmatpush.bf16.msk.msra.mxu1 %vm6876_vm14, %v5294_v1 }
0x2d74   :  { %v5780_v24 = vpop.permute.xlu0 %5779 }
0x2d75   :  { %v5782_v29 = vunpack.i.h.bf16 %v5780_v24  ;;  %v5781_v4 = vunpack.i.l.bf16 %v5780_v24 }
0x2d77   :  { %v5303_v27 = vpack.c.bf16 %v5782_v29, %v5781_v4 }
0x2d79   :  { %5304 = vmatpush.bf16.msk.msrb.mxu3 %vm6880_vm15, %v5303_v27 }
0x2d7c   :  { %v5810_v39 = vpop.permute.xlu1 %5809 }
0x2d7d   :  { %v5785_v60 = vpop.permute.xlu0 %5784  ;;  %5307 = vmatpush.bf16.msk.msrb.mxu3 %vm6880_vm15, %v5306_v63  ;;  %v5812_v47 = vunpack.i.h.bf16 %v5810_v39  ;;  %v5811_v0 = vunpack.i.l.bf16 %v5810_v39 }
0x2d7e   :  { %v5787_v18 = vunpack.i.h.bf16 %v5785_v60  ;;  %v5786_v14 = vunpack.i.l.bf16 %v5785_v60 }
0x2d7f   :  { %v5300_v58 = vpack.c.bf16 %v5812_v47, %v5811_v0 }
0x2d80   :  { %v5309_v7 = vpack.c.bf16 %v5787_v18, %v5786_v14 }
0x2d82   :  { %5310 = vmatpush.bf16.msk.msrb.mxu3 %vm6880_vm15, %v5309_v7 }
0x2d85   :  { %v5805_v46 = vpop.permute.xlu0 %5804 }
0x2d86   :  { %v5807_v19 = vunpack.i.h.bf16 %v5805_v46  ;;  %v5806_v56 = vunpack.i.l.bf16 %v5805_v46  ;;  %5313 = vmatpush.bf16.msk.msrb.mxu3 %vm6880_vm15, %v5312_v17 }
0x2d88   :  { %v5297_v6 = vpack.c.bf16 %v5807_v19, %v5806_v56 }
0x2d89   :  { %5314 = vmatmul.msk.bf16.vlgmr.msrb.gmra.mxu3 %vm1614_vm9, %v5265_v20 }
0x2d8a   :  { %5298 = vmatpush.bf16.msk.msra.mxu1 %vm6876_vm14, %v5297_v6 }
0x2d8e   :  { %5301 = vmatpush.bf16.msk.msra.mxu1 %vm6876_vm14, %v5300_v58 }
0x2d91   :  { %4428 = vmatmul.bf16.vlgmr.msra.gmra.mxu1 %v5261_v57 }
0x2d99   :  { %5315 = vmatmul.msk.bf16.gmra.mxu3 %vm1614_vm9, %v5273_v50 }
0x2da1   :  { %4433 = vmatmul.bf16.gmra.mxu1 %v5269_v9 }
0x2da9   :  { %5316 = vmatmul.msk.bf16.gmra.mxu3 %vm1614_vm9, %v5281_v62 }
0x2db1   :  { %4438 = vmatmul.bf16.gmra.mxu1 %v5277_v49 }
0x2db9   :  { %5317 = vmatmul.msk.bf16.gmra.mxu3 %vm1614_vm9, %v5289_v32 }
0x2dc1   :  { %4443 = vmatmul.bf16.gmra.mxu1 %v5285_v28 }
0x2e0c   :  { %v4458_v38 = vpop.f32.mrf.mxu3 }
0x2e0e   :  { %v4429_v10 = vpop.f32.mrf.mxu1 }
0x2e0f   :  { %v4459_v40 = vadd.f32 %v4458_v38, %v4429_v10 }
0x2e11   :  { %v4486_v58 = vmul.f32 0.4, %v4459_v40  ;;  %vm4478_vm6 = vcmp.gt.f32.partialorder %v4459_v40, 0.0 }
0x2e13   :  { %v4494_v35 = vsel %vm4478_vm6, %v4459_v40, %v4486_v58  ;;  %vm8077_vm6 = vmmov %vm8061_vm0 }
0x2e14   :  { %v4460_v23 = vpop.f32.mrf.mxu3 }
0x2e16   :  { %v4431_v2 = vpop.f32.mrf.mxu1 }
0x2e17   :  { %v4461_v19 = vadd.f32 %v4460_v23, %v4431_v2 }
0x2e19   :  { %v4487_v25 = vmul.f32 0.4, %v4461_v19  ;;  %vm4479_vm11 = vcmp.gt.f32.partialorder %v4461_v19, 0.0 }
0x2e1b   :  { %v4495_v21 = vsel %vm4479_vm11, %v4461_v19, %v4487_v25  ;;  %vm8076_vm11 = vmmov %vm8061_vm0 }
0x2e1c   :  { %v4463_v22 = vpop.f32.mrf.mxu3  ;;  %v5828_v50 = vpack.i.bf16 %v4495_v21, %v4494_v35  ;;  %v4626_v53 = vpack.c.bf16 %v4495_v21, %v4494_v35 }
0x2e1e   :  { %v4434_v33 = vpop.f32.mrf.mxu1 }
0x2e1f   :  { %v4464_v59 = vadd.f32 %v4463_v22, %v4434_v33 }
0x2e21   :  { %v4488_v30 = vmul.f32 0.4, %v4464_v59  ;;  %vm4480_vm10 = vcmp.gt.f32.partialorder %v4464_v59, 0.0 }
0x2e23   :  { %v7858_v1 = vsel %vm4480_vm10, %v4464_v59, %v4488_v30  ;;  %vm8070_vm10 = vmmov %vm8061_vm0 }
0x2e24   :  { %v4465_v37 = vpop.f32.mrf.mxu3 }
0x2e26   :  { %v4436_v26 = vpop.f32.mrf.mxu1 }
0x2e27   :  { %v4466_v11 = vadd.f32 %v4465_v37, %v4436_v26 }
0x2e29   :  { %vm4481_vm1 = vcmp.gt.f32.partialorder %v4466_v11, 0.0  ;;  %v4489_v41 = vmul.f32 0.4, %v4466_v11 }
0x2e2b   :  { %v7860_v24 = vsel %vm4481_vm1, %v4466_v11, %v4489_v41  ;;  %vm8071_vm1 = vmmov %vm8061_vm0 }
0x2e2c   :  { %v4468_v29 = vpop.f32.mrf.mxu3  ;;  %v5823_v4 = vpack.i.bf16 %v7860_v24, %v7858_v1  ;;  %v4627_v61 = vpack.c.bf16 %v7860_v24, %v7858_v1 }
0x2e2e   :  { %5824 = vrot.lane.b32.xlu1 %v5823_v4, %s6224_s21  ;;  %v4439_v16 = vpop.f32.mrf.mxu1 }
0x2e2f   :  { %v4469_v42 = vadd.f32 %v4468_v29, %v4439_v16 }
0x2e31   :  { %v4490_v8 = vmul.f32 0.4, %v4469_v42  ;;  %vm4482_vm8 = vcmp.gt.f32.partialorder %v4469_v42, 0.0 }
0x2e33   :  { %v7865_v14 = vsel %vm4482_vm8, %v4469_v42, %v4490_v8  ;;  %vm8072_vm8 = vmmov %vm8061_vm0 }
0x2e34   :  { %v4470_v27 = vpop.f32.mrf.mxu3 }
0x2e36   :  { %v4441_v63 = vpop.f32.mrf.mxu1 }
0x2e37   :  { %v4471_v60 = vadd.f32 %v4470_v27, %v4441_v63 }
0x2e39   :  { %vm4483_vm7 = vcmp.gt.f32.partialorder %v4471_v60, 0.0  ;;  %v4491_v18 = vmul.f32 0.4, %v4471_v60 }
0x2e3b   :  { %v7867_v51 = vsel %vm4483_vm7, %v4471_v60, %v4491_v18  ;;  %vm8073_vm7 = vmmov %vm8061_vm0 }
0x2e3c   :  { %v4473_v31 = vpop.f32.mrf.mxu3  ;;  %v5818_v7 = vpack.i.bf16 %v7867_v51, %v7865_v14  ;;  %v4628_v57 = vpack.c.bf16 %v7867_v51, %v7865_v14 }
0x2e3e   :  { %5819 = vrot.lane.b32.xlu0 %v5818_v7, %s6224_s21  ;;  %v4444_v43 = vpop.f32.mrf.mxu1 }
0x2e3f   :  { %v4474_v54 = vadd.f32 %v4473_v31, %v4444_v43 }
0x2e41   :  { %v4492_v46 = vmul.f32 0.4, %v4474_v54  ;;  %vm4484_vm5 = vcmp.gt.f32.partialorder %v4474_v54, 0.0 }
0x2e43   :  { %v4500_v47 = vsel %vm4484_vm5, %v4474_v54, %v4492_v46  ;;  %vm8074_vm5 = vmmov %vm8061_vm0 }
0x2e44   :  { %v4475_v39 = vpop.f32.mrf.mxu3 }
0x2e46   :  { %v4446_v17 = vpop.f32.mrf.mxu1 }
0x2e47   :  { %v4476_v20 = vadd.f32 %v4475_v39, %v4446_v17 }
0x2e49   :  { %vm4485_vm3 = vcmp.gt.f32.partialorder %v4476_v20, 0.0  ;;  %v4493_v56 = vmul.f32 0.4, %v4476_v20 }
0x2e4b   :  { %v4501_v0 = vsel %vm4485_vm3, %v4476_v20, %v4493_v56  ;;  %vm8075_vm3 = vmmov %vm8061_vm0 }
0x2e4c   :  { %v5813_v6 = vpack.i.bf16 %v4501_v0, %v4500_v47  ;;  %v4629_v44 = vpack.c.bf16 %v4501_v0, %v4500_v47 }
0x2e4e   :  { %5814 = vrot.lane.b32.xlu2 %v5813_v6, %s6224_s21  ;;  %4648 = vmatpush.bf16.msra.mxu0 %v4629_v44 }
0x2e52   :  { %4649 = vmatpush.bf16.msra.mxu0 %v4628_v57 }
0x2e56   :  { %5829 = vrot.lane.b32.xlu2 %v5828_v50, %s6224_s21  ;;  %4650 = vmatpush.bf16.msra.mxu0 %v4627_v61 }
0x2e5a   :  { %4651 = vmatpush.bf16.msra.mxu0 %v4626_v53 }
0x2ea0   :  { %v5825_v9 = vpop.permute.xlu1 %5824 }
0x2ea1   :  { %v5827_v34 = vunpack.i.h.bf16 %v5825_v9  ;;  %v5826_v15 = vunpack.i.l.bf16 %v5825_v9 }
0x2ea3   :  { %v4513_v62 = vsel %vm8061_vm0, %v5827_v34, %v7860_v24  ;;  %v4510_v55 = vsel %vm8066_vm2, %v5826_v15, %v7858_v1  ;;  %vm8078_vm2 = vmmov %vm8061_vm0 }
0x2ea4   :  { %v5843_v13 = vpack.i.bf16 %v4513_v62, %v4510_v55  ;;  %v5320_v62 = vld [vmem:[#allocation2 + $0x470] sm:$0xf]  ;;  %v5451_v55 = vld [vmem:[#allocation2 + $0x474] sm:$0xf0] }
0x2ea6   :  { %5844 = vrot.lane.b32.xlu2 %v5843_v13, %s6224_s21 }
0x2ea8   :  { %v5815_v49 = vpop.permute.xlu2 %5814 }
0x2ea9   :  { %v5817_v5 = vunpack.i.h.bf16 %v5815_v49  ;;  %v5816_v45 = vunpack.i.l.bf16 %v5815_v49 }
0x2eab   :  { %v4525_v32 = vsel %vm8067_vm4, %v5817_v5, %v4501_v0  ;;  %v4522_v3 = vsel %vm8068_vm12, %v5816_v45, %v4500_v47  ;;  %vm8079_vm4 = vmmov %vm8061_vm0  ;;  %v5321_v45 = vor.u32 %v5451_v55, %v5320_v62 }
0x2eac   :  { %v5833_v48 = vpack.i.bf16 %v4525_v32, %v4522_v3 }
0x2eae   :  { %5834 = vrot.lane.b32.xlu0 %v5833_v48, %s6224_s21 }
0x2eb0   :  { %v5820_v28 = vpop.permute.xlu0 %5819  ;;  %v5830_v38 = vpop.permute.xlu2 %5829 }
0x2eb1   :  { %v5822_v10 = vunpack.i.h.bf16 %v5820_v28  ;;  %v5821_v40 = vunpack.i.l.bf16 %v5820_v28  ;;  %v5832_v23 = vunpack.i.h.bf16 %v5830_v38  ;;  %v5831_v2 = vunpack.i.l.bf16 %v5830_v38 }
0x2eb3   :  { %v4519_v22 = vsel %vm8069_vm13, %v5822_v10, %v7867_v51  ;;  %v4516_v33 = vsel %vm8070_vm10, %v5821_v40, %v7865_v14  ;;  %v4507_v59 = vsel %vm8071_vm1, %v5832_v23, %v4495_v21  ;;  %v4504_v37 = vsel %vm8072_vm8, %v5831_v2, %v4494_v35 }
0x2eb4   :  { %v5838_v26 = vpack.i.bf16 %v4519_v22, %v4516_v33  ;;  %v5848_v30 = vpack.i.bf16 %v4507_v59, %v4504_v37  ;;  %v5322_v59 = vld [vmem:[#allocation2 + $0x478] sm:$0xf0] }
0x2eb6   :  { %5839 = vrot.lane.b32.xlu1 %v5838_v26, %s6224_s21  ;;  %5849 = vrot.lane.b32.xlu0 %v5848_v30, %s6224_s21 }
0x2f00   :  { %v5845_v11 = vpop.permute.xlu2 %5844 }
0x2f01   :  { %v5847_v41 = vunpack.i.h.bf16 %v5845_v11  ;;  %v5846_v29 = vunpack.i.l.bf16 %v5845_v11 }
0x2f03   :  { %v4545_v4 = vsel %vm8073_vm7, %v5847_v41, %v7860_v24  ;;  %v4544_v16 = vsel %vm8074_vm5, %v5846_v29, %v7858_v1  ;;  %v1481_v41 = vld [vmem:[%s7945_s1 + $0x8] sm:$0xff] }
0x2f04   :  { %v5863_v42 = vpack.i.bf16 %v4545_v4, %v4544_v16 }
0x2f06   :  { %5864 = vrot.lane.b32.xlu0 %v5863_v42, %s6225_s25 }
0x2f20   :  { %v5835_v27 = vpop.permute.xlu0 %5834 }
0x2f21   :  { %v5837_v63 = vunpack.i.h.bf16 %v5835_v27  ;;  %v5836_v8 = vunpack.i.l.bf16 %v5835_v27 }
0x2f23   :  { %v4549_v60 = vsel %vm8075_vm3, %v5837_v63, %v4501_v0  ;;  %v4548_v18 = vsel %vm8076_vm11, %v5836_v8, %v4500_v47 }
0x2f24   :  { %v5853_v31 = vpack.i.bf16 %v4549_v60, %v4548_v18 }
0x2f26   :  { %5854 = vrot.lane.b32.xlu1 %v5853_v31, %s6225_s25 }
0x2f28   :  { %v5840_v7 = vpop.permute.xlu1 %5839  ;;  %v5850_v43 = vpop.permute.xlu0 %5849 }
0x2f29   :  { %v5842_v54 = vunpack.i.h.bf16 %v5840_v7  ;;  %v5841_v24 = vunpack.i.l.bf16 %v5840_v7  ;;  %v5852_v17 = vunpack.i.h.bf16 %v5850_v43  ;;  %v5851_v39 = vunpack.i.l.bf16 %v5850_v43 }
0x2f2b   :  { %v4547_v1 = vsel %vm8077_vm6, %v5842_v54, %v7867_v51  ;;  %v4546_v46 = vsel %vm8061_vm0, %v5841_v24, %v7865_v14  ;;  %v4543_v20 = vsel %vm8078_vm2, %v5852_v17, %v4495_v21  ;;  %v4542_v19 = vsel %vm8079_vm4, %v5851_v39, %v4494_v35 }
0x2f2c   :  { %v5878_v56 = vpack.i.bf16 %v4547_v1, %v4546_v46  ;;  %v5868_v47 = vpack.i.bf16 %v4543_v20, %v4542_v19 }
0x2f2e   :  { %5859 = vrot.lane.b32.xlu2 %v5878_v56, %s6225_s25  ;;  %5879 = vrot.lane.b32.xlu0 %v5878_v56, %s6223_s5 }
0x2f2f   :  { %5869 = vrot.lane.b32.xlu1 %v5868_v47, %s6225_s25 }
0x2f36   :  { %5874 = vrot.lane.b32.xlu2 %v5853_v31, %s6223_s5 }
0x2f37   :  { %5884 = vrot.lane.b32.xlu1 %v5863_v42, %s6223_s5 }
0x2f3e   :  { %5889 = vrot.lane.b32.xlu2 %v5868_v47, %s6223_s5 }
0x2f78   :  { %v5865_v57 = vpop.permute.xlu0 %5864 }
0x2f79   :  { %v5867_v21 = vunpack.i.h.bf16 %v5865_v57  ;;  %v5866_v35 = vunpack.i.l.bf16 %v5865_v57 }
0x2f7b   :  { %v5333_v53 = vpack.c.bf16 %v5867_v21, %v5866_v35 }
0x2f88   :  { %v5860_v51 = vpop.permute.xlu2 %5859 }
0x2f89   :  { %v5862_v44 = vunpack.i.h.bf16 %v5860_v51  ;;  %v5861_v25 = vunpack.i.l.bf16 %v5860_v51 }
0x2f8b   :  { %v5330_v50 = vpack.c.bf16 %v5862_v44, %v5861_v25 }
0x2f90   :  { %v5875_v15 = vpop.permute.xlu2 %5874 }
0x2f91   :  { %v5877_v49 = vunpack.i.h.bf16 %v5875_v15  ;;  %v5876_v5 = vunpack.i.l.bf16 %v5875_v15 }
0x2f93   :  { %v5339_v3 = vpack.c.bf16 %v5877_v49, %v5876_v5 }
0x2f98   :  { %v5855_v14 = vpop.permute.xlu1 %5854  ;;  %v5890_v2 = vpop.permute.xlu2 %5889 }
0x2f99   :  { %v5857_v0 = vunpack.i.h.bf16 %v5855_v14  ;;  %v5856_v6 = vunpack.i.l.bf16 %v5855_v14  ;;  %v5892_v22 = vunpack.i.h.bf16 %v5890_v2  ;;  %v5891_v12 = vunpack.i.l.bf16 %v5890_v2 }
0x2f9b   :  { %v5327_v58 = vpack.c.bf16 %v5857_v0, %v5856_v6  ;;  %v5348_v37 = vpack.c.bf16 %v5892_v22, %v5891_v12 }
0x2f9d   :  { %5328 = vmatpush.bf16.msk.msra.mxu0 %vm6876_vm14, %v5327_v58 }
0x2fa0   :  { %v5880_v32 = vpop.permute.xlu0 %5879 }
0x2fa1   :  { %v5870_v61 = vpop.permute.xlu1 %5869  ;;  %5331 = vmatpush.bf16.msk.msra.mxu0 %vm6876_vm14, %v5330_v50  ;;  %v5882_v48 = vunpack.i.h.bf16 %v5880_v32  ;;  %v5881_v28 = vunpack.i.l.bf16 %v5880_v32 }
0x2fa2   :  { %v5872_v9 = vunpack.i.h.bf16 %v5870_v61  ;;  %v5871_v34 = vunpack.i.l.bf16 %v5870_v61 }
0x2fa3   :  { %v5342_v10 = vpack.c.bf16 %v5882_v48, %v5881_v28 }
0x2fa4   :  { %v5336_v13 = vpack.c.bf16 %v5872_v9, %v5871_v34 }
0x2fa5   :  { %5334 = vmatpush.bf16.msk.msra.mxu0 %vm6876_vm14, %v5333_v53 }
0x2fa9   :  { %5337 = vmatpush.bf16.msk.msra.mxu0 %vm6876_vm14, %v5336_v13  ;;  %v5885_v38 = vpop.permute.xlu1 %5884  ;;  %vm4680_vm14 = vcmask 367616  }
0x2faa   :  { %v5887_v40 = vunpack.i.h.bf16 %v5885_v38  ;;  %v5886_v23 = vunpack.i.l.bf16 %v5885_v38 }
0x2fac   :  { %4656 = vmatmul.bf16.vlgmr.msra.gmra.mxu0 %v5321_v45  ;;  %v5345_v33 = vpack.c.bf16 %v5887_v40, %v5886_v23 }
0x2fad   :  { %4665 = vmatpush.bf16.msrb.mxu0 %v6635_v36  ;;  %v5450_v36 = vld [vmem:[#allocation2 + $0x474] sm:$0xf] }
0x2fae   :  { %v5325_v26 = vor.u32 %v5450_v36, %v5322_v59 }
0x2fb1   :  { %5340 = vmatpush.bf16.msk.msrb.mxu0 %vm6880_vm15, %v5339_v3 }
0x2fb5   :  { %5343 = vmatpush.bf16.msk.msrb.mxu0 %vm6880_vm15, %v5342_v10 }
0x2fb9   :  { %5346 = vmatpush.bf16.msk.msrb.mxu0 %vm6880_vm15, %v5345_v33 }
0x2fbd   :  { %5349 = vmatpush.bf16.msk.msrb.mxu0 %vm6880_vm15, %v5348_v37 }
0x2fc0   :  { %5350 = vmatmul.msk.bf16.vlgmr.msrb.gmra.mxu0 %vm1614_vm9, %v5325_v26 }
0x3029   :  { %v4657_v30 = vpop.f32.mrf.mxu0 }
0x3031   :  { %v4659_v11 = vpop.f32.mrf.mxu0 }
0x303d   :  { %v4671_v29 = vpop.f32.mrf.mxu0 }
0x303e   :  { %v4672_v4 = vadd.f32 %v4671_v29, %v4657_v30 }
0x3040   :  { %v4676_v16 = vsub.f32 %v4672_v4, %v1481_v41 }
0x3042   :  { %v4678_v42 = vmul.f32 %v4676_v16, %v4676_v16 }
0x3044   :  { %4681 = vst.msk [vmem:[%s7948_s4] sm:$0xff] %vm4680_vm14, %v4678_v42 }
0x3045   :  { %v4673_v27 = vpop.f32.mrf.mxu0 }
0x3046   :  { %v4674_v63 = vadd.f32 %v4673_v27, %v4659_v11 }
0x3048   :  { %v4677_v8 = vsub.f32 %v4674_v63, %v1482_v52 }
0x304a   :  { %v4679_v60 = vmul.f32 %v4677_v8, %v4677_v8 }
0x304c   :  { %4682 = vst.msk [vmem:[%s7948_s4 + $0x8] sm:$0xff] %vm4680_vm14, %v4679_v60 }
0x304d   :  { %4687 = vsyncpa [#allocation3], 1 }

</bundles_post_ra>
